<compile_context>
chip_gen: v7x
topology: tpu7x:2x2x1
jax: 0.10.0
libtpu: 0.0.40
codegen_flags: <defaults>
</compile_context>

<pallas_src>
import functools

import jax
import jax.numpy as jnp
from jax.experimental import pallas as pl
from jax.experimental.pallas import tpu as pltpu

LANE = 128      # vreg lane width
SUBLANE = 8     # vreg sublane count


def _round_up(n, m):
    return ((n + m - 1) // m) * m


# ----------------------------------------------------------------------------
# One LSTM step.  `gx` already holds x_t @ W_ih + (b_ih + b_hh); only the
# recurrent matmul is on the serial chain.  Packed gate order is [i | f | o | g]
# so a single sigmoid covers the first 3 lane blocks and a single tanh the last.
# ----------------------------------------------------------------------------
def _lstm_cell(gx, h, c, w_hh_ref):
    f32 = jnp.float32
    hp = h.shape[-1]
    gates = gx + jnp.dot(h, w_hh_ref[...], preferred_element_type=f32)
    sig = jax.nn.sigmoid(gates[:, : 3 * hp])        # fused: i, f, o
    i_g = sig[:, 0 * hp:1 * hp]
    f_g = sig[:, 1 * hp:2 * hp]
    o_g = sig[:, 2 * hp:3 * hp]
    g_g = jnp.tanh(gates[:, 3 * hp:4 * hp])
    c_new = f_g * c + i_g * g_g
    h_new = o_g * jnp.tanh(c_new)
    return h_new, c_new


# ----------------------------------------------------------------------------
# Fused autoencoder kernel (runs once; no grid).
# ----------------------------------------------------------------------------
def _autoencoder_kernel(
        # inputs (all resident in VMEM)
        x_ref,                              # (T*B_pad, F_pad) time-major, flattened
        we_ih1, we_hh1, be1,                # encoder layer 1 (F_pad,4H) (H,4H) (1,4H)
        we_ih2, we_hh2, be2,                # encoder layer 2
        wd_ih1, wd_hh1, bd1,                # decoder layer 1 (H,4G) (G,4G) (1,4G)
        wd_ih2, wd_hh2, bd2,                # decoder layer 2
        wl, bl,                             # linear (G_pad, F_pad), (1, F_pad)
        # output
        out_ref,                            # (BT_pad, F_pad)
        # scratch
        gx_scr,                             # (T*B_pad, 4H)  shared enc L1 / L2 projection
        h1_scr,                             # (T*B_pad, H)   encoder L1 hidden sequence
        gd1_scr,                            # (B_pad, 4G)    decoder L1 input projection
        gd2_scr,                            # (BT_pad, 4G)   decoder L2 input projection
        d1_scr,                             # (BT_pad, G)    decoder L1 hidden sequence
        *, T, B, B_pad, H_pad, G_pad, BT_pad):
    f32 = jnp.float32
    nblk = BT_pad // SUBLANE
    enc_unroll = True if T <= 16 else 8
    dec_unroll = True if nblk <= 8 else 4

    # ---------------- Encoder layer 1 ----------------
    # Hoisted input projection: one (T*B_pad, F_pad) x (F_pad, 4H) MXU matmul.
    gx_scr[...] = jnp.dot(x_ref[...], we_ih1[...],
                          preferred_element_type=f32) + be1[...]

    zeros_e = jnp.zeros((B_pad, H_pad), f32)

    def enc1_step(t, carry):
        h, c = carry
        r = pl.multiple_of(t * B_pad, B_pad)
        h, c = _lstm_cell(gx_scr[pl.ds(r, B_pad), :], h, c, we_hh1)
        h1_scr[pl.ds(r, B_pad), :] = h              # aligned (B_pad, H_pad) store
        return h, c

    jax.lax.fori_loop(0, T, enc1_step, (zeros_e, zeros_e), unroll=enc_unroll)

    # ---------------- Encoder layer 2 (only final h is needed) ----------------
    # gx_scr is dead after the L1 loop -> reuse the SAME buffer for the L2
    # projection (halves the largest scratch; v7x VMEM hygiene).
    gx_scr[...] = jnp.dot(h1_scr[...], we_ih2[...],
                          preferred_element_type=f32) + be2[...]

    def enc2_step(t, carry):
        h, c = carry
        r = pl.multiple_of(t * B_pad, B_pad)
        return _lstm_cell(gx_scr[pl.ds(r, B_pad), :], h, c, we_hh2)

    h_enc, _ = jax.lax.fori_loop(0, T, enc2_step, (zeros_e, zeros_e),
                                 unroll=enc_unroll)
    # NOTE: padded batch rows (B..B_pad-1) of h_enc hold bias-driven values;
    # they are finite and never read below (the decoder indexes rows < B only).

    # ---------------- Decoder layer 1 ----------------
    # torch semantics: hn[-1].unsqueeze(0).repeat(1, T, 1) fed to a
    # batch_first decoder is ONE batch-1 sequence of length B*T whose step-s
    # input is h_enc[s % B], with recurrent state carried across all B*T steps.
    # Only B distinct inputs exist -> input projection computed exactly once.
    gd1_scr[...] = jnp.dot(h_enc, wd_ih1[...],
                           preferred_element_type=f32) + bd1[...]

    row_ids = jax.lax.broadcasted_iota(jnp.int32, (SUBLANE, G_pad), 0)
    zeros_d = jnp.zeros((1, G_pad), f32)            # decoder batch is 1 -> 1-row state

    def dec1_block(blk, carry):
        # 8 steps per block: outputs staged in a register tile and written back
        # as ONE aligned (8, G_pad) store (no per-step masked partial stores).
        h, c = carry
        base = blk * SUBLANE
        rows = jnp.zeros((SUBLANE, G_pad), f32)
        for j in range(SUBLANE):                    # static inner unroll
            b_idx = (base + j) % B
            gx = gd1_scr[pl.ds(b_idx, 1), :]        # (1, 4G); no broadcast needed
            h, c = _lstm_cell(gx, h, c, wd_hh1)
            rows = jnp.where(row_ids == j, h, rows)
        d1_scr[pl.ds(pl.multiple_of(base, SUBLANE), SUBLANE), :] = rows
        return h, c

    jax.lax.fori_loop(0, nblk, dec1_block, (zeros_d, zeros_d),
                      unroll=dec_unroll)
    # Steps BT..BT_pad-1 of the last block are padding; their rows are finite
    # and are sliced away by the wrapper.

    # ---------------- Decoder layer 2 + fused output Linear ----------------
    gd2_scr[...] = jnp.dot(d1_scr[...], wd_ih2[...],
                           preferred_element_type=f32) + bd2[...]

    def dec2_block(blk, carry):
        h, c = carry
        base8 = pl.multiple_of(blk * SUBLANE, SUBLANE)
        gxt = gd2_scr[pl.ds(base8, SUBLANE), :]     # one aligned load per 8 steps
        rows = jnp.zeros((SUBLANE, G_pad), f32)
        for j in range(SUBLANE):                    # static inner unroll
            gx = gxt[j:j + 1, :]                    # static sublane slice (register)
            h, c = _lstm_cell(gx, h, c, wd_hh2)
            rows = jnp.where(row_ids == j, h, rows)
        # Final Linear fused per block: one small matmul + one aligned,
        # lane-dense store straight into the output slab.
        out_ref[pl.ds(base8, SUBLANE), :] = (
            jnp.dot(rows, wl[...], preferred_element_type=f32) + bl[...])
        return h, c

    jax.lax.fori_loop(0, nblk, dec2_block, (zeros_d, zeros_d),
                      unroll=dec_unroll)


# ----------------------------------------------------------------------------
# Weight packing: PyTorch layout -> padded, per-gate 128-lane-aligned blocks.
# Packed gate-block order is [i | f | o | g]; torch rows are [i | f | g | o].
# ----------------------------------------------------------------------------
def _pack_lstm(w_ih, w_hh, b_ih, b_hh, din_pad, h_pad):
    four_h, din = w_ih.shape
    h = four_h // 4
    wih_p = jnp.zeros((din_pad, 4 * h_pad), jnp.float32)
    whh_p = jnp.zeros((h_pad, 4 * h_pad), jnp.float32)
    b_p = jnp.zeros((1, 4 * h_pad), jnp.float32)
    b = (b_ih + b_hh).astype(jnp.float32)
    for blk, g in enumerate((0, 1, 3, 2)):          # [i, f, o, g] <- torch [i, f, g, o]
        wih_p = wih_p.at[:din, blk * h_pad: blk * h_pad + h].set(
            w_ih[g * h:(g + 1) * h, :].T.astype(jnp.float32))
        whh_p = whh_p.at[:h, blk * h_pad: blk * h_pad + h].set(
            w_hh[g * h:(g + 1) * h, :].T.astype(jnp.float32))
        b_p = b_p.at[0, blk * h_pad: blk * h_pad + h].set(b[g * h:(g + 1) * h])
    # TODO(synk): cast wih_p / whh_p to bfloat16 here at production scale.
    return wih_p, whh_p, b_p


# ----------------------------------------------------------------------------
# Public forward: matches Autoencoder.forward exactly.
# ----------------------------------------------------------------------------
@jax.jit
def autoencoder_forward(x, enc_params, dec_params, lin_w, lin_b):
    """x: (B, T, F) float32 batch-first.
    enc_params / dec_params: list of (w_ih, w_hh, b_ih, b_hh) per layer in
    PyTorch layout (w_ih: (4H, Din), w_hh: (4H, H), biases: (4H,)).
    lin_w: (F, F) torch Linear weight (out, in); lin_b: (F,)."""
    assert len(enc_params) == 2 and len(dec_params) == 2
    B, T, F = x.shape
    H = enc_params[0][1].shape[1]                   # encoder hidden size
    G = dec_params[0][1].shape[1]                   # decoder hidden size (== F)

    F_pad = _round_up(F, LANE)
    H_pad = _round_up(H, LANE)
    G_pad = _round_up(G, LANE)
    B_pad = _round_up(B, SUBLANE)
    BT = B * T
    BT_pad = _round_up(BT, SUBLANE)

    # Pad + time-major flatten the input once in the wrapper (cheap, tiny).
    x_tm = jnp.transpose(x.astype(jnp.float32), (1, 0, 2))           # (T, B, F)
    x2d = jnp.zeros((T, B_pad, F_pad), jnp.float32).at[:, :B, :F].set(x_tm)
    x2d = x2d.reshape(T * B_pad, F_pad)

    we_ih1, we_hh1, be1 = _pack_lstm(*enc_params[0], F_pad, H_pad)
    we_ih2, we_hh2, be2 = _pack_lstm(*enc_params[1], H_pad, H_pad)
    wd_ih1, wd_hh1, bd1 = _pack_lstm(*dec_params[0], H_pad, G_pad)
    wd_ih2, wd_hh2, bd2 = _pack_lstm(*dec_params[1], G_pad, G_pad)

    wl_p = jnp.zeros((G_pad, F_pad), jnp.float32).at[:F, :F].set(
        lin_w.T.astype(jnp.float32))
    bl_p = jnp.zeros((1, F_pad), jnp.float32).at[0, :F].set(
        lin_b.astype(jnp.float32))

    inputs = [x2d,
              we_ih1, we_hh1, be1, we_ih2, we_hh2, be2,
              wd_ih1, wd_hh1, bd1, wd_ih2, wd_hh2, bd2,
              wl_p, bl_p]

    kernel = functools.partial(
        _autoencoder_kernel,
        T=T, B=B, B_pad=B_pad, H_pad=H_pad, G_pad=G_pad, BT_pad=BT_pad)

    scratch_shapes = [
        pltpu.VMEM((T * B_pad, 4 * H_pad), jnp.float32),   # gx_scr (shared L1/L2)
        pltpu.VMEM((T * B_pad, H_pad), jnp.float32),       # h1_scr
        pltpu.VMEM((B_pad, 4 * G_pad), jnp.float32),       # gd1_scr
        pltpu.VMEM((BT_pad, 4 * G_pad), jnp.float32),      # gd2_scr
        pltpu.VMEM((BT_pad, G_pad), jnp.float32),          # d1_scr
    ]

    # Advisory cost hint + explicit VMEM budget (review items).
    def _mm(m, k, n):
        return 2 * m * k * n
    flops = (_mm(T * B_pad, F_pad, 4 * H_pad)              # enc L1 projection
             + _mm(T * B_pad, H_pad, 4 * H_pad)            # enc L2 projection
             + 2 * T * _mm(B_pad, H_pad, 4 * H_pad)        # enc recurrences
             + _mm(B_pad, H_pad, 4 * G_pad)                # dec L1 projection
             + _mm(BT_pad, G_pad, 4 * G_pad)               # dec L2 projection
             + 2 * BT_pad * _mm(SUBLANE, G_pad, 4 * G_pad) # dec recurrences
             + _mm(BT_pad, G_pad, F_pad))                  # final linear
    transcendentals = 2 * T * 5 * B_pad * H_pad + 2 * BT_pad * 5 * G_pad
    io_bytes = (sum(int(a.size) * a.dtype.itemsize for a in inputs)
                + BT_pad * F_pad * 4)
    scratch_bytes = 4 * (T * B_pad * 4 * H_pad + T * B_pad * H_pad
                         + B_pad * 4 * G_pad + BT_pad * 4 * G_pad
                         + BT_pad * G_pad)
    vmem_limit = int(min(48 * 1024 * 1024,
                         max(8 * 1024 * 1024, 2 * (io_bytes + scratch_bytes))))

    y_full = pl.pallas_call(
        kernel,
        # No grid: kernel runs once, every operand fully resident in VMEM
        # (kills the degenerate double-buffered pipeline of grid=(1,)).
        in_specs=[pl.BlockSpec(memory_space=pltpu.MemorySpace.VMEM)
                  for _ in inputs],
        out_specs=pl.BlockSpec(memory_space=pltpu.MemorySpace.VMEM),
        out_shape=jax.ShapeDtypeStruct((BT_pad, F_pad), jnp.float32),
        scratch_shapes=scratch_shapes,
        compiler_params=pltpu.CompilerParams(vmem_limit_bytes=vmem_limit),
        cost_estimate=pl.CostEstimate(flops=flops,
                                      transcendentals=transcendentals,
                                      bytes_accessed=io_bytes),
    )(*inputs)

    # Rows are in decoder-sequence order, identical to torch's reshape/view.
    return y_full[:BT, :F].reshape(B, T, F)


# ----------------------------------------------------------------------------
# Pure-JAX reference (direct transcription of the PyTorch module) for checking.
# ----------------------------------------------------------------------------
def _lstm_ref(x, layers):
    Bx, Tx, _ = x.shape
    out = x
    h_last = None
    for (w_ih, w_hh, b_ih, b_hh) in layers:
        Hh = w_hh.shape[1]
        h = jnp.zeros((Bx, Hh), jnp.float32)
        c = jnp.zeros((Bx, Hh), jnp.float32)
        ys = []
        for t in range(Tx):
            gates = out[:, t, :] @ w_ih.T + h @ w_hh.T + b_ih + b_hh
            i = jax.nn.sigmoid(gates[:, 0:Hh])
            f = jax.nn.sigmoid(gates[:, Hh:2 * Hh])
            g = jnp.tanh(gates[:, 2 * Hh:3 * Hh])
            o = jax.nn.sigmoid(gates[:, 3 * Hh:4 * Hh])
            c = f * c + i * g
            h = o * jnp.tanh(c)
            ys.append(h)
        out = jnp.stack(ys, axis=1)
        h_last = h
    return out, h_last


def _autoencoder_ref(x, enc, dec, lin_w, lin_b):
    B, T, F = x.shape
    _, hn = _lstm_ref(x, enc)                                 # (B, H)
    rep = jnp.tile(hn[None, :, :], (1, T, 1))                 # (1, B*T, H)
    dec_out, _ = _lstm_ref(rep, dec)                          # (1, B*T, F)
    y = dec_out.reshape(-1, F) @ lin_w.T + lin_b
    return y.reshape(B, T, -1)


# ----------------------------------------------------------------------------
# Example run
# ----------------------------------------------------------------------------
if __name__ == "__main__":
    B, T = 2, 8
    input_dim = 3          # ['Heartbeat', 'Temperature', 'OutsideTemperature']
    hidden_dim = 50        # matches the original module
    num_layers = 2

    def init_lstm(key, din, hid, nl):
        layers = []
        k = 1.0 / (hid ** 0.5)
        d = din
        for _ in range(nl):
            key, k1, k2, k3, k4 = jax.random.split(key, 5)
            w_ih = jax.random.uniform(k1, (4 * hid, d), minval=-k, maxval=k, dtype=jnp.float32)
            w_hh = jax.random.uniform(k2, (4 * hid, hid), minval=-k, maxval=k, dtype=jnp.float32)
            b_ih = jax.random.uniform(k3, (4 * hid,), minval=-k, maxval=k, dtype=jnp.float32)
            b_hh = jax.random.uniform(k4, (4 * hid,), minval=-k, maxval=k, dtype=jnp.float32)
            layers.append((w_ih, w_hh, b_ih, b_hh))
            d = hid
        return key, layers

    key = jax.random.PRNGKey(0)
    key, enc_params = init_lstm(key, input_dim, hidden_dim, num_layers)
    key, dec_params = init_lstm(key, hidden_dim, input_dim, num_layers)

    key, kw, kb, kx = jax.random.split(key, 4)
    kl = 1.0 / (input_dim ** 0.5)
    lin_w = jax.random.uniform(kw, (input_dim, input_dim), minval=-kl, maxval=kl, dtype=jnp.float32)
    lin_b = jax.random.uniform(kb, (input_dim,), minval=-kl, maxval=kl, dtype=jnp.float32)

    x = jax.random.normal(kx, (B, T, input_dim), dtype=jnp.float32)

    y = autoencoder_forward(x, enc_params, dec_params, lin_w, lin_b)
    y = jax.block_until_ready(y)

    assert y.shape == (B, T, input_dim), y.shape
    assert bool(jnp.all(jnp.isfinite(y)))

    with jax.default_matmul_precision("highest"):
        y_ref = _autoencoder_ref(x, enc_params, dec_params, lin_w, lin_b)
    max_err = float(jnp.max(jnp.abs(y - y_ref)))
    # All-f32 path: tight tolerance (was 2e-2) so gate-order / packing bugs
    # cannot hide behind slack.
    assert max_err < 2e-3, f"mismatch vs reference: max abs err {max_err}"

    print("KERNEL_OK")
</pallas_src>

<mosaic_0001>
module attributes {stable_mosaic.version = 11 : i64} {
  func.func @_autoencoder_kernel(%arg0: memref<64x128xf32, #tpu.memory_space<vmem>>, %arg1: memref<128x512xf32, #tpu.memory_space<vmem>>, %arg2: memref<128x512xf32, #tpu.memory_space<vmem>>, %arg3: memref<1x512xf32, #tpu.memory_space<vmem>>, %arg4: memref<128x512xf32, #tpu.memory_space<vmem>>, %arg5: memref<128x512xf32, #tpu.memory_space<vmem>>, %arg6: memref<1x512xf32, #tpu.memory_space<vmem>>, %arg7: memref<128x512xf32, #tpu.memory_space<vmem>>, %arg8: memref<128x512xf32, #tpu.memory_space<vmem>>, %arg9: memref<1x512xf32, #tpu.memory_space<vmem>>, %arg10: memref<128x512xf32, #tpu.memory_space<vmem>>, %arg11: memref<128x512xf32, #tpu.memory_space<vmem>>, %arg12: memref<1x512xf32, #tpu.memory_space<vmem>>, %arg13: memref<128x128xf32, #tpu.memory_space<vmem>>, %arg14: memref<1x128xf32, #tpu.memory_space<vmem>>, %arg15: memref<16x128xf32, #tpu.memory_space<vmem>>, %arg16: memref<64x512xf32, #tpu.memory_space<vmem>>, %arg17: memref<64x128xf32, #tpu.memory_space<vmem>>, %arg18: memref<8x512xf32, #tpu.memory_space<vmem>>, %arg19: memref<16x512xf32, #tpu.memory_space<vmem>>, %arg20: memref<16x128xf32, #tpu.memory_space<vmem>>) attributes {dimension_semantics = [], scalar_prefetch = 0 : i64, scratch_operands = 5 : i64, tpu.core_type = #tpu.core_type<tc>} {
    %c0 = arith.constant 0 : index
    %c0_0 = arith.constant 0 : index
    %0 = vector.load %arg0[%c0, %c0_0] : memref<64x128xf32, #tpu.memory_space<vmem>>, vector<64x128xf32>
    %c0_1 = arith.constant 0 : index
    %c0_2 = arith.constant 0 : index
    %1 = vector.load %arg1[%c0_1, %c0_2] : memref<128x512xf32, #tpu.memory_space<vmem>>, vector<128x512xf32>
    %cst = arith.constant dense<0.000000e+00> : vector<64x512xf32>
    %2 = tpu.matmul %0, %1, %cst {dimension_numbers = #tpu.dot_dimension_numbers<[1], [0], [0], [1], [0, 0, 1, 1], [], []>} : vector<64x128xf32>, vector<128x512xf32>, vector<64x512xf32> -> vector<64x512xf32>
    %c0_3 = arith.constant 0 : index
    %c0_4 = arith.constant 0 : index
    %3 = vector.load %arg3[%c0_3, %c0_4] : memref<1x512xf32, #tpu.memory_space<vmem>>, vector<1x512xf32>
    %4 = vector.broadcast %3 : vector<1x512xf32> to vector<64x512xf32>
    %5 = arith.addf %2, %4 : vector<64x512xf32>
    %c0_5 = arith.constant 0 : index
    %c0_6 = arith.constant 0 : index
    %6 = vector.load %arg16[%c0_5, %c0_6] : memref<64x512xf32, #tpu.memory_space<vmem>>, vector<64x512xf32>
    tpu.vector_store %arg16[%c0_5, %c0_6], %5 {strides = array<i32>} : memref<64x512xf32, #tpu.memory_space<vmem>>, vector<64x512xf32>,
    %cst_7 = arith.constant 0.000000e+00 : f32
    %7 = vector.broadcast %cst_7 : f32 to vector<8x128xf32>
    %c0_i32 = arith.constant 0 : i32
    %c8_i32 = arith.constant 8 : i32
    %8 = arith.muli %c0_i32, %c8_i32 : i32
    %9 = tpu.assume_multiple %8, 8 : i32
    %10 = arith.index_cast %9 : i32 to index
    %c0_8 = arith.constant 0 : index
    %11 = vector.load %arg16[%10, %c0_8] : memref<64x512xf32, #tpu.memory_space<vmem>>, vector<8x512xf32>
    %c0_9 = arith.constant 0 : index
    %c0_10 = arith.constant 0 : index
    %12 = vector.load %arg2[%c0_9, %c0_10] : memref<128x512xf32, #tpu.memory_space<vmem>>, vector<128x512xf32>
    %cst_11 = arith.constant dense<0.000000e+00> : vector<8x512xf32>
    %13 = tpu.matmul %7, %12, %cst_11 {dimension_numbers = #tpu.dot_dimension_numbers<[1], [0], [0], [1], [0, 0, 1, 1], [], []>} : vector<8x128xf32>, vector<128x512xf32>, vector<8x512xf32> -> vector<8x512xf32>
    %14 = arith.addf %11, %13 : vector<8x512xf32>
    %15 = vector.extract_strided_slice %14 {offsets = [0, 0], sizes = [8, 384], strides = [1, 1]} : vector<8x512xf32> to vector<8x384xf32>
    %16 = arith.negf %15 : vector<8x384xf32>
    %17 = math.exp %16 : vector<8x384xf32>
    %cst_12 = arith.constant 1.000000e+00 : f32
    %18 = vector.broadcast %cst_12 : f32 to vector<8x384xf32>
    %19 = arith.addf %18, %17 : vector<8x384xf32>
    %20 = arith.divf %18, %19 : vector<8x384xf32>
    %21 = vector.extract_strided_slice %20 {offsets = [0, 0], sizes = [8, 128], strides = [1, 1]} : vector<8x384xf32> to vector<8x128xf32>
    %22 = vector.extract_strided_slice %20 {offsets = [0, 128], sizes = [8, 128], strides = [1, 1]} : vector<8x384xf32> to vector<8x128xf32>
    %23 = vector.extract_strided_slice %20 {offsets = [0, 256], sizes = [8, 128], strides = [1, 1]} : vector<8x384xf32> to vector<8x128xf32>
    %24 = vector.extract_strided_slice %14 {offsets = [0, 384], sizes = [8, 128], strides = [1, 1]} : vector<8x512xf32> to vector<8x128xf32>
    %25 = math.tanh %24 : vector<8x128xf32>
    %26 = arith.mulf %22, %7 : vector<8x128xf32>
    %27 = arith.mulf %21, %25 : vector<8x128xf32>
    %28 = arith.addf %26, %27 : vector<8x128xf32>
    %29 = math.tanh %28 : vector<8x128xf32>
    %30 = arith.mulf %23, %29 : vector<8x128xf32>
    %31 = arith.index_cast %9 : i32 to index
    %c0_13 = arith.constant 0 : index
    %32 = vector.load %arg17[%31, %c0_13] : memref<64x128xf32, #tpu.memory_space<vmem>>, vector<8x128xf32>
    tpu.vector_store %arg17[%31, %c0_13], %30 {strides = array<i32>} : memref<64x128xf32, #tpu.memory_space<vmem>>, vector<8x128xf32>,
    %c1_i32 = arith.constant 1 : i32
    %c8_i32_14 = arith.constant 8 : i32
    %33 = arith.muli %c1_i32, %c8_i32_14 : i32
    %34 = tpu.assume_multiple %33, 8 : i32
    %35 = arith.index_cast %34 : i32 to index
    %c0_15 = arith.constant 0 : index
    %36 = vector.load %arg16[%35, %c0_15] : memref<64x512xf32, #tpu.memory_space<vmem>>, vector<8x512xf32>
    %c0_16 = arith.constant 0 : index
    %c0_17 = arith.constant 0 : index
    %37 = vector.load %arg2[%c0_16, %c0_17] : memref<128x512xf32, #tpu.memory_space<vmem>>, vector<128x512xf32>
    %cst_18 = arith.constant dense<0.000000e+00> : vector<8x512xf32>
    %38 = tpu.matmul %30, %37, %cst_18 {dimension_numbers = #tpu.dot_dimension_numbers<[1], [0], [0], [1], [0, 0, 1, 1], [], []>} : vector<8x128xf32>, vector<128x512xf32>, vector<8x512xf32> -> vector<8x512xf32>
    %39 = arith.addf %36, %38 : vector<8x512xf32>
    %40 = vector.extract_strided_slice %39 {offsets = [0, 0], sizes = [8, 384], strides = [1, 1]} : vector<8x512xf32> to vector<8x384xf32>
    %41 = arith.negf %40 : vector<8x384xf32>
    %42 = math.exp %41 : vector<8x384xf32>
    %cst_19 = arith.constant 1.000000e+00 : f32
    %43 = vector.broadcast %cst_19 : f32 to vector<8x384xf32>
    %44 = arith.addf %43, %42 : vector<8x384xf32>
    %45 = arith.divf %43, %44 : vector<8x384xf32>
    %46 = vector.extract_strided_slice %45 {offsets = [0, 0], sizes = [8, 128], strides = [1, 1]} : vector<8x384xf32> to vector<8x128xf32>
    %47 = vector.extract_strided_slice %45 {offsets = [0, 128], sizes = [8, 128], strides = [1, 1]} : vector<8x384xf32> to vector<8x128xf32>
    %48 = vector.extract_strided_slice %45 {offsets = [0, 256], sizes = [8, 128], strides = [1, 1]} : vector<8x384xf32> to vector<8x128xf32>
    %49 = vector.extract_strided_slice %39 {offsets = [0, 384], sizes = [8, 128], strides = [1, 1]} : vector<8x512xf32> to vector<8x128xf32>
    %50 = math.tanh %49 : vector<8x128xf32>
    %51 = arith.mulf %47, %28 : vector<8x128xf32>
    %52 = arith.mulf %46, %50 : vector<8x128xf32>
    %53 = arith.addf %51, %52 : vector<8x128xf32>
    %54 = math.tanh %53 : vector<8x128xf32>
    %55 = arith.mulf %48, %54 : vector<8x128xf32>
    %56 = arith.index_cast %34 : i32 to index
    %c0_20 = arith.constant 0 : index
    %57 = vector.load %arg17[%56, %c0_20] : memref<64x128xf32, #tpu.memory_space<vmem>>, vector<8x128xf32>
    tpu.vector_store %arg17[%56, %c0_20], %55 {strides = array<i32>} : memref<64x128xf32, #tpu.memory_space<vmem>>, vector<8x128xf32>,
    %c2_i32 = arith.constant 2 : i32
    %c8_i32_21 = arith.constant 8 : i32
    %58 = arith.muli %c2_i32, %c8_i32_21 : i32
    %59 = tpu.assume_multiple %58, 8 : i32
    %60 = arith.index_cast %59 : i32 to index
    %c0_22 = arith.constant 0 : index
    %61 = vector.load %arg16[%60, %c0_22] : memref<64x512xf32, #tpu.memory_space<vmem>>, vector<8x512xf32>
    %c0_23 = arith.constant 0 : index
    %c0_24 = arith.constant 0 : index
    %62 = vector.load %arg2[%c0_23, %c0_24] : memref<128x512xf32, #tpu.memory_space<vmem>>, vector<128x512xf32>
    %cst_25 = arith.constant dense<0.000000e+00> : vector<8x512xf32>
    %63 = tpu.matmul %55, %62, %cst_25 {dimension_numbers = #tpu.dot_dimension_numbers<[1], [0], [0], [1], [0, 0, 1, 1], [], []>} : vector<8x128xf32>, vector<128x512xf32>, vector<8x512xf32> -> vector<8x512xf32>
    %64 = arith.addf %61, %63 : vector<8x512xf32>
    %65 = vector.extract_strided_slice %64 {offsets = [0, 0], sizes = [8, 384], strides = [1, 1]} : vector<8x512xf32> to vector<8x384xf32>
    %66 = arith.negf %65 : vector<8x384xf32>
    %67 = math.exp %66 : vector<8x384xf32>
    %cst_26 = arith.constant 1.000000e+00 : f32
    %68 = vector.broadcast %cst_26 : f32 to vector<8x384xf32>
    %69 = arith.addf %68, %67 : vector<8x384xf32>
    %70 = arith.divf %68, %69 : vector<8x384xf32>
    %71 = vector.extract_strided_slice %70 {offsets = [0, 0], sizes = [8, 128], strides = [1, 1]} : vector<8x384xf32> to vector<8x128xf32>
    %72 = vector.extract_strided_slice %70 {offsets = [0, 128], sizes = [8, 128], strides = [1, 1]} : vector<8x384xf32> to vector<8x128xf32>
    %73 = vector.extract_strided_slice %70 {offsets = [0, 256], sizes = [8, 128], strides = [1, 1]} : vector<8x384xf32> to vector<8x128xf32>
    %74 = vector.extract_strided_slice %64 {offsets = [0, 384], sizes = [8, 128], strides = [1, 1]} : vector<8x512xf32> to vector<8x128xf32>
    %75 = math.tanh %74 : vector<8x128xf32>
    %76 = arith.mulf %72, %53 : vector<8x128xf32>
    %77 = arith.mulf %71, %75 : vector<8x128xf32>
    %78 = arith.addf %76, %77 : vector<8x128xf32>
    %79 = math.tanh %78 : vector<8x128xf32>
    %80 = arith.mulf %73, %79 : vector<8x128xf32>
    %81 = arith.index_cast %59 : i32 to index
    %c0_27 = arith.constant 0 : index
    %82 = vector.load %arg17[%81, %c0_27] : memref<64x128xf32, #tpu.memory_space<vmem>>, vector<8x128xf32>
    tpu.vector_store %arg17[%81, %c0_27], %80 {strides = array<i32>} : memref<64x128xf32, #tpu.memory_space<vmem>>, vector<8x128xf32>,
    %c3_i32 = arith.constant 3 : i32
    %c8_i32_28 = arith.constant 8 : i32
    %83 = arith.muli %c3_i32, %c8_i32_28 : i32
    %84 = tpu.assume_multiple %83, 8 : i32
    %85 = arith.index_cast %84 : i32 to index
    %c0_29 = arith.constant 0 : index
    %86 = vector.load %arg16[%85, %c0_29] : memref<64x512xf32, #tpu.memory_space<vmem>>, vector<8x512xf32>
    %c0_30 = arith.constant 0 : index
    %c0_31 = arith.constant 0 : index
    %87 = vector.load %arg2[%c0_30, %c0_31] : memref<128x512xf32, #tpu.memory_space<vmem>>, vector<128x512xf32>
    %cst_32 = arith.constant dense<0.000000e+00> : vector<8x512xf32>
    %88 = tpu.matmul %80, %87, %cst_32 {dimension_numbers = #tpu.dot_dimension_numbers<[1], [0], [0], [1], [0, 0, 1, 1], [], []>} : vector<8x128xf32>, vector<128x512xf32>, vector<8x512xf32> -> vector<8x512xf32>
    %89 = arith.addf %86, %88 : vector<8x512xf32>
    %90 = vector.extract_strided_slice %89 {offsets = [0, 0], sizes = [8, 384], strides = [1, 1]} : vector<8x512xf32> to vector<8x384xf32>
    %91 = arith.negf %90 : vector<8x384xf32>
    %92 = math.exp %91 : vector<8x384xf32>
    %cst_33 = arith.constant 1.000000e+00 : f32
    %93 = vector.broadcast %cst_33 : f32 to vector<8x384xf32>
    %94 = arith.addf %93, %92 : vector<8x384xf32>
    %95 = arith.divf %93, %94 : vector<8x384xf32>
    %96 = vector.extract_strided_slice %95 {offsets = [0, 0], sizes = [8, 128], strides = [1, 1]} : vector<8x384xf32> to vector<8x128xf32>
    %97 = vector.extract_strided_slice %95 {offsets = [0, 128], sizes = [8, 128], strides = [1, 1]} : vector<8x384xf32> to vector<8x128xf32>
    %98 = vector.extract_strided_slice %95 {offsets = [0, 256], sizes = [8, 128], strides = [1, 1]} : vector<8x384xf32> to vector<8x128xf32>
    %99 = vector.extract_strided_slice %89 {offsets = [0, 384], sizes = [8, 128], strides = [1, 1]} : vector<8x512xf32> to vector<8x128xf32>
    %100 = math.tanh %99 : vector<8x128xf32>
    %101 = arith.mulf %97, %78 : vector<8x128xf32>
    %102 = arith.mulf %96, %100 : vector<8x128xf32>
    %103 = arith.addf %101, %102 : vector<8x128xf32>
    %104 = math.tanh %103 : vector<8x128xf32>
    %105 = arith.mulf %98, %104 : vector<8x128xf32>
    %106 = arith.index_cast %84 : i32 to index
    %c0_34 = arith.constant 0 : index
    %107 = vector.load %arg17[%106, %c0_34] : memref<64x128xf32, #tpu.memory_space<vmem>>, vector<8x128xf32>
    tpu.vector_store %arg17[%106, %c0_34], %105 {strides = array<i32>} : memref<64x128xf32, #tpu.memory_space<vmem>>, vector<8x128xf32>,
    %c4_i32 = arith.constant 4 : i32
    %c8_i32_35 = arith.constant 8 : i32
    %108 = arith.muli %c4_i32, %c8_i32_35 : i32
    %109 = tpu.assume_multiple %108, 8 : i32
    %110 = arith.index_cast %109 : i32 to index
    %c0_36 = arith.constant 0 : index
    %111 = vector.load %arg16[%110, %c0_36] : memref<64x512xf32, #tpu.memory_space<vmem>>, vector<8x512xf32>
    %c0_37 = arith.constant 0 : index
    %c0_38 = arith.constant 0 : index
    %112 = vector.load %arg2[%c0_37, %c0_38] : memref<128x512xf32, #tpu.memory_space<vmem>>, vector<128x512xf32>
    %cst_39 = arith.constant dense<0.000000e+00> : vector<8x512xf32>
    %113 = tpu.matmul %105, %112, %cst_39 {dimension_numbers = #tpu.dot_dimension_numbers<[1], [0], [0], [1], [0, 0, 1, 1], [], []>} : vector<8x128xf32>, vector<128x512xf32>, vector<8x512xf32> -> vector<8x512xf32>
    %114 = arith.addf %111, %113 : vector<8x512xf32>
    %115 = vector.extract_strided_slice %114 {offsets = [0, 0], sizes = [8, 384], strides = [1, 1]} : vector<8x512xf32> to vector<8x384xf32>
    %116 = arith.negf %115 : vector<8x384xf32>
    %117 = math.exp %116 : vector<8x384xf32>
    %cst_40 = arith.constant 1.000000e+00 : f32
    %118 = vector.broadcast %cst_40 : f32 to vector<8x384xf32>
    %119 = arith.addf %118, %117 : vector<8x384xf32>
    %120 = arith.divf %118, %119 : vector<8x384xf32>
    %121 = vector.extract_strided_slice %120 {offsets = [0, 0], sizes = [8, 128], strides = [1, 1]} : vector<8x384xf32> to vector<8x128xf32>
    %122 = vector.extract_strided_slice %120 {offsets = [0, 128], sizes = [8, 128], strides = [1, 1]} : vector<8x384xf32> to vector<8x128xf32>
    %123 = vector.extract_strided_slice %120 {offsets = [0, 256], sizes = [8, 128], strides = [1, 1]} : vector<8x384xf32> to vector<8x128xf32>
    %124 = vector.extract_strided_slice %114 {offsets = [0, 384], sizes = [8, 128], strides = [1, 1]} : vector<8x512xf32> to vector<8x128xf32>
    %125 = math.tanh %124 : vector<8x128xf32>
    %126 = arith.mulf %122, %103 : vector<8x128xf32>
    %127 = arith.mulf %121, %125 : vector<8x128xf32>
    %128 = arith.addf %126, %127 : vector<8x128xf32>
    %129 = math.tanh %128 : vector<8x128xf32>
    %130 = arith.mulf %123, %129 : vector<8x128xf32>
    %131 = arith.index_cast %109 : i32 to index
    %c0_41 = arith.constant 0 : index
    %132 = vector.load %arg17[%131, %c0_41] : memref<64x128xf32, #tpu.memory_space<vmem>>, vector<8x128xf32>
    tpu.vector_store %arg17[%131, %c0_41], %130 {strides = array<i32>} : memref<64x128xf32, #tpu.memory_space<vmem>>, vector<8x128xf32>,
    %c5_i32 = arith.constant 5 : i32
    %c8_i32_42 = arith.constant 8 : i32
    %133 = arith.muli %c5_i32, %c8_i32_42 : i32
    %134 = tpu.assume_multiple %133, 8 : i32
    %135 = arith.index_cast %134 : i32 to index
    %c0_43 = arith.constant 0 : index
    %136 = vector.load %arg16[%135, %c0_43] : memref<64x512xf32, #tpu.memory_space<vmem>>, vector<8x512xf32>
    %c0_44 = arith.constant 0 : index
    %c0_45 = arith.constant 0 : index
    %137 = vector.load %arg2[%c0_44, %c0_45] : memref<128x512xf32, #tpu.memory_space<vmem>>, vector<128x512xf32>
    %cst_46 = arith.constant dense<0.000000e+00> : vector<8x512xf32>
    %138 = tpu.matmul %130, %137, %cst_46 {dimension_numbers = #tpu.dot_dimension_numbers<[1], [0], [0], [1], [0, 0, 1, 1], [], []>} : vector<8x128xf32>, vector<128x512xf32>, vector<8x512xf32> -> vector<8x512xf32>
    %139 = arith.addf %136, %138 : vector<8x512xf32>
    %140 = vector.extract_strided_slice %139 {offsets = [0, 0], sizes = [8, 384], strides = [1, 1]} : vector<8x512xf32> to vector<8x384xf32>
    %141 = arith.negf %140 : vector<8x384xf32>
    %142 = math.exp %141 : vector<8x384xf32>
    %cst_47 = arith.constant 1.000000e+00 : f32
    %143 = vector.broadcast %cst_47 : f32 to vector<8x384xf32>
    %144 = arith.addf %143, %142 : vector<8x384xf32>
    %145 = arith.divf %143, %144 : vector<8x384xf32>
    %146 = vector.extract_strided_slice %145 {offsets = [0, 0], sizes = [8, 128], strides = [1, 1]} : vector<8x384xf32> to vector<8x128xf32>
    %147 = vector.extract_strided_slice %145 {offsets = [0, 128], sizes = [8, 128], strides = [1, 1]} : vector<8x384xf32> to vector<8x128xf32>
    %148 = vector.extract_strided_slice %145 {offsets = [0, 256], sizes = [8, 128], strides = [1, 1]} : vector<8x384xf32> to vector<8x128xf32>
    %149 = vector.extract_strided_slice %139 {offsets = [0, 384], sizes = [8, 128], strides = [1, 1]} : vector<8x512xf32> to vector<8x128xf32>
    %150 = math.tanh %149 : vector<8x128xf32>
    %151 = arith.mulf %147, %128 : vector<8x128xf32>
    %152 = arith.mulf %146, %150 : vector<8x128xf32>
    %153 = arith.addf %151, %152 : vector<8x128xf32>
    %154 = math.tanh %153 : vector<8x128xf32>
    %155 = arith.mulf %148, %154 : vector<8x128xf32>
    %156 = arith.index_cast %134 : i32 to index
    %c0_48 = arith.constant 0 : index
    %157 = vector.load %arg17[%156, %c0_48] : memref<64x128xf32, #tpu.memory_space<vmem>>, vector<8x128xf32>
    tpu.vector_store %arg17[%156, %c0_48], %155 {strides = array<i32>} : memref<64x128xf32, #tpu.memory_space<vmem>>, vector<8x128xf32>,
    %c6_i32 = arith.constant 6 : i32
    %c8_i32_49 = arith.constant 8 : i32
    %158 = arith.muli %c6_i32, %c8_i32_49 : i32
    %159 = tpu.assume_multiple %158, 8 : i32
    %160 = arith.index_cast %159 : i32 to index
    %c0_50 = arith.constant 0 : index
    %161 = vector.load %arg16[%160, %c0_50] : memref<64x512xf32, #tpu.memory_space<vmem>>, vector<8x512xf32>
    %c0_51 = arith.constant 0 : index
    %c0_52 = arith.constant 0 : index
    %162 = vector.load %arg2[%c0_51, %c0_52] : memref<128x512xf32, #tpu.memory_space<vmem>>, vector<128x512xf32>
    %cst_53 = arith.constant dense<0.000000e+00> : vector<8x512xf32>
    %163 = tpu.matmul %155, %162, %cst_53 {dimension_numbers = #tpu.dot_dimension_numbers<[1], [0], [0], [1], [0, 0, 1, 1], [], []>} : vector<8x128xf32>, vector<128x512xf32>, vector<8x512xf32> -> vector<8x512xf32>
    %164 = arith.addf %161, %163 : vector<8x512xf32>
    %165 = vector.extract_strided_slice %164 {offsets = [0, 0], sizes = [8, 384], strides = [1, 1]} : vector<8x512xf32> to vector<8x384xf32>
    %166 = arith.negf %165 : vector<8x384xf32>
    %167 = math.exp %166 : vector<8x384xf32>
    %cst_54 = arith.constant 1.000000e+00 : f32
    %168 = vector.broadcast %cst_54 : f32 to vector<8x384xf32>
    %169 = arith.addf %168, %167 : vector<8x384xf32>
    %170 = arith.divf %168, %169 : vector<8x384xf32>
    %171 = vector.extract_strided_slice %170 {offsets = [0, 0], sizes = [8, 128], strides = [1, 1]} : vector<8x384xf32> to vector<8x128xf32>
    %172 = vector.extract_strided_slice %170 {offsets = [0, 128], sizes = [8, 128], strides = [1, 1]} : vector<8x384xf32> to vector<8x128xf32>
    %173 = vector.extract_strided_slice %170 {offsets = [0, 256], sizes = [8, 128], strides = [1, 1]} : vector<8x384xf32> to vector<8x128xf32>
    %174 = vector.extract_strided_slice %164 {offsets = [0, 384], sizes = [8, 128], strides = [1, 1]} : vector<8x512xf32> to vector<8x128xf32>
    %175 = math.tanh %174 : vector<8x128xf32>
    %176 = arith.mulf %172, %153 : vector<8x128xf32>
    %177 = arith.mulf %171, %175 : vector<8x128xf32>
    %178 = arith.addf %176, %177 : vector<8x128xf32>
    %179 = math.tanh %178 : vector<8x128xf32>
    %180 = arith.mulf %173, %179 : vector<8x128xf32>
    %181 = arith.index_cast %159 : i32 to index
    %c0_55 = arith.constant 0 : index
    %182 = vector.load %arg17[%181, %c0_55] : memref<64x128xf32, #tpu.memory_space<vmem>>, vector<8x128xf32>
    tpu.vector_store %arg17[%181, %c0_55], %180 {strides = array<i32>} : memref<64x128xf32, #tpu.memory_space<vmem>>, vector<8x128xf32>,
    %c7_i32 = arith.constant 7 : i32
    %c8_i32_56 = arith.constant 8 : i32
    %183 = arith.muli %c7_i32, %c8_i32_56 : i32
    %184 = tpu.assume_multiple %183, 8 : i32
    %185 = arith.index_cast %184 : i32 to index
    %c0_57 = arith.constant 0 : index
    %186 = vector.load %arg16[%185, %c0_57] : memref<64x512xf32, #tpu.memory_space<vmem>>, vector<8x512xf32>
    %c0_58 = arith.constant 0 : index
    %c0_59 = arith.constant 0 : index
    %187 = vector.load %arg2[%c0_58, %c0_59] : memref<128x512xf32, #tpu.memory_space<vmem>>, vector<128x512xf32>
    %cst_60 = arith.constant dense<0.000000e+00> : vector<8x512xf32>
    %188 = tpu.matmul %180, %187, %cst_60 {dimension_numbers = #tpu.dot_dimension_numbers<[1], [0], [0], [1], [0, 0, 1, 1], [], []>} : vector<8x128xf32>, vector<128x512xf32>, vector<8x512xf32> -> vector<8x512xf32>
    %189 = arith.addf %186, %188 : vector<8x512xf32>
    %190 = vector.extract_strided_slice %189 {offsets = [0, 0], sizes = [8, 384], strides = [1, 1]} : vector<8x512xf32> to vector<8x384xf32>
    %191 = arith.negf %190 : vector<8x384xf32>
    %192 = math.exp %191 : vector<8x384xf32>
    %cst_61 = arith.constant 1.000000e+00 : f32
    %193 = vector.broadcast %cst_61 : f32 to vector<8x384xf32>
    %194 = arith.addf %193, %192 : vector<8x384xf32>
    %195 = arith.divf %193, %194 : vector<8x384xf32>
    %196 = vector.extract_strided_slice %195 {offsets = [0, 0], sizes = [8, 128], strides = [1, 1]} : vector<8x384xf32> to vector<8x128xf32>
    %197 = vector.extract_strided_slice %195 {offsets = [0, 128], sizes = [8, 128], strides = [1, 1]} : vector<8x384xf32> to vector<8x128xf32>
    %198 = vector.extract_strided_slice %195 {offsets = [0, 256], sizes = [8, 128], strides = [1, 1]} : vector<8x384xf32> to vector<8x128xf32>
    %199 = vector.extract_strided_slice %189 {offsets = [0, 384], sizes = [8, 128], strides = [1, 1]} : vector<8x512xf32> to vector<8x128xf32>
    %200 = math.tanh %199 : vector<8x128xf32>
    %201 = arith.mulf %197, %178 : vector<8x128xf32>
    %202 = arith.mulf %196, %200 : vector<8x128xf32>
    %203 = arith.addf %201, %202 : vector<8x128xf32>
    %204 = math.tanh %203 : vector<8x128xf32>
    %205 = arith.mulf %198, %204 : vector<8x128xf32>
    %206 = arith.index_cast %184 : i32 to index
    %c0_62 = arith.constant 0 : index
    %207 = vector.load %arg17[%206, %c0_62] : memref<64x128xf32, #tpu.memory_space<vmem>>, vector<8x128xf32>
    tpu.vector_store %arg17[%206, %c0_62], %205 {strides = array<i32>} : memref<64x128xf32, #tpu.memory_space<vmem>>, vector<8x128xf32>,
    %c8_i32_63 = arith.constant 8 : i32
    %c0_64 = arith.constant 0 : index
    %c0_65 = arith.constant 0 : index
    %208 = vector.load %arg17[%c0_64, %c0_65] : memref<64x128xf32, #tpu.memory_space<vmem>>, vector<64x128xf32>
    %c0_66 = arith.constant 0 : index
    %c0_67 = arith.constant 0 : index
    %209 = vector.load %arg4[%c0_66, %c0_67] : memref<128x512xf32, #tpu.memory_space<vmem>>, vector<128x512xf32>
    %cst_68 = arith.constant dense<0.000000e+00> : vector<64x512xf32>
    %210 = tpu.matmul %208, %209, %cst_68 {dimension_numbers = #tpu.dot_dimension_numbers<[1], [0], [0], [1], [0, 0, 1, 1], [], []>} : vector<64x128xf32>, vector<128x512xf32>, vector<64x512xf32> -> vector<64x512xf32>
    %c0_69 = arith.constant 0 : index
    %c0_70 = arith.constant 0 : index
    %211 = vector.load %arg6[%c0_69, %c0_70] : memref<1x512xf32, #tpu.memory_space<vmem>>, vector<1x512xf32>
    %212 = vector.broadcast %211 : vector<1x512xf32> to vector<64x512xf32>
    %213 = arith.addf %210, %212 : vector<64x512xf32>
    %c0_71 = arith.constant 0 : index
    %c0_72 = arith.constant 0 : index
    %214 = vector.load %arg16[%c0_71, %c0_72] : memref<64x512xf32, #tpu.memory_space<vmem>>, vector<64x512xf32>
    tpu.vector_store %arg16[%c0_71, %c0_72], %213 {strides = array<i32>} : memref<64x512xf32, #tpu.memory_space<vmem>>, vector<64x512xf32>,
    %c0_i32_73 = arith.constant 0 : i32
    %c8_i32_74 = arith.constant 8 : i32
    %215 = arith.muli %c0_i32_73, %c8_i32_74 : i32
    %216 = tpu.assume_multiple %215, 8 : i32
    %217 = arith.index_cast %216 : i32 to index
    %c0_75 = arith.constant 0 : index
    %218 = vector.load %arg16[%217, %c0_75] : memref<64x512xf32, #tpu.memory_space<vmem>>, vector<8x512xf32>
    %c0_76 = arith.constant 0 : index
    %c0_77 = arith.constant 0 : index
    %219 = vector.load %arg5[%c0_76, %c0_77] : memref<128x512xf32, #tpu.memory_space<vmem>>, vector<128x512xf32>
    %cst_78 = arith.constant dense<0.000000e+00> : vector<8x512xf32>
    %220 = tpu.matmul %7, %219, %cst_78 {dimension_numbers = #tpu.dot_dimension_numbers<[1], [0], [0], [1], [0, 0, 1, 1], [], []>} : vector<8x128xf32>, vector<128x512xf32>, vector<8x512xf32> -> vector<8x512xf32>
    %221 = arith.addf %218, %220 : vector<8x512xf32>
    %222 = vector.extract_strided_slice %221 {offsets = [0, 0], sizes = [8, 384], strides = [1, 1]} : vector<8x512xf32> to vector<8x384xf32>
    %223 = arith.negf %222 : vector<8x384xf32>
    %224 = math.exp %223 : vector<8x384xf32>
    %cst_79 = arith.constant 1.000000e+00 : f32
    %225 = vector.broadcast %cst_79 : f32 to vector<8x384xf32>
    %226 = arith.addf %225, %224 : vector<8x384xf32>
    %227 = arith.divf %225, %226 : vector<8x384xf32>
    %228 = vector.extract_strided_slice %227 {offsets = [0, 0], sizes = [8, 128], strides = [1, 1]} : vector<8x384xf32> to vector<8x128xf32>
    %229 = vector.extract_strided_slice %227 {offsets = [0, 128], sizes = [8, 128], strides = [1, 1]} : vector<8x384xf32> to vector<8x128xf32>
    %230 = vector.extract_strided_slice %227 {offsets = [0, 256], sizes = [8, 128], strides = [1, 1]} : vector<8x384xf32> to vector<8x128xf32>
    %231 = vector.extract_strided_slice %221 {offsets = [0, 384], sizes = [8, 128], strides = [1, 1]} : vector<8x512xf32> to vector<8x128xf32>
    %232 = math.tanh %231 : vector<8x128xf32>
    %233 = arith.mulf %229, %7 : vector<8x128xf32>
    %234 = arith.mulf %228, %232 : vector<8x128xf32>
    %235 = arith.addf %233, %234 : vector<8x128xf32>
    %236 = math.tanh %235 : vector<8x128xf32>
    %237 = arith.mulf %230, %236 : vector<8x128xf32>
    %c1_i32_80 = arith.constant 1 : i32
    %c8_i32_81 = arith.constant 8 : i32
    %238 = arith.muli %c1_i32_80, %c8_i32_81 : i32
    %239 = tpu.assume_multiple %238, 8 : i32
    %240 = arith.index_cast %239 : i32 to index
    %c0_82 = arith.constant 0 : index
    %241 = vector.load %arg16[%240, %c0_82] : memref<64x512xf32, #tpu.memory_space<vmem>>, vector<8x512xf32>
    %c0_83 = arith.constant 0 : index
    %c0_84 = arith.constant 0 : index
    %242 = vector.load %arg5[%c0_83, %c0_84] : memref<128x512xf32, #tpu.memory_space<vmem>>, vector<128x512xf32>
    %cst_85 = arith.constant dense<0.000000e+00> : vector<8x512xf32>
    %243 = tpu.matmul %237, %242, %cst_85 {dimension_numbers = #tpu.dot_dimension_numbers<[1], [0], [0], [1], [0, 0, 1, 1], [], []>} : vector<8x128xf32>, vector<128x512xf32>, vector<8x512xf32> -> vector<8x512xf32>
    %244 = arith.addf %241, %243 : vector<8x512xf32>
    %245 = vector.extract_strided_slice %244 {offsets = [0, 0], sizes = [8, 384], strides = [1, 1]} : vector<8x512xf32> to vector<8x384xf32>
    %246 = arith.negf %245 : vector<8x384xf32>
    %247 = math.exp %246 : vector<8x384xf32>
    %cst_86 = arith.constant 1.000000e+00 : f32
    %248 = vector.broadcast %cst_86 : f32 to vector<8x384xf32>
    %249 = arith.addf %248, %247 : vector<8x384xf32>
    %250 = arith.divf %248, %249 : vector<8x384xf32>
    %251 = vector.extract_strided_slice %250 {offsets = [0, 0], sizes = [8, 128], strides = [1, 1]} : vector<8x384xf32> to vector<8x128xf32>
    %252 = vector.extract_strided_slice %250 {offsets = [0, 128], sizes = [8, 128], strides = [1, 1]} : vector<8x384xf32> to vector<8x128xf32>
    %253 = vector.extract_strided_slice %250 {offsets = [0, 256], sizes = [8, 128], strides = [1, 1]} : vector<8x384xf32> to vector<8x128xf32>
    %254 = vector.extract_strided_slice %244 {offsets = [0, 384], sizes = [8, 128], strides = [1, 1]} : vector<8x512xf32> to vector<8x128xf32>
    %255 = math.tanh %254 : vector<8x128xf32>
    %256 = arith.mulf %252, %235 : vector<8x128xf32>
    %257 = arith.mulf %251, %255 : vector<8x128xf32>
    %258 = arith.addf %256, %257 : vector<8x128xf32>
    %259 = math.tanh %258 : vector<8x128xf32>
    %260 = arith.mulf %253, %259 : vector<8x128xf32>
    %c2_i32_87 = arith.constant 2 : i32
    %c8_i32_88 = arith.constant 8 : i32
    %261 = arith.muli %c2_i32_87, %c8_i32_88 : i32
    %262 = tpu.assume_multiple %261, 8 : i32
    %263 = arith.index_cast %262 : i32 to index
    %c0_89 = arith.constant 0 : index
    %264 = vector.load %arg16[%263, %c0_89] : memref<64x512xf32, #tpu.memory_space<vmem>>, vector<8x512xf32>
    %c0_90 = arith.constant 0 : index
    %c0_91 = arith.constant 0 : index
    %265 = vector.load %arg5[%c0_90, %c0_91] : memref<128x512xf32, #tpu.memory_space<vmem>>, vector<128x512xf32>
    %cst_92 = arith.constant dense<0.000000e+00> : vector<8x512xf32>
    %266 = tpu.matmul %260, %265, %cst_92 {dimension_numbers = #tpu.dot_dimension_numbers<[1], [0], [0], [1], [0, 0, 1, 1], [], []>} : vector<8x128xf32>, vector<128x512xf32>, vector<8x512xf32> -> vector<8x512xf32>
    %267 = arith.addf %264, %266 : vector<8x512xf32>
    %268 = vector.extract_strided_slice %267 {offsets = [0, 0], sizes = [8, 384], strides = [1, 1]} : vector<8x512xf32> to vector<8x384xf32>
    %269 = arith.negf %268 : vector<8x384xf32>
    %270 = math.exp %269 : vector<8x384xf32>
    %cst_93 = arith.constant 1.000000e+00 : f32
    %271 = vector.broadcast %cst_93 : f32 to vector<8x384xf32>
    %272 = arith.addf %271, %270 : vector<8x384xf32>
    %273 = arith.divf %271, %272 : vector<8x384xf32>
    %274 = vector.extract_strided_slice %273 {offsets = [0, 0], sizes = [8, 128], strides = [1, 1]} : vector<8x384xf32> to vector<8x128xf32>
    %275 = vector.extract_strided_slice %273 {offsets = [0, 128], sizes = [8, 128], strides = [1, 1]} : vector<8x384xf32> to vector<8x128xf32>
    %276 = vector.extract_strided_slice %273 {offsets = [0, 256], sizes = [8, 128], strides = [1, 1]} : vector<8x384xf32> to vector<8x128xf32>
    %277 = vector.extract_strided_slice %267 {offsets = [0, 384], sizes = [8, 128], strides = [1, 1]} : vector<8x512xf32> to vector<8x128xf32>
    %278 = math.tanh %277 : vector<8x128xf32>
    %279 = arith.mulf %275, %258 : vector<8x128xf32>
    %280 = arith.mulf %274, %278 : vector<8x128xf32>
    %281 = arith.addf %279, %280 : vector<8x128xf32>
    %282 = math.tanh %281 : vector<8x128xf32>
    %283 = arith.mulf %276, %282 : vector<8x128xf32>
    %c3_i32_94 = arith.constant 3 : i32
    %c8_i32_95 = arith.constant 8 : i32
    %284 = arith.muli %c3_i32_94, %c8_i32_95 : i32
    %285 = tpu.assume_multiple %284, 8 : i32
    %286 = arith.index_cast %285 : i32 to index
    %c0_96 = arith.constant 0 : index
    %287 = vector.load %arg16[%286, %c0_96] : memref<64x512xf32, #tpu.memory_space<vmem>>, vector<8x512xf32>
    %c0_97 = arith.constant 0 : index
    %c0_98 = arith.constant 0 : index
    %288 = vector.load %arg5[%c0_97, %c0_98] : memref<128x512xf32, #tpu.memory_space<vmem>>, vector<128x512xf32>
    %cst_99 = arith.constant dense<0.000000e+00> : vector<8x512xf32>
    %289 = tpu.matmul %283, %288, %cst_99 {dimension_numbers = #tpu.dot_dimension_numbers<[1], [0], [0], [1], [0, 0, 1, 1], [], []>} : vector<8x128xf32>, vector<128x512xf32>, vector<8x512xf32> -> vector<8x512xf32>
    %290 = arith.addf %287, %289 : vector<8x512xf32>
    %291 = vector.extract_strided_slice %290 {offsets = [0, 0], sizes = [8, 384], strides = [1, 1]} : vector<8x512xf32> to vector<8x384xf32>
    %292 = arith.negf %291 : vector<8x384xf32>
    %293 = math.exp %292 : vector<8x384xf32>
    %cst_100 = arith.constant 1.000000e+00 : f32
    %294 = vector.broadcast %cst_100 : f32 to vector<8x384xf32>
    %295 = arith.addf %294, %293 : vector<8x384xf32>
    %296 = arith.divf %294, %295 : vector<8x384xf32>
    %297 = vector.extract_strided_slice %296 {offsets = [0, 0], sizes = [8, 128], strides = [1, 1]} : vector<8x384xf32> to vector<8x128xf32>
    %298 = vector.extract_strided_slice %296 {offsets = [0, 128], sizes = [8, 128], strides = [1, 1]} : vector<8x384xf32> to vector<8x128xf32>
    %299 = vector.extract_strided_slice %296 {offsets = [0, 256], sizes = [8, 128], strides = [1, 1]} : vector<8x384xf32> to vector<8x128xf32>
    %300 = vector.extract_strided_slice %290 {offsets = [0, 384], sizes = [8, 128], strides = [1, 1]} : vector<8x512xf32> to vector<8x128xf32>
    %301 = math.tanh %300 : vector<8x128xf32>
    %302 = arith.mulf %298, %281 : vector<8x128xf32>
    %303 = arith.mulf %297, %301 : vector<8x128xf32>
    %304 = arith.addf %302, %303 : vector<8x128xf32>
    %305 = math.tanh %304 : vector<8x128xf32>
    %306 = arith.mulf %299, %305 : vector<8x128xf32>
    %c4_i32_101 = arith.constant 4 : i32
    %c8_i32_102 = arith.constant 8 : i32
    %307 = arith.muli %c4_i32_101, %c8_i32_102 : i32
    %308 = tpu.assume_multiple %307, 8 : i32
    %309 = arith.index_cast %308 : i32 to index
    %c0_103 = arith.constant 0 : index
    %310 = vector.load %arg16[%309, %c0_103] : memref<64x512xf32, #tpu.memory_space<vmem>>, vector<8x512xf32>
    %c0_104 = arith.constant 0 : index
    %c0_105 = arith.constant 0 : index
    %311 = vector.load %arg5[%c0_104, %c0_105] : memref<128x512xf32, #tpu.memory_space<vmem>>, vector<128x512xf32>
    %cst_106 = arith.constant dense<0.000000e+00> : vector<8x512xf32>
    %312 = tpu.matmul %306, %311, %cst_106 {dimension_numbers = #tpu.dot_dimension_numbers<[1], [0], [0], [1], [0, 0, 1, 1], [], []>} : vector<8x128xf32>, vector<128x512xf32>, vector<8x512xf32> -> vector<8x512xf32>
    %313 = arith.addf %310, %312 : vector<8x512xf32>
    %314 = vector.extract_strided_slice %313 {offsets = [0, 0], sizes = [8, 384], strides = [1, 1]} : vector<8x512xf32> to vector<8x384xf32>
    %315 = arith.negf %314 : vector<8x384xf32>
    %316 = math.exp %315 : vector<8x384xf32>
    %cst_107 = arith.constant 1.000000e+00 : f32
    %317 = vector.broadcast %cst_107 : f32 to vector<8x384xf32>
    %318 = arith.addf %317, %316 : vector<8x384xf32>
    %319 = arith.divf %317, %318 : vector<8x384xf32>
    %320 = vector.extract_strided_slice %319 {offsets = [0, 0], sizes = [8, 128], strides = [1, 1]} : vector<8x384xf32> to vector<8x128xf32>
    %321 = vector.extract_strided_slice %319 {offsets = [0, 128], sizes = [8, 128], strides = [1, 1]} : vector<8x384xf32> to vector<8x128xf32>
    %322 = vector.extract_strided_slice %319 {offsets = [0, 256], sizes = [8, 128], strides = [1, 1]} : vector<8x384xf32> to vector<8x128xf32>
    %323 = vector.extract_strided_slice %313 {offsets = [0, 384], sizes = [8, 128], strides = [1, 1]} : vector<8x512xf32> to vector<8x128xf32>
    %324 = math.tanh %323 : vector<8x128xf32>
    %325 = arith.mulf %321, %304 : vector<8x128xf32>
    %326 = arith.mulf %320, %324 : vector<8x128xf32>
    %327 = arith.addf %325, %326 : vector<8x128xf32>
    %328 = math.tanh %327 : vector<8x128xf32>
    %329 = arith.mulf %322, %328 : vector<8x128xf32>
    %c5_i32_108 = arith.constant 5 : i32
    %c8_i32_109 = arith.constant 8 : i32
    %330 = arith.muli %c5_i32_108, %c8_i32_109 : i32
    %331 = tpu.assume_multiple %330, 8 : i32
    %332 = arith.index_cast %331 : i32 to index
    %c0_110 = arith.constant 0 : index
    %333 = vector.load %arg16[%332, %c0_110] : memref<64x512xf32, #tpu.memory_space<vmem>>, vector<8x512xf32>
    %c0_111 = arith.constant 0 : index
    %c0_112 = arith.constant 0 : index
    %334 = vector.load %arg5[%c0_111, %c0_112] : memref<128x512xf32, #tpu.memory_space<vmem>>, vector<128x512xf32>
    %cst_113 = arith.constant dense<0.000000e+00> : vector<8x512xf32>
    %335 = tpu.matmul %329, %334, %cst_113 {dimension_numbers = #tpu.dot_dimension_numbers<[1], [0], [0], [1], [0, 0, 1, 1], [], []>} : vector<8x128xf32>, vector<128x512xf32>, vector<8x512xf32> -> vector<8x512xf32>
    %336 = arith.addf %333, %335 : vector<8x512xf32>
    %337 = vector.extract_strided_slice %336 {offsets = [0, 0], sizes = [8, 384], strides = [1, 1]} : vector<8x512xf32> to vector<8x384xf32>
    %338 = arith.negf %337 : vector<8x384xf32>
    %339 = math.exp %338 : vector<8x384xf32>
    %cst_114 = arith.constant 1.000000e+00 : f32
    %340 = vector.broadcast %cst_114 : f32 to vector<8x384xf32>
    %341 = arith.addf %340, %339 : vector<8x384xf32>
    %342 = arith.divf %340, %341 : vector<8x384xf32>
    %343 = vector.extract_strided_slice %342 {offsets = [0, 0], sizes = [8, 128], strides = [1, 1]} : vector<8x384xf32> to vector<8x128xf32>
    %344 = vector.extract_strided_slice %342 {offsets = [0, 128], sizes = [8, 128], strides = [1, 1]} : vector<8x384xf32> to vector<8x128xf32>
    %345 = vector.extract_strided_slice %342 {offsets = [0, 256], sizes = [8, 128], strides = [1, 1]} : vector<8x384xf32> to vector<8x128xf32>
    %346 = vector.extract_strided_slice %336 {offsets = [0, 384], sizes = [8, 128], strides = [1, 1]} : vector<8x512xf32> to vector<8x128xf32>
    %347 = math.tanh %346 : vector<8x128xf32>
    %348 = arith.mulf %344, %327 : vector<8x128xf32>
    %349 = arith.mulf %343, %347 : vector<8x128xf32>
    %350 = arith.addf %348, %349 : vector<8x128xf32>
    %351 = math.tanh %350 : vector<8x128xf32>
    %352 = arith.mulf %345, %351 : vector<8x128xf32>
    %c6_i32_115 = arith.constant 6 : i32
    %c8_i32_116 = arith.constant 8 : i32
    %353 = arith.muli %c6_i32_115, %c8_i32_116 : i32
    %354 = tpu.assume_multiple %353, 8 : i32
    %355 = arith.index_cast %354 : i32 to index
    %c0_117 = arith.constant 0 : index
    %356 = vector.load %arg16[%355, %c0_117] : memref<64x512xf32, #tpu.memory_space<vmem>>, vector<8x512xf32>
    %c0_118 = arith.constant 0 : index
    %c0_119 = arith.constant 0 : index
    %357 = vector.load %arg5[%c0_118, %c0_119] : memref<128x512xf32, #tpu.memory_space<vmem>>, vector<128x512xf32>
    %cst_120 = arith.constant dense<0.000000e+00> : vector<8x512xf32>
    %358 = tpu.matmul %352, %357, %cst_120 {dimension_numbers = #tpu.dot_dimension_numbers<[1], [0], [0], [1], [0, 0, 1, 1], [], []>} : vector<8x128xf32>, vector<128x512xf32>, vector<8x512xf32> -> vector<8x512xf32>
    %359 = arith.addf %356, %358 : vector<8x512xf32>
    %360 = vector.extract_strided_slice %359 {offsets = [0, 0], sizes = [8, 384], strides = [1, 1]} : vector<8x512xf32> to vector<8x384xf32>
    %361 = arith.negf %360 : vector<8x384xf32>
    %362 = math.exp %361 : vector<8x384xf32>
    %cst_121 = arith.constant 1.000000e+00 : f32
    %363 = vector.broadcast %cst_121 : f32 to vector<8x384xf32>
    %364 = arith.addf %363, %362 : vector<8x384xf32>
    %365 = arith.divf %363, %364 : vector<8x384xf32>
    %366 = vector.extract_strided_slice %365 {offsets = [0, 0], sizes = [8, 128], strides = [1, 1]} : vector<8x384xf32> to vector<8x128xf32>
    %367 = vector.extract_strided_slice %365 {offsets = [0, 128], sizes = [8, 128], strides = [1, 1]} : vector<8x384xf32> to vector<8x128xf32>
    %368 = vector.extract_strided_slice %365 {offsets = [0, 256], sizes = [8, 128], strides = [1, 1]} : vector<8x384xf32> to vector<8x128xf32>
    %369 = vector.extract_strided_slice %359 {offsets = [0, 384], sizes = [8, 128], strides = [1, 1]} : vector<8x512xf32> to vector<8x128xf32>
    %370 = math.tanh %369 : vector<8x128xf32>
    %371 = arith.mulf %367, %350 : vector<8x128xf32>
    %372 = arith.mulf %366, %370 : vector<8x128xf32>
    %373 = arith.addf %371, %372 : vector<8x128xf32>
    %374 = math.tanh %373 : vector<8x128xf32>
    %375 = arith.mulf %368, %374 : vector<8x128xf32>
    %c7_i32_122 = arith.constant 7 : i32
    %c8_i32_123 = arith.constant 8 : i32
    %376 = arith.muli %c7_i32_122, %c8_i32_123 : i32
    %377 = tpu.assume_multiple %376, 8 : i32
    %378 = arith.index_cast %377 : i32 to index
    %c0_124 = arith.constant 0 : index
    %379 = vector.load %arg16[%378, %c0_124] : memref<64x512xf32, #tpu.memory_space<vmem>>, vector<8x512xf32>
    %c0_125 = arith.constant 0 : index
    %c0_126 = arith.constant 0 : index
    %380 = vector.load %arg5[%c0_125, %c0_126] : memref<128x512xf32, #tpu.memory_space<vmem>>, vector<128x512xf32>
    %cst_127 = arith.constant dense<0.000000e+00> : vector<8x512xf32>
    %381 = tpu.matmul %375, %380, %cst_127 {dimension_numbers = #tpu.dot_dimension_numbers<[1], [0], [0], [1], [0, 0, 1, 1], [], []>} : vector<8x128xf32>, vector<128x512xf32>, vector<8x512xf32> -> vector<8x512xf32>
    %382 = arith.addf %379, %381 : vector<8x512xf32>
    %383 = vector.extract_strided_slice %382 {offsets = [0, 0], sizes = [8, 384], strides = [1, 1]} : vector<8x512xf32> to vector<8x384xf32>
    %384 = arith.negf %383 : vector<8x384xf32>
    %385 = math.exp %384 : vector<8x384xf32>
    %cst_128 = arith.constant 1.000000e+00 : f32
    %386 = vector.broadcast %cst_128 : f32 to vector<8x384xf32>
    %387 = arith.addf %386, %385 : vector<8x384xf32>
    %388 = arith.divf %386, %387 : vector<8x384xf32>
    %389 = vector.extract_strided_slice %388 {offsets = [0, 0], sizes = [8, 128], strides = [1, 1]} : vector<8x384xf32> to vector<8x128xf32>
    %390 = vector.extract_strided_slice %388 {offsets = [0, 128], sizes = [8, 128], strides = [1, 1]} : vector<8x384xf32> to vector<8x128xf32>
    %391 = vector.extract_strided_slice %388 {offsets = [0, 256], sizes = [8, 128], strides = [1, 1]} : vector<8x384xf32> to vector<8x128xf32>
    %392 = vector.extract_strided_slice %382 {offsets = [0, 384], sizes = [8, 128], strides = [1, 1]} : vector<8x512xf32> to vector<8x128xf32>
    %393 = math.tanh %392 : vector<8x128xf32>
    %394 = arith.mulf %390, %373 : vector<8x128xf32>
    %395 = arith.mulf %389, %393 : vector<8x128xf32>
    %396 = arith.addf %394, %395 : vector<8x128xf32>
    %397 = math.tanh %396 : vector<8x128xf32>
    %398 = arith.mulf %391, %397 : vector<8x128xf32>
    %c8_i32_129 = arith.constant 8 : i32
    %c0_130 = arith.constant 0 : index
    %c0_131 = arith.constant 0 : index
    %399 = vector.load %arg7[%c0_130, %c0_131] : memref<128x512xf32, #tpu.memory_space<vmem>>, vector<128x512xf32>
    %cst_132 = arith.constant dense<0.000000e+00> : vector<8x512xf32>
    %400 = tpu.matmul %398, %399, %cst_132 {dimension_numbers = #tpu.dot_dimension_numbers<[1], [0], [0], [1], [0, 0, 1, 1], [], []>} : vector<8x128xf32>, vector<128x512xf32>, vector<8x512xf32> -> vector<8x512xf32>
    %c0_133 = arith.constant 0 : index
    %c0_134 = arith.constant 0 : index
    %401 = vector.load %arg9[%c0_133, %c0_134] : memref<1x512xf32, #tpu.memory_space<vmem>>, vector<1x512xf32>
    %402 = vector.broadcast %401 : vector<1x512xf32> to vector<8x512xf32>
    %403 = arith.addf %400, %402 : vector<8x512xf32>
    %c0_135 = arith.constant 0 : index
    %c0_136 = arith.constant 0 : index
    %404 = vector.load %arg18[%c0_135, %c0_136] : memref<8x512xf32, #tpu.memory_space<vmem>>, vector<8x512xf32>
    tpu.vector_store %arg18[%c0_135, %c0_136], %403 {strides = array<i32>} : memref<8x512xf32, #tpu.memory_space<vmem>>, vector<8x512xf32>,
    %405 = tpu.iota {dimensions = array<i32: 0>} : vector<8x128xi32>
    %cst_137 = arith.constant 0.000000e+00 : f32
    %406 = vector.broadcast %cst_137 : f32 to vector<1x128xf32>
    %c0_i32_138 = arith.constant 0 : i32
    %c8_i32_139 = arith.constant 8 : i32
    %407 = arith.muli %c0_i32_138, %c8_i32_139 : i32
    %cst_140 = arith.constant 0.000000e+00 : f32
    %408 = vector.broadcast %cst_140 : f32 to vector<8x128xf32>
    %c0_i32_141 = arith.constant 0 : i32
    %409 = arith.addi %407, %c0_i32_141 : i32
    %c2_i32_142 = arith.constant 2 : i32
    %c0_i32_143 = arith.constant 0 : i32
    %410 = arith.cmpi eq, %c2_i32_142, %c0_i32_143 : i32
    %c1_i32_144 = arith.constant 1 : i32
    %411 = arith.select %410, %c1_i32_144, %c2_i32_142 : i32
    %412 = arith.remsi %409, %411 : i32
    %c0_i32_145 = arith.constant 0 : i32
    %413 = arith.cmpi ne, %412, %c0_i32_145 : i32
    %c0_i32_146 = arith.constant 0 : i32
    %414 = arith.cmpi slt, %412, %c0_i32_146 : i32
    %c0_i32_147 = arith.constant 0 : i32
    %415 = arith.cmpi slt, %411, %c0_i32_147 : i32
    %416 = arith.xori %414, %415 : i1
    %417 = arith.andi %416, %413 : i1
    %418 = arith.addi %412, %411 : i32
    %419 = arith.select %417, %418, %412 : i32
    %420 = arith.index_cast %419 : i32 to index
    %c0_148 = arith.constant 0 : index
    %421 = vector.load %arg18[%420, %c0_148] : memref<8x512xf32, #tpu.memory_space<vmem>>, vector<1x512xf32>
    %c0_149 = arith.constant 0 : index
    %c0_150 = arith.constant 0 : index
    %422 = vector.load %arg8[%c0_149, %c0_150] : memref<128x512xf32, #tpu.memory_space<vmem>>, vector<128x512xf32>
    %cst_151 = arith.constant dense<0.000000e+00> : vector<1x512xf32>
    %423 = tpu.matmul %406, %422, %cst_151 {dimension_numbers = #tpu.dot_dimension_numbers<[1], [0], [0], [1], [0, 0, 1, 1], [], []>} : vector<1x128xf32>, vector<128x512xf32>, vector<1x512xf32> -> vector<1x512xf32>
    %424 = arith.addf %421, %423 : vector<1x512xf32>
    %425 = vector.extract_strided_slice %424 {offsets = [0, 0], sizes = [1, 384], strides = [1, 1]} : vector<1x512xf32> to vector<1x384xf32>
    %426 = arith.negf %425 : vector<1x384xf32>
    %427 = math.exp %426 : vector<1x384xf32>
    %cst_152 = arith.constant 1.000000e+00 : f32
    %428 = vector.broadcast %cst_152 : f32 to vector<1x384xf32>
    %429 = arith.addf %428, %427 : vector<1x384xf32>
    %430 = arith.divf %428, %429 : vector<1x384xf32>
    %431 = vector.extract_strided_slice %430 {offsets = [0, 0], sizes = [1, 128], strides = [1, 1]} : vector<1x384xf32> to vector<1x128xf32>
    %432 = vector.extract_strided_slice %430 {offsets = [0, 128], sizes = [1, 128], strides = [1, 1]} : vector<1x384xf32> to vector<1x128xf32>
    %433 = vector.extract_strided_slice %430 {offsets = [0, 256], sizes = [1, 128], strides = [1, 1]} : vector<1x384xf32> to vector<1x128xf32>
    %434 = vector.extract_strided_slice %424 {offsets = [0, 384], sizes = [1, 128], strides = [1, 1]} : vector<1x512xf32> to vector<1x128xf32>
    %435 = math.tanh %434 : vector<1x128xf32>
    %436 = arith.mulf %432, %406 : vector<1x128xf32>
    %437 = arith.mulf %431, %435 : vector<1x128xf32>
    %438 = arith.addf %436, %437 : vector<1x128xf32>
    %439 = math.tanh %438 : vector<1x128xf32>
    %440 = arith.mulf %433, %439 : vector<1x128xf32>
    %c0_i32_153 = arith.constant 0 : i32
    %441 = vector.broadcast %c0_i32_153 : i32 to vector<8x128xi32>
    %442 = arith.cmpi eq, %405, %441 : vector<8x128xi32>
    %443 = vector.shape_cast %440 : vector<1x128xf32> to vector<1x128xf32>
    %444 = vector.broadcast %443 : vector<1x128xf32> to vector<8x128xf32>
    %445 = arith.select %442, %444, %408 : vector<8x128xi1>, vector<8x128xf32>
    %c1_i32_154 = arith.constant 1 : i32
    %446 = arith.addi %407, %c1_i32_154 : i32
    %c2_i32_155 = arith.constant 2 : i32
    %c0_i32_156 = arith.constant 0 : i32
    %447 = arith.cmpi eq, %c2_i32_155, %c0_i32_156 : i32
    %c1_i32_157 = arith.constant 1 : i32
    %448 = arith.select %447, %c1_i32_157, %c2_i32_155 : i32
    %449 = arith.remsi %446, %448 : i32
    %c0_i32_158 = arith.constant 0 : i32
    %450 = arith.cmpi ne, %449, %c0_i32_158 : i32
    %c0_i32_159 = arith.constant 0 : i32
    %451 = arith.cmpi slt, %449, %c0_i32_159 : i32
    %c0_i32_160 = arith.constant 0 : i32
    %452 = arith.cmpi slt, %448, %c0_i32_160 : i32
    %453 = arith.xori %451, %452 : i1
    %454 = arith.andi %453, %450 : i1
    %455 = arith.addi %449, %448 : i32
    %456 = arith.select %454, %455, %449 : i32
    %457 = arith.index_cast %456 : i32 to index
    %c0_161 = arith.constant 0 : index
    %458 = vector.load %arg18[%457, %c0_161] : memref<8x512xf32, #tpu.memory_space<vmem>>, vector<1x512xf32>
    %c0_162 = arith.constant 0 : index
    %c0_163 = arith.constant 0 : index
    %459 = vector.load %arg8[%c0_162, %c0_163] : memref<128x512xf32, #tpu.memory_space<vmem>>, vector<128x512xf32>
    %cst_164 = arith.constant dense<0.000000e+00> : vector<1x512xf32>
    %460 = tpu.matmul %440, %459, %cst_164 {dimension_numbers = #tpu.dot_dimension_numbers<[1], [0], [0], [1], [0, 0, 1, 1], [], []>} : vector<1x128xf32>, vector<128x512xf32>, vector<1x512xf32> -> vector<1x512xf32>
    %461 = arith.addf %458, %460 : vector<1x512xf32>
    %462 = vector.extract_strided_slice %461 {offsets = [0, 0], sizes = [1, 384], strides = [1, 1]} : vector<1x512xf32> to vector<1x384xf32>
    %463 = arith.negf %462 : vector<1x384xf32>
    %464 = math.exp %463 : vector<1x384xf32>
    %cst_165 = arith.constant 1.000000e+00 : f32
    %465 = vector.broadcast %cst_165 : f32 to vector<1x384xf32>
    %466 = arith.addf %465, %464 : vector<1x384xf32>
    %467 = arith.divf %465, %466 : vector<1x384xf32>
    %468 = vector.extract_strided_slice %467 {offsets = [0, 0], sizes = [1, 128], strides = [1, 1]} : vector<1x384xf32> to vector<1x128xf32>
    %469 = vector.extract_strided_slice %467 {offsets = [0, 128], sizes = [1, 128], strides = [1, 1]} : vector<1x384xf32> to vector<1x128xf32>
    %470 = vector.extract_strided_slice %467 {offsets = [0, 256], sizes = [1, 128], strides = [1, 1]} : vector<1x384xf32> to vector<1x128xf32>
    %471 = vector.extract_strided_slice %461 {offsets = [0, 384], sizes = [1, 128], strides = [1, 1]} : vector<1x512xf32> to vector<1x128xf32>
    %472 = math.tanh %471 : vector<1x128xf32>
    %473 = arith.mulf %469, %438 : vector<1x128xf32>
    %474 = arith.mulf %468, %472 : vector<1x128xf32>
    %475 = arith.addf %473, %474 : vector<1x128xf32>
    %476 = math.tanh %475 : vector<1x128xf32>
    %477 = arith.mulf %470, %476 : vector<1x128xf32>
    %c1_i32_166 = arith.constant 1 : i32
    %478 = vector.broadcast %c1_i32_166 : i32 to vector<8x128xi32>
    %479 = arith.cmpi eq, %405, %478 : vector<8x128xi32>
    %480 = vector.shape_cast %477 : vector<1x128xf32> to vector<1x128xf32>
    %481 = vector.broadcast %480 : vector<1x128xf32> to vector<8x128xf32>
    %482 = arith.select %479, %481, %445 : vector<8x128xi1>, vector<8x128xf32>
    %c2_i32_167 = arith.constant 2 : i32
    %483 = arith.addi %407, %c2_i32_167 : i32
    %c2_i32_168 = arith.constant 2 : i32
    %c0_i32_169 = arith.constant 0 : i32
    %484 = arith.cmpi eq, %c2_i32_168, %c0_i32_169 : i32
    %c1_i32_170 = arith.constant 1 : i32
    %485 = arith.select %484, %c1_i32_170, %c2_i32_168 : i32
    %486 = arith.remsi %483, %485 : i32
    %c0_i32_171 = arith.constant 0 : i32
    %487 = arith.cmpi ne, %486, %c0_i32_171 : i32
    %c0_i32_172 = arith.constant 0 : i32
    %488 = arith.cmpi slt, %486, %c0_i32_172 : i32
    %c0_i32_173 = arith.constant 0 : i32
    %489 = arith.cmpi slt, %485, %c0_i32_173 : i32
    %490 = arith.xori %488, %489 : i1
    %491 = arith.andi %490, %487 : i1
    %492 = arith.addi %486, %485 : i32
    %493 = arith.select %491, %492, %486 : i32
    %494 = arith.index_cast %493 : i32 to index
    %c0_174 = arith.constant 0 : index
    %495 = vector.load %arg18[%494, %c0_174] : memref<8x512xf32, #tpu.memory_space<vmem>>, vector<1x512xf32>
    %c0_175 = arith.constant 0 : index
    %c0_176 = arith.constant 0 : index
    %496 = vector.load %arg8[%c0_175, %c0_176] : memref<128x512xf32, #tpu.memory_space<vmem>>, vector<128x512xf32>
    %cst_177 = arith.constant dense<0.000000e+00> : vector<1x512xf32>
    %497 = tpu.matmul %477, %496, %cst_177 {dimension_numbers = #tpu.dot_dimension_numbers<[1], [0], [0], [1], [0, 0, 1, 1], [], []>} : vector<1x128xf32>, vector<128x512xf32>, vector<1x512xf32> -> vector<1x512xf32>
    %498 = arith.addf %495, %497 : vector<1x512xf32>
    %499 = vector.extract_strided_slice %498 {offsets = [0, 0], sizes = [1, 384], strides = [1, 1]} : vector<1x512xf32> to vector<1x384xf32>
    %500 = arith.negf %499 : vector<1x384xf32>
    %501 = math.exp %500 : vector<1x384xf32>
    %cst_178 = arith.constant 1.000000e+00 : f32
    %502 = vector.broadcast %cst_178 : f32 to vector<1x384xf32>
    %503 = arith.addf %502, %501 : vector<1x384xf32>
    %504 = arith.divf %502, %503 : vector<1x384xf32>
    %505 = vector.extract_strided_slice %504 {offsets = [0, 0], sizes = [1, 128], strides = [1, 1]} : vector<1x384xf32> to vector<1x128xf32>
    %506 = vector.extract_strided_slice %504 {offsets = [0, 128], sizes = [1, 128], strides = [1, 1]} : vector<1x384xf32> to vector<1x128xf32>
    %507 = vector.extract_strided_slice %504 {offsets = [0, 256], sizes = [1, 128], strides = [1, 1]} : vector<1x384xf32> to vector<1x128xf32>
    %508 = vector.extract_strided_slice %498 {offsets = [0, 384], sizes = [1, 128], strides = [1, 1]} : vector<1x512xf32> to vector<1x128xf32>
    %509 = math.tanh %508 : vector<1x128xf32>
    %510 = arith.mulf %506, %475 : vector<1x128xf32>
    %511 = arith.mulf %505, %509 : vector<1x128xf32>
    %512 = arith.addf %510, %511 : vector<1x128xf32>
    %513 = math.tanh %512 : vector<1x128xf32>
    %514 = arith.mulf %507, %513 : vector<1x128xf32>
    %c2_i32_179 = arith.constant 2 : i32
    %515 = vector.broadcast %c2_i32_179 : i32 to vector<8x128xi32>
    %516 = arith.cmpi eq, %405, %515 : vector<8x128xi32>
    %517 = vector.shape_cast %514 : vector<1x128xf32> to vector<1x128xf32>
    %518 = vector.broadcast %517 : vector<1x128xf32> to vector<8x128xf32>
    %519 = arith.select %516, %518, %482 : vector<8x128xi1>, vector<8x128xf32>
    %c3_i32_180 = arith.constant 3 : i32
    %520 = arith.addi %407, %c3_i32_180 : i32
    %c2_i32_181 = arith.constant 2 : i32
    %c0_i32_182 = arith.constant 0 : i32
    %521 = arith.cmpi eq, %c2_i32_181, %c0_i32_182 : i32
    %c1_i32_183 = arith.constant 1 : i32
    %522 = arith.select %521, %c1_i32_183, %c2_i32_181 : i32
    %523 = arith.remsi %520, %522 : i32
    %c0_i32_184 = arith.constant 0 : i32
    %524 = arith.cmpi ne, %523, %c0_i32_184 : i32
    %c0_i32_185 = arith.constant 0 : i32
    %525 = arith.cmpi slt, %523, %c0_i32_185 : i32
    %c0_i32_186 = arith.constant 0 : i32
    %526 = arith.cmpi slt, %522, %c0_i32_186 : i32
    %527 = arith.xori %525, %526 : i1
    %528 = arith.andi %527, %524 : i1
    %529 = arith.addi %523, %522 : i32
    %530 = arith.select %528, %529, %523 : i32
    %531 = arith.index_cast %530 : i32 to index
    %c0_187 = arith.constant 0 : index
    %532 = vector.load %arg18[%531, %c0_187] : memref<8x512xf32, #tpu.memory_space<vmem>>, vector<1x512xf32>
    %c0_188 = arith.constant 0 : index
    %c0_189 = arith.constant 0 : index
    %533 = vector.load %arg8[%c0_188, %c0_189] : memref<128x512xf32, #tpu.memory_space<vmem>>, vector<128x512xf32>
    %cst_190 = arith.constant dense<0.000000e+00> : vector<1x512xf32>
    %534 = tpu.matmul %514, %533, %cst_190 {dimension_numbers = #tpu.dot_dimension_numbers<[1], [0], [0], [1], [0, 0, 1, 1], [], []>} : vector<1x128xf32>, vector<128x512xf32>, vector<1x512xf32> -> vector<1x512xf32>
    %535 = arith.addf %532, %534 : vector<1x512xf32>
    %536 = vector.extract_strided_slice %535 {offsets = [0, 0], sizes = [1, 384], strides = [1, 1]} : vector<1x512xf32> to vector<1x384xf32>
    %537 = arith.negf %536 : vector<1x384xf32>
    %538 = math.exp %537 : vector<1x384xf32>
    %cst_191 = arith.constant 1.000000e+00 : f32
    %539 = vector.broadcast %cst_191 : f32 to vector<1x384xf32>
    %540 = arith.addf %539, %538 : vector<1x384xf32>
    %541 = arith.divf %539, %540 : vector<1x384xf32>
    %542 = vector.extract_strided_slice %541 {offsets = [0, 0], sizes = [1, 128], strides = [1, 1]} : vector<1x384xf32> to vector<1x128xf32>
    %543 = vector.extract_strided_slice %541 {offsets = [0, 128], sizes = [1, 128], strides = [1, 1]} : vector<1x384xf32> to vector<1x128xf32>
    %544 = vector.extract_strided_slice %541 {offsets = [0, 256], sizes = [1, 128], strides = [1, 1]} : vector<1x384xf32> to vector<1x128xf32>
    %545 = vector.extract_strided_slice %535 {offsets = [0, 384], sizes = [1, 128], strides = [1, 1]} : vector<1x512xf32> to vector<1x128xf32>
    %546 = math.tanh %545 : vector<1x128xf32>
    %547 = arith.mulf %543, %512 : vector<1x128xf32>
    %548 = arith.mulf %542, %546 : vector<1x128xf32>
    %549 = arith.addf %547, %548 : vector<1x128xf32>
    %550 = math.tanh %549 : vector<1x128xf32>
    %551 = arith.mulf %544, %550 : vector<1x128xf32>
    %c3_i32_192 = arith.constant 3 : i32
    %552 = vector.broadcast %c3_i32_192 : i32 to vector<8x128xi32>
    %553 = arith.cmpi eq, %405, %552 : vector<8x128xi32>
    %554 = vector.shape_cast %551 : vector<1x128xf32> to vector<1x128xf32>
    %555 = vector.broadcast %554 : vector<1x128xf32> to vector<8x128xf32>
    %556 = arith.select %553, %555, %519 : vector<8x128xi1>, vector<8x128xf32>
    %c4_i32_193 = arith.constant 4 : i32
    %557 = arith.addi %407, %c4_i32_193 : i32
    %c2_i32_194 = arith.constant 2 : i32
    %c0_i32_195 = arith.constant 0 : i32
    %558 = arith.cmpi eq, %c2_i32_194, %c0_i32_195 : i32
    %c1_i32_196 = arith.constant 1 : i32
    %559 = arith.select %558, %c1_i32_196, %c2_i32_194 : i32
    %560 = arith.remsi %557, %559 : i32
    %c0_i32_197 = arith.constant 0 : i32
    %561 = arith.cmpi ne, %560, %c0_i32_197 : i32
    %c0_i32_198 = arith.constant 0 : i32
    %562 = arith.cmpi slt, %560, %c0_i32_198 : i32
    %c0_i32_199 = arith.constant 0 : i32
    %563 = arith.cmpi slt, %559, %c0_i32_199 : i32
    %564 = arith.xori %562, %563 : i1
    %565 = arith.andi %564, %561 : i1
    %566 = arith.addi %560, %559 : i32
    %567 = arith.select %565, %566, %560 : i32
    %568 = arith.index_cast %567 : i32 to index
    %c0_200 = arith.constant 0 : index
    %569 = vector.load %arg18[%568, %c0_200] : memref<8x512xf32, #tpu.memory_space<vmem>>, vector<1x512xf32>
    %c0_201 = arith.constant 0 : index
    %c0_202 = arith.constant 0 : index
    %570 = vector.load %arg8[%c0_201, %c0_202] : memref<128x512xf32, #tpu.memory_space<vmem>>, vector<128x512xf32>
    %cst_203 = arith.constant dense<0.000000e+00> : vector<1x512xf32>
    %571 = tpu.matmul %551, %570, %cst_203 {dimension_numbers = #tpu.dot_dimension_numbers<[1], [0], [0], [1], [0, 0, 1, 1], [], []>} : vector<1x128xf32>, vector<128x512xf32>, vector<1x512xf32> -> vector<1x512xf32>
    %572 = arith.addf %569, %571 : vector<1x512xf32>
    %573 = vector.extract_strided_slice %572 {offsets = [0, 0], sizes = [1, 384], strides = [1, 1]} : vector<1x512xf32> to vector<1x384xf32>
    %574 = arith.negf %573 : vector<1x384xf32>
    %575 = math.exp %574 : vector<1x384xf32>
    %cst_204 = arith.constant 1.000000e+00 : f32
    %576 = vector.broadcast %cst_204 : f32 to vector<1x384xf32>
    %577 = arith.addf %576, %575 : vector<1x384xf32>
    %578 = arith.divf %576, %577 : vector<1x384xf32>
    %579 = vector.extract_strided_slice %578 {offsets = [0, 0], sizes = [1, 128], strides = [1, 1]} : vector<1x384xf32> to vector<1x128xf32>
    %580 = vector.extract_strided_slice %578 {offsets = [0, 128], sizes = [1, 128], strides = [1, 1]} : vector<1x384xf32> to vector<1x128xf32>
    %581 = vector.extract_strided_slice %578 {offsets = [0, 256], sizes = [1, 128], strides = [1, 1]} : vector<1x384xf32> to vector<1x128xf32>
    %582 = vector.extract_strided_slice %572 {offsets = [0, 384], sizes = [1, 128], strides = [1, 1]} : vector<1x512xf32> to vector<1x128xf32>
    %583 = math.tanh %582 : vector<1x128xf32>
    %584 = arith.mulf %580, %549 : vector<1x128xf32>
    %585 = arith.mulf %579, %583 : vector<1x128xf32>
    %586 = arith.addf %584, %585 : vector<1x128xf32>
    %587 = math.tanh %586 : vector<1x128xf32>
    %588 = arith.mulf %581, %587 : vector<1x128xf32>
    %c4_i32_205 = arith.constant 4 : i32
    %589 = vector.broadcast %c4_i32_205 : i32 to vector<8x128xi32>
    %590 = arith.cmpi eq, %405, %589 : vector<8x128xi32>
    %591 = vector.shape_cast %588 : vector<1x128xf32> to vector<1x128xf32>
    %592 = vector.broadcast %591 : vector<1x128xf32> to vector<8x128xf32>
    %593 = arith.select %590, %592, %556 : vector<8x128xi1>, vector<8x128xf32>
    %c5_i32_206 = arith.constant 5 : i32
    %594 = arith.addi %407, %c5_i32_206 : i32
    %c2_i32_207 = arith.constant 2 : i32
    %c0_i32_208 = arith.constant 0 : i32
    %595 = arith.cmpi eq, %c2_i32_207, %c0_i32_208 : i32
    %c1_i32_209 = arith.constant 1 : i32
    %596 = arith.select %595, %c1_i32_209, %c2_i32_207 : i32
    %597 = arith.remsi %594, %596 : i32
    %c0_i32_210 = arith.constant 0 : i32
    %598 = arith.cmpi ne, %597, %c0_i32_210 : i32
    %c0_i32_211 = arith.constant 0 : i32
    %599 = arith.cmpi slt, %597, %c0_i32_211 : i32
    %c0_i32_212 = arith.constant 0 : i32
    %600 = arith.cmpi slt, %596, %c0_i32_212 : i32
    %601 = arith.xori %599, %600 : i1
    %602 = arith.andi %601, %598 : i1
    %603 = arith.addi %597, %596 : i32
    %604 = arith.select %602, %603, %597 : i32
    %605 = arith.index_cast %604 : i32 to index
    %c0_213 = arith.constant 0 : index
    %606 = vector.load %arg18[%605, %c0_213] : memref<8x512xf32, #tpu.memory_space<vmem>>, vector<1x512xf32>
    %c0_214 = arith.constant 0 : index
    %c0_215 = arith.constant 0 : index
    %607 = vector.load %arg8[%c0_214, %c0_215] : memref<128x512xf32, #tpu.memory_space<vmem>>, vector<128x512xf32>
    %cst_216 = arith.constant dense<0.000000e+00> : vector<1x512xf32>
    %608 = tpu.matmul %588, %607, %cst_216 {dimension_numbers = #tpu.dot_dimension_numbers<[1], [0], [0], [1], [0, 0, 1, 1], [], []>} : vector<1x128xf32>, vector<128x512xf32>, vector<1x512xf32> -> vector<1x512xf32>
    %609 = arith.addf %606, %608 : vector<1x512xf32>
    %610 = vector.extract_strided_slice %609 {offsets = [0, 0], sizes = [1, 384], strides = [1, 1]} : vector<1x512xf32> to vector<1x384xf32>
    %611 = arith.negf %610 : vector<1x384xf32>
    %612 = math.exp %611 : vector<1x384xf32>
    %cst_217 = arith.constant 1.000000e+00 : f32
    %613 = vector.broadcast %cst_217 : f32 to vector<1x384xf32>
    %614 = arith.addf %613, %612 : vector<1x384xf32>
    %615 = arith.divf %613, %614 : vector<1x384xf32>
    %616 = vector.extract_strided_slice %615 {offsets = [0, 0], sizes = [1, 128], strides = [1, 1]} : vector<1x384xf32> to vector<1x128xf32>
    %617 = vector.extract_strided_slice %615 {offsets = [0, 128], sizes = [1, 128], strides = [1, 1]} : vector<1x384xf32> to vector<1x128xf32>
    %618 = vector.extract_strided_slice %615 {offsets = [0, 256], sizes = [1, 128], strides = [1, 1]} : vector<1x384xf32> to vector<1x128xf32>
    %619 = vector.extract_strided_slice %609 {offsets = [0, 384], sizes = [1, 128], strides = [1, 1]} : vector<1x512xf32> to vector<1x128xf32>
    %620 = math.tanh %619 : vector<1x128xf32>
    %621 = arith.mulf %617, %586 : vector<1x128xf32>
    %622 = arith.mulf %616, %620 : vector<1x128xf32>
    %623 = arith.addf %621, %622 : vector<1x128xf32>
    %624 = math.tanh %623 : vector<1x128xf32>
    %625 = arith.mulf %618, %624 : vector<1x128xf32>
    %c5_i32_218 = arith.constant 5 : i32
    %626 = vector.broadcast %c5_i32_218 : i32 to vector<8x128xi32>
    %627 = arith.cmpi eq, %405, %626 : vector<8x128xi32>
    %628 = vector.shape_cast %625 : vector<1x128xf32> to vector<1x128xf32>
    %629 = vector.broadcast %628 : vector<1x128xf32> to vector<8x128xf32>
    %630 = arith.select %627, %629, %593 : vector<8x128xi1>, vector<8x128xf32>
    %c6_i32_219 = arith.constant 6 : i32
    %631 = arith.addi %407, %c6_i32_219 : i32
    %c2_i32_220 = arith.constant 2 : i32
    %c0_i32_221 = arith.constant 0 : i32
    %632 = arith.cmpi eq, %c2_i32_220, %c0_i32_221 : i32
    %c1_i32_222 = arith.constant 1 : i32
    %633 = arith.select %632, %c1_i32_222, %c2_i32_220 : i32
    %634 = arith.remsi %631, %633 : i32
    %c0_i32_223 = arith.constant 0 : i32
    %635 = arith.cmpi ne, %634, %c0_i32_223 : i32
    %c0_i32_224 = arith.constant 0 : i32
    %636 = arith.cmpi slt, %634, %c0_i32_224 : i32
    %c0_i32_225 = arith.constant 0 : i32
    %637 = arith.cmpi slt, %633, %c0_i32_225 : i32
    %638 = arith.xori %636, %637 : i1
    %639 = arith.andi %638, %635 : i1
    %640 = arith.addi %634, %633 : i32
    %641 = arith.select %639, %640, %634 : i32
    %642 = arith.index_cast %641 : i32 to index
    %c0_226 = arith.constant 0 : index
    %643 = vector.load %arg18[%642, %c0_226] : memref<8x512xf32, #tpu.memory_space<vmem>>, vector<1x512xf32>
    %c0_227 = arith.constant 0 : index
    %c0_228 = arith.constant 0 : index
    %644 = vector.load %arg8[%c0_227, %c0_228] : memref<128x512xf32, #tpu.memory_space<vmem>>, vector<128x512xf32>
    %cst_229 = arith.constant dense<0.000000e+00> : vector<1x512xf32>
    %645 = tpu.matmul %625, %644, %cst_229 {dimension_numbers = #tpu.dot_dimension_numbers<[1], [0], [0], [1], [0, 0, 1, 1], [], []>} : vector<1x128xf32>, vector<128x512xf32>, vector<1x512xf32> -> vector<1x512xf32>
    %646 = arith.addf %643, %645 : vector<1x512xf32>
    %647 = vector.extract_strided_slice %646 {offsets = [0, 0], sizes = [1, 384], strides = [1, 1]} : vector<1x512xf32> to vector<1x384xf32>
    %648 = arith.negf %647 : vector<1x384xf32>
    %649 = math.exp %648 : vector<1x384xf32>
    %cst_230 = arith.constant 1.000000e+00 : f32
    %650 = vector.broadcast %cst_230 : f32 to vector<1x384xf32>
    %651 = arith.addf %650, %649 : vector<1x384xf32>
    %652 = arith.divf %650, %651 : vector<1x384xf32>
    %653 = vector.extract_strided_slice %652 {offsets = [0, 0], sizes = [1, 128], strides = [1, 1]} : vector<1x384xf32> to vector<1x128xf32>
    %654 = vector.extract_strided_slice %652 {offsets = [0, 128], sizes = [1, 128], strides = [1, 1]} : vector<1x384xf32> to vector<1x128xf32>
    %655 = vector.extract_strided_slice %652 {offsets = [0, 256], sizes = [1, 128], strides = [1, 1]} : vector<1x384xf32> to vector<1x128xf32>
    %656 = vector.extract_strided_slice %646 {offsets = [0, 384], sizes = [1, 128], strides = [1, 1]} : vector<1x512xf32> to vector<1x128xf32>
    %657 = math.tanh %656 : vector<1x128xf32>
    %658 = arith.mulf %654, %623 : vector<1x128xf32>
    %659 = arith.mulf %653, %657 : vector<1x128xf32>
    %660 = arith.addf %658, %659 : vector<1x128xf32>
    %661 = math.tanh %660 : vector<1x128xf32>
    %662 = arith.mulf %655, %661 : vector<1x128xf32>
    %c6_i32_231 = arith.constant 6 : i32
    %663 = vector.broadcast %c6_i32_231 : i32 to vector<8x128xi32>
    %664 = arith.cmpi eq, %405, %663 : vector<8x128xi32>
    %665 = vector.shape_cast %662 : vector<1x128xf32> to vector<1x128xf32>
    %666 = vector.broadcast %665 : vector<1x128xf32> to vector<8x128xf32>
    %667 = arith.select %664, %666, %630 : vector<8x128xi1>, vector<8x128xf32>
    %c7_i32_232 = arith.constant 7 : i32
    %668 = arith.addi %407, %c7_i32_232 : i32
    %c2_i32_233 = arith.constant 2 : i32
    %c0_i32_234 = arith.constant 0 : i32
    %669 = arith.cmpi eq, %c2_i32_233, %c0_i32_234 : i32
    %c1_i32_235 = arith.constant 1 : i32
    %670 = arith.select %669, %c1_i32_235, %c2_i32_233 : i32
    %671 = arith.remsi %668, %670 : i32
    %c0_i32_236 = arith.constant 0 : i32
    %672 = arith.cmpi ne, %671, %c0_i32_236 : i32
    %c0_i32_237 = arith.constant 0 : i32
    %673 = arith.cmpi slt, %671, %c0_i32_237 : i32
    %c0_i32_238 = arith.constant 0 : i32
    %674 = arith.cmpi slt, %670, %c0_i32_238 : i32
    %675 = arith.xori %673, %674 : i1
    %676 = arith.andi %675, %672 : i1
    %677 = arith.addi %671, %670 : i32
    %678 = arith.select %676, %677, %671 : i32
    %679 = arith.index_cast %678 : i32 to index
    %c0_239 = arith.constant 0 : index
    %680 = vector.load %arg18[%679, %c0_239] : memref<8x512xf32, #tpu.memory_space<vmem>>, vector<1x512xf32>
    %c0_240 = arith.constant 0 : index
    %c0_241 = arith.constant 0 : index
    %681 = vector.load %arg8[%c0_240, %c0_241] : memref<128x512xf32, #tpu.memory_space<vmem>>, vector<128x512xf32>
    %cst_242 = arith.constant dense<0.000000e+00> : vector<1x512xf32>
    %682 = tpu.matmul %662, %681, %cst_242 {dimension_numbers = #tpu.dot_dimension_numbers<[1], [0], [0], [1], [0, 0, 1, 1], [], []>} : vector<1x128xf32>, vector<128x512xf32>, vector<1x512xf32> -> vector<1x512xf32>
    %683 = arith.addf %680, %682 : vector<1x512xf32>
    %684 = vector.extract_strided_slice %683 {offsets = [0, 0], sizes = [1, 384], strides = [1, 1]} : vector<1x512xf32> to vector<1x384xf32>
    %685 = arith.negf %684 : vector<1x384xf32>
    %686 = math.exp %685 : vector<1x384xf32>
    %cst_243 = arith.constant 1.000000e+00 : f32
    %687 = vector.broadcast %cst_243 : f32 to vector<1x384xf32>
    %688 = arith.addf %687, %686 : vector<1x384xf32>
    %689 = arith.divf %687, %688 : vector<1x384xf32>
    %690 = vector.extract_strided_slice %689 {offsets = [0, 0], sizes = [1, 128], strides = [1, 1]} : vector<1x384xf32> to vector<1x128xf32>
    %691 = vector.extract_strided_slice %689 {offsets = [0, 128], sizes = [1, 128], strides = [1, 1]} : vector<1x384xf32> to vector<1x128xf32>
    %692 = vector.extract_strided_slice %689 {offsets = [0, 256], sizes = [1, 128], strides = [1, 1]} : vector<1x384xf32> to vector<1x128xf32>
    %693 = vector.extract_strided_slice %683 {offsets = [0, 384], sizes = [1, 128], strides = [1, 1]} : vector<1x512xf32> to vector<1x128xf32>
    %694 = math.tanh %693 : vector<1x128xf32>
    %695 = arith.mulf %691, %660 : vector<1x128xf32>
    %696 = arith.mulf %690, %694 : vector<1x128xf32>
    %697 = arith.addf %695, %696 : vector<1x128xf32>
    %698 = math.tanh %697 : vector<1x128xf32>
    %699 = arith.mulf %692, %698 : vector<1x128xf32>
    %c7_i32_244 = arith.constant 7 : i32
    %700 = vector.broadcast %c7_i32_244 : i32 to vector<8x128xi32>
    %701 = arith.cmpi eq, %405, %700 : vector<8x128xi32>
    %702 = vector.shape_cast %699 : vector<1x128xf32> to vector<1x128xf32>
    %703 = vector.broadcast %702 : vector<1x128xf32> to vector<8x128xf32>
    %704 = arith.select %701, %703, %667 : vector<8x128xi1>, vector<8x128xf32>
    %705 = tpu.assume_multiple %407, 8 : i32
    %706 = arith.index_cast %705 : i32 to index
    %c0_245 = arith.constant 0 : index
    %707 = vector.load %arg20[%706, %c0_245] : memref<16x128xf32, #tpu.memory_space<vmem>>, vector<8x128xf32>
    tpu.vector_store %arg20[%706, %c0_245], %704 {strides = array<i32>} : memref<16x128xf32, #tpu.memory_space<vmem>>, vector<8x128xf32>,
    %c1_i32_246 = arith.constant 1 : i32
    %c8_i32_247 = arith.constant 8 : i32
    %708 = arith.muli %c1_i32_246, %c8_i32_247 : i32
    %cst_248 = arith.constant 0.000000e+00 : f32
    %709 = vector.broadcast %cst_248 : f32 to vector<8x128xf32>
    %c0_i32_249 = arith.constant 0 : i32
    %710 = arith.addi %708, %c0_i32_249 : i32
    %c2_i32_250 = arith.constant 2 : i32
    %c0_i32_251 = arith.constant 0 : i32
    %711 = arith.cmpi eq, %c2_i32_250, %c0_i32_251 : i32
    %c1_i32_252 = arith.constant 1 : i32
    %712 = arith.select %711, %c1_i32_252, %c2_i32_250 : i32
    %713 = arith.remsi %710, %712 : i32
    %c0_i32_253 = arith.constant 0 : i32
    %714 = arith.cmpi ne, %713, %c0_i32_253 : i32
    %c0_i32_254 = arith.constant 0 : i32
    %715 = arith.cmpi slt, %713, %c0_i32_254 : i32
    %c0_i32_255 = arith.constant 0 : i32
    %716 = arith.cmpi slt, %712, %c0_i32_255 : i32
    %717 = arith.xori %715, %716 : i1
    %718 = arith.andi %717, %714 : i1
    %719 = arith.addi %713, %712 : i32
    %720 = arith.select %718, %719, %713 : i32
    %721 = arith.index_cast %720 : i32 to index
    %c0_256 = arith.constant 0 : index
    %722 = vector.load %arg18[%721, %c0_256] : memref<8x512xf32, #tpu.memory_space<vmem>>, vector<1x512xf32>
    %c0_257 = arith.constant 0 : index
    %c0_258 = arith.constant 0 : index
    %723 = vector.load %arg8[%c0_257, %c0_258] : memref<128x512xf32, #tpu.memory_space<vmem>>, vector<128x512xf32>
    %cst_259 = arith.constant dense<0.000000e+00> : vector<1x512xf32>
    %724 = tpu.matmul %699, %723, %cst_259 {dimension_numbers = #tpu.dot_dimension_numbers<[1], [0], [0], [1], [0, 0, 1, 1], [], []>} : vector<1x128xf32>, vector<128x512xf32>, vector<1x512xf32> -> vector<1x512xf32>
    %725 = arith.addf %722, %724 : vector<1x512xf32>
    %726 = vector.extract_strided_slice %725 {offsets = [0, 0], sizes = [1, 384], strides = [1, 1]} : vector<1x512xf32> to vector<1x384xf32>
    %727 = arith.negf %726 : vector<1x384xf32>
    %728 = math.exp %727 : vector<1x384xf32>
    %cst_260 = arith.constant 1.000000e+00 : f32
    %729 = vector.broadcast %cst_260 : f32 to vector<1x384xf32>
    %730 = arith.addf %729, %728 : vector<1x384xf32>
    %731 = arith.divf %729, %730 : vector<1x384xf32>
    %732 = vector.extract_strided_slice %731 {offsets = [0, 0], sizes = [1, 128], strides = [1, 1]} : vector<1x384xf32> to vector<1x128xf32>
    %733 = vector.extract_strided_slice %731 {offsets = [0, 128], sizes = [1, 128], strides = [1, 1]} : vector<1x384xf32> to vector<1x128xf32>
    %734 = vector.extract_strided_slice %731 {offsets = [0, 256], sizes = [1, 128], strides = [1, 1]} : vector<1x384xf32> to vector<1x128xf32>
    %735 = vector.extract_strided_slice %725 {offsets = [0, 384], sizes = [1, 128], strides = [1, 1]} : vector<1x512xf32> to vector<1x128xf32>
    %736 = math.tanh %735 : vector<1x128xf32>
    %737 = arith.mulf %733, %697 : vector<1x128xf32>
    %738 = arith.mulf %732, %736 : vector<1x128xf32>
    %739 = arith.addf %737, %738 : vector<1x128xf32>
    %740 = math.tanh %739 : vector<1x128xf32>
    %741 = arith.mulf %734, %740 : vector<1x128xf32>
    %c0_i32_261 = arith.constant 0 : i32
    %742 = vector.broadcast %c0_i32_261 : i32 to vector<8x128xi32>
    %743 = arith.cmpi eq, %405, %742 : vector<8x128xi32>
    %744 = vector.shape_cast %741 : vector<1x128xf32> to vector<1x128xf32>
    %745 = vector.broadcast %744 : vector<1x128xf32> to vector<8x128xf32>
    %746 = arith.select %743, %745, %709 : vector<8x128xi1>, vector<8x128xf32>
    %c1_i32_262 = arith.constant 1 : i32
    %747 = arith.addi %708, %c1_i32_262 : i32
    %c2_i32_263 = arith.constant 2 : i32
    %c0_i32_264 = arith.constant 0 : i32
    %748 = arith.cmpi eq, %c2_i32_263, %c0_i32_264 : i32
    %c1_i32_265 = arith.constant 1 : i32
    %749 = arith.select %748, %c1_i32_265, %c2_i32_263 : i32
    %750 = arith.remsi %747, %749 : i32
    %c0_i32_266 = arith.constant 0 : i32
    %751 = arith.cmpi ne, %750, %c0_i32_266 : i32
    %c0_i32_267 = arith.constant 0 : i32
    %752 = arith.cmpi slt, %750, %c0_i32_267 : i32
    %c0_i32_268 = arith.constant 0 : i32
    %753 = arith.cmpi slt, %749, %c0_i32_268 : i32
    %754 = arith.xori %752, %753 : i1
    %755 = arith.andi %754, %751 : i1
    %756 = arith.addi %750, %749 : i32
    %757 = arith.select %755, %756, %750 : i32
    %758 = arith.index_cast %757 : i32 to index
    %c0_269 = arith.constant 0 : index
    %759 = vector.load %arg18[%758, %c0_269] : memref<8x512xf32, #tpu.memory_space<vmem>>, vector<1x512xf32>
    %c0_270 = arith.constant 0 : index
    %c0_271 = arith.constant 0 : index
    %760 = vector.load %arg8[%c0_270, %c0_271] : memref<128x512xf32, #tpu.memory_space<vmem>>, vector<128x512xf32>
    %cst_272 = arith.constant dense<0.000000e+00> : vector<1x512xf32>
    %761 = tpu.matmul %741, %760, %cst_272 {dimension_numbers = #tpu.dot_dimension_numbers<[1], [0], [0], [1], [0, 0, 1, 1], [], []>} : vector<1x128xf32>, vector<128x512xf32>, vector<1x512xf32> -> vector<1x512xf32>
    %762 = arith.addf %759, %761 : vector<1x512xf32>
    %763 = vector.extract_strided_slice %762 {offsets = [0, 0], sizes = [1, 384], strides = [1, 1]} : vector<1x512xf32> to vector<1x384xf32>
    %764 = arith.negf %763 : vector<1x384xf32>
    %765 = math.exp %764 : vector<1x384xf32>
    %cst_273 = arith.constant 1.000000e+00 : f32
    %766 = vector.broadcast %cst_273 : f32 to vector<1x384xf32>
    %767 = arith.addf %766, %765 : vector<1x384xf32>
    %768 = arith.divf %766, %767 : vector<1x384xf32>
    %769 = vector.extract_strided_slice %768 {offsets = [0, 0], sizes = [1, 128], strides = [1, 1]} : vector<1x384xf32> to vector<1x128xf32>
    %770 = vector.extract_strided_slice %768 {offsets = [0, 128], sizes = [1, 128], strides = [1, 1]} : vector<1x384xf32> to vector<1x128xf32>
    %771 = vector.extract_strided_slice %768 {offsets = [0, 256], sizes = [1, 128], strides = [1, 1]} : vector<1x384xf32> to vector<1x128xf32>
    %772 = vector.extract_strided_slice %762 {offsets = [0, 384], sizes = [1, 128], strides = [1, 1]} : vector<1x512xf32> to vector<1x128xf32>
    %773 = math.tanh %772 : vector<1x128xf32>
    %774 = arith.mulf %770, %739 : vector<1x128xf32>
    %775 = arith.mulf %769, %773 : vector<1x128xf32>
    %776 = arith.addf %774, %775 : vector<1x128xf32>
    %777 = math.tanh %776 : vector<1x128xf32>
    %778 = arith.mulf %771, %777 : vector<1x128xf32>
    %c1_i32_274 = arith.constant 1 : i32
    %779 = vector.broadcast %c1_i32_274 : i32 to vector<8x128xi32>
    %780 = arith.cmpi eq, %405, %779 : vector<8x128xi32>
    %781 = vector.shape_cast %778 : vector<1x128xf32> to vector<1x128xf32>
    %782 = vector.broadcast %781 : vector<1x128xf32> to vector<8x128xf32>
    %783 = arith.select %780, %782, %746 : vector<8x128xi1>, vector<8x128xf32>
    %c2_i32_275 = arith.constant 2 : i32
    %784 = arith.addi %708, %c2_i32_275 : i32
    %c2_i32_276 = arith.constant 2 : i32
    %c0_i32_277 = arith.constant 0 : i32
    %785 = arith.cmpi eq, %c2_i32_276, %c0_i32_277 : i32
    %c1_i32_278 = arith.constant 1 : i32
    %786 = arith.select %785, %c1_i32_278, %c2_i32_276 : i32
    %787 = arith.remsi %784, %786 : i32
    %c0_i32_279 = arith.constant 0 : i32
    %788 = arith.cmpi ne, %787, %c0_i32_279 : i32
    %c0_i32_280 = arith.constant 0 : i32
    %789 = arith.cmpi slt, %787, %c0_i32_280 : i32
    %c0_i32_281 = arith.constant 0 : i32
    %790 = arith.cmpi slt, %786, %c0_i32_281 : i32
    %791 = arith.xori %789, %790 : i1
    %792 = arith.andi %791, %788 : i1
    %793 = arith.addi %787, %786 : i32
    %794 = arith.select %792, %793, %787 : i32
    %795 = arith.index_cast %794 : i32 to index
    %c0_282 = arith.constant 0 : index
    %796 = vector.load %arg18[%795, %c0_282] : memref<8x512xf32, #tpu.memory_space<vmem>>, vector<1x512xf32>
    %c0_283 = arith.constant 0 : index
    %c0_284 = arith.constant 0 : index
    %797 = vector.load %arg8[%c0_283, %c0_284] : memref<128x512xf32, #tpu.memory_space<vmem>>, vector<128x512xf32>
    %cst_285 = arith.constant dense<0.000000e+00> : vector<1x512xf32>
    %798 = tpu.matmul %778, %797, %cst_285 {dimension_numbers = #tpu.dot_dimension_numbers<[1], [0], [0], [1], [0, 0, 1, 1], [], []>} : vector<1x128xf32>, vector<128x512xf32>, vector<1x512xf32> -> vector<1x512xf32>
    %799 = arith.addf %796, %798 : vector<1x512xf32>
    %800 = vector.extract_strided_slice %799 {offsets = [0, 0], sizes = [1, 384], strides = [1, 1]} : vector<1x512xf32> to vector<1x384xf32>
    %801 = arith.negf %800 : vector<1x384xf32>
    %802 = math.exp %801 : vector<1x384xf32>
    %cst_286 = arith.constant 1.000000e+00 : f32
    %803 = vector.broadcast %cst_286 : f32 to vector<1x384xf32>
    %804 = arith.addf %803, %802 : vector<1x384xf32>
    %805 = arith.divf %803, %804 : vector<1x384xf32>
    %806 = vector.extract_strided_slice %805 {offsets = [0, 0], sizes = [1, 128], strides = [1, 1]} : vector<1x384xf32> to vector<1x128xf32>
    %807 = vector.extract_strided_slice %805 {offsets = [0, 128], sizes = [1, 128], strides = [1, 1]} : vector<1x384xf32> to vector<1x128xf32>
    %808 = vector.extract_strided_slice %805 {offsets = [0, 256], sizes = [1, 128], strides = [1, 1]} : vector<1x384xf32> to vector<1x128xf32>
    %809 = vector.extract_strided_slice %799 {offsets = [0, 384], sizes = [1, 128], strides = [1, 1]} : vector<1x512xf32> to vector<1x128xf32>
    %810 = math.tanh %809 : vector<1x128xf32>
    %811 = arith.mulf %807, %776 : vector<1x128xf32>
    %812 = arith.mulf %806, %810 : vector<1x128xf32>
    %813 = arith.addf %811, %812 : vector<1x128xf32>
    %814 = math.tanh %813 : vector<1x128xf32>
    %815 = arith.mulf %808, %814 : vector<1x128xf32>
    %c2_i32_287 = arith.constant 2 : i32
    %816 = vector.broadcast %c2_i32_287 : i32 to vector<8x128xi32>
    %817 = arith.cmpi eq, %405, %816 : vector<8x128xi32>
    %818 = vector.shape_cast %815 : vector<1x128xf32> to vector<1x128xf32>
    %819 = vector.broadcast %818 : vector<1x128xf32> to vector<8x128xf32>
    %820 = arith.select %817, %819, %783 : vector<8x128xi1>, vector<8x128xf32>
    %c3_i32_288 = arith.constant 3 : i32
    %821 = arith.addi %708, %c3_i32_288 : i32
    %c2_i32_289 = arith.constant 2 : i32
    %c0_i32_290 = arith.constant 0 : i32
    %822 = arith.cmpi eq, %c2_i32_289, %c0_i32_290 : i32
    %c1_i32_291 = arith.constant 1 : i32
    %823 = arith.select %822, %c1_i32_291, %c2_i32_289 : i32
    %824 = arith.remsi %821, %823 : i32
    %c0_i32_292 = arith.constant 0 : i32
    %825 = arith.cmpi ne, %824, %c0_i32_292 : i32
    %c0_i32_293 = arith.constant 0 : i32
    %826 = arith.cmpi slt, %824, %c0_i32_293 : i32
    %c0_i32_294 = arith.constant 0 : i32
    %827 = arith.cmpi slt, %823, %c0_i32_294 : i32
    %828 = arith.xori %826, %827 : i1
    %829 = arith.andi %828, %825 : i1
    %830 = arith.addi %824, %823 : i32
    %831 = arith.select %829, %830, %824 : i32
    %832 = arith.index_cast %831 : i32 to index
    %c0_295 = arith.constant 0 : index
    %833 = vector.load %arg18[%832, %c0_295] : memref<8x512xf32, #tpu.memory_space<vmem>>, vector<1x512xf32>
    %c0_296 = arith.constant 0 : index
    %c0_297 = arith.constant 0 : index
    %834 = vector.load %arg8[%c0_296, %c0_297] : memref<128x512xf32, #tpu.memory_space<vmem>>, vector<128x512xf32>
    %cst_298 = arith.constant dense<0.000000e+00> : vector<1x512xf32>
    %835 = tpu.matmul %815, %834, %cst_298 {dimension_numbers = #tpu.dot_dimension_numbers<[1], [0], [0], [1], [0, 0, 1, 1], [], []>} : vector<1x128xf32>, vector<128x512xf32>, vector<1x512xf32> -> vector<1x512xf32>
    %836 = arith.addf %833, %835 : vector<1x512xf32>
    %837 = vector.extract_strided_slice %836 {offsets = [0, 0], sizes = [1, 384], strides = [1, 1]} : vector<1x512xf32> to vector<1x384xf32>
    %838 = arith.negf %837 : vector<1x384xf32>
    %839 = math.exp %838 : vector<1x384xf32>
    %cst_299 = arith.constant 1.000000e+00 : f32
    %840 = vector.broadcast %cst_299 : f32 to vector<1x384xf32>
    %841 = arith.addf %840, %839 : vector<1x384xf32>
    %842 = arith.divf %840, %841 : vector<1x384xf32>
    %843 = vector.extract_strided_slice %842 {offsets = [0, 0], sizes = [1, 128], strides = [1, 1]} : vector<1x384xf32> to vector<1x128xf32>
    %844 = vector.extract_strided_slice %842 {offsets = [0, 128], sizes = [1, 128], strides = [1, 1]} : vector<1x384xf32> to vector<1x128xf32>
    %845 = vector.extract_strided_slice %842 {offsets = [0, 256], sizes = [1, 128], strides = [1, 1]} : vector<1x384xf32> to vector<1x128xf32>
    %846 = vector.extract_strided_slice %836 {offsets = [0, 384], sizes = [1, 128], strides = [1, 1]} : vector<1x512xf32> to vector<1x128xf32>
    %847 = math.tanh %846 : vector<1x128xf32>
    %848 = arith.mulf %844, %813 : vector<1x128xf32>
    %849 = arith.mulf %843, %847 : vector<1x128xf32>
    %850 = arith.addf %848, %849 : vector<1x128xf32>
    %851 = math.tanh %850 : vector<1x128xf32>
    %852 = arith.mulf %845, %851 : vector<1x128xf32>
    %c3_i32_300 = arith.constant 3 : i32
    %853 = vector.broadcast %c3_i32_300 : i32 to vector<8x128xi32>
    %854 = arith.cmpi eq, %405, %853 : vector<8x128xi32>
    %855 = vector.shape_cast %852 : vector<1x128xf32> to vector<1x128xf32>
    %856 = vector.broadcast %855 : vector<1x128xf32> to vector<8x128xf32>
    %857 = arith.select %854, %856, %820 : vector<8x128xi1>, vector<8x128xf32>
    %c4_i32_301 = arith.constant 4 : i32
    %858 = arith.addi %708, %c4_i32_301 : i32
    %c2_i32_302 = arith.constant 2 : i32
    %c0_i32_303 = arith.constant 0 : i32
    %859 = arith.cmpi eq, %c2_i32_302, %c0_i32_303 : i32
    %c1_i32_304 = arith.constant 1 : i32
    %860 = arith.select %859, %c1_i32_304, %c2_i32_302 : i32
    %861 = arith.remsi %858, %860 : i32
    %c0_i32_305 = arith.constant 0 : i32
    %862 = arith.cmpi ne, %861, %c0_i32_305 : i32
    %c0_i32_306 = arith.constant 0 : i32
    %863 = arith.cmpi slt, %861, %c0_i32_306 : i32
    %c0_i32_307 = arith.constant 0 : i32
    %864 = arith.cmpi slt, %860, %c0_i32_307 : i32
    %865 = arith.xori %863, %864 : i1
    %866 = arith.andi %865, %862 : i1
    %867 = arith.addi %861, %860 : i32
    %868 = arith.select %866, %867, %861 : i32
    %869 = arith.index_cast %868 : i32 to index
    %c0_308 = arith.constant 0 : index
    %870 = vector.load %arg18[%869, %c0_308] : memref<8x512xf32, #tpu.memory_space<vmem>>, vector<1x512xf32>
    %c0_309 = arith.constant 0 : index
    %c0_310 = arith.constant 0 : index
    %871 = vector.load %arg8[%c0_309, %c0_310] : memref<128x512xf32, #tpu.memory_space<vmem>>, vector<128x512xf32>
    %cst_311 = arith.constant dense<0.000000e+00> : vector<1x512xf32>
    %872 = tpu.matmul %852, %871, %cst_311 {dimension_numbers = #tpu.dot_dimension_numbers<[1], [0], [0], [1], [0, 0, 1, 1], [], []>} : vector<1x128xf32>, vector<128x512xf32>, vector<1x512xf32> -> vector<1x512xf32>
    %873 = arith.addf %870, %872 : vector<1x512xf32>
    %874 = vector.extract_strided_slice %873 {offsets = [0, 0], sizes = [1, 384], strides = [1, 1]} : vector<1x512xf32> to vector<1x384xf32>
    %875 = arith.negf %874 : vector<1x384xf32>
    %876 = math.exp %875 : vector<1x384xf32>
    %cst_312 = arith.constant 1.000000e+00 : f32
    %877 = vector.broadcast %cst_312 : f32 to vector<1x384xf32>
    %878 = arith.addf %877, %876 : vector<1x384xf32>
    %879 = arith.divf %877, %878 : vector<1x384xf32>
    %880 = vector.extract_strided_slice %879 {offsets = [0, 0], sizes = [1, 128], strides = [1, 1]} : vector<1x384xf32> to vector<1x128xf32>
    %881 = vector.extract_strided_slice %879 {offsets = [0, 128], sizes = [1, 128], strides = [1, 1]} : vector<1x384xf32> to vector<1x128xf32>
    %882 = vector.extract_strided_slice %879 {offsets = [0, 256], sizes = [1, 128], strides = [1, 1]} : vector<1x384xf32> to vector<1x128xf32>
    %883 = vector.extract_strided_slice %873 {offsets = [0, 384], sizes = [1, 128], strides = [1, 1]} : vector<1x512xf32> to vector<1x128xf32>
    %884 = math.tanh %883 : vector<1x128xf32>
    %885 = arith.mulf %881, %850 : vector<1x128xf32>
    %886 = arith.mulf %880, %884 : vector<1x128xf32>
    %887 = arith.addf %885, %886 : vector<1x128xf32>
    %888 = math.tanh %887 : vector<1x128xf32>
    %889 = arith.mulf %882, %888 : vector<1x128xf32>
    %c4_i32_313 = arith.constant 4 : i32
    %890 = vector.broadcast %c4_i32_313 : i32 to vector<8x128xi32>
    %891 = arith.cmpi eq, %405, %890 : vector<8x128xi32>
    %892 = vector.shape_cast %889 : vector<1x128xf32> to vector<1x128xf32>
    %893 = vector.broadcast %892 : vector<1x128xf32> to vector<8x128xf32>
    %894 = arith.select %891, %893, %857 : vector<8x128xi1>, vector<8x128xf32>
    %c5_i32_314 = arith.constant 5 : i32
    %895 = arith.addi %708, %c5_i32_314 : i32
    %c2_i32_315 = arith.constant 2 : i32
    %c0_i32_316 = arith.constant 0 : i32
    %896 = arith.cmpi eq, %c2_i32_315, %c0_i32_316 : i32
    %c1_i32_317 = arith.constant 1 : i32
    %897 = arith.select %896, %c1_i32_317, %c2_i32_315 : i32
    %898 = arith.remsi %895, %897 : i32
    %c0_i32_318 = arith.constant 0 : i32
    %899 = arith.cmpi ne, %898, %c0_i32_318 : i32
    %c0_i32_319 = arith.constant 0 : i32
    %900 = arith.cmpi slt, %898, %c0_i32_319 : i32
    %c0_i32_320 = arith.constant 0 : i32
    %901 = arith.cmpi slt, %897, %c0_i32_320 : i32
    %902 = arith.xori %900, %901 : i1
    %903 = arith.andi %902, %899 : i1
    %904 = arith.addi %898, %897 : i32
    %905 = arith.select %903, %904, %898 : i32
    %906 = arith.index_cast %905 : i32 to index
    %c0_321 = arith.constant 0 : index
    %907 = vector.load %arg18[%906, %c0_321] : memref<8x512xf32, #tpu.memory_space<vmem>>, vector<1x512xf32>
    %c0_322 = arith.constant 0 : index
    %c0_323 = arith.constant 0 : index
    %908 = vector.load %arg8[%c0_322, %c0_323] : memref<128x512xf32, #tpu.memory_space<vmem>>, vector<128x512xf32>
    %cst_324 = arith.constant dense<0.000000e+00> : vector<1x512xf32>
    %909 = tpu.matmul %889, %908, %cst_324 {dimension_numbers = #tpu.dot_dimension_numbers<[1], [0], [0], [1], [0, 0, 1, 1], [], []>} : vector<1x128xf32>, vector<128x512xf32>, vector<1x512xf32> -> vector<1x512xf32>
    %910 = arith.addf %907, %909 : vector<1x512xf32>
    %911 = vector.extract_strided_slice %910 {offsets = [0, 0], sizes = [1, 384], strides = [1, 1]} : vector<1x512xf32> to vector<1x384xf32>
    %912 = arith.negf %911 : vector<1x384xf32>
    %913 = math.exp %912 : vector<1x384xf32>
    %cst_325 = arith.constant 1.000000e+00 : f32
    %914 = vector.broadcast %cst_325 : f32 to vector<1x384xf32>
    %915 = arith.addf %914, %913 : vector<1x384xf32>
    %916 = arith.divf %914, %915 : vector<1x384xf32>
    %917 = vector.extract_strided_slice %916 {offsets = [0, 0], sizes = [1, 128], strides = [1, 1]} : vector<1x384xf32> to vector<1x128xf32>
    %918 = vector.extract_strided_slice %916 {offsets = [0, 128], sizes = [1, 128], strides = [1, 1]} : vector<1x384xf32> to vector<1x128xf32>
    %919 = vector.extract_strided_slice %916 {offsets = [0, 256], sizes = [1, 128], strides = [1, 1]} : vector<1x384xf32> to vector<1x128xf32>
    %920 = vector.extract_strided_slice %910 {offsets = [0, 384], sizes = [1, 128], strides = [1, 1]} : vector<1x512xf32> to vector<1x128xf32>
    %921 = math.tanh %920 : vector<1x128xf32>
    %922 = arith.mulf %918, %887 : vector<1x128xf32>
    %923 = arith.mulf %917, %921 : vector<1x128xf32>
    %924 = arith.addf %922, %923 : vector<1x128xf32>
    %925 = math.tanh %924 : vector<1x128xf32>
    %926 = arith.mulf %919, %925 : vector<1x128xf32>
    %c5_i32_326 = arith.constant 5 : i32
    %927 = vector.broadcast %c5_i32_326 : i32 to vector<8x128xi32>
    %928 = arith.cmpi eq, %405, %927 : vector<8x128xi32>
    %929 = vector.shape_cast %926 : vector<1x128xf32> to vector<1x128xf32>
    %930 = vector.broadcast %929 : vector<1x128xf32> to vector<8x128xf32>
    %931 = arith.select %928, %930, %894 : vector<8x128xi1>, vector<8x128xf32>
    %c6_i32_327 = arith.constant 6 : i32
    %932 = arith.addi %708, %c6_i32_327 : i32
    %c2_i32_328 = arith.constant 2 : i32
    %c0_i32_329 = arith.constant 0 : i32
    %933 = arith.cmpi eq, %c2_i32_328, %c0_i32_329 : i32
    %c1_i32_330 = arith.constant 1 : i32
    %934 = arith.select %933, %c1_i32_330, %c2_i32_328 : i32
    %935 = arith.remsi %932, %934 : i32
    %c0_i32_331 = arith.constant 0 : i32
    %936 = arith.cmpi ne, %935, %c0_i32_331 : i32
    %c0_i32_332 = arith.constant 0 : i32
    %937 = arith.cmpi slt, %935, %c0_i32_332 : i32
    %c0_i32_333 = arith.constant 0 : i32
    %938 = arith.cmpi slt, %934, %c0_i32_333 : i32
    %939 = arith.xori %937, %938 : i1
    %940 = arith.andi %939, %936 : i1
    %941 = arith.addi %935, %934 : i32
    %942 = arith.select %940, %941, %935 : i32
    %943 = arith.index_cast %942 : i32 to index
    %c0_334 = arith.constant 0 : index
    %944 = vector.load %arg18[%943, %c0_334] : memref<8x512xf32, #tpu.memory_space<vmem>>, vector<1x512xf32>
    %c0_335 = arith.constant 0 : index
    %c0_336 = arith.constant 0 : index
    %945 = vector.load %arg8[%c0_335, %c0_336] : memref<128x512xf32, #tpu.memory_space<vmem>>, vector<128x512xf32>
    %cst_337 = arith.constant dense<0.000000e+00> : vector<1x512xf32>
    %946 = tpu.matmul %926, %945, %cst_337 {dimension_numbers = #tpu.dot_dimension_numbers<[1], [0], [0], [1], [0, 0, 1, 1], [], []>} : vector<1x128xf32>, vector<128x512xf32>, vector<1x512xf32> -> vector<1x512xf32>
    %947 = arith.addf %944, %946 : vector<1x512xf32>
    %948 = vector.extract_strided_slice %947 {offsets = [0, 0], sizes = [1, 384], strides = [1, 1]} : vector<1x512xf32> to vector<1x384xf32>
    %949 = arith.negf %948 : vector<1x384xf32>
    %950 = math.exp %949 : vector<1x384xf32>
    %cst_338 = arith.constant 1.000000e+00 : f32
    %951 = vector.broadcast %cst_338 : f32 to vector<1x384xf32>
    %952 = arith.addf %951, %950 : vector<1x384xf32>
    %953 = arith.divf %951, %952 : vector<1x384xf32>
    %954 = vector.extract_strided_slice %953 {offsets = [0, 0], sizes = [1, 128], strides = [1, 1]} : vector<1x384xf32> to vector<1x128xf32>
    %955 = vector.extract_strided_slice %953 {offsets = [0, 128], sizes = [1, 128], strides = [1, 1]} : vector<1x384xf32> to vector<1x128xf32>
    %956 = vector.extract_strided_slice %953 {offsets = [0, 256], sizes = [1, 128], strides = [1, 1]} : vector<1x384xf32> to vector<1x128xf32>
    %957 = vector.extract_strided_slice %947 {offsets = [0, 384], sizes = [1, 128], strides = [1, 1]} : vector<1x512xf32> to vector<1x128xf32>
    %958 = math.tanh %957 : vector<1x128xf32>
    %959 = arith.mulf %955, %924 : vector<1x128xf32>
    %960 = arith.mulf %954, %958 : vector<1x128xf32>
    %961 = arith.addf %959, %960 : vector<1x128xf32>
    %962 = math.tanh %961 : vector<1x128xf32>
    %963 = arith.mulf %956, %962 : vector<1x128xf32>
    %c6_i32_339 = arith.constant 6 : i32
    %964 = vector.broadcast %c6_i32_339 : i32 to vector<8x128xi32>
    %965 = arith.cmpi eq, %405, %964 : vector<8x128xi32>
    %966 = vector.shape_cast %963 : vector<1x128xf32> to vector<1x128xf32>
    %967 = vector.broadcast %966 : vector<1x128xf32> to vector<8x128xf32>
    %968 = arith.select %965, %967, %931 : vector<8x128xi1>, vector<8x128xf32>
    %c7_i32_340 = arith.constant 7 : i32
    %969 = arith.addi %708, %c7_i32_340 : i32
    %c2_i32_341 = arith.constant 2 : i32
    %c0_i32_342 = arith.constant 0 : i32
    %970 = arith.cmpi eq, %c2_i32_341, %c0_i32_342 : i32
    %c1_i32_343 = arith.constant 1 : i32
    %971 = arith.select %970, %c1_i32_343, %c2_i32_341 : i32
    %972 = arith.remsi %969, %971 : i32
    %c0_i32_344 = arith.constant 0 : i32
    %973 = arith.cmpi ne, %972, %c0_i32_344 : i32
    %c0_i32_345 = arith.constant 0 : i32
    %974 = arith.cmpi slt, %972, %c0_i32_345 : i32
    %c0_i32_346 = arith.constant 0 : i32
    %975 = arith.cmpi slt, %971, %c0_i32_346 : i32
    %976 = arith.xori %974, %975 : i1
    %977 = arith.andi %976, %973 : i1
    %978 = arith.addi %972, %971 : i32
    %979 = arith.select %977, %978, %972 : i32
    %980 = arith.index_cast %979 : i32 to index
    %c0_347 = arith.constant 0 : index
    %981 = vector.load %arg18[%980, %c0_347] : memref<8x512xf32, #tpu.memory_space<vmem>>, vector<1x512xf32>
    %c0_348 = arith.constant 0 : index
    %c0_349 = arith.constant 0 : index
    %982 = vector.load %arg8[%c0_348, %c0_349] : memref<128x512xf32, #tpu.memory_space<vmem>>, vector<128x512xf32>
    %cst_350 = arith.constant dense<0.000000e+00> : vector<1x512xf32>
    %983 = tpu.matmul %963, %982, %cst_350 {dimension_numbers = #tpu.dot_dimension_numbers<[1], [0], [0], [1], [0, 0, 1, 1], [], []>} : vector<1x128xf32>, vector<128x512xf32>, vector<1x512xf32> -> vector<1x512xf32>
    %984 = arith.addf %981, %983 : vector<1x512xf32>
    %985 = vector.extract_strided_slice %984 {offsets = [0, 0], sizes = [1, 384], strides = [1, 1]} : vector<1x512xf32> to vector<1x384xf32>
    %986 = arith.negf %985 : vector<1x384xf32>
    %987 = math.exp %986 : vector<1x384xf32>
    %cst_351 = arith.constant 1.000000e+00 : f32
    %988 = vector.broadcast %cst_351 : f32 to vector<1x384xf32>
    %989 = arith.addf %988, %987 : vector<1x384xf32>
    %990 = arith.divf %988, %989 : vector<1x384xf32>
    %991 = vector.extract_strided_slice %990 {offsets = [0, 0], sizes = [1, 128], strides = [1, 1]} : vector<1x384xf32> to vector<1x128xf32>
    %992 = vector.extract_strided_slice %990 {offsets = [0, 128], sizes = [1, 128], strides = [1, 1]} : vector<1x384xf32> to vector<1x128xf32>
    %993 = vector.extract_strided_slice %990 {offsets = [0, 256], sizes = [1, 128], strides = [1, 1]} : vector<1x384xf32> to vector<1x128xf32>
    %994 = vector.extract_strided_slice %984 {offsets = [0, 384], sizes = [1, 128], strides = [1, 1]} : vector<1x512xf32> to vector<1x128xf32>
    %995 = math.tanh %994 : vector<1x128xf32>
    %996 = arith.mulf %992, %961 : vector<1x128xf32>
    %997 = arith.mulf %991, %995 : vector<1x128xf32>
    %998 = arith.addf %996, %997 : vector<1x128xf32>
    %999 = math.tanh %998 : vector<1x128xf32>
    %1000 = arith.mulf %993, %999 : vector<1x128xf32>
    %c7_i32_352 = arith.constant 7 : i32
    %1001 = vector.broadcast %c7_i32_352 : i32 to vector<8x128xi32>
    %1002 = arith.cmpi eq, %405, %1001 : vector<8x128xi32>
    %1003 = vector.shape_cast %1000 : vector<1x128xf32> to vector<1x128xf32>
    %1004 = vector.broadcast %1003 : vector<1x128xf32> to vector<8x128xf32>
    %1005 = arith.select %1002, %1004, %968 : vector<8x128xi1>, vector<8x128xf32>
    %1006 = tpu.assume_multiple %708, 8 : i32
    %1007 = arith.index_cast %1006 : i32 to index
    %c0_353 = arith.constant 0 : index
    %1008 = vector.load %arg20[%1007, %c0_353] : memref<16x128xf32, #tpu.memory_space<vmem>>, vector<8x128xf32>
    tpu.vector_store %arg20[%1007, %c0_353], %1005 {strides = array<i32>} : memref<16x128xf32, #tpu.memory_space<vmem>>, vector<8x128xf32>,
    %c2_i32_354 = arith.constant 2 : i32
    %c0_355 = arith.constant 0 : index
    %c0_356 = arith.constant 0 : index
    %1009 = vector.load %arg20[%c0_355, %c0_356] : memref<16x128xf32, #tpu.memory_space<vmem>>, vector<16x128xf32>
    %c0_357 = arith.constant 0 : index
    %c0_358 = arith.constant 0 : index
    %1010 = vector.load %arg10[%c0_357, %c0_358] : memref<128x512xf32, #tpu.memory_space<vmem>>, vector<128x512xf32>
    %cst_359 = arith.constant dense<0.000000e+00> : vector<16x512xf32>
    %1011 = tpu.matmul %1009, %1010, %cst_359 {dimension_numbers = #tpu.dot_dimension_numbers<[1], [0], [0], [1], [0, 0, 1, 1], [], []>} : vector<16x128xf32>, vector<128x512xf32>, vector<16x512xf32> -> vector<16x512xf32>
    %c0_360 = arith.constant 0 : index
    %c0_361 = arith.constant 0 : index
    %1012 = vector.load %arg12[%c0_360, %c0_361] : memref<1x512xf32, #tpu.memory_space<vmem>>, vector<1x512xf32>
    %1013 = vector.broadcast %1012 : vector<1x512xf32> to vector<16x512xf32>
    %1014 = arith.addf %1011, %1013 : vector<16x512xf32>
    %c0_362 = arith.constant 0 : index
    %c0_363 = arith.constant 0 : index
    %1015 = vector.load %arg19[%c0_362, %c0_363] : memref<16x512xf32, #tpu.memory_space<vmem>>, vector<16x512xf32>
    tpu.vector_store %arg19[%c0_362, %c0_363], %1014 {strides = array<i32>} : memref<16x512xf32, #tpu.memory_space<vmem>>, vector<16x512xf32>,
    %c0_i32_364 = arith.constant 0 : i32
    %c8_i32_365 = arith.constant 8 : i32
    %1016 = arith.muli %c0_i32_364, %c8_i32_365 : i32
    %1017 = tpu.assume_multiple %1016, 8 : i32
    %1018 = arith.index_cast %1017 : i32 to index
    %c0_366 = arith.constant 0 : index
    %1019 = vector.load %arg19[%1018, %c0_366] : memref<16x512xf32, #tpu.memory_space<vmem>>, vector<8x512xf32>
    %cst_367 = arith.constant 0.000000e+00 : f32
    %1020 = vector.broadcast %cst_367 : f32 to vector<8x128xf32>
    %1021 = vector.extract_strided_slice %1019 {offsets = [0, 0], sizes = [1, 512], strides = [1, 1]} : vector<8x512xf32> to vector<1x512xf32>
    %c0_368 = arith.constant 0 : index
    %c0_369 = arith.constant 0 : index
    %1022 = vector.load %arg11[%c0_368, %c0_369] : memref<128x512xf32, #tpu.memory_space<vmem>>, vector<128x512xf32>
    %cst_370 = arith.constant dense<0.000000e+00> : vector<1x512xf32>
    %1023 = tpu.matmul %406, %1022, %cst_370 {dimension_numbers = #tpu.dot_dimension_numbers<[1], [0], [0], [1], [0, 0, 1, 1], [], []>} : vector<1x128xf32>, vector<128x512xf32>, vector<1x512xf32> -> vector<1x512xf32>
    %1024 = arith.addf %1021, %1023 : vector<1x512xf32>
    %1025 = vector.extract_strided_slice %1024 {offsets = [0, 0], sizes = [1, 384], strides = [1, 1]} : vector<1x512xf32> to vector<1x384xf32>
    %1026 = arith.negf %1025 : vector<1x384xf32>
    %1027 = math.exp %1026 : vector<1x384xf32>
    %cst_371 = arith.constant 1.000000e+00 : f32
    %1028 = vector.broadcast %cst_371 : f32 to vector<1x384xf32>
    %1029 = arith.addf %1028, %1027 : vector<1x384xf32>
    %1030 = arith.divf %1028, %1029 : vector<1x384xf32>
    %1031 = vector.extract_strided_slice %1030 {offsets = [0, 0], sizes = [1, 128], strides = [1, 1]} : vector<1x384xf32> to vector<1x128xf32>
    %1032 = vector.extract_strided_slice %1030 {offsets = [0, 128], sizes = [1, 128], strides = [1, 1]} : vector<1x384xf32> to vector<1x128xf32>
    %1033 = vector.extract_strided_slice %1030 {offsets = [0, 256], sizes = [1, 128], strides = [1, 1]} : vector<1x384xf32> to vector<1x128xf32>
    %1034 = vector.extract_strided_slice %1024 {offsets = [0, 384], sizes = [1, 128], strides = [1, 1]} : vector<1x512xf32> to vector<1x128xf32>
    %1035 = math.tanh %1034 : vector<1x128xf32>
    %1036 = arith.mulf %1032, %406 : vector<1x128xf32>
    %1037 = arith.mulf %1031, %1035 : vector<1x128xf32>
    %1038 = arith.addf %1036, %1037 : vector<1x128xf32>
    %1039 = math.tanh %1038 : vector<1x128xf32>
    %1040 = arith.mulf %1033, %1039 : vector<1x128xf32>
    %c0_i32_372 = arith.constant 0 : i32
    %1041 = vector.broadcast %c0_i32_372 : i32 to vector<8x128xi32>
    %1042 = arith.cmpi eq, %405, %1041 : vector<8x128xi32>
    %1043 = vector.shape_cast %1040 : vector<1x128xf32> to vector<1x128xf32>
    %1044 = vector.broadcast %1043 : vector<1x128xf32> to vector<8x128xf32>
    %1045 = arith.select %1042, %1044, %1020 : vector<8x128xi1>, vector<8x128xf32>
    %1046 = vector.extract_strided_slice %1019 {offsets = [1, 0], sizes = [1, 512], strides = [1, 1]} : vector<8x512xf32> to vector<1x512xf32>
    %c0_373 = arith.constant 0 : index
    %c0_374 = arith.constant 0 : index
    %1047 = vector.load %arg11[%c0_373, %c0_374] : memref<128x512xf32, #tpu.memory_space<vmem>>, vector<128x512xf32>
    %cst_375 = arith.constant dense<0.000000e+00> : vector<1x512xf32>
    %1048 = tpu.matmul %1040, %1047, %cst_375 {dimension_numbers = #tpu.dot_dimension_numbers<[1], [0], [0], [1], [0, 0, 1, 1], [], []>} : vector<1x128xf32>, vector<128x512xf32>, vector<1x512xf32> -> vector<1x512xf32>
    %1049 = arith.addf %1046, %1048 : vector<1x512xf32>
    %1050 = vector.extract_strided_slice %1049 {offsets = [0, 0], sizes = [1, 384], strides = [1, 1]} : vector<1x512xf32> to vector<1x384xf32>
    %1051 = arith.negf %1050 : vector<1x384xf32>
    %1052 = math.exp %1051 : vector<1x384xf32>
    %cst_376 = arith.constant 1.000000e+00 : f32
    %1053 = vector.broadcast %cst_376 : f32 to vector<1x384xf32>
    %1054 = arith.addf %1053, %1052 : vector<1x384xf32>
    %1055 = arith.divf %1053, %1054 : vector<1x384xf32>
    %1056 = vector.extract_strided_slice %1055 {offsets = [0, 0], sizes = [1, 128], strides = [1, 1]} : vector<1x384xf32> to vector<1x128xf32>
    %1057 = vector.extract_strided_slice %1055 {offsets = [0, 128], sizes = [1, 128], strides = [1, 1]} : vector<1x384xf32> to vector<1x128xf32>
    %1058 = vector.extract_strided_slice %1055 {offsets = [0, 256], sizes = [1, 128], strides = [1, 1]} : vector<1x384xf32> to vector<1x128xf32>
    %1059 = vector.extract_strided_slice %1049 {offsets = [0, 384], sizes = [1, 128], strides = [1, 1]} : vector<1x512xf32> to vector<1x128xf32>
    %1060 = math.tanh %1059 : vector<1x128xf32>
    %1061 = arith.mulf %1057, %1038 : vector<1x128xf32>
    %1062 = arith.mulf %1056, %1060 : vector<1x128xf32>
    %1063 = arith.addf %1061, %1062 : vector<1x128xf32>
    %1064 = math.tanh %1063 : vector<1x128xf32>
    %1065 = arith.mulf %1058, %1064 : vector<1x128xf32>
    %c1_i32_377 = arith.constant 1 : i32
    %1066 = vector.broadcast %c1_i32_377 : i32 to vector<8x128xi32>
    %1067 = arith.cmpi eq, %405, %1066 : vector<8x128xi32>
    %1068 = vector.shape_cast %1065 : vector<1x128xf32> to vector<1x128xf32>
    %1069 = vector.broadcast %1068 : vector<1x128xf32> to vector<8x128xf32>
    %1070 = arith.select %1067, %1069, %1045 : vector<8x128xi1>, vector<8x128xf32>
    %1071 = vector.extract_strided_slice %1019 {offsets = [2, 0], sizes = [1, 512], strides = [1, 1]} : vector<8x512xf32> to vector<1x512xf32>
    %c0_378 = arith.constant 0 : index
    %c0_379 = arith.constant 0 : index
    %1072 = vector.load %arg11[%c0_378, %c0_379] : memref<128x512xf32, #tpu.memory_space<vmem>>, vector<128x512xf32>
    %cst_380 = arith.constant dense<0.000000e+00> : vector<1x512xf32>
    %1073 = tpu.matmul %1065, %1072, %cst_380 {dimension_numbers = #tpu.dot_dimension_numbers<[1], [0], [0], [1], [0, 0, 1, 1], [], []>} : vector<1x128xf32>, vector<128x512xf32>, vector<1x512xf32> -> vector<1x512xf32>
    %1074 = arith.addf %1071, %1073 : vector<1x512xf32>
    %1075 = vector.extract_strided_slice %1074 {offsets = [0, 0], sizes = [1, 384], strides = [1, 1]} : vector<1x512xf32> to vector<1x384xf32>
    %1076 = arith.negf %1075 : vector<1x384xf32>
    %1077 = math.exp %1076 : vector<1x384xf32>
    %cst_381 = arith.constant 1.000000e+00 : f32
    %1078 = vector.broadcast %cst_381 : f32 to vector<1x384xf32>
    %1079 = arith.addf %1078, %1077 : vector<1x384xf32>
    %1080 = arith.divf %1078, %1079 : vector<1x384xf32>
    %1081 = vector.extract_strided_slice %1080 {offsets = [0, 0], sizes = [1, 128], strides = [1, 1]} : vector<1x384xf32> to vector<1x128xf32>
    %1082 = vector.extract_strided_slice %1080 {offsets = [0, 128], sizes = [1, 128], strides = [1, 1]} : vector<1x384xf32> to vector<1x128xf32>
    %1083 = vector.extract_strided_slice %1080 {offsets = [0, 256], sizes = [1, 128], strides = [1, 1]} : vector<1x384xf32> to vector<1x128xf32>
    %1084 = vector.extract_strided_slice %1074 {offsets = [0, 384], sizes = [1, 128], strides = [1, 1]} : vector<1x512xf32> to vector<1x128xf32>
    %1085 = math.tanh %1084 : vector<1x128xf32>
    %1086 = arith.mulf %1082, %1063 : vector<1x128xf32>
    %1087 = arith.mulf %1081, %1085 : vector<1x128xf32>
    %1088 = arith.addf %1086, %1087 : vector<1x128xf32>
    %1089 = math.tanh %1088 : vector<1x128xf32>
    %1090 = arith.mulf %1083, %1089 : vector<1x128xf32>
    %c2_i32_382 = arith.constant 2 : i32
    %1091 = vector.broadcast %c2_i32_382 : i32 to vector<8x128xi32>
    %1092 = arith.cmpi eq, %405, %1091 : vector<8x128xi32>
    %1093 = vector.shape_cast %1090 : vector<1x128xf32> to vector<1x128xf32>
    %1094 = vector.broadcast %1093 : vector<1x128xf32> to vector<8x128xf32>
    %1095 = arith.select %1092, %1094, %1070 : vector<8x128xi1>, vector<8x128xf32>
    %1096 = vector.extract_strided_slice %1019 {offsets = [3, 0], sizes = [1, 512], strides = [1, 1]} : vector<8x512xf32> to vector<1x512xf32>
    %c0_383 = arith.constant 0 : index
    %c0_384 = arith.constant 0 : index
    %1097 = vector.load %arg11[%c0_383, %c0_384] : memref<128x512xf32, #tpu.memory_space<vmem>>, vector<128x512xf32>
    %cst_385 = arith.constant dense<0.000000e+00> : vector<1x512xf32>
    %1098 = tpu.matmul %1090, %1097, %cst_385 {dimension_numbers = #tpu.dot_dimension_numbers<[1], [0], [0], [1], [0, 0, 1, 1], [], []>} : vector<1x128xf32>, vector<128x512xf32>, vector<1x512xf32> -> vector<1x512xf32>
    %1099 = arith.addf %1096, %1098 : vector<1x512xf32>
    %1100 = vector.extract_strided_slice %1099 {offsets = [0, 0], sizes = [1, 384], strides = [1, 1]} : vector<1x512xf32> to vector<1x384xf32>
    %1101 = arith.negf %1100 : vector<1x384xf32>
    %1102 = math.exp %1101 : vector<1x384xf32>
    %cst_386 = arith.constant 1.000000e+00 : f32
    %1103 = vector.broadcast %cst_386 : f32 to vector<1x384xf32>
    %1104 = arith.addf %1103, %1102 : vector<1x384xf32>
    %1105 = arith.divf %1103, %1104 : vector<1x384xf32>
    %1106 = vector.extract_strided_slice %1105 {offsets = [0, 0], sizes = [1, 128], strides = [1, 1]} : vector<1x384xf32> to vector<1x128xf32>
    %1107 = vector.extract_strided_slice %1105 {offsets = [0, 128], sizes = [1, 128], strides = [1, 1]} : vector<1x384xf32> to vector<1x128xf32>
    %1108 = vector.extract_strided_slice %1105 {offsets = [0, 256], sizes = [1, 128], strides = [1, 1]} : vector<1x384xf32> to vector<1x128xf32>
    %1109 = vector.extract_strided_slice %1099 {offsets = [0, 384], sizes = [1, 128], strides = [1, 1]} : vector<1x512xf32> to vector<1x128xf32>
    %1110 = math.tanh %1109 : vector<1x128xf32>
    %1111 = arith.mulf %1107, %1088 : vector<1x128xf32>
    %1112 = arith.mulf %1106, %1110 : vector<1x128xf32>
    %1113 = arith.addf %1111, %1112 : vector<1x128xf32>
    %1114 = math.tanh %1113 : vector<1x128xf32>
    %1115 = arith.mulf %1108, %1114 : vector<1x128xf32>
    %c3_i32_387 = arith.constant 3 : i32
    %1116 = vector.broadcast %c3_i32_387 : i32 to vector<8x128xi32>
    %1117 = arith.cmpi eq, %405, %1116 : vector<8x128xi32>
    %1118 = vector.shape_cast %1115 : vector<1x128xf32> to vector<1x128xf32>
    %1119 = vector.broadcast %1118 : vector<1x128xf32> to vector<8x128xf32>
    %1120 = arith.select %1117, %1119, %1095 : vector<8x128xi1>, vector<8x128xf32>
    %1121 = vector.extract_strided_slice %1019 {offsets = [4, 0], sizes = [1, 512], strides = [1, 1]} : vector<8x512xf32> to vector<1x512xf32>
    %c0_388 = arith.constant 0 : index
    %c0_389 = arith.constant 0 : index
    %1122 = vector.load %arg11[%c0_388, %c0_389] : memref<128x512xf32, #tpu.memory_space<vmem>>, vector<128x512xf32>
    %cst_390 = arith.constant dense<0.000000e+00> : vector<1x512xf32>
    %1123 = tpu.matmul %1115, %1122, %cst_390 {dimension_numbers = #tpu.dot_dimension_numbers<[1], [0], [0], [1], [0, 0, 1, 1], [], []>} : vector<1x128xf32>, vector<128x512xf32>, vector<1x512xf32> -> vector<1x512xf32>
    %1124 = arith.addf %1121, %1123 : vector<1x512xf32>
    %1125 = vector.extract_strided_slice %1124 {offsets = [0, 0], sizes = [1, 384], strides = [1, 1]} : vector<1x512xf32> to vector<1x384xf32>
    %1126 = arith.negf %1125 : vector<1x384xf32>
    %1127 = math.exp %1126 : vector<1x384xf32>
    %cst_391 = arith.constant 1.000000e+00 : f32
    %1128 = vector.broadcast %cst_391 : f32 to vector<1x384xf32>
    %1129 = arith.addf %1128, %1127 : vector<1x384xf32>
    %1130 = arith.divf %1128, %1129 : vector<1x384xf32>
    %1131 = vector.extract_strided_slice %1130 {offsets = [0, 0], sizes = [1, 128], strides = [1, 1]} : vector<1x384xf32> to vector<1x128xf32>
    %1132 = vector.extract_strided_slice %1130 {offsets = [0, 128], sizes = [1, 128], strides = [1, 1]} : vector<1x384xf32> to vector<1x128xf32>
    %1133 = vector.extract_strided_slice %1130 {offsets = [0, 256], sizes = [1, 128], strides = [1, 1]} : vector<1x384xf32> to vector<1x128xf32>
    %1134 = vector.extract_strided_slice %1124 {offsets = [0, 384], sizes = [1, 128], strides = [1, 1]} : vector<1x512xf32> to vector<1x128xf32>
    %1135 = math.tanh %1134 : vector<1x128xf32>
    %1136 = arith.mulf %1132, %1113 : vector<1x128xf32>
    %1137 = arith.mulf %1131, %1135 : vector<1x128xf32>
    %1138 = arith.addf %1136, %1137 : vector<1x128xf32>
    %1139 = math.tanh %1138 : vector<1x128xf32>
    %1140 = arith.mulf %1133, %1139 : vector<1x128xf32>
    %c4_i32_392 = arith.constant 4 : i32
    %1141 = vector.broadcast %c4_i32_392 : i32 to vector<8x128xi32>
    %1142 = arith.cmpi eq, %405, %1141 : vector<8x128xi32>
    %1143 = vector.shape_cast %1140 : vector<1x128xf32> to vector<1x128xf32>
    %1144 = vector.broadcast %1143 : vector<1x128xf32> to vector<8x128xf32>
    %1145 = arith.select %1142, %1144, %1120 : vector<8x128xi1>, vector<8x128xf32>
    %1146 = vector.extract_strided_slice %1019 {offsets = [5, 0], sizes = [1, 512], strides = [1, 1]} : vector<8x512xf32> to vector<1x512xf32>
    %c0_393 = arith.constant 0 : index
    %c0_394 = arith.constant 0 : index
    %1147 = vector.load %arg11[%c0_393, %c0_394] : memref<128x512xf32, #tpu.memory_space<vmem>>, vector<128x512xf32>
    %cst_395 = arith.constant dense<0.000000e+00> : vector<1x512xf32>
    %1148 = tpu.matmul %1140, %1147, %cst_395 {dimension_numbers = #tpu.dot_dimension_numbers<[1], [0], [0], [1], [0, 0, 1, 1], [], []>} : vector<1x128xf32>, vector<128x512xf32>, vector<1x512xf32> -> vector<1x512xf32>
    %1149 = arith.addf %1146, %1148 : vector<1x512xf32>
    %1150 = vector.extract_strided_slice %1149 {offsets = [0, 0], sizes = [1, 384], strides = [1, 1]} : vector<1x512xf32> to vector<1x384xf32>
    %1151 = arith.negf %1150 : vector<1x384xf32>
    %1152 = math.exp %1151 : vector<1x384xf32>
    %cst_396 = arith.constant 1.000000e+00 : f32
    %1153 = vector.broadcast %cst_396 : f32 to vector<1x384xf32>
    %1154 = arith.addf %1153, %1152 : vector<1x384xf32>
    %1155 = arith.divf %1153, %1154 : vector<1x384xf32>
    %1156 = vector.extract_strided_slice %1155 {offsets = [0, 0], sizes = [1, 128], strides = [1, 1]} : vector<1x384xf32> to vector<1x128xf32>
    %1157 = vector.extract_strided_slice %1155 {offsets = [0, 128], sizes = [1, 128], strides = [1, 1]} : vector<1x384xf32> to vector<1x128xf32>
    %1158 = vector.extract_strided_slice %1155 {offsets = [0, 256], sizes = [1, 128], strides = [1, 1]} : vector<1x384xf32> to vector<1x128xf32>
    %1159 = vector.extract_strided_slice %1149 {offsets = [0, 384], sizes = [1, 128], strides = [1, 1]} : vector<1x512xf32> to vector<1x128xf32>
    %1160 = math.tanh %1159 : vector<1x128xf32>
    %1161 = arith.mulf %1157, %1138 : vector<1x128xf32>
    %1162 = arith.mulf %1156, %1160 : vector<1x128xf32>
    %1163 = arith.addf %1161, %1162 : vector<1x128xf32>
    %1164 = math.tanh %1163 : vector<1x128xf32>
    %1165 = arith.mulf %1158, %1164 : vector<1x128xf32>
    %c5_i32_397 = arith.constant 5 : i32
    %1166 = vector.broadcast %c5_i32_397 : i32 to vector<8x128xi32>
    %1167 = arith.cmpi eq, %405, %1166 : vector<8x128xi32>
    %1168 = vector.shape_cast %1165 : vector<1x128xf32> to vector<1x128xf32>
    %1169 = vector.broadcast %1168 : vector<1x128xf32> to vector<8x128xf32>
    %1170 = arith.select %1167, %1169, %1145 : vector<8x128xi1>, vector<8x128xf32>
    %1171 = vector.extract_strided_slice %1019 {offsets = [6, 0], sizes = [1, 512], strides = [1, 1]} : vector<8x512xf32> to vector<1x512xf32>
    %c0_398 = arith.constant 0 : index
    %c0_399 = arith.constant 0 : index
    %1172 = vector.load %arg11[%c0_398, %c0_399] : memref<128x512xf32, #tpu.memory_space<vmem>>, vector<128x512xf32>
    %cst_400 = arith.constant dense<0.000000e+00> : vector<1x512xf32>
    %1173 = tpu.matmul %1165, %1172, %cst_400 {dimension_numbers = #tpu.dot_dimension_numbers<[1], [0], [0], [1], [0, 0, 1, 1], [], []>} : vector<1x128xf32>, vector<128x512xf32>, vector<1x512xf32> -> vector<1x512xf32>
    %1174 = arith.addf %1171, %1173 : vector<1x512xf32>
    %1175 = vector.extract_strided_slice %1174 {offsets = [0, 0], sizes = [1, 384], strides = [1, 1]} : vector<1x512xf32> to vector<1x384xf32>
    %1176 = arith.negf %1175 : vector<1x384xf32>
    %1177 = math.exp %1176 : vector<1x384xf32>
    %cst_401 = arith.constant 1.000000e+00 : f32
    %1178 = vector.broadcast %cst_401 : f32 to vector<1x384xf32>
    %1179 = arith.addf %1178, %1177 : vector<1x384xf32>
    %1180 = arith.divf %1178, %1179 : vector<1x384xf32>
    %1181 = vector.extract_strided_slice %1180 {offsets = [0, 0], sizes = [1, 128], strides = [1, 1]} : vector<1x384xf32> to vector<1x128xf32>
    %1182 = vector.extract_strided_slice %1180 {offsets = [0, 128], sizes = [1, 128], strides = [1, 1]} : vector<1x384xf32> to vector<1x128xf32>
    %1183 = vector.extract_strided_slice %1180 {offsets = [0, 256], sizes = [1, 128], strides = [1, 1]} : vector<1x384xf32> to vector<1x128xf32>
    %1184 = vector.extract_strided_slice %1174 {offsets = [0, 384], sizes = [1, 128], strides = [1, 1]} : vector<1x512xf32> to vector<1x128xf32>
    %1185 = math.tanh %1184 : vector<1x128xf32>
    %1186 = arith.mulf %1182, %1163 : vector<1x128xf32>
    %1187 = arith.mulf %1181, %1185 : vector<1x128xf32>
    %1188 = arith.addf %1186, %1187 : vector<1x128xf32>
    %1189 = math.tanh %1188 : vector<1x128xf32>
    %1190 = arith.mulf %1183, %1189 : vector<1x128xf32>
    %c6_i32_402 = arith.constant 6 : i32
    %1191 = vector.broadcast %c6_i32_402 : i32 to vector<8x128xi32>
    %1192 = arith.cmpi eq, %405, %1191 : vector<8x128xi32>
    %1193 = vector.shape_cast %1190 : vector<1x128xf32> to vector<1x128xf32>
    %1194 = vector.broadcast %1193 : vector<1x128xf32> to vector<8x128xf32>
    %1195 = arith.select %1192, %1194, %1170 : vector<8x128xi1>, vector<8x128xf32>
    %1196 = vector.extract_strided_slice %1019 {offsets = [7, 0], sizes = [1, 512], strides = [1, 1]} : vector<8x512xf32> to vector<1x512xf32>
    %c0_403 = arith.constant 0 : index
    %c0_404 = arith.constant 0 : index
    %1197 = vector.load %arg11[%c0_403, %c0_404] : memref<128x512xf32, #tpu.memory_space<vmem>>, vector<128x512xf32>
    %cst_405 = arith.constant dense<0.000000e+00> : vector<1x512xf32>
    %1198 = tpu.matmul %1190, %1197, %cst_405 {dimension_numbers = #tpu.dot_dimension_numbers<[1], [0], [0], [1], [0, 0, 1, 1], [], []>} : vector<1x128xf32>, vector<128x512xf32>, vector<1x512xf32> -> vector<1x512xf32>
    %1199 = arith.addf %1196, %1198 : vector<1x512xf32>
    %1200 = vector.extract_strided_slice %1199 {offsets = [0, 0], sizes = [1, 384], strides = [1, 1]} : vector<1x512xf32> to vector<1x384xf32>
    %1201 = arith.negf %1200 : vector<1x384xf32>
    %1202 = math.exp %1201 : vector<1x384xf32>
    %cst_406 = arith.constant 1.000000e+00 : f32
    %1203 = vector.broadcast %cst_406 : f32 to vector<1x384xf32>
    %1204 = arith.addf %1203, %1202 : vector<1x384xf32>
    %1205 = arith.divf %1203, %1204 : vector<1x384xf32>
    %1206 = vector.extract_strided_slice %1205 {offsets = [0, 0], sizes = [1, 128], strides = [1, 1]} : vector<1x384xf32> to vector<1x128xf32>
    %1207 = vector.extract_strided_slice %1205 {offsets = [0, 128], sizes = [1, 128], strides = [1, 1]} : vector<1x384xf32> to vector<1x128xf32>
    %1208 = vector.extract_strided_slice %1205 {offsets = [0, 256], sizes = [1, 128], strides = [1, 1]} : vector<1x384xf32> to vector<1x128xf32>
    %1209 = vector.extract_strided_slice %1199 {offsets = [0, 384], sizes = [1, 128], strides = [1, 1]} : vector<1x512xf32> to vector<1x128xf32>
    %1210 = math.tanh %1209 : vector<1x128xf32>
    %1211 = arith.mulf %1207, %1188 : vector<1x128xf32>
    %1212 = arith.mulf %1206, %1210 : vector<1x128xf32>
    %1213 = arith.addf %1211, %1212 : vector<1x128xf32>
    %1214 = math.tanh %1213 : vector<1x128xf32>
    %1215 = arith.mulf %1208, %1214 : vector<1x128xf32>
    %c7_i32_407 = arith.constant 7 : i32
    %1216 = vector.broadcast %c7_i32_407 : i32 to vector<8x128xi32>
    %1217 = arith.cmpi eq, %405, %1216 : vector<8x128xi32>
    %1218 = vector.shape_cast %1215 : vector<1x128xf32> to vector<1x128xf32>
    %1219 = vector.broadcast %1218 : vector<1x128xf32> to vector<8x128xf32>
    %1220 = arith.select %1217, %1219, %1195 : vector<8x128xi1>, vector<8x128xf32>
    %c0_408 = arith.constant 0 : index
    %c0_409 = arith.constant 0 : index
    %1221 = vector.load %arg13[%c0_408, %c0_409] : memref<128x128xf32, #tpu.memory_space<vmem>>, vector<128x128xf32>
    %cst_410 = arith.constant dense<0.000000e+00> : vector<8x128xf32>
    %1222 = tpu.matmul %1220, %1221, %cst_410 {dimension_numbers = #tpu.dot_dimension_numbers<[1], [0], [0], [1], [0, 0, 1, 1], [], []>} : vector<8x128xf32>, vector<128x128xf32>, vector<8x128xf32> -> vector<8x128xf32>
    %c0_411 = arith.constant 0 : index
    %c0_412 = arith.constant 0 : index
    %1223 = vector.load %arg14[%c0_411, %c0_412] : memref<1x128xf32, #tpu.memory_space<vmem>>, vector<1x128xf32>
    %1224 = vector.broadcast %1223 : vector<1x128xf32> to vector<8x128xf32>
    %1225 = arith.addf %1222, %1224 : vector<8x128xf32>
    %1226 = arith.index_cast %1017 : i32 to index
    %c0_413 = arith.constant 0 : index
    %1227 = vector.load %arg15[%1226, %c0_413] : memref<16x128xf32, #tpu.memory_space<vmem>>, vector<8x128xf32>
    tpu.vector_store %arg15[%1226, %c0_413], %1225 {strides = array<i32>} : memref<16x128xf32, #tpu.memory_space<vmem>>, vector<8x128xf32>,
    %c1_i32_414 = arith.constant 1 : i32
    %c8_i32_415 = arith.constant 8 : i32
    %1228 = arith.muli %c1_i32_414, %c8_i32_415 : i32
    %1229 = tpu.assume_multiple %1228, 8 : i32
    %1230 = arith.index_cast %1229 : i32 to index
    %c0_416 = arith.constant 0 : index
    %1231 = vector.load %arg19[%1230, %c0_416] : memref<16x512xf32, #tpu.memory_space<vmem>>, vector<8x512xf32>
    %cst_417 = arith.constant 0.000000e+00 : f32
    %1232 = vector.broadcast %cst_417 : f32 to vector<8x128xf32>
    %1233 = vector.extract_strided_slice %1231 {offsets = [0, 0], sizes = [1, 512], strides = [1, 1]} : vector<8x512xf32> to vector<1x512xf32>
    %c0_418 = arith.constant 0 : index
    %c0_419 = arith.constant 0 : index
    %1234 = vector.load %arg11[%c0_418, %c0_419] : memref<128x512xf32, #tpu.memory_space<vmem>>, vector<128x512xf32>
    %cst_420 = arith.constant dense<0.000000e+00> : vector<1x512xf32>
    %1235 = tpu.matmul %1215, %1234, %cst_420 {dimension_numbers = #tpu.dot_dimension_numbers<[1], [0], [0], [1], [0, 0, 1, 1], [], []>} : vector<1x128xf32>, vector<128x512xf32>, vector<1x512xf32> -> vector<1x512xf32>
    %1236 = arith.addf %1233, %1235 : vector<1x512xf32>
    %1237 = vector.extract_strided_slice %1236 {offsets = [0, 0], sizes = [1, 384], strides = [1, 1]} : vector<1x512xf32> to vector<1x384xf32>
    %1238 = arith.negf %1237 : vector<1x384xf32>
    %1239 = math.exp %1238 : vector<1x384xf32>
    %cst_421 = arith.constant 1.000000e+00 : f32
    %1240 = vector.broadcast %cst_421 : f32 to vector<1x384xf32>
    %1241 = arith.addf %1240, %1239 : vector<1x384xf32>
    %1242 = arith.divf %1240, %1241 : vector<1x384xf32>
    %1243 = vector.extract_strided_slice %1242 {offsets = [0, 0], sizes = [1, 128], strides = [1, 1]} : vector<1x384xf32> to vector<1x128xf32>
    %1244 = vector.extract_strided_slice %1242 {offsets = [0, 128], sizes = [1, 128], strides = [1, 1]} : vector<1x384xf32> to vector<1x128xf32>
    %1245 = vector.extract_strided_slice %1242 {offsets = [0, 256], sizes = [1, 128], strides = [1, 1]} : vector<1x384xf32> to vector<1x128xf32>
    %1246 = vector.extract_strided_slice %1236 {offsets = [0, 384], sizes = [1, 128], strides = [1, 1]} : vector<1x512xf32> to vector<1x128xf32>
    %1247 = math.tanh %1246 : vector<1x128xf32>
    %1248 = arith.mulf %1244, %1213 : vector<1x128xf32>
    %1249 = arith.mulf %1243, %1247 : vector<1x128xf32>
    %1250 = arith.addf %1248, %1249 : vector<1x128xf32>
    %1251 = math.tanh %1250 : vector<1x128xf32>
    %1252 = arith.mulf %1245, %1251 : vector<1x128xf32>
    %c0_i32_422 = arith.constant 0 : i32
    %1253 = vector.broadcast %c0_i32_422 : i32 to vector<8x128xi32>
    %1254 = arith.cmpi eq, %405, %1253 : vector<8x128xi32>
    %1255 = vector.shape_cast %1252 : vector<1x128xf32> to vector<1x128xf32>
    %1256 = vector.broadcast %1255 : vector<1x128xf32> to vector<8x128xf32>
    %1257 = arith.select %1254, %1256, %1232 : vector<8x128xi1>, vector<8x128xf32>
    %1258 = vector.extract_strided_slice %1231 {offsets = [1, 0], sizes = [1, 512], strides = [1, 1]} : vector<8x512xf32> to vector<1x512xf32>
    %c0_423 = arith.constant 0 : index
    %c0_424 = arith.constant 0 : index
    %1259 = vector.load %arg11[%c0_423, %c0_424] : memref<128x512xf32, #tpu.memory_space<vmem>>, vector<128x512xf32>
    %cst_425 = arith.constant dense<0.000000e+00> : vector<1x512xf32>
    %1260 = tpu.matmul %1252, %1259, %cst_425 {dimension_numbers = #tpu.dot_dimension_numbers<[1], [0], [0], [1], [0, 0, 1, 1], [], []>} : vector<1x128xf32>, vector<128x512xf32>, vector<1x512xf32> -> vector<1x512xf32>
    %1261 = arith.addf %1258, %1260 : vector<1x512xf32>
    %1262 = vector.extract_strided_slice %1261 {offsets = [0, 0], sizes = [1, 384], strides = [1, 1]} : vector<1x512xf32> to vector<1x384xf32>
    %1263 = arith.negf %1262 : vector<1x384xf32>
    %1264 = math.exp %1263 : vector<1x384xf32>
    %cst_426 = arith.constant 1.000000e+00 : f32
    %1265 = vector.broadcast %cst_426 : f32 to vector<1x384xf32>
    %1266 = arith.addf %1265, %1264 : vector<1x384xf32>
    %1267 = arith.divf %1265, %1266 : vector<1x384xf32>
    %1268 = vector.extract_strided_slice %1267 {offsets = [0, 0], sizes = [1, 128], strides = [1, 1]} : vector<1x384xf32> to vector<1x128xf32>
    %1269 = vector.extract_strided_slice %1267 {offsets = [0, 128], sizes = [1, 128], strides = [1, 1]} : vector<1x384xf32> to vector<1x128xf32>
    %1270 = vector.extract_strided_slice %1267 {offsets = [0, 256], sizes = [1, 128], strides = [1, 1]} : vector<1x384xf32> to vector<1x128xf32>
    %1271 = vector.extract_strided_slice %1261 {offsets = [0, 384], sizes = [1, 128], strides = [1, 1]} : vector<1x512xf32> to vector<1x128xf32>
    %1272 = math.tanh %1271 : vector<1x128xf32>
    %1273 = arith.mulf %1269, %1250 : vector<1x128xf32>
    %1274 = arith.mulf %1268, %1272 : vector<1x128xf32>
    %1275 = arith.addf %1273, %1274 : vector<1x128xf32>
    %1276 = math.tanh %1275 : vector<1x128xf32>
    %1277 = arith.mulf %1270, %1276 : vector<1x128xf32>
    %c1_i32_427 = arith.constant 1 : i32
    %1278 = vector.broadcast %c1_i32_427 : i32 to vector<8x128xi32>
    %1279 = arith.cmpi eq, %405, %1278 : vector<8x128xi32>
    %1280 = vector.shape_cast %1277 : vector<1x128xf32> to vector<1x128xf32>
    %1281 = vector.broadcast %1280 : vector<1x128xf32> to vector<8x128xf32>
    %1282 = arith.select %1279, %1281, %1257 : vector<8x128xi1>, vector<8x128xf32>
    %1283 = vector.extract_strided_slice %1231 {offsets = [2, 0], sizes = [1, 512], strides = [1, 1]} : vector<8x512xf32> to vector<1x512xf32>
    %c0_428 = arith.constant 0 : index
    %c0_429 = arith.constant 0 : index
    %1284 = vector.load %arg11[%c0_428, %c0_429] : memref<128x512xf32, #tpu.memory_space<vmem>>, vector<128x512xf32>
    %cst_430 = arith.constant dense<0.000000e+00> : vector<1x512xf32>
    %1285 = tpu.matmul %1277, %1284, %cst_430 {dimension_numbers = #tpu.dot_dimension_numbers<[1], [0], [0], [1], [0, 0, 1, 1], [], []>} : vector<1x128xf32>, vector<128x512xf32>, vector<1x512xf32> -> vector<1x512xf32>
    %1286 = arith.addf %1283, %1285 : vector<1x512xf32>
    %1287 = vector.extract_strided_slice %1286 {offsets = [0, 0], sizes = [1, 384], strides = [1, 1]} : vector<1x512xf32> to vector<1x384xf32>
    %1288 = arith.negf %1287 : vector<1x384xf32>
    %1289 = math.exp %1288 : vector<1x384xf32>
    %cst_431 = arith.constant 1.000000e+00 : f32
    %1290 = vector.broadcast %cst_431 : f32 to vector<1x384xf32>
    %1291 = arith.addf %1290, %1289 : vector<1x384xf32>
    %1292 = arith.divf %1290, %1291 : vector<1x384xf32>
    %1293 = vector.extract_strided_slice %1292 {offsets = [0, 0], sizes = [1, 128], strides = [1, 1]} : vector<1x384xf32> to vector<1x128xf32>
    %1294 = vector.extract_strided_slice %1292 {offsets = [0, 128], sizes = [1, 128], strides = [1, 1]} : vector<1x384xf32> to vector<1x128xf32>
    %1295 = vector.extract_strided_slice %1292 {offsets = [0, 256], sizes = [1, 128], strides = [1, 1]} : vector<1x384xf32> to vector<1x128xf32>
    %1296 = vector.extract_strided_slice %1286 {offsets = [0, 384], sizes = [1, 128], strides = [1, 1]} : vector<1x512xf32> to vector<1x128xf32>
    %1297 = math.tanh %1296 : vector<1x128xf32>
    %1298 = arith.mulf %1294, %1275 : vector<1x128xf32>
    %1299 = arith.mulf %1293, %1297 : vector<1x128xf32>
    %1300 = arith.addf %1298, %1299 : vector<1x128xf32>
    %1301 = math.tanh %1300 : vector<1x128xf32>
    %1302 = arith.mulf %1295, %1301 : vector<1x128xf32>
    %c2_i32_432 = arith.constant 2 : i32
    %1303 = vector.broadcast %c2_i32_432 : i32 to vector<8x128xi32>
    %1304 = arith.cmpi eq, %405, %1303 : vector<8x128xi32>
    %1305 = vector.shape_cast %1302 : vector<1x128xf32> to vector<1x128xf32>
    %1306 = vector.broadcast %1305 : vector<1x128xf32> to vector<8x128xf32>
    %1307 = arith.select %1304, %1306, %1282 : vector<8x128xi1>, vector<8x128xf32>
    %1308 = vector.extract_strided_slice %1231 {offsets = [3, 0], sizes = [1, 512], strides = [1, 1]} : vector<8x512xf32> to vector<1x512xf32>
    %c0_433 = arith.constant 0 : index
    %c0_434 = arith.constant 0 : index
    %1309 = vector.load %arg11[%c0_433, %c0_434] : memref<128x512xf32, #tpu.memory_space<vmem>>, vector<128x512xf32>
    %cst_435 = arith.constant dense<0.000000e+00> : vector<1x512xf32>
    %1310 = tpu.matmul %1302, %1309, %cst_435 {dimension_numbers = #tpu.dot_dimension_numbers<[1], [0], [0], [1], [0, 0, 1, 1], [], []>} : vector<1x128xf32>, vector<128x512xf32>, vector<1x512xf32> -> vector<1x512xf32>
    %1311 = arith.addf %1308, %1310 : vector<1x512xf32>
    %1312 = vector.extract_strided_slice %1311 {offsets = [0, 0], sizes = [1, 384], strides = [1, 1]} : vector<1x512xf32> to vector<1x384xf32>
    %1313 = arith.negf %1312 : vector<1x384xf32>
    %1314 = math.exp %1313 : vector<1x384xf32>
    %cst_436 = arith.constant 1.000000e+00 : f32
    %1315 = vector.broadcast %cst_436 : f32 to vector<1x384xf32>
    %1316 = arith.addf %1315, %1314 : vector<1x384xf32>
    %1317 = arith.divf %1315, %1316 : vector<1x384xf32>
    %1318 = vector.extract_strided_slice %1317 {offsets = [0, 0], sizes = [1, 128], strides = [1, 1]} : vector<1x384xf32> to vector<1x128xf32>
    %1319 = vector.extract_strided_slice %1317 {offsets = [0, 128], sizes = [1, 128], strides = [1, 1]} : vector<1x384xf32> to vector<1x128xf32>
    %1320 = vector.extract_strided_slice %1317 {offsets = [0, 256], sizes = [1, 128], strides = [1, 1]} : vector<1x384xf32> to vector<1x128xf32>
    %1321 = vector.extract_strided_slice %1311 {offsets = [0, 384], sizes = [1, 128], strides = [1, 1]} : vector<1x512xf32> to vector<1x128xf32>
    %1322 = math.tanh %1321 : vector<1x128xf32>
    %1323 = arith.mulf %1319, %1300 : vector<1x128xf32>
    %1324 = arith.mulf %1318, %1322 : vector<1x128xf32>
    %1325 = arith.addf %1323, %1324 : vector<1x128xf32>
    %1326 = math.tanh %1325 : vector<1x128xf32>
    %1327 = arith.mulf %1320, %1326 : vector<1x128xf32>
    %c3_i32_437 = arith.constant 3 : i32
    %1328 = vector.broadcast %c3_i32_437 : i32 to vector<8x128xi32>
    %1329 = arith.cmpi eq, %405, %1328 : vector<8x128xi32>
    %1330 = vector.shape_cast %1327 : vector<1x128xf32> to vector<1x128xf32>
    %1331 = vector.broadcast %1330 : vector<1x128xf32> to vector<8x128xf32>
    %1332 = arith.select %1329, %1331, %1307 : vector<8x128xi1>, vector<8x128xf32>
    %1333 = vector.extract_strided_slice %1231 {offsets = [4, 0], sizes = [1, 512], strides = [1, 1]} : vector<8x512xf32> to vector<1x512xf32>
    %c0_438 = arith.constant 0 : index
    %c0_439 = arith.constant 0 : index
    %1334 = vector.load %arg11[%c0_438, %c0_439] : memref<128x512xf32, #tpu.memory_space<vmem>>, vector<128x512xf32>
    %cst_440 = arith.constant dense<0.000000e+00> : vector<1x512xf32>
    %1335 = tpu.matmul %1327, %1334, %cst_440 {dimension_numbers = #tpu.dot_dimension_numbers<[1], [0], [0], [1], [0, 0, 1, 1], [], []>} : vector<1x128xf32>, vector<128x512xf32>, vector<1x512xf32> -> vector<1x512xf32>
    %1336 = arith.addf %1333, %1335 : vector<1x512xf32>
    %1337 = vector.extract_strided_slice %1336 {offsets = [0, 0], sizes = [1, 384], strides = [1, 1]} : vector<1x512xf32> to vector<1x384xf32>
    %1338 = arith.negf %1337 : vector<1x384xf32>
    %1339 = math.exp %1338 : vector<1x384xf32>
    %cst_441 = arith.constant 1.000000e+00 : f32
    %1340 = vector.broadcast %cst_441 : f32 to vector<1x384xf32>
    %1341 = arith.addf %1340, %1339 : vector<1x384xf32>
    %1342 = arith.divf %1340, %1341 : vector<1x384xf32>
    %1343 = vector.extract_strided_slice %1342 {offsets = [0, 0], sizes = [1, 128], strides = [1, 1]} : vector<1x384xf32> to vector<1x128xf32>
    %1344 = vector.extract_strided_slice %1342 {offsets = [0, 128], sizes = [1, 128], strides = [1, 1]} : vector<1x384xf32> to vector<1x128xf32>
    %1345 = vector.extract_strided_slice %1342 {offsets = [0, 256], sizes = [1, 128], strides = [1, 1]} : vector<1x384xf32> to vector<1x128xf32>
    %1346 = vector.extract_strided_slice %1336 {offsets = [0, 384], sizes = [1, 128], strides = [1, 1]} : vector<1x512xf32> to vector<1x128xf32>
    %1347 = math.tanh %1346 : vector<1x128xf32>
    %1348 = arith.mulf %1344, %1325 : vector<1x128xf32>
    %1349 = arith.mulf %1343, %1347 : vector<1x128xf32>
    %1350 = arith.addf %1348, %1349 : vector<1x128xf32>
    %1351 = math.tanh %1350 : vector<1x128xf32>
    %1352 = arith.mulf %1345, %1351 : vector<1x128xf32>
    %c4_i32_442 = arith.constant 4 : i32
    %1353 = vector.broadcast %c4_i32_442 : i32 to vector<8x128xi32>
    %1354 = arith.cmpi eq, %405, %1353 : vector<8x128xi32>
    %1355 = vector.shape_cast %1352 : vector<1x128xf32> to vector<1x128xf32>
    %1356 = vector.broadcast %1355 : vector<1x128xf32> to vector<8x128xf32>
    %1357 = arith.select %1354, %1356, %1332 : vector<8x128xi1>, vector<8x128xf32>
    %1358 = vector.extract_strided_slice %1231 {offsets = [5, 0], sizes = [1, 512], strides = [1, 1]} : vector<8x512xf32> to vector<1x512xf32>
    %c0_443 = arith.constant 0 : index
    %c0_444 = arith.constant 0 : index
    %1359 = vector.load %arg11[%c0_443, %c0_444] : memref<128x512xf32, #tpu.memory_space<vmem>>, vector<128x512xf32>
    %cst_445 = arith.constant dense<0.000000e+00> : vector<1x512xf32>
    %1360 = tpu.matmul %1352, %1359, %cst_445 {dimension_numbers = #tpu.dot_dimension_numbers<[1], [0], [0], [1], [0, 0, 1, 1], [], []>} : vector<1x128xf32>, vector<128x512xf32>, vector<1x512xf32> -> vector<1x512xf32>
    %1361 = arith.addf %1358, %1360 : vector<1x512xf32>
    %1362 = vector.extract_strided_slice %1361 {offsets = [0, 0], sizes = [1, 384], strides = [1, 1]} : vector<1x512xf32> to vector<1x384xf32>
    %1363 = arith.negf %1362 : vector<1x384xf32>
    %1364 = math.exp %1363 : vector<1x384xf32>
    %cst_446 = arith.constant 1.000000e+00 : f32
    %1365 = vector.broadcast %cst_446 : f32 to vector<1x384xf32>
    %1366 = arith.addf %1365, %1364 : vector<1x384xf32>
    %1367 = arith.divf %1365, %1366 : vector<1x384xf32>
    %1368 = vector.extract_strided_slice %1367 {offsets = [0, 0], sizes = [1, 128], strides = [1, 1]} : vector<1x384xf32> to vector<1x128xf32>
    %1369 = vector.extract_strided_slice %1367 {offsets = [0, 128], sizes = [1, 128], strides = [1, 1]} : vector<1x384xf32> to vector<1x128xf32>
    %1370 = vector.extract_strided_slice %1367 {offsets = [0, 256], sizes = [1, 128], strides = [1, 1]} : vector<1x384xf32> to vector<1x128xf32>
    %1371 = vector.extract_strided_slice %1361 {offsets = [0, 384], sizes = [1, 128], strides = [1, 1]} : vector<1x512xf32> to vector<1x128xf32>
    %1372 = math.tanh %1371 : vector<1x128xf32>
    %1373 = arith.mulf %1369, %1350 : vector<1x128xf32>
    %1374 = arith.mulf %1368, %1372 : vector<1x128xf32>
    %1375 = arith.addf %1373, %1374 : vector<1x128xf32>
    %1376 = math.tanh %1375 : vector<1x128xf32>
    %1377 = arith.mulf %1370, %1376 : vector<1x128xf32>
    %c5_i32_447 = arith.constant 5 : i32
    %1378 = vector.broadcast %c5_i32_447 : i32 to vector<8x128xi32>
    %1379 = arith.cmpi eq, %405, %1378 : vector<8x128xi32>
    %1380 = vector.shape_cast %1377 : vector<1x128xf32> to vector<1x128xf32>
    %1381 = vector.broadcast %1380 : vector<1x128xf32> to vector<8x128xf32>
    %1382 = arith.select %1379, %1381, %1357 : vector<8x128xi1>, vector<8x128xf32>
    %1383 = vector.extract_strided_slice %1231 {offsets = [6, 0], sizes = [1, 512], strides = [1, 1]} : vector<8x512xf32> to vector<1x512xf32>
    %c0_448 = arith.constant 0 : index
    %c0_449 = arith.constant 0 : index
    %1384 = vector.load %arg11[%c0_448, %c0_449] : memref<128x512xf32, #tpu.memory_space<vmem>>, vector<128x512xf32>
    %cst_450 = arith.constant dense<0.000000e+00> : vector<1x512xf32>
    %1385 = tpu.matmul %1377, %1384, %cst_450 {dimension_numbers = #tpu.dot_dimension_numbers<[1], [0], [0], [1], [0, 0, 1, 1], [], []>} : vector<1x128xf32>, vector<128x512xf32>, vector<1x512xf32> -> vector<1x512xf32>
    %1386 = arith.addf %1383, %1385 : vector<1x512xf32>
    %1387 = vector.extract_strided_slice %1386 {offsets = [0, 0], sizes = [1, 384], strides = [1, 1]} : vector<1x512xf32> to vector<1x384xf32>
    %1388 = arith.negf %1387 : vector<1x384xf32>
    %1389 = math.exp %1388 : vector<1x384xf32>
    %cst_451 = arith.constant 1.000000e+00 : f32
    %1390 = vector.broadcast %cst_451 : f32 to vector<1x384xf32>
    %1391 = arith.addf %1390, %1389 : vector<1x384xf32>
    %1392 = arith.divf %1390, %1391 : vector<1x384xf32>
    %1393 = vector.extract_strided_slice %1392 {offsets = [0, 0], sizes = [1, 128], strides = [1, 1]} : vector<1x384xf32> to vector<1x128xf32>
    %1394 = vector.extract_strided_slice %1392 {offsets = [0, 128], sizes = [1, 128], strides = [1, 1]} : vector<1x384xf32> to vector<1x128xf32>
    %1395 = vector.extract_strided_slice %1392 {offsets = [0, 256], sizes = [1, 128], strides = [1, 1]} : vector<1x384xf32> to vector<1x128xf32>
    %1396 = vector.extract_strided_slice %1386 {offsets = [0, 384], sizes = [1, 128], strides = [1, 1]} : vector<1x512xf32> to vector<1x128xf32>
    %1397 = math.tanh %1396 : vector<1x128xf32>
    %1398 = arith.mulf %1394, %1375 : vector<1x128xf32>
    %1399 = arith.mulf %1393, %1397 : vector<1x128xf32>
    %1400 = arith.addf %1398, %1399 : vector<1x128xf32>
    %1401 = math.tanh %1400 : vector<1x128xf32>
    %1402 = arith.mulf %1395, %1401 : vector<1x128xf32>
    %c6_i32_452 = arith.constant 6 : i32
    %1403 = vector.broadcast %c6_i32_452 : i32 to vector<8x128xi32>
    %1404 = arith.cmpi eq, %405, %1403 : vector<8x128xi32>
    %1405 = vector.shape_cast %1402 : vector<1x128xf32> to vector<1x128xf32>
    %1406 = vector.broadcast %1405 : vector<1x128xf32> to vector<8x128xf32>
    %1407 = arith.select %1404, %1406, %1382 : vector<8x128xi1>, vector<8x128xf32>
    %1408 = vector.extract_strided_slice %1231 {offsets = [7, 0], sizes = [1, 512], strides = [1, 1]} : vector<8x512xf32> to vector<1x512xf32>
    %c0_453 = arith.constant 0 : index
    %c0_454 = arith.constant 0 : index
    %1409 = vector.load %arg11[%c0_453, %c0_454] : memref<128x512xf32, #tpu.memory_space<vmem>>, vector<128x512xf32>
    %cst_455 = arith.constant dense<0.000000e+00> : vector<1x512xf32>
    %1410 = tpu.matmul %1402, %1409, %cst_455 {dimension_numbers = #tpu.dot_dimension_numbers<[1], [0], [0], [1], [0, 0, 1, 1], [], []>} : vector<1x128xf32>, vector<128x512xf32>, vector<1x512xf32> -> vector<1x512xf32>
    %1411 = arith.addf %1408, %1410 : vector<1x512xf32>
    %1412 = vector.extract_strided_slice %1411 {offsets = [0, 0], sizes = [1, 384], strides = [1, 1]} : vector<1x512xf32> to vector<1x384xf32>
    %1413 = arith.negf %1412 : vector<1x384xf32>
    %1414 = math.exp %1413 : vector<1x384xf32>
    %cst_456 = arith.constant 1.000000e+00 : f32
    %1415 = vector.broadcast %cst_456 : f32 to vector<1x384xf32>
    %1416 = arith.addf %1415, %1414 : vector<1x384xf32>
    %1417 = arith.divf %1415, %1416 : vector<1x384xf32>
    %1418 = vector.extract_strided_slice %1417 {offsets = [0, 0], sizes = [1, 128], strides = [1, 1]} : vector<1x384xf32> to vector<1x128xf32>
    %1419 = vector.extract_strided_slice %1417 {offsets = [0, 128], sizes = [1, 128], strides = [1, 1]} : vector<1x384xf32> to vector<1x128xf32>
    %1420 = vector.extract_strided_slice %1417 {offsets = [0, 256], sizes = [1, 128], strides = [1, 1]} : vector<1x384xf32> to vector<1x128xf32>
    %1421 = vector.extract_strided_slice %1411 {offsets = [0, 384], sizes = [1, 128], strides = [1, 1]} : vector<1x512xf32> to vector<1x128xf32>
    %1422 = math.tanh %1421 : vector<1x128xf32>
    %1423 = arith.mulf %1419, %1400 : vector<1x128xf32>
    %1424 = arith.mulf %1418, %1422 : vector<1x128xf32>
    %1425 = arith.addf %1423, %1424 : vector<1x128xf32>
    %1426 = math.tanh %1425 : vector<1x128xf32>
    %1427 = arith.mulf %1420, %1426 : vector<1x128xf32>
    %c7_i32_457 = arith.constant 7 : i32
    %1428 = vector.broadcast %c7_i32_457 : i32 to vector<8x128xi32>
    %1429 = arith.cmpi eq, %405, %1428 : vector<8x128xi32>
    %1430 = vector.shape_cast %1427 : vector<1x128xf32> to vector<1x128xf32>
    %1431 = vector.broadcast %1430 : vector<1x128xf32> to vector<8x128xf32>
    %1432 = arith.select %1429, %1431, %1407 : vector<8x128xi1>, vector<8x128xf32>
    %c0_458 = arith.constant 0 : index
    %c0_459 = arith.constant 0 : index
    %1433 = vector.load %arg13[%c0_458, %c0_459] : memref<128x128xf32, #tpu.memory_space<vmem>>, vector<128x128xf32>
    %cst_460 = arith.constant dense<0.000000e+00> : vector<8x128xf32>
    %1434 = tpu.matmul %1432, %1433, %cst_460 {dimension_numbers = #tpu.dot_dimension_numbers<[1], [0], [0], [1], [0, 0, 1, 1], [], []>} : vector<8x128xf32>, vector<128x128xf32>, vector<8x128xf32> -> vector<8x128xf32>
    %c0_461 = arith.constant 0 : index
    %c0_462 = arith.constant 0 : index
    %1435 = vector.load %arg14[%c0_461, %c0_462] : memref<1x128xf32, #tpu.memory_space<vmem>>, vector<1x128xf32>
    %1436 = vector.broadcast %1435 : vector<1x128xf32> to vector<8x128xf32>
    %1437 = arith.addf %1434, %1436 : vector<8x128xf32>
    %1438 = arith.index_cast %1229 : i32 to index
    %c0_463 = arith.constant 0 : index
    %1439 = vector.load %arg15[%1438, %c0_463] : memref<16x128xf32, #tpu.memory_space<vmem>>, vector<8x128xf32>
    tpu.vector_store %arg15[%1438, %c0_463], %1437 {strides = array<i32>} : memref<16x128xf32, #tpu.memory_space<vmem>>, vector<8x128xf32>,
    %c2_i32_464 = arith.constant 2 : i32
    return
  }
}

</mosaic_0001>

<bundles_post_ra>
// kernel: autoencoder_forward.1
= control target key start
LH: loop header
LB: loop body
LE: loop exit
PB: predicated region body
PF: predicated region fallthrough
CT: control target
= control target key end

     0   :  { %v21030_v3 = vmov 0.0   ;;  %vm15729_vm8 = vmmov 0   ;;  %s21014_s1 = inlined_call_operand.vmem [shape: f32[128,512], index: 1, kind: input, shape index: {}]   ;;  %s21015_s2 = inlined_call_operand.vmem [shape: f32[128,512], index: 2, kind: input, shape index: {}]   ;;  %s21016_s0 = inlined_call_operand.vmem [shape: f32[64,128], index: 0, kind: input, shape index: {}]   ;;  %s21017_s3 = inlined_call_operand.vmem [shape: f32[1,512], index: 3, kind: input, shape index: {}]   ;;  %s21018_s4 = inlined_call_operand.vmem [shape: f32[128,512], index: 4, kind: input, shape index: {}]   ;;  %s21019_s5 = inlined_call_operand.vmem [shape: f32[128,512], index: 5, kind: input, shape index: {}]   ;;  %s21020_s6 = inlined_call_operand.vmem [shape: f32[1,512], index: 6, kind: input, shape index: {}]   ;;  %s21021_s7 = inlined_call_operand.vmem [shape: f32[128,512], index: 7, kind: input, shape index: {}]   ;;  %s21022_s8 = inlined_call_operand.vmem [shape: f32[128,512], index: 8, kind: input, shape index: {}]   ;;  %s21023_s9 = inlined_call_operand.vmem [shape: f32[1,512], index: 9, kind: input, shape index: {}]   ;;  %s21024_s10 = inlined_call_operand.vmem [shape: f32[128,512], index: 10, kind: input, shape index: {}]   ;;  %s21025_s11 = inlined_call_operand.vmem [shape: f32[128,512], index: 11, kind: input, shape index: {}]   ;;  %s21026_s12 = inlined_call_operand.vmem [shape: f32[1,512], index: 12, kind: input, shape index: {}]   ;;  %s21027_s13 = inlined_call_operand.vmem [shape: f32[128,128], index: 13, kind: input, shape index: {}]   ;;  %s21028_s14 = inlined_call_operand.vmem [shape: f32[1,128], index: 14, kind: input, shape index: {}]   ;;  %s21029_s15 = inlined_call_operand.vmem [shape: f32[16,128], index: 15, kind: output, shape index: {}]  }
   0x1   :  { %v59_v0 = vld [vmem:[%s21014_s1 + $0x8] sm:$0xff]  ;;  %v61_v2 = vld [vmem:[%s21014_s1 + $0x18] sm:$0xff]  ;;  %208 = vmatprep.mubr.f32.mxu0 %v21030_v3  ;;  %321 = vmatprep.mubr.f32.mxu1 %v21030_v3  ;;  %v58_v6 = vld [vmem:[%s21014_s1] sm:$0xff] }
   0x2   :  { %v63_v1 = vld [vmem:[%s21014_s1 + $0x28] sm:$0xff]  ;;  %v65_v5 = vld [vmem:[%s21014_s1 + $0x38] sm:$0xff]  ;;  %v62_v7 = vld [vmem:[%s21014_s1 + $0x20] sm:$0xff] }
   0x3   :  { %v11577_v4 = vpack.c.bf16 %v63_v1, %v59_v0  ;;  %v11609_v8 = vpack.c.bf16 %v65_v5, %v61_v2  ;;  %v11579_v9 = vpack.c.bf16 %v62_v7, %v58_v6  ;;  %v60_v10 = vld [vmem:[%s21014_s1 + $0x10] sm:$0xff]  ;;  %v67_v12 = vld [vmem:[%s21014_s1 + $0x48] sm:$0xff]  ;;  %v69_v15 = vld [vmem:[%s21014_s1 + $0x58] sm:$0xff] }
   0x4   :  { %v64_v11 = vld [vmem:[%s21014_s1 + $0x30] sm:$0xff]  ;;  %v71_v14 = vld [vmem:[%s21014_s1 + $0x68] sm:$0xff]  ;;  %v73_v16 = vld [vmem:[%s21014_s1 + $0x78] sm:$0xff] }
   0x5   :  { %11578 = vmatprep.subr.bf16.mxu0 %v11577_v4  ;;  %v11611_v13 = vpack.c.bf16 %v64_v11, %v60_v10  ;;  %11610 = vmatprep.subr.bf16.mxu1 %v11609_v8  ;;  %v11581_v17 = vpack.c.bf16 %v71_v14, %v67_v12  ;;  %v11613_v18 = vpack.c.bf16 %v73_v16, %v69_v15  ;;  %v66_v19 = vld [vmem:[%s21014_s1 + $0x40] sm:$0xff]  ;;  %v68_v21 = vld [vmem:[%s21014_s1 + $0x50] sm:$0xff]  ;;  %v75_v24 = vld [vmem:[%s21014_s1 + $0x88] sm:$0xff] }
   0x6   :  { %11580 = vmatpush1.bf16.msra.mxu0 %v11579_v9  ;;  %v70_v20 = vld [vmem:[%s21014_s1 + $0x60] sm:$0xff]  ;;  %v72_v23 = vld [vmem:[%s21014_s1 + $0x70] sm:$0xff]  ;;  %v79_v25 = vld [vmem:[%s21014_s1 + $0xa8] sm:$0xff] }
   0x7   :  { %11612 = vmatpush1.bf16.msra.mxu1 %v11611_v13  ;;  %v11583_v22 = vpack.c.bf16 %v70_v20, %v66_v19  ;;  %11582 = vmatprep.subr.bf16.mxu0 %v11581_v17  ;;  %v11615_v26 = vpack.c.bf16 %v72_v23, %v68_v21  ;;  %v11585_v27 = vpack.c.bf16 %v79_v25, %v75_v24  ;;  %v77_v28 = vld [vmem:[%s21014_s1 + $0x98] sm:$0xff]  ;;  %v74_v30 = vld [vmem:[%s21014_s1 + $0x80] sm:$0xff]  ;;  %v76_v33 = vld [vmem:[%s21014_s1 + $0x90] sm:$0xff] }
   0x8   :  { %11614 = vmatprep.subr.bf16.mxu1 %v11613_v18  ;;  %v81_v29 = vld [vmem:[%s21014_s1 + $0xb8] sm:$0xff]  ;;  %v78_v32 = vld [vmem:[%s21014_s1 + $0xa0] sm:$0xff]  ;;  %v80_v34 = vld [vmem:[%s21014_s1 + $0xb0] sm:$0xff] }
   0x9   :  { %v11617_v31 = vpack.c.bf16 %v81_v29, %v77_v28  ;;  %v11587_v35 = vpack.c.bf16 %v78_v32, %v74_v30  ;;  %v83_v36 = vld [vmem:[%s21014_s1 + $0xc8] sm:$0xff]  ;;  %v85_v38 = vld [vmem:[%s21014_s1 + $0xd8] sm:$0xff]  ;;  %v11619_v39 = vpack.c.bf16 %v80_v34, %v76_v33  ;;  %v82_v42 = vld [vmem:[%s21014_s1 + $0xc0] sm:$0xff] }
   0xa   :  { %11584 = vmatpush1.bf16.msra.mxu0 %v11583_v22  ;;  %v87_v37 = vld [vmem:[%s21014_s1 + $0xe8] sm:$0xff]  ;;  %v89_v41 = vld [vmem:[%s21014_s1 + $0xf8] sm:$0xff]  ;;  %v86_v43 = vld [vmem:[%s21014_s1 + $0xe0] sm:$0xff] }
   0xb   :  { %11616 = vmatpush1.bf16.msra.mxu1 %v11615_v26  ;;  %11586 = vmatprep.subr.bf16.mxu0 %v11585_v27  ;;  %v11589_v40 = vpack.c.bf16 %v87_v37, %v83_v36  ;;  %v11621_v44 = vpack.c.bf16 %v89_v41, %v85_v38  ;;  %v84_v45 = vld [vmem:[%s21014_s1 + $0xd0] sm:$0xff]  ;;  %v91_v47 = vld [vmem:[%s21014_s1 + $0x108] sm:$0xff]  ;;  %v93_v49 = vld [vmem:[%s21014_s1 + $0x118] sm:$0xff]  ;;  %v11591_v51 = vpack.c.bf16 %v86_v43, %v82_v42 }
   0xc   :  { %11618 = vmatprep.subr.bf16.mxu1 %v11617_v31  ;;  %v88_v46 = vld [vmem:[%s21014_s1 + $0xf0] sm:$0xff]  ;;  %v95_v48 = vld [vmem:[%s21014_s1 + $0x128] sm:$0xff]  ;;  %v97_v50 = vld [vmem:[%s21014_s1 + $0x138] sm:$0xff] }
   0xd   :  { %v11623_v52 = vpack.c.bf16 %v88_v46, %v84_v45  ;;  %v11593_v53 = vpack.c.bf16 %v95_v48, %v91_v47  ;;  %v90_v54 = vld [vmem:[%s21014_s1 + $0x100] sm:$0xff]  ;;  %v92_v56 = vld [vmem:[%s21014_s1 + $0x110] sm:$0xff]  ;;  %v11625_v57 = vpack.c.bf16 %v97_v50, %v93_v49  ;;  %v99_v59 = vld [vmem:[%s21014_s1 + $0x148] sm:$0xff] }
   0xe   :  { %11588 = vmatpush1.bf16.msra.mxu0 %v11587_v35  ;;  %v94_v55 = vld [vmem:[%s21014_s1 + $0x120] sm:$0xff]  ;;  %v96_v58 = vld [vmem:[%s21014_s1 + $0x130] sm:$0xff]  ;;  %v103_v60 = vld [vmem:[%s21014_s1 + $0x168] sm:$0xff] }
   0xf   :  { %11620 = vmatpush1.bf16.msra.mxu1 %v11619_v39  ;;  %11590 = vmatprep.subr.bf16.mxu0 %v11589_v40  ;;  %v101_v61 = vld [vmem:[%s21014_s1 + $0x158] sm:$0xff]  ;;  %v11595_v63 = vpack.c.bf16 %v94_v55, %v90_v54  ;;  %v11627_v0 = vpack.c.bf16 %v96_v58, %v92_v56  ;;  %v11597_v1 = vpack.c.bf16 %v103_v60, %v99_v59  ;;  %v98_v2 = vld [vmem:[%s21014_s1 + $0x140] sm:$0xff]  ;;  %v100_v5 = vld [vmem:[%s21014_s1 + $0x150] sm:$0xff] }
  0x10   :  { %11622 = vmatprep.subr.bf16.mxu1 %v11621_v44  ;;  %v105_v62 = vld [vmem:[%s21014_s1 + $0x178] sm:$0xff]  ;;  %v102_v4 = vld [vmem:[%s21014_s1 + $0x160] sm:$0xff]  ;;  %v104_v7 = vld [vmem:[%s21014_s1 + $0x170] sm:$0xff] }
  0x11   :  { %v11629_v6 = vpack.c.bf16 %v105_v62, %v101_v61  ;;  %v107_v8 = vld [vmem:[%s21014_s1 + $0x188] sm:$0xff]  ;;  %v109_v10 = vld [vmem:[%s21014_s1 + $0x198] sm:$0xff]  ;;  %v11599_v12 = vpack.c.bf16 %v102_v4, %v98_v2  ;;  %v11631_v13 = vpack.c.bf16 %v104_v7, %v100_v5  ;;  %v106_v15 = vld [vmem:[%s21014_s1 + $0x180] sm:$0xff] }
  0x12   :  { %11592 = vmatpush1.bf16.msra.mxu0 %v11591_v51  ;;  %v111_v9 = vld [vmem:[%s21014_s1 + $0x1a8] sm:$0xff]  ;;  %v113_v11 = vld [vmem:[%s21014_s1 + $0x1b8] sm:$0xff]  ;;  %v110_v16 = vld [vmem:[%s21014_s1 + $0x1a0] sm:$0xff] }
  0x13   :  { %11624 = vmatpush1.bf16.msra.mxu1 %v11623_v52  ;;  %11594 = vmatprep.subr.bf16.mxu0 %v11593_v53  ;;  %v11601_v14 = vpack.c.bf16 %v111_v9, %v107_v8  ;;  %v108_v17 = vld [vmem:[%s21014_s1 + $0x190] sm:$0xff]  ;;  %v11633_v18 = vpack.c.bf16 %v113_v11, %v109_v10  ;;  %v115_v20 = vld [vmem:[%s21014_s1 + $0x1c8] sm:$0xff]  ;;  %v117_v22 = vld [vmem:[%s21014_s1 + $0x1d8] sm:$0xff]  ;;  %v11603_v24 = vpack.c.bf16 %v110_v16, %v106_v15 }
  0x14   :  { %11626 = vmatprep.subr.bf16.mxu1 %v11625_v57  ;;  %v112_v19 = vld [vmem:[%s21014_s1 + $0x1b0] sm:$0xff]  ;;  %v119_v21 = vld [vmem:[%s21014_s1 + $0x1e8] sm:$0xff]  ;;  %v121_v23 = vld [vmem:[%s21014_s1 + $0x1f8] sm:$0xff] }
  0x15   :  { %v11635_v25 = vpack.c.bf16 %v112_v19, %v108_v17  ;;  %v11605_v26 = vpack.c.bf16 %v119_v21, %v115_v20  ;;  %v114_v27 = vld [vmem:[%s21014_s1 + $0x1c0] sm:$0xff]  ;;  %v116_v29 = vld [vmem:[%s21014_s1 + $0x1d0] sm:$0xff]  ;;  %v11637_v30 = vpack.c.bf16 %v121_v23, %v117_v22  ;;  %v410_v32 = vld [vmem:[%s21015_s2 + $0x8] sm:$0xff] }
  0x16   :  { %11596 = vmatpush1.bf16.msra.mxu0 %v11595_v63  ;;  %v118_v28 = vld [vmem:[%s21014_s1 + $0x1e0] sm:$0xff]  ;;  %v120_v31 = vld [vmem:[%s21014_s1 + $0x1f0] sm:$0xff]  ;;  %v414_v33 = vld [vmem:[%s21015_s2 + $0x28] sm:$0xff] }
  0x17   :  { %11628 = vmatpush1.bf16.msra.mxu1 %v11627_v0  ;;  %11598 = vmatprep.subr.bf16.mxu0 %v11597_v1  ;;  %v412_v34 = vld [vmem:[%s21015_s2 + $0x18] sm:$0xff]  ;;  %v11607_v36 = vpack.c.bf16 %v118_v28, %v114_v27  ;;  %v11639_v37 = vpack.c.bf16 %v120_v31, %v116_v29  ;;  %v16016_v38 = vpack.c.bf16 %v414_v33, %v410_v32  ;;  %v409_v39 = vld [vmem:[%s21015_s2] sm:$0xff]  ;;  %v411_v42 = vld [vmem:[%s21015_s2 + $0x10] sm:$0xff] }
  0x18   :  { %11630 = vmatprep.subr.bf16.mxu1 %v11629_v6  ;;  %v416_v35 = vld [vmem:[%s21015_s2 + $0x38] sm:$0xff]  ;;  %v413_v40 = vld [vmem:[%s21015_s2 + $0x20] sm:$0xff]  ;;  %v415_v43 = vld [vmem:[%s21015_s2 + $0x30] sm:$0xff] }
  0x19   :  { %v16024_v41 = vpack.c.bf16 %v416_v35, %v412_v34  ;;  %v418_v44 = vld [vmem:[%s21015_s2 + $0x48] sm:$0xff]  ;;  %v50_v46 = vld [vmem:[%s21016_s0] sm:$0xff]  ;;  %v16041_v47 = vpack.c.bf16 %v413_v40, %v409_v39  ;;  %v420_v48 = vld [vmem:[%s21015_s2 + $0x58] sm:$0xff]  ;;  %v16050_v50 = vpack.c.bf16 %v415_v43, %v411_v42 }
  0x1a   :  { %11600 = vmatpush1.bf16.msra.mxu0 %v11599_v12  ;;  %v422_v45 = vld [vmem:[%s21015_s2 + $0x68] sm:$0xff]  ;;  %v424_v49 = vld [vmem:[%s21015_s2 + $0x78] sm:$0xff]  ;;  %v417_v51 = vld [vmem:[%s21015_s2 + $0x40] sm:$0xff] }
  0x1b   :  { %11632 = vmatpush1.bf16.msra.mxu1 %v11631_v13  ;;  %11602 = vmatprep.subr.bf16.mxu0 %v11601_v14  ;;  %v421_v52 = vld [vmem:[%s21015_s2 + $0x60] sm:$0xff]  ;;  %v16059_v53 = vpack.c.bf16 %v422_v45, %v418_v44  ;;  %v419_v54 = vld [vmem:[%s21015_s2 + $0x50] sm:$0xff]  ;;  %v16067_v56 = vpack.c.bf16 %v424_v49, %v420_v48  ;;  %v426_v57 = vld [vmem:[%s21015_s2 + $0x88] sm:$0xff] }
  0x1c   :  { %11634 = vmatprep.subr.bf16.mxu1 %v11633_v18  ;;  %v423_v55 = vld [vmem:[%s21015_s2 + $0x70] sm:$0xff]  ;;  %v430_v58 = vld [vmem:[%s21015_s2 + $0xa8] sm:$0xff]  ;;  %v16079_v60 = vpack.c.bf16 %v421_v52, %v417_v51  ;;  %v428_v61 = vld [vmem:[%s21015_s2 + $0x98] sm:$0xff] }
  0x1d   :  { %v51_v59 = vld [vmem:[%s21016_s0 + $0x8] sm:$0xff]  ;;  %v432_v62 = vld [vmem:[%s21015_s2 + $0xb8] sm:$0xff]  ;;  %v16089_v63 = vpack.c.bf16 %v423_v55, %v419_v54  ;;  %v425_v0 = vld [vmem:[%s21015_s2 + $0x80] sm:$0xff]  ;;  %v16099_v2 = vpack.c.bf16 %v430_v58, %v426_v57 }
  0x1e   :  { %11604 = vmatpush1.bf16.msra.mxu0 %v11603_v24  ;;  %v429_v1 = vld [vmem:[%s21015_s2 + $0xa0] sm:$0xff]  ;;  %v427_v4 = vld [vmem:[%s21015_s2 + $0x90] sm:$0xff]  ;;  %v16108_v6 = vpack.c.bf16 %v432_v62, %v428_v61  ;;  %v434_v7 = vld [vmem:[%s21015_s2 + $0xc8] sm:$0xff] }
  0x1f   :  { %11636 = vmatpush1.bf16.msra.mxu1 %v11635_v25  ;;  %11606 = vmatprep.subr.bf16.mxu0 %v11605_v26  ;;  %v431_v5 = vld [vmem:[%s21015_s2 + $0xb0] sm:$0xff]  ;;  %v438_v8 = vld [vmem:[%s21015_s2 + $0xe8] sm:$0xff]  ;;  %v16120_v10 = vpack.c.bf16 %v429_v1, %v425_v0  ;;  %v436_v11 = vld [vmem:[%s21015_s2 + $0xd8] sm:$0xff] }
  0x20   :  { %11638 = vmatprep.subr.bf16.mxu1 %v11637_v30  ;;  %v52_v9 = vld [vmem:[%s21016_s0 + $0x10] sm:$0xff]  ;;  %v440_v12 = vld [vmem:[%s21015_s2 + $0xf8] sm:$0xff]  ;;  %v16130_v13 = vpack.c.bf16 %v431_v5, %v427_v4  ;;  %v433_v14 = vld [vmem:[%s21015_s2 + $0xc0] sm:$0xff]  ;;  %v16140_v16 = vpack.c.bf16 %v438_v8, %v434_v7 }
  0x21   :  { %v437_v15 = vld [vmem:[%s21015_s2 + $0xe0] sm:$0xff]  ;;  %v435_v17 = vld [vmem:[%s21015_s2 + $0xd0] sm:$0xff]  ;;  %v16149_v19 = vpack.c.bf16 %v440_v12, %v436_v11  ;;  %v442_v20 = vld [vmem:[%s21015_s2 + $0x108] sm:$0xff] }
  0x22   :  { %11608 = vmatpush1.bf16.msra.mxu0 %v11607_v36  ;;  %v439_v18 = vld [vmem:[%s21015_s2 + $0xf0] sm:$0xff]  ;;  %v446_v21 = vld [vmem:[%s21015_s2 + $0x128] sm:$0xff]  ;;  %v53_v22 = vld [vmem:[%s21016_s0 + $0x18] sm:$0xff]  ;;  %v16161_v23 = vpack.c.bf16 %v437_v15, %v433_v14 }
  0x23   :  { %11640 = vmatpush1.bf16.msra.mxu1 %v11639_v37  ;;  %11642 = vmatprep.subr.bf16.mxu0 %v16016_v38  ;;  %v444_v24 = vld [vmem:[%s21015_s2 + $0x118] sm:$0xff]  ;;  %v16171_v26 = vpack.c.bf16 %v439_v18, %v435_v17  ;;  %v441_v27 = vld [vmem:[%s21015_s2 + $0x100] sm:$0xff]  ;;  %v16181_v29 = vpack.c.bf16 %v446_v21, %v442_v20  ;;  %v443_v30 = vld [vmem:[%s21015_s2 + $0x110] sm:$0xff] }
  0x24   :  { %11674 = vmatprep.subr.bf16.mxu1 %v16024_v41  ;;  %v448_v25 = vld [vmem:[%s21015_s2 + $0x138] sm:$0xff]  ;;  %v445_v28 = vld [vmem:[%s21015_s2 + $0x120] sm:$0xff]  ;;  %v447_v31 = vld [vmem:[%s21015_s2 + $0x130] sm:$0xff] }
  0x25   :  { %209 = vmatmul.mubr.f32.vlgmr.msra.gmra.mrb[0].mxu0 %v50_v46  ;;  %v16190_v32 = vpack.c.bf16 %v448_v25, %v444_v24  ;;  %v450_v33 = vld [vmem:[%s21015_s2 + $0x148] sm:$0xff]  ;;  %v54_v35 = vld [vmem:[%s21016_s0 + $0x20] sm:$0xff]  ;;  %v16202_v36 = vpack.c.bf16 %v445_v28, %v441_v27  ;;  %v452_v37 = vld [vmem:[%s21015_s2 + $0x158] sm:$0xff]  ;;  %v16212_v40 = vpack.c.bf16 %v447_v31, %v443_v30  ;;  %v124_v28 = vlaneseq }
  0x26   :  { %322 = vmatmul.mubr.f32.vlgmr.msra.gmra.mrb[0].mxu1 %v50_v46  ;;  %11644 = vmatpush1.bf16.msra.mxu0 %v16041_v47  ;;  %v454_v34 = vld [vmem:[%s21015_s2 + $0x168] sm:$0xff]  ;;  %v456_v39 = vld [vmem:[%s21015_s2 + $0x178] sm:$0xff]  ;;  %v449_v42 = vld [vmem:[%s21015_s2 + $0x140] sm:$0xff] }
  0x27   :  { %11676 = vmatpush1.bf16.msra.mxu1 %v16050_v50  ;;  %214 = vmatprep.mubr.f32.mxu0 %v21030_v3  ;;  %v453_v43 = vld [vmem:[%s21015_s2 + $0x160] sm:$0xff]  ;;  %v16222_v44 = vpack.c.bf16 %v454_v34, %v450_v33  ;;  %v451_v45 = vld [vmem:[%s21015_s2 + $0x150] sm:$0xff]  ;;  %v16231_v48 = vpack.c.bf16 %v456_v39, %v452_v37  ;;  %v458_v49 = vld [vmem:[%s21015_s2 + $0x188] sm:$0xff]  ;;  %v16370_v30 = vshrl.u32 %v124_v28, 7 }
  0x28   :  { %327 = vmatprep.mubr.f32.mxu1 %v21030_v3  ;;  %11646 = vmatprep.subr.bf16.mxu0 %v16059_v53  ;;  %v455_v46 = vld [vmem:[%s21015_s2 + $0x170] sm:$0xff]  ;;  %v462_v51 = vld [vmem:[%s21015_s2 + $0x1a8] sm:$0xff]  ;;  %v16243_v54 = vpack.c.bf16 %v453_v43, %v449_v42  ;;  %v460_v55 = vld [vmem:[%s21015_s2 + $0x198] sm:$0xff] }
  0x29   :  { %215 = vmatmul.mubr.f32.gmra.mrb[2].mxu0 %v51_v59  ;;  %11678 = vmatprep.subr.bf16.mxu1 %v16067_v56  ;;  %v55_v52 = vld [vmem:[%s21016_s0 + $0x28] sm:$0xff]  ;;  %v464_v57 = vld [vmem:[%s21015_s2 + $0x1b8] sm:$0xff]  ;;  %v16253_v58 = vpack.c.bf16 %v455_v46, %v451_v45  ;;  %v461_v61 = vld [vmem:[%s21015_s2 + $0x1a0] sm:$0xff]  ;;  %v16263_v62 = vpack.c.bf16 %v462_v51, %v458_v49  ;;  %v16373_v31 = vsub.s32 0, %v16370_v30  ;;  %v16379_v34 = vsub.s32 1, %v16370_v30 }
  0x2a   :  { %328 = vmatmul.mubr.f32.gmra.mrb[2].mxu1 %v51_v59  ;;  %11648 = vmatpush1.bf16.msra.mxu0 %v16079_v60  ;;  %v457_v59 = vld [vmem:[%s21015_s2 + $0x180] sm:$0xff]  ;;  %v459_v0 = vld [vmem:[%s21015_s2 + $0x190] sm:$0xff]  ;;  %v16272_v4 = vpack.c.bf16 %v464_v57, %v460_v55  ;;  %v466_v5 = vld [vmem:[%s21015_s2 + $0x1c8] sm:$0xff]  ;;  %v16388_v37 = vsub.s32 2, %v16370_v30  ;;  %v16396_v55 = vsub.s32 3, %v16370_v30  ;;  %vm4644_vm0 = vcmp.eq.s32.totalorder %v16370_v30, 0 }
  0x2b   :  { %11680 = vmatpush1.bf16.msra.mxu1 %v16089_v63  ;;  %220 = vmatprep.mubr.f32.mxu0 %v21030_v3  ;;  %v463_v1 = vld [vmem:[%s21015_s2 + $0x1b0] sm:$0xff]  ;;  %v470_v7 = vld [vmem:[%s21015_s2 + $0x1e8] sm:$0xff]  ;;  %v468_v11 = vld [vmem:[%s21015_s2 + $0x1d8] sm:$0xff]  ;;  %vm4846_vm1 = vcmp.eq.s32.totalorder %v16370_v30, 1  ;;  %vm5046_vm2 = vcmp.eq.s32.totalorder %v16370_v30, 2  ;;  %vm5246_vm3 = vcmp.eq.s32.totalorder %v16370_v30, 3 }
  0x2c   :  { %333 = vmatprep.mubr.f32.mxu1 %v21030_v3  ;;  %11650 = vmatprep.subr.bf16.mxu0 %v16099_v2  ;;  %v56_v8 = vld [vmem:[%s21016_s0 + $0x30] sm:$0xff]  ;;  %v472_v12 = vld [vmem:[%s21015_s2 + $0x1f8] sm:$0xff]  ;;  %v16294_v14 = vpack.c.bf16 %v463_v1, %v459_v0  ;;  %v465_v15 = vld [vmem:[%s21015_s2 + $0x1c0] sm:$0xff]  ;;  %v16304_v18 = vpack.c.bf16 %v470_v7, %v466_v5  ;;  %vm5446_vm4 = vcmp.eq.s32.totalorder %v16370_v30, 4  ;;  %vm5646_vm5 = vcmp.eq.s32.totalorder %v16370_v30, 5 }
  0x2d   :  { %221 = vmatmul.mubr.f32.gmra.mrb[4].mxu0 %v52_v9  ;;  %11682 = vmatprep.subr.bf16.mxu1 %v16108_v6  ;;  %v469_v17 = vld [vmem:[%s21015_s2 + $0x1e0] sm:$0xff]  ;;  %v467_v20 = vld [vmem:[%s21015_s2 + $0x1d0] sm:$0xff]  ;;  %v57_v24 = vld [vmem:[%s21016_s0 + $0x38] sm:$0xff]  ;;  %vm5846_vm6 = vcmp.eq.s32.totalorder %v16370_v30, 6  ;;  %vm6046_vm7 = vcmp.eq.s32.totalorder %v16370_v30, 7 }
  0x2e   :  { %334 = vmatmul.mubr.f32.gmra.mrb[4].mxu1 %v52_v9  ;;  %11652 = vmatpush1.bf16.msra.mxu0 %v16120_v10  ;;  %v16284_v9 = vpack.c.bf16 %v461_v61, %v457_v59  ;;  %v471_v21 = vld [vmem:[%s21015_s2 + $0x1f0] sm:$0xff]  ;;  %v16319_v25 = vpack.c.bf16 %v469_v17, %v465_v15  ;;  %v122_v33 = vld [vmem:[%s21017_s3] sm:$0xf] }
  0x2f   :  { %11684 = vmatpush1.bf16.msra.mxu1 %v16130_v13  ;;  %226 = vmatprep.mubr.f32.mxu0 %v21030_v3  ;;  %v16323_v27 = vpack.c.bf16 %v471_v21, %v467_v20  ;;  %v16393_v51 = vrot.slane %v122_v33, %v16388_v37  ;;  %v16400_v59 = vrot.slane %v122_v33, %v16396_v55 }
  0x30   :  { %339 = vmatprep.mubr.f32.mxu1 %v21030_v3  ;;  %11654 = vmatprep.subr.bf16.mxu0 %v16140_v16 }
  0x31   :  { %227 = vmatmul.mubr.f32.gmra.mrb[6].mxu0 %v53_v22  ;;  %11686 = vmatprep.subr.bf16.mxu1 %v16149_v19 }
  0x32   :  { %340 = vmatmul.mubr.f32.gmra.mrb[6].mxu1 %v53_v22  ;;  %11656 = vmatpush1.bf16.msra.mxu0 %v16161_v23  ;;  %v16313_v22 = vpack.c.bf16 %v472_v12, %v468_v11 }
  0x33   :  { %11688 = vmatpush1.bf16.msra.mxu1 %v16171_v26  ;;  %232 = vmatprep.mubr.f32.mxu0 %v21030_v3 }
  0x34   :  { %345 = vmatprep.mubr.f32.mxu1 %v21030_v3  ;;  %11658 = vmatprep.subr.bf16.mxu0 %v16181_v29 }
  0x35   :  { %233 = vmatmul.mubr.f32.gmra.mrb[8].mxu0 %v54_v35  ;;  %11690 = vmatprep.subr.bf16.mxu1 %v16190_v32 }
  0x36   :  { %346 = vmatmul.mubr.f32.gmra.mrb[8].mxu1 %v54_v35  ;;  %11660 = vmatpush1.bf16.msra.mxu0 %v16202_v36  ;;  %v16382_v35 = vrot.slane %v122_v33, %v16373_v31 }
  0x37   :  { %11692 = vmatpush1.bf16.msra.mxu1 %v16212_v40  ;;  %238 = vmatprep.mubr.f32.mxu0 %v21030_v3 }
  0x38   :  { %351 = vmatprep.mubr.f32.mxu1 %v21030_v3  ;;  %11662 = vmatprep.subr.bf16.mxu0 %v16222_v44 }
  0x39   :  { %239 = vmatmul.mubr.f32.gmra.mrb[10].mxu0 %v55_v52  ;;  %11694 = vmatprep.subr.bf16.mxu1 %v16231_v48 }
  0x3a   :  { %352 = vmatmul.mubr.f32.gmra.mrb[10].mxu1 %v55_v52  ;;  %11664 = vmatpush1.bf16.msra.mxu0 %v16243_v54 }
  0x3b   :  { %11696 = vmatpush1.bf16.msra.mxu1 %v16253_v58  ;;  %244 = vmatprep.mubr.f32.mxu0 %v21030_v3 }
  0x3c   :  { %357 = vmatprep.mubr.f32.mxu1 %v21030_v3  ;;  %11666 = vmatprep.subr.bf16.mxu0 %v16263_v62 }
  0x3d   :  { %245 = vmatmul.mubr.f32.gmra.mrb[12].mxu0 %v56_v8  ;;  %11698 = vmatprep.subr.bf16.mxu1 %v16272_v4 }
  0x3e   :  { %358 = vmatmul.mubr.f32.gmra.mrb[12].mxu1 %v56_v8  ;;  %11668 = vmatpush1.bf16.msra.mxu0 %v16284_v9 }
  0x3f   :  { %11700 = vmatpush1.bf16.msra.mxu1 %v16294_v14  ;;  %250 = vmatprep.mubr.f32.mxu0 %v21030_v3 }
  0x40   :  { %363 = vmatprep.mubr.f32.mxu1 %v21030_v3  ;;  %11670 = vmatprep.subr.bf16.mxu0 %v16304_v18 }
  0x41   :  { %251 = vmatmul.mubr.f32.gmra.mrb[14].mxu0 %v57_v24  ;;  %11702 = vmatprep.subr.bf16.mxu1 %v16313_v22 }
  0x42   :  { %364 = vmatmul.mubr.f32.gmra.mrb[14].mxu1 %v57_v24  ;;  %11672 = vmatpush1.bf16.msra.mxu0 %v16319_v25 }
  0x43   :  { %11704 = vmatpush1.bf16.msra.mxu1 %v16323_v27  ;;  %537 = vmatprep.mubr.f32.mxu0 %v21030_v3 }
  0x44   :  { %608 = vmatprep.mubr.f32.mxu1 %v21030_v3  ;;  %11706 = vmatprep.subr.bf16.mxu0 %v16016_v38 }
  0x45   :  { %538 = vmatmul.mubr.f32.vlgmr.msra.gmra.mrb[0].mxu0 %v21030_v3  ;;  %11738 = vmatprep.subr.bf16.mxu1 %v16024_v41 }
  0x46   :  { %609 = vmatmul.mubr.f32.vlgmr.msra.gmra.mrb[0].mxu1 %v21030_v3  ;;  %11708 = vmatpush1.bf16.msra.mxu0 %v16041_v47 }
  0x47   :  { %11740 = vmatpush1.bf16.msra.mxu1 %v16050_v50  ;;  %11710 = vmatprep.subr.bf16.mxu0 %v16059_v53 }
  0x48   :  { %11742 = vmatprep.subr.bf16.mxu1 %v16067_v56  ;;  %779 = vmatprep.mubr.f32.mxu0 %v21030_v3 }
  0x49   :  { %850 = vmatprep.mubr.f32.mxu1 %v21030_v3 }
  0x4a   :  { %11712 = vmatpush1.bf16.msra.mxu0 %v16079_v60 }
  0x4b   :  { %11744 = vmatpush1.bf16.msra.mxu1 %v16089_v63  ;;  %11714 = vmatprep.subr.bf16.mxu0 %v16099_v2 }
  0x4c   :  { %11746 = vmatprep.subr.bf16.mxu1 %v16108_v6 }
  0x4e   :  { %11716 = vmatpush1.bf16.msra.mxu0 %v16120_v10 }
  0x4f   :  { %11748 = vmatpush1.bf16.msra.mxu1 %v16130_v13  ;;  %11718 = vmatprep.subr.bf16.mxu0 %v16140_v16 }
  0x50   :  { %11750 = vmatprep.subr.bf16.mxu1 %v16149_v19 }
  0x52   :  { %11720 = vmatpush1.bf16.msra.mxu0 %v16161_v23 }
  0x53   :  { %11752 = vmatpush1.bf16.msra.mxu1 %v16171_v26  ;;  %11722 = vmatprep.subr.bf16.mxu0 %v16181_v29 }
  0x54   :  { %11754 = vmatprep.subr.bf16.mxu1 %v16190_v32 }
  0x56   :  { %11724 = vmatpush1.bf16.msra.mxu0 %v16202_v36 }
  0x57   :  { %11756 = vmatpush1.bf16.msra.mxu1 %v16212_v40  ;;  %11726 = vmatprep.subr.bf16.mxu0 %v16222_v44 }
  0x58   :  { %11758 = vmatprep.subr.bf16.mxu1 %v16231_v48 }
  0x5a   :  { %11728 = vmatpush1.bf16.msra.mxu0 %v16243_v54 }
  0x5b   :  { %11760 = vmatpush1.bf16.msra.mxu1 %v16253_v58  ;;  %11730 = vmatprep.subr.bf16.mxu0 %v16263_v62 }
  0x5c   :  { %11762 = vmatprep.subr.bf16.mxu1 %v16272_v4 }
  0x5e   :  { %11732 = vmatpush1.bf16.msra.mxu0 %v16284_v9 }
  0x5f   :  { %11764 = vmatpush1.bf16.msra.mxu1 %v16294_v14  ;;  %11734 = vmatprep.subr.bf16.mxu0 %v16304_v18 }
  0x60   :  { %11766 = vmatprep.subr.bf16.mxu1 %v16313_v22 }
  0x62   :  { %11736 = vmatpush1.bf16.msra.mxu0 %v16319_v25 }
  0x63   :  { %11768 = vmatpush1.bf16.msra.mxu1 %v16323_v27  ;;  %11770 = vmatprep.subr.bf16.mxu0 %v16016_v38  ;;  %v16385_v38 = vrot.slane %v122_v33, %v16379_v34 }
  0x64   :  { %11802 = vmatprep.subr.bf16.mxu1 %v16024_v41 }
 0x118   :  { %v539_v41 = vpop.f32.mrb[0].mxu0 }
 0x119   :  { %v14953_v39 = vadd.f32 %v539_v41, %v16382_v35  ;;  %v610_v42 = vpop.f32.mrb[0].mxu1  ;;  %v541_v43 = vpop.f32.mrb[1].mxu0 }
 0x11a   :  { %v14954_v45 = vadd.f32 %v541_v43, %v16385_v38  ;;  %v612_v46 = vpop.f32.mrb[1].mxu1  ;;  %v14969_v57 = vadd.f32 %v610_v42, %v16393_v51 }
 0x11b   :  { %v11358_v49 = vmul.f32 -1.442695, %v14953_v39  ;;  %v14970_v0 = vadd.f32 %v612_v46, %v16400_v59 }
 0x11c   :  { %v11359_v52 = vmul.f32 -1.442695, %v14954_v45  ;;  %v11360_v61 = vmul.f32 -1.442695, %v14969_v57 }
 0x11d   :  { %15085 = vpow2.f32 %v11358_v49 }
 0x11e   :  { %15087 = vpow2.f32 %v11359_v52 }
 0x11f   :  { %15089 = vpow2.f32 %v11360_v61 }
 0x120   :  { %15091 = vtanh.f32 %v14970_v0 }
 0x127   :  { %v15086_v1 = vpop.eup %15085 }
 0x128   :  { %v628_v5 = vadd.f32 1.0, %v15086_v1  ;;  %v15088_v7 = vpop.eup %15087 }
 0x129   :  { %v629_v8 = vadd.f32 1.0, %v15088_v7  ;;  %v15090_v11 = vpop.eup %15089 }
 0x12a   :  { %15093 = vrcp.f32 %v628_v5  ;;  %v15092_v12 = vpop.eup %15091  ;;  %v630_v21 = vadd.f32 1.0, %v15090_v11 }
 0x12b   :  { %15095 = vrcp.f32 %v629_v8 }
 0x12c   :  { %15097 = vrcp.f32 %v630_v21  ;;  %v1140_v21 = vld [vmem:[%s21015_s2 + $0x18] sm:$0xff] }
 0x134   :  { %v15094_v15 = vpop.eup %15093 }
 0x135   :  { %v639_v17 = vmul.f32 %v15094_v15, %v15092_v12  ;;  %v15096_v20 = vpop.eup %15095 }
 0x136   :  { %v638_v24 = vmul.f32 0.0, %v15096_v20  ;;  %v15098_v33 = vpop.eup %15097  ;;  %v1142_v20 = vld [vmem:[%s21015_s2 + $0x28] sm:$0xff] }
 0x138   :  { %v16403_v28 = vadd.f32 %v639_v17, %v638_v24  ;;  %v1138_v17 = vld [vmem:[%s21015_s2 + $0x8] sm:$0xff] }
 0x139   :  { %v16465_v24 = vpack.c.bf16 %v1142_v20, %v1138_v17 }
 0x13a   :  { %15099 = vtanh.f32 %v16403_v28 }
 0x144   :  { %v15100_v41 = vpop.eup %15099 }
 0x145   :  { %v16406_v39 = vmul.f32 %v15100_v41, %v15098_v33  ;;  %v1137_v33 = vld [vmem:[%s21015_s2] sm:$0xff] }
 0x146   :  { %v1141_v41 = vld [vmem:[%s21015_s2 + $0x20] sm:$0xff] }
 0x147   :  { %780 = vmatmul.mubr.f32.vlgmr.msra.gmra.mrb[2].mxu0 %v16406_v39  ;;  %851 = vmatmul.mubr.f32.vlgmr.msra.gmra.mrb[2].mxu1 %v16406_v39 }
 0x148   :  { %11772 = vmatpush1.bf16.msra.mxu0 %v16041_v47  ;;  %11804 = vmatpush1.bf16.msra.mxu1 %v16050_v50 }
 0x149   :  { %11774 = vmatprep.subr.bf16.mxu0 %v16059_v53  ;;  %11806 = vmatprep.subr.bf16.mxu1 %v16067_v56 }
 0x14a   :  { %1022 = vmatprep.mubr.f32.mxu0 %v21030_v3  ;;  %1093 = vmatprep.mubr.f32.mxu1 %v21030_v3 }
 0x14c   :  { %11776 = vmatpush1.bf16.msra.mxu0 %v16079_v60  ;;  %11808 = vmatpush1.bf16.msra.mxu1 %v16089_v63 }
 0x14d   :  { %11778 = vmatprep.subr.bf16.mxu0 %v16099_v2  ;;  %11810 = vmatprep.subr.bf16.mxu1 %v16108_v6 }
 0x150   :  { %11780 = vmatpush1.bf16.msra.mxu0 %v16120_v10  ;;  %11812 = vmatpush1.bf16.msra.mxu1 %v16130_v13 }
 0x151   :  { %11782 = vmatprep.subr.bf16.mxu0 %v16140_v16  ;;  %11814 = vmatprep.subr.bf16.mxu1 %v16149_v19 }
 0x154   :  { %11784 = vmatpush1.bf16.msra.mxu0 %v16161_v23  ;;  %11816 = vmatpush1.bf16.msra.mxu1 %v16171_v26 }
 0x155   :  { %11786 = vmatprep.subr.bf16.mxu0 %v16181_v29  ;;  %11818 = vmatprep.subr.bf16.mxu1 %v16190_v32 }
 0x158   :  { %11788 = vmatpush1.bf16.msra.mxu0 %v16202_v36  ;;  %11820 = vmatpush1.bf16.msra.mxu1 %v16212_v40 }
 0x159   :  { %11790 = vmatprep.subr.bf16.mxu0 %v16222_v44  ;;  %11822 = vmatprep.subr.bf16.mxu1 %v16231_v48 }
 0x15c   :  { %11792 = vmatpush1.bf16.msra.mxu0 %v16243_v54  ;;  %11824 = vmatpush1.bf16.msra.mxu1 %v16253_v58 }
 0x15d   :  { %11794 = vmatprep.subr.bf16.mxu0 %v16263_v62  ;;  %11826 = vmatprep.subr.bf16.mxu1 %v16272_v4 }
 0x160   :  { %11796 = vmatpush1.bf16.msra.mxu0 %v16284_v9  ;;  %11828 = vmatpush1.bf16.msra.mxu1 %v16294_v14 }
 0x161   :  { %11798 = vmatprep.subr.bf16.mxu0 %v16304_v18  ;;  %11830 = vmatprep.subr.bf16.mxu1 %v16313_v22 }
 0x164   :  { %11800 = vmatpush1.bf16.msra.mxu0 %v16319_v25  ;;  %11832 = vmatpush1.bf16.msra.mxu1 %v16323_v27 }
 0x165   :  { %11834 = vmatprep.subr.bf16.mxu0 %v16465_v24 }
 0x21a   :  { %v781_v47 = vpop.f32.mrb[2].mxu0  ;;  %v852_v50 = vpop.f32.mrb[2].mxu1 }
 0x21b   :  { %v14955_v53 = vadd.f32 %v781_v47, %v16382_v35  ;;  %v783_v56 = vpop.f32.mrb[3].mxu0  ;;  %v854_v60 = vpop.f32.mrb[3].mxu1  ;;  %v14971_v10 = vadd.f32 %v852_v50, %v16393_v51  ;;  %v16478_v50 = vpack.c.bf16 %v1141_v41, %v1137_v33 }
 0x21c   :  { %v14956_v63 = vadd.f32 %v783_v56, %v16385_v38  ;;  %v14972_v13 = vadd.f32 %v854_v60, %v16400_v59  ;;  %v1143_v56 = vld [vmem:[%s21015_s2 + $0x30] sm:$0xff] }
 0x21d   :  { %v11361_v2 = vmul.f32 -1.442695, %v14955_v53  ;;  %v11363_v42 = vmul.f32 -1.442695, %v14971_v10  ;;  %v1139_v53 = vld [vmem:[%s21015_s2 + $0x10] sm:$0xff] }
 0x21e   :  { %v11362_v6 = vmul.f32 -1.442695, %v14956_v63  ;;  %v16487_v60 = vpack.c.bf16 %v1143_v56, %v1139_v53  ;;  %v1146_v63 = vld [vmem:[%s21015_s2 + $0x48] sm:$0xff] }
 0x21f   :  { %15101 = vpow2.f32 %v11361_v2  ;;  %v1150_v2 = vld [vmem:[%s21015_s2 + $0x68] sm:$0xff] }
 0x220   :  { %15103 = vpow2.f32 %v11362_v6  ;;  %v1148_v6 = vld [vmem:[%s21015_s2 + $0x58] sm:$0xff]  ;;  %v16501_v10 = vpack.c.bf16 %v1150_v2, %v1146_v63 }
 0x221   :  { %15105 = vtanh.f32 %v14972_v13  ;;  %v1152_v13 = vld [vmem:[%s21015_s2 + $0x78] sm:$0xff] }
 0x222   :  { %15107 = vpow2.f32 %v11363_v42  ;;  %v1145_v42 = vld [vmem:[%s21015_s2 + $0x40] sm:$0xff] }
 0x229   :  { %v15102_v43 = vpop.eup %15101 }
 0x22a   :  { %v870_v45 = vadd.f32 1.0, %v15102_v43  ;;  %v15104_v46 = vpop.eup %15103  ;;  %v1149_v43 = vld [vmem:[%s21015_s2 + $0x60] sm:$0xff] }
 0x22b   :  { %v871_v49 = vadd.f32 1.0, %v15104_v46  ;;  %v15106_v52 = vpop.eup %15105  ;;  %v16514_v46 = vpack.c.bf16 %v1149_v43, %v1145_v42  ;;  %v1407_v42 = vld [vmem:[%s21015_s2 + $0xd8] sm:$0xff] }
 0x22c   :  { %15109 = vrcp.f32 %v870_v45  ;;  %v15108_v57 = vpop.eup %15107  ;;  %v16512_v45 = vpack.c.bf16 %v1152_v13, %v1148_v6  ;;  %v1409_v13 = vld [vmem:[%s21015_s2 + $0xe8] sm:$0xff] }
 0x22d   :  { %15111 = vrcp.f32 %v871_v49  ;;  %v872_v5 = vadd.f32 1.0, %v15108_v57  ;;  %v1147_v49 = vld [vmem:[%s21015_s2 + $0x50] sm:$0xff] }
 0x22f   :  { %15113 = vrcp.f32 %v872_v5 }
 0x236   :  { %v15110_v61 = vpop.eup %15109 }
 0x237   :  { %v881_v0 = vmul.f32 %v15110_v61, %v15106_v52  ;;  %v15112_v1 = vpop.eup %15111  ;;  %v1151_v52 = vld [vmem:[%s21015_s2 + $0x70] sm:$0xff]  ;;  %v1154_v61 = vld [vmem:[%s21015_s2 + $0x88] sm:$0xff] }
 0x238   :  { %v880_v7 = vmul.f32 %v15112_v1, %v16403_v28  ;;  %v1144_v28 = vld [vmem:[%s21015_s2 + $0x38] sm:$0xff]  ;;  %v16523_v57 = vpack.c.bf16 %v1151_v52, %v1147_v49  ;;  %v1404_v52 = vld [vmem:[%s21015_s2 + $0xc0] sm:$0xff] }
 0x239   :  { %v15114_v11 = vpop.eup %15113  ;;  %v16476_v47 = vpack.c.bf16 %v1144_v28, %v1140_v21  ;;  %v1156_v1 = vld [vmem:[%s21015_s2 + $0x98] sm:$0xff]  ;;  %v1155_v21 = vld [vmem:[%s21015_s2 + $0x90] sm:$0xff] }
 0x23a   :  { %v16447_v8 = vadd.f32 %v881_v0, %v880_v7  ;;  %v1158_v0 = vld [vmem:[%s21015_s2 + $0xa8] sm:$0xff]  ;;  %v1160_v7 = vld [vmem:[%s21015_s2 + $0xb8] sm:$0xff]  ;;  %v1159_v28 = vld [vmem:[%s21015_s2 + $0xb0] sm:$0xff] }
 0x23b   :  { %11866 = vmatprep.subr.bf16.mxu1 %v16476_v47  ;;  %v16537_v5 = vpack.c.bf16 %v1158_v0, %v1154_v61  ;;  %v16548_v17 = vpack.c.bf16 %v1160_v7, %v1156_v1  ;;  %v16559_v33 = vpack.c.bf16 %v1159_v28, %v1155_v21  ;;  %v1411_v49 = vld [vmem:[%s21015_s2 + $0xf8] sm:$0xff]  ;;  %v1408_v61 = vld [vmem:[%s21015_s2 + $0xe0] sm:$0xff]  ;;  %v1406_v7 = vld [vmem:[%s21015_s2 + $0xd0] sm:$0xff] }
 0x23c   :  { %15115 = vtanh.f32 %v16447_v8  ;;  %v16630_v0 = vpack.c.bf16 %v1411_v49, %v1407_v42  ;;  %v16632_v1 = vpack.c.bf16 %v1408_v61, %v1404_v52  ;;  %v1413_v21 = vld [vmem:[%s21015_s2 + $0x108] sm:$0xff]  ;;  %v1428_v52 = vld [vmem:[%s21015_s2 + $0x180] sm:$0xff] }
 0x23d   :  { %v1417_v28 = vld [vmem:[%s21015_s2 + $0x128] sm:$0xff]  ;;  %v1432_v61 = vld [vmem:[%s21015_s2 + $0x1a0] sm:$0xff] }
 0x246   :  { %v15116_v12 = vpop.eup %15115 }
 0x247   :  { %v16450_v15 = vmul.f32 %v15116_v12, %v15114_v11  ;;  %v1153_v11 = vld [vmem:[%s21015_s2 + $0x80] sm:$0xff] }
 0x248   :  { %v1157_v12 = vld [vmem:[%s21015_s2 + $0xa0] sm:$0xff] }
 0x249   :  { %1023 = vmatmul.mubr.f32.vlgmr.msra.gmra.mrb[4].mxu0 %v16450_v15  ;;  %1094 = vmatmul.mubr.f32.vlgmr.msra.gmra.mrb[4].mxu1 %v16450_v15  ;;  %v16550_v20 = vpack.c.bf16 %v1157_v12, %v1153_v11  ;;  %v1410_v11 = vld [vmem:[%s21015_s2 + $0xf0] sm:$0xff] }
 0x24a   :  { %1265 = vmatprep.mubr.f32.mxu0 %v21030_v3  ;;  %1336 = vmatprep.mubr.f32.mxu1 %v21030_v3  ;;  %v16641_v12 = vpack.c.bf16 %v1410_v11, %v1406_v7  ;;  %v1430_v7 = vld [vmem:[%s21015_s2 + $0x190] sm:$0xff]  ;;  %v16743_v11 = vpack.c.bf16 %v1432_v61, %v1428_v52 }
 0x24b   :  { %11836 = vmatpush1.bf16.msra.mxu0 %v16478_v50  ;;  %11868 = vmatpush1.bf16.msra.mxu1 %v16487_v60 }
 0x24c   :  { %11838 = vmatprep.subr.bf16.mxu0 %v16501_v10  ;;  %11870 = vmatprep.subr.bf16.mxu1 %v16512_v45 }
 0x24f   :  { %11840 = vmatpush1.bf16.msra.mxu0 %v16514_v46  ;;  %11872 = vmatpush1.bf16.msra.mxu1 %v16523_v57 }
 0x250   :  { %11842 = vmatprep.subr.bf16.mxu0 %v16537_v5  ;;  %11874 = vmatprep.subr.bf16.mxu1 %v16548_v17 }
 0x253   :  { %11844 = vmatpush1.bf16.msra.mxu0 %v16550_v20  ;;  %11876 = vmatpush1.bf16.msra.mxu1 %v16559_v33 }
 0x254   :  { %11846 = vmatprep.subr.bf16.mxu0 %v16140_v16  ;;  %11878 = vmatprep.subr.bf16.mxu1 %v16149_v19 }
 0x257   :  { %11848 = vmatpush1.bf16.msra.mxu0 %v16161_v23  ;;  %11880 = vmatpush1.bf16.msra.mxu1 %v16171_v26 }
 0x258   :  { %11850 = vmatprep.subr.bf16.mxu0 %v16181_v29  ;;  %11882 = vmatprep.subr.bf16.mxu1 %v16190_v32 }
 0x25b   :  { %11852 = vmatpush1.bf16.msra.mxu0 %v16202_v36  ;;  %11884 = vmatpush1.bf16.msra.mxu1 %v16212_v40 }
 0x25c   :  { %11854 = vmatprep.subr.bf16.mxu0 %v16222_v44  ;;  %11886 = vmatprep.subr.bf16.mxu1 %v16231_v48 }
 0x25f   :  { %11856 = vmatpush1.bf16.msra.mxu0 %v16243_v54  ;;  %11888 = vmatpush1.bf16.msra.mxu1 %v16253_v58 }
 0x260   :  { %11858 = vmatprep.subr.bf16.mxu0 %v16263_v62  ;;  %11890 = vmatprep.subr.bf16.mxu1 %v16272_v4 }
 0x263   :  { %11860 = vmatpush1.bf16.msra.mxu0 %v16284_v9  ;;  %11892 = vmatpush1.bf16.msra.mxu1 %v16294_v14 }
 0x264   :  { %11862 = vmatprep.subr.bf16.mxu0 %v16304_v18  ;;  %11894 = vmatprep.subr.bf16.mxu1 %v16313_v22 }
 0x267   :  { %11864 = vmatpush1.bf16.msra.mxu0 %v16319_v25  ;;  %11896 = vmatpush1.bf16.msra.mxu1 %v16323_v27 }
 0x268   :  { %11898 = vmatprep.subr.bf16.mxu0 %v16465_v24  ;;  %11930 = vmatprep.subr.bf16.mxu1 %v16476_v47 }
 0x31c   :  { %v1024_v16 = vpop.f32.mrb[4].mxu0  ;;  %v1095_v19 = vpop.f32.mrb[4].mxu1 }
 0x31d   :  { %v14957_v23 = vadd.f32 %v1024_v16, %v16382_v35  ;;  %v1026_v26 = vpop.f32.mrb[5].mxu0  ;;  %v1097_v29 = vpop.f32.mrb[5].mxu1  ;;  %v14973_v44 = vadd.f32 %v1095_v19, %v16393_v51  ;;  %v1415_v16 = vld [vmem:[%s21015_s2 + $0x118] sm:$0xff]  ;;  %v16655_v19 = vpack.c.bf16 %v1417_v28, %v1413_v21  ;;  %v1434_v21 = vld [vmem:[%s21015_s2 + $0x1b0] sm:$0xff]  ;;  %v1437_v28 = vld [vmem:[%s21015_s2 + $0x1c8] sm:$0xff] }
 0x31e   :  { %v14958_v32 = vadd.f32 %v1026_v26, %v16385_v38  ;;  %v14974_v48 = vadd.f32 %v1097_v29, %v16400_v59  ;;  %v1412_v26 = vld [vmem:[%s21015_s2 + $0x100] sm:$0xff] }
 0x31f   :  { %v11364_v36 = vmul.f32 -1.442695, %v14957_v23  ;;  %v11366_v54 = vmul.f32 -1.442695, %v14973_v44  ;;  %v1419_v23 = vld [vmem:[%s21015_s2 + $0x138] sm:$0xff]  ;;  %v1416_v29 = vld [vmem:[%s21015_s2 + $0x120] sm:$0xff] }
 0x320   :  { %v11365_v40 = vmul.f32 -1.442695, %v14958_v32  ;;  %v16666_v32 = vpack.c.bf16 %v1419_v23, %v1415_v16  ;;  %v1418_v44 = vld [vmem:[%s21015_s2 + $0x130] sm:$0xff]  ;;  %v1441_v16 = vld [vmem:[%s21015_s2 + $0x1e8] sm:$0xff]  ;;  %v16756_v23 = vpack.c.bf16 %v1434_v21, %v1430_v7 }
 0x321   :  { %15117 = vpow2.f32 %v11364_v36  ;;  %v16668_v36 = vpack.c.bf16 %v1416_v29, %v1412_v26  ;;  %v16758_v26 = vpack.c.bf16 %v1441_v16, %v1437_v28  ;;  %v1439_v29 = vld [vmem:[%s21015_s2 + $0x1d8] sm:$0xff] }
 0x322   :  { %15119 = vpow2.f32 %v11365_v40  ;;  %v1414_v40 = vld [vmem:[%s21015_s2 + $0x110] sm:$0xff] }
 0x323   :  { %15121 = vtanh.f32 %v14974_v48  ;;  %v16677_v48 = vpack.c.bf16 %v1418_v44, %v1414_v40  ;;  %v1443_v40 = vld [vmem:[%s21015_s2 + $0x1f8] sm:$0xff]  ;;  %v1436_v44 = vld [vmem:[%s21015_s2 + $0x1c0] sm:$0xff] }
 0x324   :  { %15123 = vpow2.f32 %v11366_v54  ;;  %v1421_v54 = vld [vmem:[%s21015_s2 + $0x148] sm:$0xff] }
 0x32b   :  { %v15118_v58 = vpop.eup %15117 }
 0x32c   :  { %v1113_v62 = vadd.f32 1.0, %v15118_v58  ;;  %v15120_v4 = vpop.eup %15119  ;;  %v1425_v58 = vld [vmem:[%s21015_s2 + $0x168] sm:$0xff] }
 0x32d   :  { %v1114_v9 = vadd.f32 1.0, %v15120_v4  ;;  %v15122_v14 = vpop.eup %15121  ;;  %v16691_v4 = vpack.c.bf16 %v1425_v58, %v1421_v54  ;;  %v16769_v54 = vpack.c.bf16 %v1443_v40, %v1439_v29  ;;  %v1440_v58 = vld [vmem:[%s21015_s2 + $0x1e0] sm:$0xff] }
 0x32e   :  { %15125 = vrcp.f32 %v1113_v62  ;;  %v15124_v18 = vpop.eup %15123  ;;  %v1423_v62 = vld [vmem:[%s21015_s2 + $0x158] sm:$0xff] }
 0x32f   :  { %15127 = vrcp.f32 %v1114_v9  ;;  %v1115_v41 = vadd.f32 1.0, %v15124_v18  ;;  %v1427_v9 = vld [vmem:[%s21015_s2 + $0x178] sm:$0xff]  ;;  %v1424_v18 = vld [vmem:[%s21015_s2 + $0x160] sm:$0xff] }
 0x331   :  { %15129 = vrcp.f32 %v1115_v41  ;;  %v1426_v41 = vld [vmem:[%s21015_s2 + $0x170] sm:$0xff] }
 0x338   :  { %v15126_v22 = vpop.eup %15125 }
 0x339   :  { %v1124_v25 = vmul.f32 %v15126_v22, %v15122_v14  ;;  %v15128_v27 = vpop.eup %15127  ;;  %v1420_v14 = vld [vmem:[%s21015_s2 + $0x140] sm:$0xff]  ;;  %v16702_v22 = vpack.c.bf16 %v1427_v9, %v1423_v62  ;;  %v1438_v62 = vld [vmem:[%s21015_s2 + $0x1d0] sm:$0xff] }
 0x33a   :  { %v1123_v53 = vmul.f32 %v15128_v27, %v16447_v8  ;;  %v1405_v8 = vld [vmem:[%s21015_s2 + $0xc8] sm:$0xff]  ;;  %v1422_v27 = vld [vmem:[%s21015_s2 + $0x150] sm:$0xff] }
 0x33b   :  { %v15130_v63 = vpop.eup %15129  ;;  %v16619_v43 = vpack.c.bf16 %v1409_v13, %v1405_v8  ;;  %v1431_v8 = vld [vmem:[%s21015_s2 + $0x198] sm:$0xff]  ;;  %v1442_v9 = vld [vmem:[%s21015_s2 + $0x1f0] sm:$0xff] }
 0x33c   :  { %v16591_v56 = vadd.f32 %v1124_v25, %v1123_v53  ;;  %v16704_v25 = vpack.c.bf16 %v1424_v18, %v1420_v14  ;;  %v1429_v53 = vld [vmem:[%s21015_s2 + $0x188] sm:$0xff]  ;;  %v1435_v13 = vld [vmem:[%s21015_s2 + $0x1b8] sm:$0xff]  ;;  %v16781_v14 = vpack.c.bf16 %v1440_v58, %v1436_v44  ;;  %v16785_v18 = vpack.c.bf16 %v1442_v9, %v1438_v62 }
 0x33d   :  { %v16731_v49 = vpack.c.bf16 %v1435_v13, %v1431_v8 }
 0x33e   :  { %15131 = vtanh.f32 %v16591_v56 }
 0x348   :  { %v15132_v2 = vpop.eup %15131 }
 0x349   :  { %v16594_v6 = vmul.f32 %v15132_v2, %v15130_v63  ;;  %v16716_v63 = vpack.c.bf16 %v1426_v41, %v1422_v27  ;;  %v1433_v2 = vld [vmem:[%s21015_s2 + $0x1a8] sm:$0xff] }
 0x34a   :  { %v16729_v42 = vpack.c.bf16 %v1433_v2, %v1429_v53 }
 0x34b   :  { %1266 = vmatmul.mubr.f32.vlgmr.msra.gmra.mrb[6].mxu0 %v16594_v6  ;;  %1337 = vmatmul.mubr.f32.vlgmr.msra.gmra.mrb[6].mxu1 %v16594_v6 }
 0x34c   :  { %11900 = vmatpush1.bf16.msra.mxu0 %v16478_v50  ;;  %11932 = vmatpush1.bf16.msra.mxu1 %v16487_v60 }
 0x34d   :  { %11902 = vmatprep.subr.bf16.mxu0 %v16501_v10  ;;  %11934 = vmatprep.subr.bf16.mxu1 %v16512_v45 }
 0x34e   :  { %1508 = vmatprep.mubr.f32.mxu0 %v21030_v3  ;;  %1579 = vmatprep.mubr.f32.mxu1 %v21030_v3 }
 0x350   :  { %11904 = vmatpush1.bf16.msra.mxu0 %v16514_v46  ;;  %11936 = vmatpush1.bf16.msra.mxu1 %v16523_v57 }
 0x351   :  { %11906 = vmatprep.subr.bf16.mxu0 %v16537_v5  ;;  %11938 = vmatprep.subr.bf16.mxu1 %v16548_v17 }
 0x354   :  { %11908 = vmatpush1.bf16.msra.mxu0 %v16550_v20  ;;  %11940 = vmatpush1.bf16.msra.mxu1 %v16559_v33 }
 0x355   :  { %11910 = vmatprep.subr.bf16.mxu0 %v16619_v43  ;;  %11942 = vmatprep.subr.bf16.mxu1 %v16630_v0 }
 0x358   :  { %11912 = vmatpush1.bf16.msra.mxu0 %v16632_v1  ;;  %11944 = vmatpush1.bf16.msra.mxu1 %v16641_v12 }
 0x359   :  { %11914 = vmatprep.subr.bf16.mxu0 %v16655_v19  ;;  %11946 = vmatprep.subr.bf16.mxu1 %v16666_v32 }
 0x35c   :  { %11916 = vmatpush1.bf16.msra.mxu0 %v16668_v36  ;;  %11948 = vmatpush1.bf16.msra.mxu1 %v16677_v48 }
 0x35d   :  { %11918 = vmatprep.subr.bf16.mxu0 %v16691_v4  ;;  %11950 = vmatprep.subr.bf16.mxu1 %v16702_v22 }
 0x360   :  { %11920 = vmatpush1.bf16.msra.mxu0 %v16704_v25  ;;  %11952 = vmatpush1.bf16.msra.mxu1 %v16716_v63 }
 0x361   :  { %11922 = vmatprep.subr.bf16.mxu0 %v16729_v42  ;;  %11954 = vmatprep.subr.bf16.mxu1 %v16731_v49 }
 0x364   :  { %11924 = vmatpush1.bf16.msra.mxu0 %v16743_v11  ;;  %11956 = vmatpush1.bf16.msra.mxu1 %v16756_v23 }
 0x365   :  { %11926 = vmatprep.subr.bf16.mxu0 %v16758_v26  ;;  %11958 = vmatprep.subr.bf16.mxu1 %v16769_v54 }
 0x368   :  { %11928 = vmatpush1.bf16.msra.mxu0 %v16781_v14  ;;  %11960 = vmatpush1.bf16.msra.mxu1 %v16785_v18 }
 0x369   :  { %11962 = vmatprep.subr.bf16.mxu0 %v16465_v24  ;;  %11994 = vmatprep.subr.bf16.mxu1 %v16476_v47 }
 0x41e   :  { %v1267_v27 = vpop.f32.mrb[6].mxu0  ;;  %v1338_v41 = vpop.f32.mrb[6].mxu1 }
 0x41f   :  { %v14959_v53 = vadd.f32 %v1267_v27, %v16382_v35  ;;  %v1269_v2 = vpop.f32.mrb[7].mxu0  ;;  %v1340_v8 = vpop.f32.mrb[7].mxu1  ;;  %v14975_v7 = vadd.f32 %v1338_v41, %v16393_v51 }
 0x420   :  { %v14960_v13 = vadd.f32 %v1269_v2, %v16385_v38  ;;  %v14976_v21 = vadd.f32 %v1340_v8, %v16400_v59 }
 0x421   :  { %v11367_v52 = vmul.f32 -1.442695, %v14959_v53  ;;  %v11369_v28 = vmul.f32 -1.442695, %v14975_v7 }
 0x422   :  { %v11368_v61 = vmul.f32 -1.442695, %v14960_v13 }
 0x423   :  { %15133 = vpow2.f32 %v11367_v52 }
 0x424   :  { %15135 = vpow2.f32 %v11368_v61 }
 0x425   :  { %15137 = vtanh.f32 %v14976_v21 }
 0x426   :  { %15139 = vpow2.f32 %v11369_v28 }
 0x42d   :  { %v15134_v16 = vpop.eup %15133 }
 0x42e   :  { %v1356_v29 = vadd.f32 1.0, %v15134_v16  ;;  %v15136_v40 = vpop.eup %15135 }
 0x42f   :  { %v1357_v44 = vadd.f32 1.0, %v15136_v40  ;;  %v15138_v58 = vpop.eup %15137 }
 0x430   :  { %15141 = vrcp.f32 %v1356_v29  ;;  %v15140_v62 = vpop.eup %15139 }
 0x431   :  { %15143 = vrcp.f32 %v1357_v44  ;;  %v1358_v2 = vadd.f32 1.0, %v15140_v62 }
 0x433   :  { %15145 = vrcp.f32 %v1358_v2 }
 0x43a   :  { %v15142_v9 = vpop.eup %15141 }
 0x43b   :  { %v1367_v27 = vmul.f32 %v15142_v9, %v15138_v58  ;;  %v15144_v53 = vpop.eup %15143 }
 0x43c   :  { %v1366_v13 = vmul.f32 %v15144_v53, %v16591_v56 }
 0x43d   :  { %v15146_v8 = vpop.eup %15145 }
 0x43e   :  { %v16797_v41 = vadd.f32 %v1367_v27, %v1366_v13 }
 0x440   :  { %15147 = vtanh.f32 %v16797_v41 }
 0x44a   :  { %v15148_v52 = vpop.eup %15147 }
 0x44b   :  { %v16800_v61 = vmul.f32 %v15148_v52, %v15146_v8 }
 0x44d   :  { %1509 = vmatmul.mubr.f32.vlgmr.msra.gmra.mrb[8].mxu0 %v16800_v61  ;;  %1580 = vmatmul.mubr.f32.vlgmr.msra.gmra.mrb[8].mxu1 %v16800_v61 }
 0x44e   :  { %11964 = vmatpush1.bf16.msra.mxu0 %v16478_v50  ;;  %11996 = vmatpush1.bf16.msra.mxu1 %v16487_v60 }
 0x44f   :  { %11966 = vmatprep.subr.bf16.mxu0 %v16501_v10  ;;  %11998 = vmatprep.subr.bf16.mxu1 %v16512_v45 }
 0x450   :  { %1751 = vmatprep.mubr.f32.mxu0 %v21030_v3  ;;  %1822 = vmatprep.mubr.f32.mxu1 %v21030_v3 }
 0x452   :  { %11968 = vmatpush1.bf16.msra.mxu0 %v16514_v46  ;;  %12000 = vmatpush1.bf16.msra.mxu1 %v16523_v57 }
 0x453   :  { %11970 = vmatprep.subr.bf16.mxu0 %v16537_v5  ;;  %12002 = vmatprep.subr.bf16.mxu1 %v16548_v17 }
 0x456   :  { %11972 = vmatpush1.bf16.msra.mxu0 %v16550_v20  ;;  %12004 = vmatpush1.bf16.msra.mxu1 %v16559_v33 }
 0x457   :  { %11974 = vmatprep.subr.bf16.mxu0 %v16619_v43  ;;  %12006 = vmatprep.subr.bf16.mxu1 %v16630_v0 }
 0x45a   :  { %11976 = vmatpush1.bf16.msra.mxu0 %v16632_v1  ;;  %12008 = vmatpush1.bf16.msra.mxu1 %v16641_v12 }
 0x45b   :  { %11978 = vmatprep.subr.bf16.mxu0 %v16655_v19  ;;  %12010 = vmatprep.subr.bf16.mxu1 %v16666_v32 }
 0x45e   :  { %11980 = vmatpush1.bf16.msra.mxu0 %v16668_v36  ;;  %12012 = vmatpush1.bf16.msra.mxu1 %v16677_v48 }
 0x45f   :  { %11982 = vmatprep.subr.bf16.mxu0 %v16691_v4  ;;  %12014 = vmatprep.subr.bf16.mxu1 %v16702_v22 }
 0x462   :  { %11984 = vmatpush1.bf16.msra.mxu0 %v16704_v25  ;;  %12016 = vmatpush1.bf16.msra.mxu1 %v16716_v63 }
 0x463   :  { %11986 = vmatprep.subr.bf16.mxu0 %v16729_v42  ;;  %12018 = vmatprep.subr.bf16.mxu1 %v16731_v49 }
 0x466   :  { %11988 = vmatpush1.bf16.msra.mxu0 %v16743_v11  ;;  %12020 = vmatpush1.bf16.msra.mxu1 %v16756_v23 }
 0x467   :  { %11990 = vmatprep.subr.bf16.mxu0 %v16758_v26  ;;  %12022 = vmatprep.subr.bf16.mxu1 %v16769_v54 }
 0x46a   :  { %11992 = vmatpush1.bf16.msra.mxu0 %v16781_v14  ;;  %12024 = vmatpush1.bf16.msra.mxu1 %v16785_v18 }
 0x46b   :  { %12026 = vmatprep.subr.bf16.mxu0 %v16465_v24  ;;  %12058 = vmatprep.subr.bf16.mxu1 %v16476_v47 }
 0x520   :  { %v1510_v56 = vpop.f32.mrb[8].mxu0  ;;  %v1581_v7 = vpop.f32.mrb[8].mxu1 }
 0x521   :  { %v14961_v21 = vadd.f32 %v1510_v56, %v16382_v35  ;;  %v1512_v28 = vpop.f32.mrb[9].mxu0  ;;  %v1583_v16 = vpop.f32.mrb[9].mxu1  ;;  %v14977_v58 = vadd.f32 %v1581_v7, %v16393_v51 }
 0x522   :  { %v14962_v29 = vadd.f32 %v1512_v28, %v16385_v38  ;;  %v14978_v62 = vadd.f32 %v1583_v16, %v16400_v59 }
 0x523   :  { %v11370_v40 = vmul.f32 -1.442695, %v14961_v21  ;;  %v11372_v9 = vmul.f32 -1.442695, %v14977_v58 }
 0x524   :  { %v11371_v44 = vmul.f32 -1.442695, %v14962_v29 }
 0x525   :  { %15149 = vpow2.f32 %v11370_v40 }
 0x526   :  { %15151 = vpow2.f32 %v11371_v44 }
 0x527   :  { %15153 = vtanh.f32 %v14978_v62 }
 0x528   :  { %15155 = vpow2.f32 %v11372_v9 }
 0x52f   :  { %v15150_v24 = vpop.eup %15149 }
 0x530   :  { %v1599_v27 = vadd.f32 1.0, %v15150_v24  ;;  %v15152_v47 = vpop.eup %15151 }
 0x531   :  { %v1600_v53 = vadd.f32 1.0, %v15152_v47  ;;  %v15154_v2 = vpop.eup %15153 }
 0x532   :  { %15157 = vrcp.f32 %v1599_v27  ;;  %v15156_v13 = vpop.eup %15155 }
 0x533   :  { %15159 = vrcp.f32 %v1600_v53  ;;  %v1601_v21 = vadd.f32 1.0, %v15156_v13 }
 0x535   :  { %15161 = vrcp.f32 %v1601_v21 }
 0x53c   :  { %v15158_v8 = vpop.eup %15157 }
 0x53d   :  { %v1610_v52 = vmul.f32 %v15158_v8, %v15154_v2  ;;  %v15160_v56 = vpop.eup %15159 }
 0x53e   :  { %v1609_v28 = vmul.f32 %v15160_v56, %v16797_v41 }
 0x53f   :  { %v15162_v16 = vpop.eup %15161 }
 0x540   :  { %v16843_v7 = vadd.f32 %v1610_v52, %v1609_v28 }
 0x542   :  { %15163 = vtanh.f32 %v16843_v7 }
 0x54c   :  { %v15164_v29 = vpop.eup %15163 }
 0x54d   :  { %v16846_v40 = vmul.f32 %v15164_v29, %v15162_v16  ;;  %v2114_v16 = vld [vmem:[%s21015_s2 + $0x28] sm:$0xff]  ;;  %v2112_v29 = vld [vmem:[%s21015_s2 + $0x18] sm:$0xff] }
 0x54f   :  { %1752 = vmatmul.mubr.f32.vlgmr.msra.gmra.mrb[10].mxu0 %v16846_v40  ;;  %1823 = vmatmul.mubr.f32.vlgmr.msra.gmra.mrb[10].mxu1 %v16846_v40 }
 0x550   :  { %12028 = vmatpush1.bf16.msra.mxu0 %v16478_v50  ;;  %12060 = vmatpush1.bf16.msra.mxu1 %v16487_v60 }
 0x551   :  { %12030 = vmatprep.subr.bf16.mxu0 %v16501_v10  ;;  %12062 = vmatprep.subr.bf16.mxu1 %v16512_v45 }
 0x552   :  { %1994 = vmatprep.mubr.f32.mxu0 %v21030_v3  ;;  %2065 = vmatprep.mubr.f32.mxu1 %v21030_v3 }
 0x554   :  { %12032 = vmatpush1.bf16.msra.mxu0 %v16514_v46  ;;  %12064 = vmatpush1.bf16.msra.mxu1 %v16523_v57 }
 0x555   :  { %12034 = vmatprep.subr.bf16.mxu0 %v16537_v5  ;;  %12066 = vmatprep.subr.bf16.mxu1 %v16548_v17 }
 0x558   :  { %12036 = vmatpush1.bf16.msra.mxu0 %v16550_v20  ;;  %12068 = vmatpush1.bf16.msra.mxu1 %v16559_v33 }
 0x559   :  { %12038 = vmatprep.subr.bf16.mxu0 %v16619_v43  ;;  %12070 = vmatprep.subr.bf16.mxu1 %v16630_v0 }
 0x55c   :  { %12040 = vmatpush1.bf16.msra.mxu0 %v16632_v1  ;;  %12072 = vmatpush1.bf16.msra.mxu1 %v16641_v12 }
 0x55d   :  { %12042 = vmatprep.subr.bf16.mxu0 %v16655_v19  ;;  %12074 = vmatprep.subr.bf16.mxu1 %v16666_v32 }
 0x560   :  { %12044 = vmatpush1.bf16.msra.mxu0 %v16668_v36  ;;  %12076 = vmatpush1.bf16.msra.mxu1 %v16677_v48 }
 0x561   :  { %12046 = vmatprep.subr.bf16.mxu0 %v16691_v4  ;;  %12078 = vmatprep.subr.bf16.mxu1 %v16702_v22 }
 0x564   :  { %12048 = vmatpush1.bf16.msra.mxu0 %v16704_v25  ;;  %12080 = vmatpush1.bf16.msra.mxu1 %v16716_v63 }
 0x565   :  { %12050 = vmatprep.subr.bf16.mxu0 %v16729_v42  ;;  %12082 = vmatprep.subr.bf16.mxu1 %v16731_v49 }
 0x568   :  { %12052 = vmatpush1.bf16.msra.mxu0 %v16743_v11  ;;  %12084 = vmatpush1.bf16.msra.mxu1 %v16756_v23 }
 0x569   :  { %12054 = vmatprep.subr.bf16.mxu0 %v16758_v26  ;;  %12086 = vmatprep.subr.bf16.mxu1 %v16769_v54 }
 0x56c   :  { %12056 = vmatpush1.bf16.msra.mxu0 %v16781_v14  ;;  %12088 = vmatpush1.bf16.msra.mxu1 %v16785_v18 }
 0x622   :  { %v1753_v50 = vpop.f32.mrb[10].mxu0  ;;  %v1824_v60 = vpop.f32.mrb[10].mxu1 }
 0x623   :  { %v14963_v10 = vadd.f32 %v1753_v50, %v16382_v35  ;;  %v1755_v45 = vpop.f32.mrb[11].mxu0  ;;  %v1826_v46 = vpop.f32.mrb[11].mxu1  ;;  %v14979_v20 = vadd.f32 %v1824_v60, %v16393_v51  ;;  %v2116_v60 = vld [vmem:[%s21015_s2 + $0x38] sm:$0xff] }
 0x624   :  { %v14964_v57 = vadd.f32 %v1755_v45, %v16385_v38  ;;  %v14980_v33 = vadd.f32 %v1826_v46, %v16400_v59  ;;  %v2113_v45 = vld [vmem:[%s21015_s2 + $0x20] sm:$0xff]  ;;  %v12121_v46 = vpack.c.bf16 %v2116_v60, %v2112_v29 }
 0x625   :  { %v11373_v5 = vmul.f32 -1.442695, %v14963_v10  ;;  %v11375_v41 = vmul.f32 -1.442695, %v14979_v20  ;;  %v2109_v10 = vld [vmem:[%s21015_s2] sm:$0xff] }
 0x626   :  { %v11374_v17 = vmul.f32 -1.442695, %v14964_v57  ;;  %v12091_v57 = vpack.c.bf16 %v2113_v45, %v2109_v10  ;;  %12122 = vmatprep.subr.bf16.mxu1 %v12121_v46  ;;  %v2125_v29 = vld [vmem:[%s21015_s2 + $0x80] sm:$0xff]  ;;  %v2127_v45 = vld [vmem:[%s21015_s2 + $0x90] sm:$0xff] }
 0x627   :  { %15165 = vpow2.f32 %v11373_v5  ;;  %v2111_v5 = vld [vmem:[%s21015_s2 + $0x10] sm:$0xff] }
 0x628   :  { %15167 = vpow2.f32 %v11374_v17  ;;  %v2115_v17 = vld [vmem:[%s21015_s2 + $0x30] sm:$0xff] }
 0x629   :  { %15169 = vtanh.f32 %v14980_v33  ;;  %v12123_v20 = vpack.c.bf16 %v2115_v17, %v2111_v5  ;;  %v2118_v33 = vld [vmem:[%s21015_s2 + $0x48] sm:$0xff]  ;;  %v2131_v46 = vld [vmem:[%s21015_s2 + $0xb0] sm:$0xff] }
 0x62a   :  { %15171 = vpow2.f32 %v11375_v41  ;;  %v2122_v41 = vld [vmem:[%s21015_s2 + $0x68] sm:$0xff] }
 0x631   :  { %v15166_v44 = vpop.eup %15165 }
 0x632   :  { %v1842_v58 = vadd.f32 1.0, %v15166_v44  ;;  %v15168_v62 = vpop.eup %15167  ;;  %v2120_v44 = vld [vmem:[%s21015_s2 + $0x58] sm:$0xff] }
 0x633   :  { %v1843_v9 = vadd.f32 1.0, %v15168_v62  ;;  %v15170_v24 = vpop.eup %15169  ;;  %v2124_v62 = vld [vmem:[%s21015_s2 + $0x78] sm:$0xff] }
 0x634   :  { %15173 = vrcp.f32 %v1842_v58  ;;  %v15172_v27 = vpop.eup %15171  ;;  %v12093_v58 = vpack.c.bf16 %v2122_v41, %v2118_v33 }
 0x635   :  { %15175 = vrcp.f32 %v1843_v9  ;;  %v1844_v13 = vadd.f32 1.0, %v15172_v27  ;;  %v2117_v9 = vld [vmem:[%s21015_s2 + $0x40] sm:$0xff]  ;;  %v12125_v27 = vpack.c.bf16 %v2124_v62, %v2120_v44 }
 0x637   :  { %15177 = vrcp.f32 %v1844_v13 }
 0x63e   :  { %v15174_v47 = vpop.eup %15173 }
 0x63f   :  { %v1853_v53 = vmul.f32 %v15174_v47, %v15170_v24  ;;  %v15176_v2 = vpop.eup %15175  ;;  %v2121_v24 = vld [vmem:[%s21015_s2 + $0x60] sm:$0xff] }
 0x640   :  { %v1852_v8 = vmul.f32 %v15176_v2, %v16843_v7  ;;  %v2110_v7 = vld [vmem:[%s21015_s2 + $0x8] sm:$0xff]  ;;  %v12095_v47 = vpack.c.bf16 %v2121_v24, %v2117_v9  ;;  %v2123_v2 = vld [vmem:[%s21015_s2 + $0x70] sm:$0xff]  ;;  %v2353_v24 = vld [vmem:[%s21018_s4] sm:$0xff] }
 0x641   :  { %v15178_v56 = vpop.eup %15177  ;;  %v12089_v50 = vpack.c.bf16 %v2114_v16, %v2110_v7  ;;  %v2132_v16 = vld [vmem:[%s21015_s2 + $0xb8] sm:$0xff] }
 0x642   :  { %v16887_v52 = vadd.f32 %v1853_v53, %v1852_v8  ;;  %v2119_v53 = vld [vmem:[%s21015_s2 + $0x50] sm:$0xff]  ;;  %v2126_v8 = vld [vmem:[%s21015_s2 + $0x88] sm:$0xff] }
 0x643   :  { %12090 = vmatprep.subr.bf16.mxu0 %v12089_v50  ;;  %v12127_v13 = vpack.c.bf16 %v2123_v2, %v2119_v53  ;;  %v2129_v50 = vld [vmem:[%s21015_s2 + $0xa0] sm:$0xff]  ;;  %v2362_v53 = vld [vmem:[%s21018_s4 + $0x48] sm:$0xff] }
 0x644   :  { %15179 = vtanh.f32 %v16887_v52  ;;  %v12099_v10 = vpack.c.bf16 %v2129_v50, %v2125_v29  ;;  %v2366_v2 = vld [vmem:[%s21018_s4 + $0x68] sm:$0xff]  ;;  %v2361_v29 = vld [vmem:[%s21018_s4 + $0x40] sm:$0xff] }
 0x645   :  { %v2365_v50 = vld [vmem:[%s21018_s4 + $0x60] sm:$0xff] }
 0x64e   :  { %v15180_v21 = vpop.eup %15179 }
 0x64f   :  { %v16890_v28 = vmul.f32 %v15180_v21, %v15178_v56  ;;  %v2130_v56 = vld [vmem:[%s21015_s2 + $0xa8] sm:$0xff]  ;;  %v2128_v21 = vld [vmem:[%s21015_s2 + $0x98] sm:$0xff] }
 0x650   :  { %v12097_v7 = vpack.c.bf16 %v2130_v56, %v2126_v8  ;;  %v12129_v60 = vpack.c.bf16 %v2132_v16, %v2128_v21  ;;  %v2368_v8 = vld [vmem:[%s21018_s4 + $0x78] sm:$0xff] }
 0x651   :  { %1995 = vmatmul.mubr.f32.vlgmr.msra.gmra.mrb[12].mxu0 %v16890_v28  ;;  %2066 = vmatmul.mubr.f32.vlgmr.msra.gmra.mrb[12].mxu1 %v16890_v28 }
 0x652   :  { %2237 = vmatprep.mubr.f32.mxu0 %v21030_v3  ;;  %2308 = vmatprep.mubr.f32.mxu1 %v21030_v3 }
 0x653   :  { %12092 = vmatpush1.bf16.msra.mxu0 %v12091_v57  ;;  %12124 = vmatpush1.bf16.msra.mxu1 %v12123_v20  ;;  %v12131_v57 = vpack.c.bf16 %v2131_v46, %v2127_v45  ;;  %v2363_v46 = vld [vmem:[%s21018_s4 + $0x50] sm:$0xff] }
 0x654   :  { %12094 = vmatprep.subr.bf16.mxu0 %v12093_v58  ;;  %12126 = vmatprep.subr.bf16.mxu1 %v12125_v27  ;;  %v2357_v27 = vld [vmem:[%s21018_s4 + $0x20] sm:$0xff] }
 0x657   :  { %12096 = vmatpush1.bf16.msra.mxu0 %v12095_v47  ;;  %12128 = vmatpush1.bf16.msra.mxu1 %v12127_v13  ;;  %v2355_v47 = vld [vmem:[%s21018_s4 + $0x10] sm:$0xff]  ;;  %v2364_v13 = vld [vmem:[%s21018_s4 + $0x58] sm:$0xff] }
 0x658   :  { %12098 = vmatprep.subr.bf16.mxu0 %v12097_v7  ;;  %12130 = vmatprep.subr.bf16.mxu1 %v12129_v60  ;;  %v12155_v7 = vpack.c.bf16 %v2357_v27, %v2353_v24  ;;  %v12189_v45 = vpack.c.bf16 %v2368_v8, %v2364_v13  ;;  %v2387_v13 = vld [vmem:[%s21018_s4 + $0x110] sm:$0xff] }
 0x659   :  { %v2391_v8 = vld [vmem:[%s21018_s4 + $0x130] sm:$0xff] }
 0x65b   :  { %12100 = vmatpush1.bf16.msra.mxu0 %v12099_v10  ;;  %12132 = vmatpush1.bf16.msra.mxu1 %v12131_v57  ;;  %v12157_v10 = vpack.c.bf16 %v2366_v2, %v2362_v53  ;;  %v2367_v57 = vld [vmem:[%s21018_s4 + $0x70] sm:$0xff] }
 0x65c   :  { %12102 = vmatprep.subr.bf16.mxu0 %v16619_v43  ;;  %12134 = vmatprep.subr.bf16.mxu1 %v16630_v0  ;;  %v2354_v43 = vld [vmem:[%s21018_s4 + $0x8] sm:$0xff] }
 0x65d   :  { %v2358_v0 = vld [vmem:[%s21018_s4 + $0x28] sm:$0xff] }
 0x65f   :  { %12104 = vmatpush1.bf16.msra.mxu0 %v16632_v1  ;;  %12136 = vmatpush1.bf16.msra.mxu1 %v16641_v12  ;;  %v2356_v1 = vld [vmem:[%s21018_s4 + $0x18] sm:$0xff] }
 0x660   :  { %12106 = vmatprep.subr.bf16.mxu0 %v16655_v19  ;;  %12138 = vmatprep.subr.bf16.mxu1 %v16666_v32  ;;  %v2360_v12 = vld [vmem:[%s21018_s4 + $0x38] sm:$0xff]  ;;  %v12153_v19 = vpack.c.bf16 %v2358_v0, %v2354_v43  ;;  %v2370_v43 = vld [vmem:[%s21018_s4 + $0x88] sm:$0xff] }
 0x661   :  { %v12185_v32 = vpack.c.bf16 %v2360_v12, %v2356_v1  ;;  %v2374_v0 = vld [vmem:[%s21018_s4 + $0xa8] sm:$0xff]  ;;  %v2372_v1 = vld [vmem:[%s21018_s4 + $0x98] sm:$0xff] }
 0x662   :  { %v2376_v12 = vld [vmem:[%s21018_s4 + $0xb8] sm:$0xff] }
 0x663   :  { %12108 = vmatpush1.bf16.msra.mxu0 %v16668_v36  ;;  %12140 = vmatpush1.bf16.msra.mxu1 %v16677_v48 }
 0x664   :  { %12110 = vmatprep.subr.bf16.mxu0 %v16691_v4  ;;  %12142 = vmatprep.subr.bf16.mxu1 %v16702_v22 }
 0x667   :  { %12112 = vmatpush1.bf16.msra.mxu0 %v16704_v25  ;;  %12144 = vmatpush1.bf16.msra.mxu1 %v16716_v63 }
 0x668   :  { %12114 = vmatprep.subr.bf16.mxu0 %v16729_v42  ;;  %12146 = vmatprep.subr.bf16.mxu1 %v16731_v49 }
 0x66b   :  { %12116 = vmatpush1.bf16.msra.mxu0 %v16743_v11  ;;  %12148 = vmatpush1.bf16.msra.mxu1 %v16756_v23 }
 0x66c   :  { %12118 = vmatprep.subr.bf16.mxu0 %v16758_v26  ;;  %12150 = vmatprep.subr.bf16.mxu1 %v16769_v54 }
 0x66f   :  { %12120 = vmatpush1.bf16.msra.mxu0 %v16781_v14  ;;  %12152 = vmatpush1.bf16.msra.mxu1 %v16785_v18 }
 0x670   :  { %12154 = vmatprep.subr.bf16.mxu0 %v12153_v19  ;;  %12186 = vmatprep.subr.bf16.mxu1 %v12185_v32  ;;  %v12159_v19 = vpack.c.bf16 %v2365_v50, %v2361_v29  ;;  %v12191_v32 = vpack.c.bf16 %v2367_v57, %v2363_v46  ;;  %v12203_v50 = vpack.c.bf16 %v2391_v8, %v2387_v13  ;;  %v2714_v13 = vld [vmem:[%s21019_s5 + $0x68] sm:$0xff]  ;;  %v2712_v8 = vld [vmem:[%s21019_s5 + $0x58] sm:$0xff] }
 0x724   :  { %v1996_v36 = vpop.f32.mrb[12].mxu0  ;;  %v2067_v48 = vpop.f32.mrb[12].mxu1 }
 0x725   :  { %v14965_v4 = vadd.f32 %v1996_v36, %v16382_v35  ;;  %v1998_v22 = vpop.f32.mrb[13].mxu0  ;;  %v2069_v25 = vpop.f32.mrb[13].mxu1  ;;  %v14981_v11 = vadd.f32 %v2067_v48, %v16393_v51  ;;  %v2369_v36 = vld [vmem:[%s21018_s4 + $0x80] sm:$0xff] }
 0x726   :  { %v14966_v63 = vadd.f32 %v1998_v22, %v16385_v38  ;;  %v14982_v23 = vadd.f32 %v2069_v25, %v16400_v59  ;;  %v2373_v48 = vld [vmem:[%s21018_s4 + $0xa0] sm:$0xff]  ;;  %v12193_v22 = vpack.c.bf16 %v2376_v12, %v2372_v1  ;;  %v2371_v25 = vld [vmem:[%s21018_s4 + $0x90] sm:$0xff]  ;;  %v2402_v1 = vld [vmem:[%s21018_s4 + $0x188] sm:$0xff] }
 0x727   :  { %v11376_v42 = vmul.f32 -1.442695, %v14965_v4  ;;  %v11378_v26 = vmul.f32 -1.442695, %v14981_v11  ;;  %v12161_v4 = vpack.c.bf16 %v2374_v0, %v2370_v43  ;;  %v2380_v11 = vld [vmem:[%s21018_s4 + $0xd8] sm:$0xff]  ;;  %v2395_v43 = vld [vmem:[%s21018_s4 + $0x150] sm:$0xff] }
 0x728   :  { %v11377_v49 = vmul.f32 -1.442695, %v14966_v63  ;;  %v2375_v63 = vld [vmem:[%s21018_s4 + $0xb0] sm:$0xff]  ;;  %v2406_v12 = vld [vmem:[%s21018_s4 + $0x1a8] sm:$0xff] }
 0x729   :  { %15181 = vpow2.f32 %v11376_v42  ;;  %v2378_v42 = vld [vmem:[%s21018_s4 + $0xc8] sm:$0xff]  ;;  %v2399_v0 = vld [vmem:[%s21018_s4 + $0x170] sm:$0xff] }
 0x72a   :  { %15183 = vpow2.f32 %v11377_v49  ;;  %v2382_v49 = vld [vmem:[%s21018_s4 + $0xe8] sm:$0xff] }
 0x72b   :  { %15185 = vtanh.f32 %v14982_v23  ;;  %v2384_v23 = vld [vmem:[%s21018_s4 + $0xf8] sm:$0xff] }
 0x72c   :  { %15187 = vpow2.f32 %v11378_v26  ;;  %v12163_v26 = vpack.c.bf16 %v2373_v48, %v2369_v36  ;;  %v12207_v48 = vpack.c.bf16 %v2399_v0, %v2395_v43  ;;  %v2722_v43 = vld [vmem:[%s21019_s5 + $0xa8] sm:$0xff]  ;;  %v2720_v0 = vld [vmem:[%s21019_s5 + $0x98] sm:$0xff] }
 0x733   :  { %v15182_v54 = vpop.eup %15181 }
 0x734   :  { %v2085_v14 = vadd.f32 1.0, %v15182_v54  ;;  %v15184_v18 = vpop.eup %15183  ;;  %v12195_v54 = vpack.c.bf16 %v2375_v63, %v2371_v25  ;;  %v12177_v25 = vpack.c.bf16 %v2406_v12, %v2402_v1  ;;  %v2724_v12 = vld [vmem:[%s21019_s5 + $0xb8] sm:$0xff] }
 0x735   :  { %v2086_v5 = vadd.f32 1.0, %v15184_v18  ;;  %v15186_v17 = vpop.eup %15185  ;;  %v2381_v18 = vld [vmem:[%s21018_s4 + $0xe0] sm:$0xff] }
 0x736   :  { %15189 = vrcp.f32 %v2085_v14  ;;  %v15188_v20 = vpop.eup %15187  ;;  %v2377_v14 = vld [vmem:[%s21018_s4 + $0xc0] sm:$0xff] }
 0x737   :  { %15191 = vrcp.f32 %v2086_v5  ;;  %v2087_v58 = vadd.f32 1.0, %v15188_v20  ;;  %v12165_v5 = vpack.c.bf16 %v2382_v49, %v2378_v42  ;;  %v2379_v20 = vld [vmem:[%s21018_s4 + $0xd0] sm:$0xff]  ;;  %v12167_v24 = vpack.c.bf16 %v2381_v18, %v2377_v14 }
 0x738   :  { %v2403_v42 = vld [vmem:[%s21018_s4 + $0x190] sm:$0xff] }
 0x739   :  { %15193 = vrcp.f32 %v2087_v58  ;;  %v2388_v58 = vld [vmem:[%s21018_s4 + $0x118] sm:$0xff]  ;;  %v2407_v49 = vld [vmem:[%s21018_s4 + $0x1b0] sm:$0xff] }
 0x73a   :  { %v12211_v18 = vpack.c.bf16 %v2407_v49, %v2403_v42  ;;  %v2730_v42 = vld [vmem:[%s21019_s5 + $0xe8] sm:$0xff]  ;;  %v2728_v49 = vld [vmem:[%s21019_s5 + $0xd8] sm:$0xff] }
 0x740   :  { %v15190_v33 = vpop.eup %15189 }
 0x741   :  { %v2096_v41 = vmul.f32 %v15190_v33, %v15186_v17  ;;  %v15192_v44 = vpop.eup %15191  ;;  %v12197_v17 = vpack.c.bf16 %v2384_v23, %v2380_v11  ;;  %v2383_v33 = vld [vmem:[%s21018_s4 + $0xf0] sm:$0xff]  ;;  %v2410_v11 = vld [vmem:[%s21018_s4 + $0x1c8] sm:$0xff] }
 0x742   :  { %v2095_v62 = vmul.f32 %v15192_v44, %v16887_v52  ;;  %v2359_v52 = vld [vmem:[%s21018_s4 + $0x30] sm:$0xff]  ;;  %v2390_v44 = vld [vmem:[%s21018_s4 + $0x128] sm:$0xff]  ;;  %v12199_v27 = vpack.c.bf16 %v2383_v33, %v2379_v20  ;;  %v2413_v33 = vld [vmem:[%s21018_s4 + $0x1e0] sm:$0xff] }
 0x743   :  { %v15194_v56 = vpop.eup %15193  ;;  %v12187_v16 = vpack.c.bf16 %v2359_v52, %v2355_v47  ;;  %v2385_v47 = vld [vmem:[%s21018_s4 + $0x100] sm:$0xff]  ;;  %v2414_v23 = vld [vmem:[%s21018_s4 + $0x1e8] sm:$0xff] }
 0x744   :  { %v17005_v9 = vadd.f32 %v2096_v41, %v2095_v62  ;;  %v2386_v41 = vld [vmem:[%s21018_s4 + $0x108] sm:$0xff]  ;;  %v2392_v62 = vld [vmem:[%s21018_s4 + $0x138] sm:$0xff]  ;;  %v2389_v52 = vld [vmem:[%s21018_s4 + $0x120] sm:$0xff] }
 0x745   :  { %v12169_v53 = vpack.c.bf16 %v2390_v44, %v2386_v41  ;;  %v12201_v2 = vpack.c.bf16 %v2392_v62, %v2388_v58  ;;  %v12171_v29 = vpack.c.bf16 %v2389_v52, %v2385_v47  ;;  %v2411_v41 = vld [vmem:[%s21018_s4 + $0x1d0] sm:$0xff] }
 0x746   :  { %15195 = vtanh.f32 %v17005_v9  ;;  %v2415_v44 = vld [vmem:[%s21018_s4 + $0x1f0] sm:$0xff] }
 0x747   :  { %v12215_v62 = vpack.c.bf16 %v2415_v44, %v2411_v41  ;;  %v2703_v47 = vld [vmem:[%s21019_s5 + $0x10] sm:$0xff]  ;;  %v2738_v41 = vld [vmem:[%s21019_s5 + $0x128] sm:$0xff]  ;;  %v2736_v44 = vld [vmem:[%s21019_s5 + $0x118] sm:$0xff] }
 0x748   :  { %v2707_v52 = vld [vmem:[%s21019_s5 + $0x30] sm:$0xff] }
 0x750   :  { %v15196_v21 = vpop.eup %15195 }
 0x751   :  { %v17038_v60 = vmul.f32 %v15196_v21, %v15194_v56  ;;  %v2394_v56 = vld [vmem:[%s21018_s4 + $0x148] sm:$0xff] }
 0x752   :  { %v2398_v21 = vld [vmem:[%s21018_s4 + $0x168] sm:$0xff] }
 0x753   :  { %2238 = vmatmul.mubr.f32.vlgmr.msra.gmra.mrb[14].mxu0 %v17038_v60  ;;  %2309 = vmatmul.mubr.f32.vlgmr.msra.gmra.mrb[14].mxu1 %v17038_v60  ;;  %v12173_v46 = vpack.c.bf16 %v2398_v21, %v2394_v56  ;;  %v2716_v21 = vld [vmem:[%s21019_s5 + $0x78] sm:$0xff] }
 0x754   :  { %12156 = vmatpush1.bf16.msra.mxu0 %v12155_v7  ;;  %12188 = vmatpush1.bf16.msra.mxu1 %v12187_v16  ;;  %v2396_v7 = vld [vmem:[%s21018_s4 + $0x158] sm:$0xff] }
 0x755   :  { %12158 = vmatprep.subr.bf16.mxu0 %v12157_v10  ;;  %12190 = vmatprep.subr.bf16.mxu1 %v12189_v45  ;;  %v2400_v16 = vld [vmem:[%s21018_s4 + $0x178] sm:$0xff]  ;;  %v2393_v10 = vld [vmem:[%s21018_s4 + $0x140] sm:$0xff] }
 0x756   :  { %2503 = vmatprep.mubr.f32.mxu0 %v21030_v3  ;;  %2616 = vmatprep.mubr.f32.mxu1 %v21030_v3  ;;  %v2397_v45 = vld [vmem:[%s21018_s4 + $0x160] sm:$0xff]  ;;  %v12205_v57 = vpack.c.bf16 %v2400_v16, %v2396_v7 }
 0x757   :  { %v12175_v36 = vpack.c.bf16 %v2397_v45, %v2393_v10  ;;  %v2709_v7 = vld [vmem:[%s21019_s5 + $0x40] sm:$0xff]  ;;  %v2711_v10 = vld [vmem:[%s21019_s5 + $0x50] sm:$0xff] }
 0x758   :  { %12160 = vmatpush1.bf16.msra.mxu0 %v12159_v19  ;;  %12192 = vmatpush1.bf16.msra.mxu1 %v12191_v32  ;;  %v2404_v19 = vld [vmem:[%s21018_s4 + $0x198] sm:$0xff]  ;;  %v2713_v16 = vld [vmem:[%s21019_s5 + $0x60] sm:$0xff]  ;;  %v2715_v45 = vld [vmem:[%s21019_s5 + $0x70] sm:$0xff] }
 0x759   :  { %12162 = vmatprep.subr.bf16.mxu0 %v12161_v4  ;;  %12194 = vmatprep.subr.bf16.mxu1 %v12193_v22  ;;  %v2408_v32 = vld [vmem:[%s21018_s4 + $0x1b8] sm:$0xff]  ;;  %v2401_v4 = vld [vmem:[%s21018_s4 + $0x180] sm:$0xff] }
 0x75a   :  { %v2405_v22 = vld [vmem:[%s21018_s4 + $0x1a0] sm:$0xff]  ;;  %v12209_v63 = vpack.c.bf16 %v2408_v32, %v2404_v19 }
 0x75b   :  { %v12179_v14 = vpack.c.bf16 %v2405_v22, %v2401_v4  ;;  %v2717_v19 = vld [vmem:[%s21019_s5 + $0x80] sm:$0xff]  ;;  %v2719_v4 = vld [vmem:[%s21019_s5 + $0x90] sm:$0xff] }
 0x75c   :  { %12164 = vmatpush1.bf16.msra.mxu0 %v12163_v26  ;;  %12196 = vmatpush1.bf16.msra.mxu1 %v12195_v54  ;;  %v2412_v26 = vld [vmem:[%s21018_s4 + $0x1d8] sm:$0xff]  ;;  %v2721_v32 = vld [vmem:[%s21019_s5 + $0xa0] sm:$0xff]  ;;  %v2723_v22 = vld [vmem:[%s21019_s5 + $0xb0] sm:$0xff] }
 0x75d   :  { %12166 = vmatprep.subr.bf16.mxu0 %v12165_v5  ;;  %12198 = vmatprep.subr.bf16.mxu1 %v12197_v17  ;;  %v2416_v54 = vld [vmem:[%s21018_s4 + $0x1f8] sm:$0xff]  ;;  %v2409_v5 = vld [vmem:[%s21018_s4 + $0x1c0] sm:$0xff]  ;;  %v12181_v17 = vpack.c.bf16 %v2414_v23, %v2410_v11 }
 0x75e   :  { %v12213_v20 = vpack.c.bf16 %v2416_v54, %v2412_v26  ;;  %v12183_v58 = vpack.c.bf16 %v2413_v33, %v2409_v5  ;;  %v2732_v23 = vld [vmem:[%s21019_s5 + $0xf8] sm:$0xff]  ;;  %v2725_v26 = vld [vmem:[%s21019_s5 + $0xc0] sm:$0xff]  ;;  %v2727_v5 = vld [vmem:[%s21019_s5 + $0xd0] sm:$0xff] }
 0x75f   :  { %v2729_v54 = vld [vmem:[%s21019_s5 + $0xe0] sm:$0xff]  ;;  %v2734_v33 = vld [vmem:[%s21019_s5 + $0x108] sm:$0xff] }
 0x760   :  { %12168 = vmatpush1.bf16.msra.mxu0 %v12167_v24  ;;  %12200 = vmatpush1.bf16.msra.mxu1 %v12199_v27 }
 0x761   :  { %12170 = vmatprep.subr.bf16.mxu0 %v12169_v53  ;;  %12202 = vmatprep.subr.bf16.mxu1 %v12201_v2  ;;  %v17253_v53 = vpack.c.bf16 %v2707_v52, %v2703_v47  ;;  %v2710_v2 = vld [vmem:[%s21019_s5 + $0x48] sm:$0xff] }
 0x762   :  { %v17267_v56 = vpack.c.bf16 %v2714_v13, %v2710_v2  ;;  %v2742_v47 = vld [vmem:[%s21019_s5 + $0x148] sm:$0xff]  ;;  %v2744_v13 = vld [vmem:[%s21019_s5 + $0x158] sm:$0xff] }
 0x763   :  { %v2746_v2 = vld [vmem:[%s21019_s5 + $0x168] sm:$0xff] }
 0x764   :  { %12172 = vmatpush1.bf16.msra.mxu0 %v12171_v29  ;;  %12204 = vmatpush1.bf16.msra.mxu1 %v12203_v50  ;;  %v17278_v29 = vpack.c.bf16 %v2716_v21, %v2712_v8  ;;  %v17280_v50 = vpack.c.bf16 %v2713_v16, %v2709_v7  ;;  %v2748_v8 = vld [vmem:[%s21019_s5 + $0x178] sm:$0xff]  ;;  %v17413_v21 = vpack.c.bf16 %v2746_v2, %v2742_v47  ;;  %v2741_v16 = vld [vmem:[%s21019_s5 + $0x140] sm:$0xff]  ;;  %v2759_v47 = vld [vmem:[%s21019_s5 + $0x1d0] sm:$0xff] }
 0x765   :  { %12174 = vmatprep.subr.bf16.mxu0 %v12173_v46  ;;  %12206 = vmatprep.subr.bf16.mxu1 %v12205_v57  ;;  %v17289_v46 = vpack.c.bf16 %v2715_v45, %v2711_v10  ;;  %v2718_v57 = vld [vmem:[%s21019_s5 + $0x88] sm:$0xff]  ;;  %v17415_v7 = vpack.c.bf16 %v2748_v8, %v2744_v13  ;;  %v2745_v10 = vld [vmem:[%s21019_s5 + $0x160] sm:$0xff]  ;;  %v2743_v45 = vld [vmem:[%s21019_s5 + $0x150] sm:$0xff] }
 0x766   :  { %v17303_v1 = vpack.c.bf16 %v2722_v43, %v2718_v57  ;;  %v17427_v57 = vpack.c.bf16 %v2745_v10, %v2741_v16  ;;  %v2747_v43 = vld [vmem:[%s21019_s5 + $0x170] sm:$0xff] }
 0x767   :  { %v2763_v2 = vld [vmem:[%s21019_s5 + $0x1f0] sm:$0xff] }
 0x768   :  { %12176 = vmatpush1.bf16.msra.mxu0 %v12175_v36  ;;  %12208 = vmatpush1.bf16.msra.mxu1 %v12207_v48  ;;  %v17314_v36 = vpack.c.bf16 %v2724_v12, %v2720_v0  ;;  %v17316_v48 = vpack.c.bf16 %v2721_v32, %v2717_v19  ;;  %v2750_v0 = vld [vmem:[%s21019_s5 + $0x188] sm:$0xff]  ;;  %v17440_v19 = vpack.c.bf16 %v2747_v43, %v2743_v45 }
 0x769   :  { %12178 = vmatprep.subr.bf16.mxu0 %v12177_v25  ;;  %12210 = vmatprep.subr.bf16.mxu1 %v12209_v63  ;;  %v17325_v25 = vpack.c.bf16 %v2723_v22, %v2719_v4  ;;  %v2726_v63 = vld [vmem:[%s21019_s5 + $0xc8] sm:$0xff]  ;;  %v2752_v4 = vld [vmem:[%s21019_s5 + $0x198] sm:$0xff]  ;;  %v17505_v13 = vpack.c.bf16 %v2763_v2, %v2759_v47 }
 0x76a   :  { %v17339_v11 = vpack.c.bf16 %v2730_v42, %v2726_v63  ;;  %v2754_v12 = vld [vmem:[%s21019_s5 + $0x1a8] sm:$0xff]  ;;  %v2756_v22 = vld [vmem:[%s21019_s5 + $0x1b8] sm:$0xff]  ;;  %v2749_v63 = vld [vmem:[%s21019_s5 + $0x180] sm:$0xff] }
 0x76b   :  { %v17442_v32 = vpack.c.bf16 %v2754_v12, %v2750_v0  ;;  %v17453_v42 = vpack.c.bf16 %v2756_v22, %v2752_v4 }
 0x76c   :  { %12180 = vmatpush1.bf16.msra.mxu0 %v12179_v14  ;;  %12212 = vmatpush1.bf16.msra.mxu1 %v12211_v18  ;;  %v17350_v14 = vpack.c.bf16 %v2732_v23, %v2728_v49  ;;  %v17352_v18 = vpack.c.bf16 %v2729_v54, %v2725_v26  ;;  %v2753_v49 = vld [vmem:[%s21019_s5 + $0x1a0] sm:$0xff]  ;;  %v2751_v23 = vld [vmem:[%s21019_s5 + $0x190] sm:$0xff] }
 0x76d   :  { %12182 = vmatprep.subr.bf16.mxu0 %v12181_v17  ;;  %12214 = vmatprep.subr.bf16.mxu1 %v12213_v20  ;;  %v2731_v17 = vld [vmem:[%s21019_s5 + $0xf0] sm:$0xff]  ;;  %v17465_v54 = vpack.c.bf16 %v2753_v49, %v2749_v63 }
 0x76e   :  { %v17361_v20 = vpack.c.bf16 %v2731_v17, %v2727_v5  ;;  %v2755_v26 = vld [vmem:[%s21019_s5 + $0x1b0] sm:$0xff]  ;;  %v2758_v17 = vld [vmem:[%s21019_s5 + $0x1c8] sm:$0xff] }
 0x76f   :  { %v17469_v5 = vpack.c.bf16 %v2755_v26, %v2751_v23 }
 0x770   :  { %12184 = vmatpush1.bf16.msra.mxu0 %v12183_v58  ;;  %12216 = vmatpush1.bf16.msra.mxu1 %v12215_v62  ;;  %v17375_v58 = vpack.c.bf16 %v2738_v41, %v2734_v33  ;;  %v2740_v62 = vld [vmem:[%s21019_s5 + $0x138] sm:$0xff]  ;;  %v2762_v33 = vld [vmem:[%s21019_s5 + $0x1e8] sm:$0xff] }
 0x771   :  { %v2760_v41 = vld [vmem:[%s21019_s5 + $0x1d8] sm:$0xff] }
 0x773   :  { %2504 = vmatmul.mubr.f32.vlgmr.msra.gmra.mrb[16].mxu0 %v16406_v39  ;;  %2617 = vmatmul.mubr.f32.vlgmr.msra.gmra.mrb[16].mxu1 %v16406_v39  ;;  %v2702_v39 = vld [vmem:[%s21019_s5 + $0x8] sm:$0xff] }
 0x774   :  { %2509 = vmatprep.mubr.f32.mxu0 %v21030_v3  ;;  %2622 = vmatprep.mubr.f32.mxu1 %v21030_v3 }
 0x777   :  { %2510 = vmatmul.mubr.f32.gmra.mrb[18].mxu0 %v16450_v15  ;;  %2623 = vmatmul.mubr.f32.gmra.mrb[18].mxu1 %v16450_v15  ;;  %v2706_v15 = vld [vmem:[%s21019_s5 + $0x28] sm:$0xff] }
 0x778   :  { %2515 = vmatprep.mubr.f32.mxu0 %v21030_v3  ;;  %2628 = vmatprep.mubr.f32.mxu1 %v21030_v3 }
 0x77b   :  { %2516 = vmatmul.mubr.f32.gmra.mrb[20].mxu0 %v16594_v6  ;;  %2629 = vmatmul.mubr.f32.gmra.mrb[20].mxu1 %v16594_v6  ;;  %v2704_v6 = vld [vmem:[%s21019_s5 + $0x18] sm:$0xff] }
 0x77c   :  { %2521 = vmatprep.mubr.f32.mxu0 %v21030_v3  ;;  %2634 = vmatprep.mubr.f32.mxu1 %v21030_v3 }
 0x77f   :  { %2522 = vmatmul.mubr.f32.gmra.mrb[22].mxu0 %v16800_v61  ;;  %2635 = vmatmul.mubr.f32.gmra.mrb[22].mxu1 %v16800_v61  ;;  %v17231_v61 = vpack.c.bf16 %v2706_v15, %v2702_v39  ;;  %v2733_v39 = vld [vmem:[%s21019_s5 + $0x100] sm:$0xff] }
 0x780   :  { %2527 = vmatprep.mubr.f32.mxu0 %v21030_v3  ;;  %2640 = vmatprep.mubr.f32.mxu1 %v21030_v3  ;;  %v2737_v15 = vld [vmem:[%s21019_s5 + $0x120] sm:$0xff] }
 0x781   :  { %12218 = vmatprep.subr.bf16.mxu0 %v17231_v61 }
 0x783   :  { %2528 = vmatmul.mubr.f32.gmra.mrb[24].mxu0 %v16846_v40  ;;  %2641 = vmatmul.mubr.f32.gmra.mrb[24].mxu1 %v16846_v40  ;;  %v2708_v40 = vld [vmem:[%s21019_s5 + $0x38] sm:$0xff] }
 0x784   :  { %2533 = vmatprep.mubr.f32.mxu0 %v21030_v3  ;;  %2646 = vmatprep.mubr.f32.mxu1 %v21030_v3  ;;  %v17242_v24 = vpack.c.bf16 %v2708_v40, %v2704_v6  ;;  %v17386_v6 = vpack.c.bf16 %v2740_v62, %v2736_v44  ;;  %v17388_v40 = vpack.c.bf16 %v2737_v15, %v2733_v39  ;;  %v2764_v62 = vld [vmem:[%s21019_s5 + $0x1f8] sm:$0xff]  ;;  %v2757_v39 = vld [vmem:[%s21019_s5 + $0x1c0] sm:$0xff] }
 0x785   :  { %v17483_v44 = vpack.c.bf16 %v2762_v33, %v2758_v17  ;;  %v2761_v15 = vld [vmem:[%s21019_s5 + $0x1e0] sm:$0xff] }
 0x786   :  { %12250 = vmatprep.subr.bf16.mxu1 %v17242_v24 }
 0x787   :  { %2534 = vmatmul.mubr.f32.gmra.mrb[26].mxu0 %v16890_v28  ;;  %2647 = vmatmul.mubr.f32.gmra.mrb[26].mxu1 %v16890_v28  ;;  %v2701_v28 = vld [vmem:[%s21019_s5] sm:$0xff] }
 0x788   :  { %2539 = vmatprep.mubr.f32.mxu0 %v21030_v3  ;;  %2652 = vmatprep.mubr.f32.mxu1 %v21030_v3 }
 0x789   :  { %12252 = vmatpush1.bf16.msra.mxu1 %v17253_v53 }
 0x78a   :  { %12254 = vmatprep.subr.bf16.mxu1 %v17278_v29 }
 0x78b   :  { %2540 = vmatmul.mubr.f32.gmra.mrb[28].mxu0 %v17038_v60  ;;  %2653 = vmatmul.mubr.f32.gmra.mrb[28].mxu1 %v17038_v60  ;;  %v2705_v60 = vld [vmem:[%s21019_s5 + $0x20] sm:$0xff] }
 0x78c   :  { %2545 = vmatprep.mubr.f32.mxu0 %v21030_v3  ;;  %2658 = vmatprep.mubr.f32.mxu1 %v21030_v3  ;;  %v17244_v27 = vpack.c.bf16 %v2705_v60, %v2701_v28  ;;  %v2735_v28 = vld [vmem:[%s21019_s5 + $0x110] sm:$0xff] }
 0x78d   :  { %12256 = vmatpush1.bf16.msra.mxu1 %v17289_v46  ;;  %v2739_v60 = vld [vmem:[%s21019_s5 + $0x130] sm:$0xff] }
 0x78e   :  { %12220 = vmatpush1.bf16.msra.mxu0 %v17244_v27  ;;  %12258 = vmatprep.subr.bf16.mxu1 %v17314_v36  ;;  %v17400_v52 = vpack.c.bf16 %v2739_v60, %v2735_v28  ;;  %v17494_v28 = vpack.c.bf16 %v2764_v62, %v2760_v41  ;;  %v17496_v60 = vpack.c.bf16 %v2761_v15, %v2757_v39 }
 0x78f   :  { %12222 = vmatprep.subr.bf16.mxu0 %v17267_v56 }
 0x791   :  { %12260 = vmatpush1.bf16.msra.mxu1 %v17325_v25 }
 0x792   :  { %12224 = vmatpush1.bf16.msra.mxu0 %v17280_v50  ;;  %12262 = vmatprep.subr.bf16.mxu1 %v17350_v14 }
 0x793   :  { %12226 = vmatprep.subr.bf16.mxu0 %v17303_v1 }
 0x795   :  { %12264 = vmatpush1.bf16.msra.mxu1 %v17361_v20 }
 0x796   :  { %12228 = vmatpush1.bf16.msra.mxu0 %v17316_v48  ;;  %12266 = vmatprep.subr.bf16.mxu1 %v17386_v6 }
 0x797   :  { %12230 = vmatprep.subr.bf16.mxu0 %v17339_v11 }
 0x799   :  { %12268 = vmatpush1.bf16.msra.mxu1 %v17400_v52 }
 0x79a   :  { %12232 = vmatpush1.bf16.msra.mxu0 %v17352_v18  ;;  %12270 = vmatprep.subr.bf16.mxu1 %v17415_v7 }
 0x79b   :  { %12234 = vmatprep.subr.bf16.mxu0 %v17375_v58 }
 0x79d   :  { %12272 = vmatpush1.bf16.msra.mxu1 %v17440_v19 }
 0x79e   :  { %12236 = vmatpush1.bf16.msra.mxu0 %v17388_v40  ;;  %12274 = vmatprep.subr.bf16.mxu1 %v17453_v42 }
 0x79f   :  { %12238 = vmatprep.subr.bf16.mxu0 %v17413_v21 }
 0x7a1   :  { %12276 = vmatpush1.bf16.msra.mxu1 %v17469_v5 }
 0x7a2   :  { %12240 = vmatpush1.bf16.msra.mxu0 %v17427_v57  ;;  %12278 = vmatprep.subr.bf16.mxu1 %v17494_v28 }
 0x7a3   :  { %12242 = vmatprep.subr.bf16.mxu0 %v17442_v32 }
 0x7a5   :  { %12280 = vmatpush1.bf16.msra.mxu1 %v17505_v13 }
 0x7a6   :  { %12244 = vmatpush1.bf16.msra.mxu0 %v17465_v54  ;;  %12314 = vmatprep.subr.bf16.mxu1 %v17242_v24 }
 0x7a7   :  { %12246 = vmatprep.subr.bf16.mxu0 %v17483_v44 }
 0x7aa   :  { %12248 = vmatpush1.bf16.msra.mxu0 %v17496_v60 }
 0x7ab   :  { %12282 = vmatprep.subr.bf16.mxu0 %v17231_v61 }
 0x826   :  { %v2239_v8 = vpop.f32.mrb[14].mxu0  ;;  %v2310_v16 = vpop.f32.mrb[14].mxu1 }
 0x827   :  { %v14967_v10 = vadd.f32 %v2239_v8, %v16382_v35  ;;  %v2241_v45 = vpop.f32.mrb[15].mxu0  ;;  %v2312_v43 = vpop.f32.mrb[15].mxu1  ;;  %v14983_v22 = vadd.f32 %v2310_v16, %v16393_v51 }
 0x828   :  { %v14968_v0 = vadd.f32 %v2241_v45, %v16385_v38  ;;  %v14984_v63 = vadd.f32 %v2312_v43, %v16400_v59 }
 0x829   :  { %v11379_v12 = vmul.f32 -1.442695, %v14967_v10  ;;  %v11381_v49 = vmul.f32 -1.442695, %v14983_v22 }
 0x82a   :  { %v11380_v4 = vmul.f32 -1.442695, %v14968_v0 }
 0x82b   :  { %15197 = vpow2.f32 %v11379_v12 }
 0x82c   :  { %15199 = vpow2.f32 %v11380_v4 }
 0x82d   :  { %15201 = vtanh.f32 %v14984_v63 }
 0x82e   :  { %15203 = vpow2.f32 %v11381_v49 }
 0x835   :  { %v15198_v23 = vpop.eup %15197 }
 0x836   :  { %v2328_v26 = vadd.f32 1.0, %v15198_v23  ;;  %v15200_v17 = vpop.eup %15199 }
 0x837   :  { %v2329_v35 = vadd.f32 1.0, %v15200_v17  ;;  %v15202_v33 = vpop.eup %15201 }
 0x838   :  { %15205 = vrcp.f32 %v2328_v26  ;;  %v15204_v41 = vpop.eup %15203 }
 0x839   :  { %15207 = vrcp.f32 %v2329_v35  ;;  %v2330_v15 = vadd.f32 1.0, %v15204_v41 }
 0x83b   :  { %15209 = vrcp.f32 %v2330_v15 }
 0x842   :  { %v15206_v38 = vpop.eup %15205 }
 0x843   :  { %v2339_v62 = vmul.f32 %v15206_v38, %v15202_v33  ;;  %v15208_v39 = vpop.eup %15207 }
 0x844   :  { %v2338_v47 = vmul.f32 %v15208_v39, %v17005_v9  ;;  %v2417_v9 = vld [vmem:[%s21020_s6] sm:$0xf] }
 0x845   :  { %v15210_v59 = vpop.eup %15209  ;;  %v17559_v16 = vrot.slane %v2417_v9, %v16373_v31  ;;  %v17562_v10 = vrot.slane %v2417_v9, %v16379_v34  ;;  %v17567_v23 = vrot.slane %v2417_v9, %v16388_v37  ;;  %v17570_v26 = vrot.slane %v2417_v9, %v16396_v55 }
 0x846   :  { %v2340_v51 = vadd.f32 %v2339_v62, %v2338_v47 }
 0x848   :  { %15211 = vtanh.f32 %v2340_v51 }
 0x852   :  { %v15212_v2 = vpop.eup %15211 }
 0x853   :  { %v2342_v8 = vmul.f32 %v15212_v2, %v15210_v59 }
 0x855   :  { %2546 = vmatmul.mubr.f32.gmra.mrb[30].mxu0 %v2342_v8  ;;  %2659 = vmatmul.mubr.f32.gmra.mrb[30].mxu1 %v2342_v8 }
 0x856   :  { %2829 = vmatprep.mubr.f32.mxu0 %v21030_v3  ;;  %2900 = vmatprep.mubr.f32.mxu1 %v21030_v3 }
 0x859   :  { %2830 = vmatmul.mubr.f32.vlgmr.msra.gmra.mrb[16].mxu0 %v21030_v3  ;;  %2901 = vmatmul.mubr.f32.vlgmr.msra.gmra.mrb[16].mxu1 %v21030_v3 }
 0x85a   :  { %12284 = vmatpush1.bf16.msra.mxu0 %v17244_v27  ;;  %12316 = vmatpush1.bf16.msra.mxu1 %v17253_v53 }
 0x85b   :  { %12286 = vmatprep.subr.bf16.mxu0 %v17267_v56  ;;  %12318 = vmatprep.subr.bf16.mxu1 %v17278_v29 }
 0x85c   :  { %3003 = vmatprep.mubr.f32.mxu0 %v21030_v3  ;;  %3074 = vmatprep.mubr.f32.mxu1 %v21030_v3 }
 0x85e   :  { %12288 = vmatpush1.bf16.msra.mxu0 %v17280_v50  ;;  %12320 = vmatpush1.bf16.msra.mxu1 %v17289_v46 }
 0x85f   :  { %12290 = vmatprep.subr.bf16.mxu0 %v17303_v1  ;;  %12322 = vmatprep.subr.bf16.mxu1 %v17314_v36 }
 0x862   :  { %12292 = vmatpush1.bf16.msra.mxu0 %v17316_v48  ;;  %12324 = vmatpush1.bf16.msra.mxu1 %v17325_v25 }
 0x863   :  { %12294 = vmatprep.subr.bf16.mxu0 %v17339_v11  ;;  %12326 = vmatprep.subr.bf16.mxu1 %v17350_v14 }
 0x866   :  { %12296 = vmatpush1.bf16.msra.mxu0 %v17352_v18  ;;  %12328 = vmatpush1.bf16.msra.mxu1 %v17361_v20 }
 0x867   :  { %12298 = vmatprep.subr.bf16.mxu0 %v17375_v58  ;;  %12330 = vmatprep.subr.bf16.mxu1 %v17386_v6 }
 0x86a   :  { %12300 = vmatpush1.bf16.msra.mxu0 %v17388_v40  ;;  %12332 = vmatpush1.bf16.msra.mxu1 %v17400_v52 }
 0x86b   :  { %12302 = vmatprep.subr.bf16.mxu0 %v17413_v21  ;;  %12334 = vmatprep.subr.bf16.mxu1 %v17415_v7 }
 0x86e   :  { %12304 = vmatpush1.bf16.msra.mxu0 %v17427_v57  ;;  %12336 = vmatpush1.bf16.msra.mxu1 %v17440_v19 }
 0x86f   :  { %12306 = vmatprep.subr.bf16.mxu0 %v17442_v32  ;;  %12338 = vmatprep.subr.bf16.mxu1 %v17453_v42 }
 0x872   :  { %12308 = vmatpush1.bf16.msra.mxu0 %v17465_v54  ;;  %12340 = vmatpush1.bf16.msra.mxu1 %v17469_v5 }
 0x873   :  { %12310 = vmatprep.subr.bf16.mxu0 %v17483_v44  ;;  %12342 = vmatprep.subr.bf16.mxu1 %v17494_v28 }
 0x876   :  { %12312 = vmatpush1.bf16.msra.mxu0 %v17496_v60  ;;  %12344 = vmatpush1.bf16.msra.mxu1 %v17505_v13 }
 0x877   :  { %12346 = vmatprep.subr.bf16.mxu0 %v17231_v61  ;;  %12378 = vmatprep.subr.bf16.mxu1 %v17242_v24 }
 0x92c   :  { %v2831_v45 = vpop.f32.mrb[16].mxu0  ;;  %v2902_v43 = vpop.f32.mrb[16].mxu1 }
 0x92d   :  { %v14985_v0 = vadd.f32 %v2831_v45, %v17559_v16  ;;  %v2833_v12 = vpop.f32.mrb[17].mxu0  ;;  %v2904_v4 = vpop.f32.mrb[17].mxu1  ;;  %v15001_v17 = vadd.f32 %v2902_v43, %v17567_v23 }
 0x92e   :  { %v14986_v22 = vadd.f32 %v2833_v12, %v17562_v10  ;;  %v15002_v35 = vadd.f32 %v2904_v4, %v17570_v26 }
 0x92f   :  { %v11382_v63 = vmul.f32 -1.442695, %v14985_v0  ;;  %v11384_v33 = vmul.f32 -1.442695, %v15001_v17 }
 0x930   :  { %v11383_v49 = vmul.f32 -1.442695, %v14986_v22 }
 0x931   :  { %15213 = vpow2.f32 %v11382_v63 }
 0x932   :  { %15215 = vpow2.f32 %v11383_v49 }
 0x933   :  { %15217 = vtanh.f32 %v15002_v35 }
 0x934   :  { %15219 = vpow2.f32 %v11384_v33 }
 0x93b   :  { %v15214_v41 = vpop.eup %15213 }
 0x93c   :  { %v2920_v38 = vadd.f32 1.0, %v15214_v41  ;;  %v15216_v62 = vpop.eup %15215 }
 0x93d   :  { %v2921_v39 = vadd.f32 1.0, %v15216_v62  ;;  %v15218_v15 = vpop.eup %15217 }
 0x93e   :  { %15221 = vrcp.f32 %v2920_v38  ;;  %v15220_v47 = vpop.eup %15219 }
 0x93f   :  { %15223 = vrcp.f32 %v2921_v39  ;;  %v2922_v8 = vadd.f32 1.0, %v15220_v47 }
 0x941   :  { %15225 = vrcp.f32 %v2922_v8 }
 0x948   :  { %v15222_v51 = vpop.eup %15221 }
 0x949   :  { %v2931_v59 = vmul.f32 %v15222_v51, %v15218_v15  ;;  %v15224_v2 = vpop.eup %15223 }
 0x94a   :  { %v2930_v9 = vmul.f32 0.0, %v15224_v2 }
 0x94b   :  { %v15226_v43 = vpop.eup %15225 }
 0x94c   :  { %v17574_v45 = vadd.f32 %v2931_v59, %v2930_v9 }
 0x94e   :  { %15227 = vtanh.f32 %v17574_v45 }
 0x958   :  { %v15228_v0 = vpop.eup %15227 }
 0x959   :  { %v2934_v12 = vmul.f32 %v15228_v0, %v15226_v43 }
 0x95b   :  { %3004 = vmatmul.mubr.f32.vlgmr.msra.gmra.mrb[18].mxu0 %v2934_v12  ;;  %3075 = vmatmul.mubr.f32.vlgmr.msra.gmra.mrb[18].mxu1 %v2934_v12 }
 0x95c   :  { %12348 = vmatpush1.bf16.msra.mxu0 %v17244_v27  ;;  %12380 = vmatpush1.bf16.msra.mxu1 %v17253_v53 }
 0x95d   :  { %12350 = vmatprep.subr.bf16.mxu0 %v17267_v56  ;;  %12382 = vmatprep.subr.bf16.mxu1 %v17278_v29 }
 0x95e   :  { %3177 = vmatprep.mubr.f32.mxu0 %v21030_v3  ;;  %3248 = vmatprep.mubr.f32.mxu1 %v21030_v3 }
 0x960   :  { %12352 = vmatpush1.bf16.msra.mxu0 %v17280_v50  ;;  %12384 = vmatpush1.bf16.msra.mxu1 %v17289_v46 }
 0x961   :  { %12354 = vmatprep.subr.bf16.mxu0 %v17303_v1  ;;  %12386 = vmatprep.subr.bf16.mxu1 %v17314_v36 }
 0x964   :  { %12356 = vmatpush1.bf16.msra.mxu0 %v17316_v48  ;;  %12388 = vmatpush1.bf16.msra.mxu1 %v17325_v25 }
 0x965   :  { %12358 = vmatprep.subr.bf16.mxu0 %v17339_v11  ;;  %12390 = vmatprep.subr.bf16.mxu1 %v17350_v14 }
 0x968   :  { %12360 = vmatpush1.bf16.msra.mxu0 %v17352_v18  ;;  %12392 = vmatpush1.bf16.msra.mxu1 %v17361_v20 }
 0x969   :  { %12362 = vmatprep.subr.bf16.mxu0 %v17375_v58  ;;  %12394 = vmatprep.subr.bf16.mxu1 %v17386_v6 }
 0x96c   :  { %12364 = vmatpush1.bf16.msra.mxu0 %v17388_v40  ;;  %12396 = vmatpush1.bf16.msra.mxu1 %v17400_v52 }
 0x96d   :  { %12366 = vmatprep.subr.bf16.mxu0 %v17413_v21  ;;  %12398 = vmatprep.subr.bf16.mxu1 %v17415_v7 }
 0x970   :  { %12368 = vmatpush1.bf16.msra.mxu0 %v17427_v57  ;;  %12400 = vmatpush1.bf16.msra.mxu1 %v17440_v19 }
 0x971   :  { %12370 = vmatprep.subr.bf16.mxu0 %v17442_v32  ;;  %12402 = vmatprep.subr.bf16.mxu1 %v17453_v42 }
 0x974   :  { %12372 = vmatpush1.bf16.msra.mxu0 %v17465_v54  ;;  %12404 = vmatpush1.bf16.msra.mxu1 %v17469_v5 }
 0x975   :  { %12374 = vmatprep.subr.bf16.mxu0 %v17483_v44  ;;  %12406 = vmatprep.subr.bf16.mxu1 %v17494_v28 }
 0x978   :  { %12376 = vmatpush1.bf16.msra.mxu0 %v17496_v60  ;;  %12408 = vmatpush1.bf16.msra.mxu1 %v17505_v13 }
 0x979   :  { %12410 = vmatprep.subr.bf16.mxu0 %v17231_v61  ;;  %12442 = vmatprep.subr.bf16.mxu1 %v17242_v24 }
 0xa2e   :  { %v3005_v4 = vpop.f32.mrb[18].mxu0  ;;  %v3076_v22 = vpop.f32.mrb[18].mxu1 }
 0xa2f   :  { %v14987_v63 = vadd.f32 %v3005_v4, %v17559_v16  ;;  %v3007_v49 = vpop.f32.mrb[19].mxu0  ;;  %v3078_v17 = vpop.f32.mrb[19].mxu1  ;;  %v15003_v38 = vadd.f32 %v3076_v22, %v17567_v23 }
 0xa30   :  { %v14988_v35 = vadd.f32 %v3007_v49, %v17562_v10  ;;  %v15004_v62 = vadd.f32 %v3078_v17, %v17570_v26 }
 0xa31   :  { %v11385_v33 = vmul.f32 -1.442695, %v14987_v63  ;;  %v11387_v39 = vmul.f32 -1.442695, %v15003_v38 }
 0xa32   :  { %v11386_v41 = vmul.f32 -1.442695, %v14988_v35 }
 0xa33   :  { %15229 = vpow2.f32 %v11385_v33 }
 0xa34   :  { %15231 = vpow2.f32 %v11386_v41 }
 0xa35   :  { %15233 = vtanh.f32 %v15004_v62 }
 0xa36   :  { %15235 = vpow2.f32 %v11387_v39 }
 0xa3d   :  { %v15230_v15 = vpop.eup %15229 }
 0xa3e   :  { %v3094_v47 = vadd.f32 1.0, %v15230_v15  ;;  %v15232_v51 = vpop.eup %15231 }
 0xa3f   :  { %v3095_v59 = vadd.f32 1.0, %v15232_v51  ;;  %v15234_v2 = vpop.eup %15233 }
 0xa40   :  { %15237 = vrcp.f32 %v3094_v47  ;;  %v15236_v8 = vpop.eup %15235 }
 0xa41   :  { %15239 = vrcp.f32 %v3095_v59  ;;  %v3096_v12 = vadd.f32 1.0, %v15236_v8 }
 0xa43   :  { %15241 = vrcp.f32 %v3096_v12 }
 0xa4a   :  { %v15238_v9 = vpop.eup %15237 }
 0xa4b   :  { %v3105_v43 = vmul.f32 %v15238_v9, %v15234_v2  ;;  %v15240_v0 = vpop.eup %15239 }
 0xa4c   :  { %v3104_v4 = vmul.f32 %v15240_v0, %v17574_v45 }
 0xa4d   :  { %v15242_v63 = vpop.eup %15241 }
 0xa4e   :  { %v17616_v22 = vadd.f32 %v3105_v43, %v3104_v4 }
 0xa50   :  { %15243 = vtanh.f32 %v17616_v22 }
 0xa5a   :  { %v15244_v49 = vpop.eup %15243 }
 0xa5b   :  { %v3108_v17 = vmul.f32 %v15244_v49, %v15242_v63 }
 0xa5d   :  { %3178 = vmatmul.mubr.f32.vlgmr.msra.gmra.mrb[20].mxu0 %v3108_v17  ;;  %3249 = vmatmul.mubr.f32.vlgmr.msra.gmra.mrb[20].mxu1 %v3108_v17 }
 0xa5e   :  { %12412 = vmatpush1.bf16.msra.mxu0 %v17244_v27  ;;  %12444 = vmatpush1.bf16.msra.mxu1 %v17253_v53 }
 0xa5f   :  { %12414 = vmatprep.subr.bf16.mxu0 %v17267_v56  ;;  %12446 = vmatprep.subr.bf16.mxu1 %v17278_v29 }
 0xa60   :  { %3351 = vmatprep.mubr.f32.mxu0 %v21030_v3  ;;  %3422 = vmatprep.mubr.f32.mxu1 %v21030_v3 }
 0xa62   :  { %12416 = vmatpush1.bf16.msra.mxu0 %v17280_v50  ;;  %12448 = vmatpush1.bf16.msra.mxu1 %v17289_v46 }
 0xa63   :  { %12418 = vmatprep.subr.bf16.mxu0 %v17303_v1  ;;  %12450 = vmatprep.subr.bf16.mxu1 %v17314_v36 }
 0xa66   :  { %12420 = vmatpush1.bf16.msra.mxu0 %v17316_v48  ;;  %12452 = vmatpush1.bf16.msra.mxu1 %v17325_v25 }
 0xa67   :  { %12422 = vmatprep.subr.bf16.mxu0 %v17339_v11  ;;  %12454 = vmatprep.subr.bf16.mxu1 %v17350_v14 }
 0xa6a   :  { %12424 = vmatpush1.bf16.msra.mxu0 %v17352_v18  ;;  %12456 = vmatpush1.bf16.msra.mxu1 %v17361_v20 }
 0xa6b   :  { %12426 = vmatprep.subr.bf16.mxu0 %v17375_v58  ;;  %12458 = vmatprep.subr.bf16.mxu1 %v17386_v6 }
 0xa6e   :  { %12428 = vmatpush1.bf16.msra.mxu0 %v17388_v40  ;;  %12460 = vmatpush1.bf16.msra.mxu1 %v17400_v52 }
 0xa6f   :  { %12430 = vmatprep.subr.bf16.mxu0 %v17413_v21  ;;  %12462 = vmatprep.subr.bf16.mxu1 %v17415_v7 }
 0xa72   :  { %12432 = vmatpush1.bf16.msra.mxu0 %v17427_v57  ;;  %12464 = vmatpush1.bf16.msra.mxu1 %v17440_v19 }
 0xa73   :  { %12434 = vmatprep.subr.bf16.mxu0 %v17442_v32  ;;  %12466 = vmatprep.subr.bf16.mxu1 %v17453_v42 }
 0xa76   :  { %12436 = vmatpush1.bf16.msra.mxu0 %v17465_v54  ;;  %12468 = vmatpush1.bf16.msra.mxu1 %v17469_v5 }
 0xa77   :  { %12438 = vmatprep.subr.bf16.mxu0 %v17483_v44  ;;  %12470 = vmatprep.subr.bf16.mxu1 %v17494_v28 }
 0xa7a   :  { %12440 = vmatpush1.bf16.msra.mxu0 %v17496_v60  ;;  %12472 = vmatpush1.bf16.msra.mxu1 %v17505_v13 }
 0xa7b   :  { %12474 = vmatprep.subr.bf16.mxu0 %v17231_v61  ;;  %12506 = vmatprep.subr.bf16.mxu1 %v17242_v24 }
 0xb30   :  { %v3179_v45 = vpop.f32.mrb[20].mxu0  ;;  %v3250_v35 = vpop.f32.mrb[20].mxu1 }
 0xb31   :  { %v14989_v33 = vadd.f32 %v3179_v45, %v17559_v16  ;;  %v3181_v41 = vpop.f32.mrb[21].mxu0  ;;  %v3252_v38 = vpop.f32.mrb[21].mxu1  ;;  %v15005_v47 = vadd.f32 %v3250_v35, %v17567_v23 }
 0xb32   :  { %v14990_v62 = vadd.f32 %v3181_v41, %v17562_v10  ;;  %v15006_v51 = vadd.f32 %v3252_v38, %v17570_v26 }
 0xb33   :  { %v11388_v39 = vmul.f32 -1.442695, %v14989_v33  ;;  %v11390_v59 = vmul.f32 -1.442695, %v15005_v47 }
 0xb34   :  { %v11389_v15 = vmul.f32 -1.442695, %v14990_v62 }
 0xb35   :  { %15245 = vpow2.f32 %v11388_v39 }
 0xb36   :  { %15247 = vpow2.f32 %v11389_v15 }
 0xb37   :  { %15249 = vtanh.f32 %v15006_v51 }
 0xb38   :  { %15251 = vpow2.f32 %v11390_v59 }
 0xb3f   :  { %v15246_v2 = vpop.eup %15245 }
 0xb40   :  { %v3268_v8 = vadd.f32 1.0, %v15246_v2  ;;  %v15248_v9 = vpop.eup %15247 }
 0xb41   :  { %v3269_v43 = vadd.f32 1.0, %v15248_v9  ;;  %v15250_v0 = vpop.eup %15249 }
 0xb42   :  { %15253 = vrcp.f32 %v3268_v8  ;;  %v15252_v12 = vpop.eup %15251 }
 0xb43   :  { %15255 = vrcp.f32 %v3269_v43  ;;  %v3270_v17 = vadd.f32 1.0, %v15252_v12 }
 0xb45   :  { %15257 = vrcp.f32 %v3270_v17 }
 0xb4c   :  { %v15254_v4 = vpop.eup %15253 }
 0xb4d   :  { %v3279_v63 = vmul.f32 %v15254_v4, %v15250_v0  ;;  %v15256_v49 = vpop.eup %15255 }
 0xb4e   :  { %v3278_v45 = vmul.f32 %v15256_v49, %v17616_v22 }
 0xb4f   :  { %v15258_v33 = vpop.eup %15257 }
 0xb50   :  { %v17658_v35 = vadd.f32 %v3279_v63, %v3278_v45 }
 0xb52   :  { %15259 = vtanh.f32 %v17658_v35 }
 0xb5c   :  { %v15260_v41 = vpop.eup %15259 }
 0xb5d   :  { %v3282_v38 = vmul.f32 %v15260_v41, %v15258_v33 }
 0xb5f   :  { %3352 = vmatmul.mubr.f32.vlgmr.msra.gmra.mrb[22].mxu0 %v3282_v38  ;;  %3423 = vmatmul.mubr.f32.vlgmr.msra.gmra.mrb[22].mxu1 %v3282_v38 }
 0xb60   :  { %12476 = vmatpush1.bf16.msra.mxu0 %v17244_v27  ;;  %12508 = vmatpush1.bf16.msra.mxu1 %v17253_v53 }
 0xb61   :  { %12478 = vmatprep.subr.bf16.mxu0 %v17267_v56  ;;  %12510 = vmatprep.subr.bf16.mxu1 %v17278_v29 }
 0xb62   :  { %3525 = vmatprep.mubr.f32.mxu0 %v21030_v3  ;;  %3596 = vmatprep.mubr.f32.mxu1 %v21030_v3 }
 0xb64   :  { %12480 = vmatpush1.bf16.msra.mxu0 %v17280_v50  ;;  %12512 = vmatpush1.bf16.msra.mxu1 %v17289_v46 }
 0xb65   :  { %12482 = vmatprep.subr.bf16.mxu0 %v17303_v1  ;;  %12514 = vmatprep.subr.bf16.mxu1 %v17314_v36 }
 0xb68   :  { %12484 = vmatpush1.bf16.msra.mxu0 %v17316_v48  ;;  %12516 = vmatpush1.bf16.msra.mxu1 %v17325_v25 }
 0xb69   :  { %12486 = vmatprep.subr.bf16.mxu0 %v17339_v11  ;;  %12518 = vmatprep.subr.bf16.mxu1 %v17350_v14 }
 0xb6c   :  { %12488 = vmatpush1.bf16.msra.mxu0 %v17352_v18  ;;  %12520 = vmatpush1.bf16.msra.mxu1 %v17361_v20 }
 0xb6d   :  { %12490 = vmatprep.subr.bf16.mxu0 %v17375_v58  ;;  %12522 = vmatprep.subr.bf16.mxu1 %v17386_v6 }
 0xb70   :  { %12492 = vmatpush1.bf16.msra.mxu0 %v17388_v40  ;;  %12524 = vmatpush1.bf16.msra.mxu1 %v17400_v52 }
 0xb71   :  { %12494 = vmatprep.subr.bf16.mxu0 %v17413_v21  ;;  %12526 = vmatprep.subr.bf16.mxu1 %v17415_v7 }
 0xb74   :  { %12496 = vmatpush1.bf16.msra.mxu0 %v17427_v57  ;;  %12528 = vmatpush1.bf16.msra.mxu1 %v17440_v19 }
 0xb75   :  { %12498 = vmatprep.subr.bf16.mxu0 %v17442_v32  ;;  %12530 = vmatprep.subr.bf16.mxu1 %v17453_v42 }
 0xb78   :  { %12500 = vmatpush1.bf16.msra.mxu0 %v17465_v54  ;;  %12532 = vmatpush1.bf16.msra.mxu1 %v17469_v5 }
 0xb79   :  { %12502 = vmatprep.subr.bf16.mxu0 %v17483_v44  ;;  %12534 = vmatprep.subr.bf16.mxu1 %v17494_v28 }
 0xb7c   :  { %12504 = vmatpush1.bf16.msra.mxu0 %v17496_v60  ;;  %12536 = vmatpush1.bf16.msra.mxu1 %v17505_v13 }
 0xb7d   :  { %12538 = vmatprep.subr.bf16.mxu0 %v17231_v61  ;;  %12570 = vmatprep.subr.bf16.mxu1 %v17242_v24 }
 0xc32   :  { %v3353_v22 = vpop.f32.mrb[22].mxu0  ;;  %v3424_v62 = vpop.f32.mrb[22].mxu1 }
 0xc33   :  { %v14991_v39 = vadd.f32 %v3353_v22, %v17559_v16  ;;  %v3355_v15 = vpop.f32.mrb[23].mxu0  ;;  %v3426_v47 = vpop.f32.mrb[23].mxu1  ;;  %v15007_v8 = vadd.f32 %v3424_v62, %v17567_v23 }
 0xc34   :  { %v14992_v51 = vadd.f32 %v3355_v15, %v17562_v10  ;;  %v15008_v9 = vadd.f32 %v3426_v47, %v17570_v26 }
 0xc35   :  { %v11391_v59 = vmul.f32 -1.442695, %v14991_v39  ;;  %v11393_v43 = vmul.f32 -1.442695, %v15007_v8 }
 0xc36   :  { %v11392_v2 = vmul.f32 -1.442695, %v14992_v51 }
 0xc37   :  { %15261 = vpow2.f32 %v11391_v59 }
 0xc38   :  { %15263 = vpow2.f32 %v11392_v2 }
 0xc39   :  { %15265 = vtanh.f32 %v15008_v9 }
 0xc3a   :  { %15267 = vpow2.f32 %v11393_v43 }
 0xc41   :  { %v15262_v0 = vpop.eup %15261 }
 0xc42   :  { %v3442_v12 = vadd.f32 1.0, %v15262_v0  ;;  %v15264_v4 = vpop.eup %15263 }
 0xc43   :  { %v3443_v63 = vadd.f32 1.0, %v15264_v4  ;;  %v15266_v49 = vpop.eup %15265 }
 0xc44   :  { %15269 = vrcp.f32 %v3442_v12  ;;  %v15268_v17 = vpop.eup %15267 }
 0xc45   :  { %15271 = vrcp.f32 %v3443_v63  ;;  %v3444_v38 = vadd.f32 1.0, %v15268_v17 }
 0xc47   :  { %15273 = vrcp.f32 %v3444_v38 }
 0xc4e   :  { %v15270_v45 = vpop.eup %15269 }
 0xc4f   :  { %v3453_v33 = vmul.f32 %v15270_v45, %v15266_v49  ;;  %v15272_v41 = vpop.eup %15271 }
 0xc50   :  { %v3452_v22 = vmul.f32 %v15272_v41, %v17658_v35 }
 0xc51   :  { %v15274_v39 = vpop.eup %15273 }
 0xc52   :  { %v17700_v62 = vadd.f32 %v3453_v33, %v3452_v22 }
 0xc54   :  { %15275 = vtanh.f32 %v17700_v62 }
 0xc5e   :  { %v15276_v15 = vpop.eup %15275 }
 0xc5f   :  { %v3456_v47 = vmul.f32 %v15276_v15, %v15274_v39 }
 0xc61   :  { %3526 = vmatmul.mubr.f32.vlgmr.msra.gmra.mrb[24].mxu0 %v3456_v47  ;;  %3597 = vmatmul.mubr.f32.vlgmr.msra.gmra.mrb[24].mxu1 %v3456_v47 }
 0xc62   :  { %12540 = vmatpush1.bf16.msra.mxu0 %v17244_v27  ;;  %12572 = vmatpush1.bf16.msra.mxu1 %v17253_v53 }
 0xc63   :  { %12542 = vmatprep.subr.bf16.mxu0 %v17267_v56  ;;  %12574 = vmatprep.subr.bf16.mxu1 %v17278_v29 }
 0xc64   :  { %3699 = vmatprep.mubr.f32.mxu0 %v21030_v3  ;;  %3770 = vmatprep.mubr.f32.mxu1 %v21030_v3 }
 0xc66   :  { %12544 = vmatpush1.bf16.msra.mxu0 %v17280_v50  ;;  %12576 = vmatpush1.bf16.msra.mxu1 %v17289_v46 }
 0xc67   :  { %12546 = vmatprep.subr.bf16.mxu0 %v17303_v1  ;;  %12578 = vmatprep.subr.bf16.mxu1 %v17314_v36 }
 0xc6a   :  { %12548 = vmatpush1.bf16.msra.mxu0 %v17316_v48  ;;  %12580 = vmatpush1.bf16.msra.mxu1 %v17325_v25 }
 0xc6b   :  { %12550 = vmatprep.subr.bf16.mxu0 %v17339_v11  ;;  %12582 = vmatprep.subr.bf16.mxu1 %v17350_v14 }
 0xc6e   :  { %12552 = vmatpush1.bf16.msra.mxu0 %v17352_v18  ;;  %12584 = vmatpush1.bf16.msra.mxu1 %v17361_v20 }
 0xc6f   :  { %12554 = vmatprep.subr.bf16.mxu0 %v17375_v58  ;;  %12586 = vmatprep.subr.bf16.mxu1 %v17386_v6 }
 0xc72   :  { %12556 = vmatpush1.bf16.msra.mxu0 %v17388_v40  ;;  %12588 = vmatpush1.bf16.msra.mxu1 %v17400_v52 }
 0xc73   :  { %12558 = vmatprep.subr.bf16.mxu0 %v17413_v21  ;;  %12590 = vmatprep.subr.bf16.mxu1 %v17415_v7 }
 0xc76   :  { %12560 = vmatpush1.bf16.msra.mxu0 %v17427_v57  ;;  %12592 = vmatpush1.bf16.msra.mxu1 %v17440_v19 }
 0xc77   :  { %12562 = vmatprep.subr.bf16.mxu0 %v17442_v32  ;;  %12594 = vmatprep.subr.bf16.mxu1 %v17453_v42 }
 0xc7a   :  { %12564 = vmatpush1.bf16.msra.mxu0 %v17465_v54  ;;  %12596 = vmatpush1.bf16.msra.mxu1 %v17469_v5 }
 0xc7b   :  { %12566 = vmatprep.subr.bf16.mxu0 %v17483_v44  ;;  %12598 = vmatprep.subr.bf16.mxu1 %v17494_v28 }
 0xc7e   :  { %12568 = vmatpush1.bf16.msra.mxu0 %v17496_v60  ;;  %12600 = vmatpush1.bf16.msra.mxu1 %v17505_v13 }
 0xc7f   :  { %12602 = vmatprep.subr.bf16.mxu0 %v17231_v61  ;;  %12634 = vmatprep.subr.bf16.mxu1 %v17242_v24 }
 0xd34   :  { %v3527_v35 = vpop.f32.mrb[24].mxu0  ;;  %v3598_v51 = vpop.f32.mrb[24].mxu1 }
 0xd35   :  { %v14993_v59 = vadd.f32 %v3527_v35, %v17559_v16  ;;  %v3529_v2 = vpop.f32.mrb[25].mxu0  ;;  %v3600_v8 = vpop.f32.mrb[25].mxu1  ;;  %v15009_v12 = vadd.f32 %v3598_v51, %v17567_v23 }
 0xd36   :  { %v14994_v9 = vadd.f32 %v3529_v2, %v17562_v10  ;;  %v15010_v4 = vadd.f32 %v3600_v8, %v17570_v26 }
 0xd37   :  { %v11394_v43 = vmul.f32 -1.442695, %v14993_v59  ;;  %v11396_v63 = vmul.f32 -1.442695, %v15009_v12 }
 0xd38   :  { %v11395_v0 = vmul.f32 -1.442695, %v14994_v9 }
 0xd39   :  { %15277 = vpow2.f32 %v11394_v43 }
 0xd3a   :  { %15279 = vpow2.f32 %v11395_v0 }
 0xd3b   :  { %15281 = vtanh.f32 %v15010_v4 }
 0xd3c   :  { %15283 = vpow2.f32 %v11396_v63 }
 0xd43   :  { %v15278_v49 = vpop.eup %15277 }
 0xd44   :  { %v3616_v17 = vadd.f32 1.0, %v15278_v49  ;;  %v15280_v45 = vpop.eup %15279 }
 0xd45   :  { %v3617_v33 = vadd.f32 1.0, %v15280_v45  ;;  %v15282_v41 = vpop.eup %15281 }
 0xd46   :  { %15285 = vrcp.f32 %v3616_v17  ;;  %v15284_v38 = vpop.eup %15283 }
 0xd47   :  { %15287 = vrcp.f32 %v3617_v33  ;;  %v3618_v47 = vadd.f32 1.0, %v15284_v38 }
 0xd49   :  { %15289 = vrcp.f32 %v3618_v47 }
 0xd50   :  { %v15286_v22 = vpop.eup %15285 }
 0xd51   :  { %v3627_v39 = vmul.f32 %v15286_v22, %v15282_v41  ;;  %v15288_v15 = vpop.eup %15287 }
 0xd52   :  { %v3626_v35 = vmul.f32 %v15288_v15, %v17700_v62 }
 0xd53   :  { %v15290_v59 = vpop.eup %15289 }
 0xd54   :  { %v17742_v51 = vadd.f32 %v3627_v39, %v3626_v35 }
 0xd56   :  { %15291 = vtanh.f32 %v17742_v51 }
 0xd60   :  { %v15292_v2 = vpop.eup %15291 }
 0xd61   :  { %v3630_v8 = vmul.f32 %v15292_v2, %v15290_v59 }
 0xd63   :  { %3700 = vmatmul.mubr.f32.vlgmr.msra.gmra.mrb[26].mxu0 %v3630_v8  ;;  %3771 = vmatmul.mubr.f32.vlgmr.msra.gmra.mrb[26].mxu1 %v3630_v8 }
 0xd64   :  { %12604 = vmatpush1.bf16.msra.mxu0 %v17244_v27  ;;  %12636 = vmatpush1.bf16.msra.mxu1 %v17253_v53 }
 0xd65   :  { %12606 = vmatprep.subr.bf16.mxu0 %v17267_v56  ;;  %12638 = vmatprep.subr.bf16.mxu1 %v17278_v29 }
 0xd66   :  { %3873 = vmatprep.mubr.f32.mxu0 %v21030_v3  ;;  %3944 = vmatprep.mubr.f32.mxu1 %v21030_v3 }
 0xd68   :  { %12608 = vmatpush1.bf16.msra.mxu0 %v17280_v50  ;;  %12640 = vmatpush1.bf16.msra.mxu1 %v17289_v46 }
 0xd69   :  { %12610 = vmatprep.subr.bf16.mxu0 %v17303_v1  ;;  %12642 = vmatprep.subr.bf16.mxu1 %v17314_v36 }
 0xd6c   :  { %12612 = vmatpush1.bf16.msra.mxu0 %v17316_v48  ;;  %12644 = vmatpush1.bf16.msra.mxu1 %v17325_v25 }
 0xd6d   :  { %12614 = vmatprep.subr.bf16.mxu0 %v17339_v11  ;;  %12646 = vmatprep.subr.bf16.mxu1 %v17350_v14 }
 0xd70   :  { %12616 = vmatpush1.bf16.msra.mxu0 %v17352_v18  ;;  %12648 = vmatpush1.bf16.msra.mxu1 %v17361_v20 }
 0xd71   :  { %12618 = vmatprep.subr.bf16.mxu0 %v17375_v58  ;;  %12650 = vmatprep.subr.bf16.mxu1 %v17386_v6 }
 0xd74   :  { %12620 = vmatpush1.bf16.msra.mxu0 %v17388_v40  ;;  %12652 = vmatpush1.bf16.msra.mxu1 %v17400_v52 }
 0xd75   :  { %12622 = vmatprep.subr.bf16.mxu0 %v17413_v21  ;;  %12654 = vmatprep.subr.bf16.mxu1 %v17415_v7 }
 0xd78   :  { %12624 = vmatpush1.bf16.msra.mxu0 %v17427_v57  ;;  %12656 = vmatpush1.bf16.msra.mxu1 %v17440_v19 }
 0xd79   :  { %12626 = vmatprep.subr.bf16.mxu0 %v17442_v32  ;;  %12658 = vmatprep.subr.bf16.mxu1 %v17453_v42 }
 0xd7c   :  { %12628 = vmatpush1.bf16.msra.mxu0 %v17465_v54  ;;  %12660 = vmatpush1.bf16.msra.mxu1 %v17469_v5 }
 0xd7d   :  { %12630 = vmatprep.subr.bf16.mxu0 %v17483_v44  ;;  %12662 = vmatprep.subr.bf16.mxu1 %v17494_v28 }
 0xd80   :  { %12632 = vmatpush1.bf16.msra.mxu0 %v17496_v60  ;;  %12664 = vmatpush1.bf16.msra.mxu1 %v17505_v13 }
 0xd81   :  { %12666 = vmatprep.subr.bf16.mxu0 %v17231_v61  ;;  %12698 = vmatprep.subr.bf16.mxu1 %v17242_v24 }
 0xe36   :  { %v3701_v62 = vpop.f32.mrb[26].mxu0  ;;  %v3772_v9 = vpop.f32.mrb[26].mxu1 }
 0xe37   :  { %v14995_v43 = vadd.f32 %v3701_v62, %v17559_v16  ;;  %v3703_v0 = vpop.f32.mrb[27].mxu0  ;;  %v3774_v12 = vpop.f32.mrb[27].mxu1  ;;  %v15011_v17 = vadd.f32 %v3772_v9, %v17567_v23 }
 0xe38   :  { %v14996_v4 = vadd.f32 %v3703_v0, %v17562_v10  ;;  %v15012_v45 = vadd.f32 %v3774_v12, %v17570_v26  ;;  %v4153_v0 = vld [vmem:[%s21021_s7] sm:$0xff] }
 0xe39   :  { %v11397_v63 = vmul.f32 -1.442695, %v14995_v43  ;;  %v11399_v33 = vmul.f32 -1.442695, %v15011_v17  ;;  %v4157_v12 = vld [vmem:[%s21021_s7 + $0x20] sm:$0xff]  ;;  %v4159_v17 = vld [vmem:[%s21021_s7 + $0x30] sm:$0xff] }
 0xe3a   :  { %v11398_v49 = vmul.f32 -1.442695, %v14996_v4 }
 0xe3b   :  { %15293 = vpow2.f32 %v11397_v63  ;;  %v12731_v63 = vpack.c.bf16 %v4157_v12, %v4153_v0  ;;  %v4191_v0 = vld [vmem:[%s21021_s7 + $0x130] sm:$0xff] }
 0xe3c   :  { %15295 = vpow2.f32 %v11398_v49  ;;  %v4155_v49 = vld [vmem:[%s21021_s7 + $0x10] sm:$0xff] }
 0xe3d   :  { %15297 = vtanh.f32 %v15012_v45  ;;  %v12763_v45 = vpack.c.bf16 %v4159_v17, %v4155_v49  ;;  %v4196_v49 = vld [vmem:[%s21021_s7 + $0x158] sm:$0xff] }
 0xe3e   :  { %15299 = vpow2.f32 %v11399_v33  ;;  %v4162_v33 = vld [vmem:[%s21021_s7 + $0x48] sm:$0xff] }
 0xe45   :  { %v15294_v61 = vpop.eup %15293 }
 0xe46   :  { %v3790_v41 = vadd.f32 1.0, %v15294_v61  ;;  %v15296_v24 = vpop.eup %15295  ;;  %v4166_v61 = vld [vmem:[%s21021_s7 + $0x68] sm:$0xff] }
 0xe47   :  { %v3791_v38 = vadd.f32 1.0, %v15296_v24  ;;  %v15298_v22 = vpop.eup %15297  ;;  %v12733_v24 = vpack.c.bf16 %v4166_v61, %v4162_v33  ;;  %v4193_v33 = vld [vmem:[%s21021_s7 + $0x140] sm:$0xff] }
 0xe48   :  { %15301 = vrcp.f32 %v3790_v41  ;;  %v15300_v39 = vpop.eup %15299  ;;  %v4164_v41 = vld [vmem:[%s21021_s7 + $0x58] sm:$0xff]  ;;  %v4197_v61 = vld [vmem:[%s21021_s7 + $0x160] sm:$0xff] }
 0xe49   :  { %15303 = vrcp.f32 %v3791_v38  ;;  %v3792_v59 = vadd.f32 1.0, %v15300_v39  ;;  %v4168_v38 = vld [vmem:[%s21021_s7 + $0x78] sm:$0xff]  ;;  %v4165_v39 = vld [vmem:[%s21021_s7 + $0x60] sm:$0xff] }
 0xe4b   :  { %15305 = vrcp.f32 %v3792_v59  ;;  %v4167_v59 = vld [vmem:[%s21021_s7 + $0x70] sm:$0xff] }
 0xe52   :  { %v15302_v15 = vpop.eup %15301 }
 0xe53   :  { %v3801_v47 = vmul.f32 %v15302_v15, %v15298_v22  ;;  %v15304_v35 = vpop.eup %15303  ;;  %v4161_v22 = vld [vmem:[%s21021_s7 + $0x40] sm:$0xff]  ;;  %v12765_v15 = vpack.c.bf16 %v4168_v38, %v4164_v41  ;;  %v4195_v38 = vld [vmem:[%s21021_s7 + $0x150] sm:$0xff] }
 0xe54   :  { %v3800_v2 = vmul.f32 %v15304_v35, %v17742_v51  ;;  %v4160_v51 = vld [vmem:[%s21021_s7 + $0x38] sm:$0xff]  ;;  %v4163_v35 = vld [vmem:[%s21021_s7 + $0x50] sm:$0xff] }
 0xe55   :  { %v15306_v62 = vpop.eup %15305 }
 0xe56   :  { %v17784_v8 = vadd.f32 %v3801_v47, %v3800_v2  ;;  %v12735_v47 = vpack.c.bf16 %v4165_v39, %v4161_v22  ;;  %v12767_v2 = vpack.c.bf16 %v4167_v59, %v4163_v35  ;;  %v4199_v22 = vld [vmem:[%s21021_s7 + $0x170] sm:$0xff]  ;;  %v4204_v35 = vld [vmem:[%s21021_s7 + $0x198] sm:$0xff] }
 0xe57   :  { %v12783_v39 = vpack.c.bf16 %v4199_v22, %v4195_v38  ;;  %v4392_v38 = vld [vmem:[%s21022_s8 + $0x20] sm:$0xff]  ;;  %v4390_v22 = vld [vmem:[%s21022_s8 + $0x10] sm:$0xff] }
 0xe58   :  { %15307 = vtanh.f32 %v17784_v8 }
 0xe62   :  { %v15308_v9 = vpop.eup %15307 }
 0xe63   :  { %v3804_v43 = vmul.f32 %v15308_v9, %v15306_v62  ;;  %v4174_v62 = vld [vmem:[%s21021_s7 + $0xa8] sm:$0xff]  ;;  %v4172_v9 = vld [vmem:[%s21021_s7 + $0x98] sm:$0xff] }
 0xe65   :  { %3874 = vmatmul.mubr.f32.vlgmr.msra.gmra.mrb[28].mxu0 %v3804_v43  ;;  %3945 = vmatmul.mubr.f32.vlgmr.msra.gmra.mrb[28].mxu1 %v3804_v43 }
 0xe66   :  { %12668 = vmatpush1.bf16.msra.mxu0 %v17244_v27  ;;  %12700 = vmatpush1.bf16.msra.mxu1 %v17253_v53 }
 0xe67   :  { %12670 = vmatprep.subr.bf16.mxu0 %v17267_v56  ;;  %12702 = vmatprep.subr.bf16.mxu1 %v17278_v29 }
 0xe68   :  { %4047 = vmatprep.mubr.f32.mxu0 %v21030_v3  ;;  %4118 = vmatprep.mubr.f32.mxu1 %v21030_v3 }
 0xe6a   :  { %12672 = vmatpush1.bf16.msra.mxu0 %v17280_v50  ;;  %12704 = vmatpush1.bf16.msra.mxu1 %v17289_v46 }
 0xe6b   :  { %12674 = vmatprep.subr.bf16.mxu0 %v17303_v1  ;;  %12706 = vmatprep.subr.bf16.mxu1 %v17314_v36 }
 0xe6e   :  { %12676 = vmatpush1.bf16.msra.mxu0 %v17316_v48  ;;  %12708 = vmatpush1.bf16.msra.mxu1 %v17325_v25 }
 0xe6f   :  { %12678 = vmatprep.subr.bf16.mxu0 %v17339_v11  ;;  %12710 = vmatprep.subr.bf16.mxu1 %v17350_v14 }
 0xe72   :  { %12680 = vmatpush1.bf16.msra.mxu0 %v17352_v18  ;;  %12712 = vmatpush1.bf16.msra.mxu1 %v17361_v20 }
 0xe73   :  { %12682 = vmatprep.subr.bf16.mxu0 %v17375_v58  ;;  %12714 = vmatprep.subr.bf16.mxu1 %v17386_v6 }
 0xe76   :  { %12684 = vmatpush1.bf16.msra.mxu0 %v17388_v40  ;;  %12716 = vmatpush1.bf16.msra.mxu1 %v17400_v52 }
 0xe77   :  { %12686 = vmatprep.subr.bf16.mxu0 %v17413_v21  ;;  %12718 = vmatprep.subr.bf16.mxu1 %v17415_v7 }
 0xe7a   :  { %12688 = vmatpush1.bf16.msra.mxu0 %v17427_v57  ;;  %12720 = vmatpush1.bf16.msra.mxu1 %v17440_v19 }
 0xe7b   :  { %12690 = vmatprep.subr.bf16.mxu0 %v17442_v32  ;;  %12722 = vmatprep.subr.bf16.mxu1 %v17453_v42 }
 0xe7e   :  { %12692 = vmatpush1.bf16.msra.mxu0 %v17465_v54  ;;  %12724 = vmatpush1.bf16.msra.mxu1 %v17469_v5 }
 0xe7f   :  { %12694 = vmatprep.subr.bf16.mxu0 %v17483_v44  ;;  %12726 = vmatprep.subr.bf16.mxu1 %v17494_v28  ;;  %v4154_v44 = vld [vmem:[%s21021_s7 + $0x8] sm:$0xff] }
 0xe80   :  { %v4158_v28 = vld [vmem:[%s21021_s7 + $0x28] sm:$0xff] }
 0xe82   :  { %12696 = vmatpush1.bf16.msra.mxu0 %v17496_v60  ;;  %12728 = vmatpush1.bf16.msra.mxu1 %v17505_v13  ;;  %v4156_v60 = vld [vmem:[%s21021_s7 + $0x18] sm:$0xff]  ;;  %v12729_v13 = vpack.c.bf16 %v4158_v28, %v4154_v44  ;;  %v4185_v44 = vld [vmem:[%s21021_s7 + $0x100] sm:$0xff] }
 0xe83   :  { %v12761_v4 = vpack.c.bf16 %v4160_v51, %v4156_v60  ;;  %v4189_v28 = vld [vmem:[%s21021_s7 + $0x120] sm:$0xff]  ;;  %v4187_v51 = vld [vmem:[%s21021_s7 + $0x110] sm:$0xff] }
 0xe84   :  { %12730 = vmatprep.subr.bf16.mxu0 %v12729_v13  ;;  %v12747_v13 = vpack.c.bf16 %v4189_v28, %v4185_v44  ;;  %v12779_v12 = vpack.c.bf16 %v4191_v0, %v4187_v51 }
 0xe85   :  { %12762 = vmatprep.subr.bf16.mxu1 %v12761_v4  ;;  %v4194_v4 = vld [vmem:[%s21021_s7 + $0x148] sm:$0xff] }
 0xf38   :  { %v3875_v27 = vpop.f32.mrb[28].mxu0  ;;  %v3946_v53 = vpop.f32.mrb[28].mxu1 }
 0xf39   :  { %v14997_v56 = vadd.f32 %v3875_v27, %v17559_v16  ;;  %v3877_v29 = vpop.f32.mrb[29].mxu0  ;;  %v3948_v50 = vpop.f32.mrb[29].mxu1  ;;  %v15013_v48 = vadd.f32 %v3946_v53, %v17567_v23  ;;  %v4176_v27 = vld [vmem:[%s21021_s7 + $0xb8] sm:$0xff]  ;;  %v4169_v53 = vld [vmem:[%s21021_s7 + $0x80] sm:$0xff] }
 0xf3a   :  { %v14998_v46 = vadd.f32 %v3877_v29, %v17562_v10  ;;  %v15014_v25 = vadd.f32 %v3948_v50, %v17570_v26  ;;  %v12769_v29 = vpack.c.bf16 %v4176_v27, %v4172_v9  ;;  %v4203_v27 = vld [vmem:[%s21021_s7 + $0x190] sm:$0xff] }
 0xf3b   :  { %v11400_v1 = vmul.f32 -1.442695, %v14997_v56  ;;  %v11402_v11 = vmul.f32 -1.442695, %v15013_v48  ;;  %v4173_v56 = vld [vmem:[%s21021_s7 + $0xa0] sm:$0xff]  ;;  %v4178_v48 = vld [vmem:[%s21021_s7 + $0xc8] sm:$0xff] }
 0xf3c   :  { %v11401_v36 = vmul.f32 -1.442695, %v14998_v46  ;;  %v12739_v50 = vpack.c.bf16 %v4173_v56, %v4169_v53  ;;  %v4171_v46 = vld [vmem:[%s21021_s7 + $0x90] sm:$0xff]  ;;  %v4210_v56 = vld [vmem:[%s21021_s7 + $0x1c8] sm:$0xff] }
 0xf3d   :  { %15309 = vpow2.f32 %v11400_v1  ;;  %v4175_v1 = vld [vmem:[%s21021_s7 + $0xb0] sm:$0xff] }
 0xf3e   :  { %15311 = vpow2.f32 %v11401_v36  ;;  %v12771_v36 = vpack.c.bf16 %v4175_v1, %v4171_v46  ;;  %v4207_v53 = vld [vmem:[%s21021_s7 + $0x1b0] sm:$0xff]  ;;  %v4212_v46 = vld [vmem:[%s21021_s7 + $0x1d8] sm:$0xff] }
 0xf3f   :  { %15313 = vtanh.f32 %v15014_v25  ;;  %v4182_v25 = vld [vmem:[%s21021_s7 + $0xe8] sm:$0xff]  ;;  %v4216_v1 = vld [vmem:[%s21021_s7 + $0x1f8] sm:$0xff] }
 0xf40   :  { %15315 = vpow2.f32 %v11402_v11  ;;  %v4180_v11 = vld [vmem:[%s21021_s7 + $0xd8] sm:$0xff] }
 0xf47   :  { %v15310_v14 = vpop.eup %15309 }
 0xf48   :  { %v3964_v18 = vadd.f32 1.0, %v15310_v14  ;;  %v15312_v20 = vpop.eup %15311  ;;  %v12741_v14 = vpack.c.bf16 %v4182_v25, %v4178_v48  ;;  %v12789_v48 = vpack.c.bf16 %v4216_v1, %v4212_v46  ;;  %v4209_v25 = vld [vmem:[%s21021_s7 + $0x1c0] sm:$0xff]  ;;  %v4405_v46 = vld [vmem:[%s21022_s8 + $0x88] sm:$0xff] }
 0xf49   :  { %v3965_v58 = vadd.f32 1.0, %v15312_v20  ;;  %v15314_v6 = vpop.eup %15313  ;;  %v4177_v20 = vld [vmem:[%s21021_s7 + $0xc0] sm:$0xff]  ;;  %v4409_v1 = vld [vmem:[%s21022_s8 + $0xa8] sm:$0xff] }
 0xf4a   :  { %15317 = vrcp.f32 %v3964_v18  ;;  %v15316_v40 = vpop.eup %15315  ;;  %v4184_v18 = vld [vmem:[%s21021_s7 + $0xf8] sm:$0xff] }
 0xf4b   :  { %15319 = vrcp.f32 %v3965_v58  ;;  %v3966_v57 = vadd.f32 1.0, %v15316_v40  ;;  %v4181_v58 = vld [vmem:[%s21021_s7 + $0xe0] sm:$0xff] }
 0xf4c   :  { %v12743_v40 = vpack.c.bf16 %v4181_v58, %v4177_v20  ;;  %v4215_v20 = vld [vmem:[%s21021_s7 + $0x1f0] sm:$0xff]  ;;  %v4389_v58 = vld [vmem:[%s21022_s8 + $0x8] sm:$0xff] }
 0xf4d   :  { %15321 = vrcp.f32 %v3966_v57  ;;  %v4186_v57 = vld [vmem:[%s21021_s7 + $0x108] sm:$0xff] }
 0xf54   :  { %v15318_v52 = vpop.eup %15317 }
 0xf55   :  { %v3975_v21 = vmul.f32 %v15318_v52, %v15314_v6  ;;  %v15320_v7 = vpop.eup %15319  ;;  %v12773_v6 = vpack.c.bf16 %v4184_v18, %v4180_v11  ;;  %v4179_v52 = vld [vmem:[%s21021_s7 + $0xd0] sm:$0xff]  ;;  %v4213_v11 = vld [vmem:[%s21021_s7 + $0x1e0] sm:$0xff] }
 0xf56   :  { %v3974_v19 = vmul.f32 %v15320_v7, %v17784_v8  ;;  %v4170_v8 = vld [vmem:[%s21021_s7 + $0x88] sm:$0xff]  ;;  %v12759_v18 = vpack.c.bf16 %v4213_v11, %v4209_v25 }
 0xf57   :  { %v15322_v42 = vpop.eup %15321  ;;  %v12737_v43 = vpack.c.bf16 %v4174_v62, %v4170_v8  ;;  %v4201_v8 = vld [vmem:[%s21021_s7 + $0x180] sm:$0xff] }
 0xf58   :  { %v17824_v32 = vadd.f32 %v3975_v21, %v3974_v19  ;;  %v4183_v21 = vld [vmem:[%s21021_s7 + $0xf0] sm:$0xff]  ;;  %v4190_v19 = vld [vmem:[%s21021_s7 + $0x128] sm:$0xff]  ;;  %v4205_v62 = vld [vmem:[%s21021_s7 + $0x1a0] sm:$0xff] }
 0xf59   :  { %v12775_v7 = vpack.c.bf16 %v4183_v21, %v4179_v52  ;;  %v4391_v21 = vld [vmem:[%s21022_s8 + $0x18] sm:$0xff] }
 0xf5a   :  { %15323 = vtanh.f32 %v17824_v32 }
 0xf64   :  { %v15324_v54 = vpop.eup %15323 }
 0xf65   :  { %v3978_v5 = vmul.f32 %v15324_v54, %v15322_v42  ;;  %v4188_v42 = vld [vmem:[%s21021_s7 + $0x118] sm:$0xff]  ;;  %v12745_v54 = vpack.c.bf16 %v4190_v19, %v4186_v57 }
 0xf67   :  { %4048 = vmatmul.mubr.f32.vlgmr.msra.gmra.mrb[30].mxu0 %v3978_v5  ;;  %4119 = vmatmul.mubr.f32.vlgmr.msra.gmra.mrb[30].mxu1 %v3978_v5  ;;  %v4192_v5 = vld [vmem:[%s21021_s7 + $0x138] sm:$0xff] }
 0xf68   :  { %4303 = vmatprep.mubr.f32.mxu0 %v21030_v3  ;;  %4374 = vmatprep.mubr.f32.mxu1 %v21030_v3  ;;  %v12777_v60 = vpack.c.bf16 %v4192_v5, %v4188_v42 }
 0xf69   :  { %12732 = vmatpush1.bf16.msra.mxu0 %v12731_v63  ;;  %12764 = vmatpush1.bf16.msra.mxu1 %v12763_v45  ;;  %v4198_v63 = vld [vmem:[%s21021_s7 + $0x168] sm:$0xff]  ;;  %v4200_v45 = vld [vmem:[%s21021_s7 + $0x178] sm:$0xff] }
 0xf6a   :  { %12734 = vmatprep.subr.bf16.mxu0 %v12733_v24  ;;  %12766 = vmatprep.subr.bf16.mxu1 %v12765_v15  ;;  %v12749_v17 = vpack.c.bf16 %v4198_v63, %v4194_v4  ;;  %v12781_v41 = vpack.c.bf16 %v4200_v45, %v4196_v49  ;;  %v12751_v24 = vpack.c.bf16 %v4197_v61, %v4193_v33  ;;  %v4202_v15 = vld [vmem:[%s21021_s7 + $0x188] sm:$0xff] }
 0xf6d   :  { %12736 = vmatpush1.bf16.msra.mxu0 %v12735_v47  ;;  %12768 = vmatpush1.bf16.msra.mxu1 %v12767_v2  ;;  %v4206_v47 = vld [vmem:[%s21021_s7 + $0x1a8] sm:$0xff]  ;;  %v4208_v2 = vld [vmem:[%s21021_s7 + $0x1b8] sm:$0xff] }
 0xf6e   :  { %12738 = vmatprep.subr.bf16.mxu0 %v12737_v43  ;;  %12770 = vmatprep.subr.bf16.mxu1 %v12769_v29  ;;  %v12753_v59 = vpack.c.bf16 %v4206_v47, %v4202_v15  ;;  %v12785_v9 = vpack.c.bf16 %v4208_v2, %v4204_v35  ;;  %v12755_v43 = vpack.c.bf16 %v4205_v62, %v4201_v8  ;;  %v4401_v15 = vld [vmem:[%s21022_s8 + $0x68] sm:$0xff]  ;;  %v4399_v47 = vld [vmem:[%s21022_s8 + $0x58] sm:$0xff] }
 0xf6f   :  { %v12787_v29 = vpack.c.bf16 %v4207_v53, %v4203_v27  ;;  %v4403_v35 = vld [vmem:[%s21022_s8 + $0x78] sm:$0xff] }
 0xf71   :  { %12740 = vmatpush1.bf16.msra.mxu0 %v12739_v50  ;;  %12772 = vmatpush1.bf16.msra.mxu1 %v12771_v36  ;;  %v4214_v50 = vld [vmem:[%s21021_s7 + $0x1e8] sm:$0xff] }
 0xf72   :  { %12742 = vmatprep.subr.bf16.mxu0 %v12741_v14  ;;  %12774 = vmatprep.subr.bf16.mxu1 %v12773_v6  ;;  %v12757_v36 = vpack.c.bf16 %v4214_v50, %v4210_v56  ;;  %v4211_v14 = vld [vmem:[%s21021_s7 + $0x1d0] sm:$0xff]  ;;  %v4393_v6 = vld [vmem:[%s21022_s8 + $0x28] sm:$0xff]  ;;  %v18080_v56 = vpack.c.bf16 %v4403_v35, %v4399_v47  ;;  %v4432_v47 = vld [vmem:[%s21022_s8 + $0x160] sm:$0xff] }
 0xf73   :  { %v18027_v52 = vpack.c.bf16 %v4393_v6, %v4389_v58  ;;  %v4402_v50 = vld [vmem:[%s21022_s8 + $0x70] sm:$0xff] }
 0xf74   :  { %v4406_v6 = vld [vmem:[%s21022_s8 + $0x90] sm:$0xff] }
 0xf75   :  { %12744 = vmatpush1.bf16.msra.mxu0 %v12743_v40  ;;  %12776 = vmatpush1.bf16.msra.mxu1 %v12775_v7  ;;  %v12791_v40 = vpack.c.bf16 %v4215_v20, %v4211_v14  ;;  %v4395_v7 = vld [vmem:[%s21022_s8 + $0x38] sm:$0xff]  ;;  %v4404_v14 = vld [vmem:[%s21022_s8 + $0x80] sm:$0xff]  ;;  %v18114_v20 = vpack.c.bf16 %v4409_v1, %v4405_v46 }
 0xf76   :  { %12746 = vmatprep.subr.bf16.mxu0 %v12745_v54  ;;  %12778 = vmatprep.subr.bf16.mxu1 %v12777_v60  ;;  %v18035_v57 = vpack.c.bf16 %v4395_v7, %v4391_v21  ;;  %v4413_v21 = vld [vmem:[%s21022_s8 + $0xc8] sm:$0xff] }
 0xf77   :  { %v4417_v7 = vld [vmem:[%s21022_s8 + $0xe8] sm:$0xff] }
 0xf79   :  { %12748 = vmatpush1.bf16.msra.mxu0 %v12747_v13  ;;  %12780 = vmatpush1.bf16.msra.mxu1 %v12779_v12 }
 0xf7a   :  { %12750 = vmatprep.subr.bf16.mxu0 %v12749_v17  ;;  %12782 = vmatprep.subr.bf16.mxu1 %v12781_v41 }
 0xf7d   :  { %12752 = vmatpush1.bf16.msra.mxu0 %v12751_v24  ;;  %12784 = vmatpush1.bf16.msra.mxu1 %v12783_v39  ;;  %v4394_v39 = vld [vmem:[%s21022_s8 + $0x30] sm:$0xff] }
 0xf7e   :  { %12754 = vmatprep.subr.bf16.mxu0 %v12753_v59  ;;  %12786 = vmatprep.subr.bf16.mxu1 %v12785_v9  ;;  %v18070_v62 = vpack.c.bf16 %v4394_v39, %v4390_v22  ;;  %v4396_v9 = vld [vmem:[%s21022_s8 + $0x40] sm:$0xff]  ;;  %v4435_v22 = vld [vmem:[%s21022_s8 + $0x178] sm:$0xff] }
 0xf81   :  { %12756 = vmatpush1.bf16.msra.mxu0 %v12755_v43  ;;  %12788 = vmatpush1.bf16.msra.mxu1 %v12787_v29  ;;  %v4400_v43 = vld [vmem:[%s21022_s8 + $0x60] sm:$0xff]  ;;  %v4398_v29 = vld [vmem:[%s21022_s8 + $0x50] sm:$0xff] }
 0xf82   :  { %12758 = vmatprep.subr.bf16.mxu0 %v12757_v36  ;;  %12790 = vmatprep.subr.bf16.mxu1 %v12789_v48  ;;  %v4407_v36 = vld [vmem:[%s21022_s8 + $0x98] sm:$0xff]  ;;  %v18102_v25 = vpack.c.bf16 %v4400_v43, %v4396_v9  ;;  %v18104_v11 = vpack.c.bf16 %v4402_v50, %v4398_v29  ;;  %v4434_v9 = vld [vmem:[%s21022_s8 + $0x170] sm:$0xff]  ;;  %v4437_v43 = vld [vmem:[%s21022_s8 + $0x188] sm:$0xff] }
 0xf83   :  { %v4411_v48 = vld [vmem:[%s21022_s8 + $0xb8] sm:$0xff] }
 0xf84   :  { %v18116_v58 = vpack.c.bf16 %v4411_v48, %v4407_v36  ;;  %v4439_v29 = vld [vmem:[%s21022_s8 + $0x198] sm:$0xff]  ;;  %v4436_v36 = vld [vmem:[%s21022_s8 + $0x180] sm:$0xff] }
 0xf85   :  { %12760 = vmatpush1.bf16.msra.mxu0 %v12759_v18  ;;  %12792 = vmatpush1.bf16.msra.mxu1 %v12791_v40  ;;  %v4408_v18 = vld [vmem:[%s21022_s8 + $0xa0] sm:$0xff]  ;;  %v4410_v40 = vld [vmem:[%s21022_s8 + $0xb0] sm:$0xff]  ;;  %v4443_v50 = vld [vmem:[%s21022_s8 + $0x1b8] sm:$0xff] }
 0xf86   :  { %12794 = vmatprep.subr.bf16.mxu0 %v18027_v52  ;;  %12826 = vmatprep.subr.bf16.mxu1 %v18035_v57  ;;  %v4440_v48 = vld [vmem:[%s21022_s8 + $0x1a0] sm:$0xff] }
0x103a   :  { %v4049_v19 = vpop.f32.mrb[30].mxu0  ;;  %v4120_v42 = vpop.f32.mrb[30].mxu1 }
0x103b   :  { %v14999_v54 = vadd.f32 %v4049_v19, %v17559_v16  ;;  %v4051_v5 = vpop.f32.mrb[31].mxu0  ;;  %v4122_v44 = vpop.f32.mrb[31].mxu1  ;;  %v15015_v51 = vadd.f32 %v4120_v42, %v17567_v23  ;;  %v4415_v19 = vld [vmem:[%s21022_s8 + $0xd8] sm:$0xff] }
0x103c   :  { %v15000_v28 = vadd.f32 %v4051_v5, %v17562_v10  ;;  %v15016_v0 = vadd.f32 %v4122_v44, %v17570_v26  ;;  %v4388_v26 = vld [vmem:[%s21022_s8] sm:$0xff]  ;;  %v4419_v42 = vld [vmem:[%s21022_s8 + $0xf8] sm:$0xff]  ;;  %v18142_v5 = vpack.c.bf16 %v4410_v40, %v4406_v6  ;;  %v4438_v6 = vld [vmem:[%s21022_s8 + $0x190] sm:$0xff] }
0x103d   :  { %v11403_v60 = vmul.f32 -1.442695, %v14999_v54  ;;  %v11405_v12 = vmul.f32 -1.442695, %v15015_v51  ;;  %v18068_v8 = vpack.c.bf16 %v4392_v38, %v4388_v26  ;;  %v18140_v54 = vpack.c.bf16 %v4408_v18, %v4404_v14  ;;  %v4412_v44 = vld [vmem:[%s21022_s8 + $0xc0] sm:$0xff]  ;;  %v4414_v51 = vld [vmem:[%s21022_s8 + $0xd0] sm:$0xff] }
0x103e   :  { %v11404_v13 = vmul.f32 -1.442695, %v15000_v28  ;;  %v4416_v28 = vld [vmem:[%s21022_s8 + $0xe0] sm:$0xff]  ;;  %v4433_v26 = vld [vmem:[%s21022_s8 + $0x168] sm:$0xff]  ;;  %v4431_v38 = vld [vmem:[%s21022_s8 + $0x158] sm:$0xff]  ;;  %v18262_v18 = vpack.c.bf16 %v4443_v50, %v4439_v29 }
0x103f   :  { %15325 = vpow2.f32 %v11403_v60  ;;  %v18152_v60 = vpack.c.bf16 %v4417_v7, %v4413_v21  ;;  %v4442_v40 = vld [vmem:[%s21022_s8 + $0x1b0] sm:$0xff]  ;;  %v4445_v21 = vld [vmem:[%s21022_s8 + $0x1c8] sm:$0xff]  ;;  %v15727_v50 = vmov 1966171168  }
0x1040   :  { %15327 = vpow2.f32 %v11404_v13  ;;  %v18154_v13 = vpack.c.bf16 %v4419_v42, %v4415_v19  ;;  %v4449_v7 = vld [vmem:[%s21022_s8 + $0x1e8] sm:$0xff]  ;;  %v4447_v19 = vld [vmem:[%s21022_s8 + $0x1d8] sm:$0xff] }
0x1041   :  { %15329 = vtanh.f32 %v15016_v0  ;;  %v4418_v0 = vld [vmem:[%s21022_s8 + $0xf0] sm:$0xff]  ;;  %v4451_v42 = vld [vmem:[%s21022_s8 + $0x1f8] sm:$0xff] }
0x1042   :  { %15331 = vpow2.f32 %v11405_v12  ;;  %v4421_v12 = vld [vmem:[%s21022_s8 + $0x108] sm:$0xff] }
0x1049   :  { %v15326_v4 = vpop.eup %15325 }
0x104a   :  { %v4138_v63 = vadd.f32 1.0, %v15326_v4  ;;  %v15328_v49 = vpop.eup %15327  ;;  %v4425_v4 = vld [vmem:[%s21022_s8 + $0x128] sm:$0xff] }
0x104b   :  { %v4139_v16 = vadd.f32 1.0, %v15328_v49  ;;  %v15330_v17 = vpop.eup %15329  ;;  %v4427_v49 = vld [vmem:[%s21022_s8 + $0x138] sm:$0xff] }
0x104c   :  { %15333 = vrcp.f32 %v4138_v63  ;;  %v15332_v45 = vpop.eup %15331  ;;  %v4423_v63 = vld [vmem:[%s21022_s8 + $0x118] sm:$0xff] }
0x104d   :  { %15335 = vrcp.f32 %v4139_v16  ;;  %v4140_v41 = vadd.f32 1.0, %v15332_v45  ;;  %v18176_v16 = vpack.c.bf16 %v4416_v28, %v4412_v44  ;;  %v4420_v45 = vld [vmem:[%s21022_s8 + $0x100] sm:$0xff]  ;;  %v18284_v44 = vpack.c.bf16 %v4440_v48, %v4436_v36 }
0x104e   :  { %v18286_v28 = vpack.c.bf16 %v4442_v40, %v4438_v6  ;;  %v4601_v36 = vunpack.c.l.s4 %v15727_v50 }
0x104f   :  { %15337 = vrcp.f32 %v4140_v41  ;;  %v4422_v41 = vld [vmem:[%s21022_s8 + $0x110] sm:$0xff] }
0x1050   :  { %v4602_v48 = vunpack.c.0.s8 %v4601_v36 }
0x1052   :  { %v18362_v6 = vsub.s32 %v4602_v48, %v16370_v30 }
0x1056   :  { %v15334_v10 = vpop.eup %15333 }
0x1057   :  { %v4149_v33 = vmul.f32 %v15334_v10, %v15330_v17  ;;  %v15336_v61 = vpop.eup %15335  ;;  %v18178_v17 = vpack.c.bf16 %v4418_v0, %v4414_v51  ;;  %v4424_v10 = vld [vmem:[%s21022_s8 + $0x120] sm:$0xff]  ;;  %v18293_v0 = vpack.c.bf16 %v4449_v7, %v4445_v21 }
0x1058   :  { %v4148_v24 = vmul.f32 %v15336_v61, %v17824_v32  ;;  %v4397_v32 = vld [vmem:[%s21022_s8 + $0x48] sm:$0xff]  ;;  %v18190_v61 = vpack.c.bf16 %v4427_v49, %v4423_v63  ;;  %v18212_v39 = vpack.c.bf16 %v4424_v10, %v4420_v45  ;;  %v4444_v51 = vld [vmem:[%s21022_s8 + $0x1c0] sm:$0xff]  ;;  %v4446_v63 = vld [vmem:[%s21022_s8 + $0x1d0] sm:$0xff] }
0x1059   :  { %v15338_v59 = vpop.eup %15337  ;;  %v18078_v53 = vpack.c.bf16 %v4401_v15, %v4397_v32  ;;  %v4428_v15 = vld [vmem:[%s21022_s8 + $0x140] sm:$0xff]  ;;  %v4450_v49 = vld [vmem:[%s21022_s8 + $0x1f0] sm:$0xff] }
0x105a   :  { %v4150_v23 = vadd.f32 %v4149_v33, %v4148_v24  ;;  %v18188_v33 = vpack.c.bf16 %v4425_v4, %v4421_v12  ;;  %v4426_v24 = vld [vmem:[%s21022_s8 + $0x130] sm:$0xff]  ;;  %v18248_v46 = vpack.c.bf16 %v4432_v47, %v4428_v15  ;;  %v18295_v12 = vpack.c.bf16 %v4451_v42, %v4447_v19  ;;  %v4448_v4 = vld [vmem:[%s21022_s8 + $0x1e0] sm:$0xff] }
0x105b   :  { %v18214_v32 = vpack.c.bf16 %v4426_v24, %v4422_v41  ;;  %v18308_v45 = vpack.c.bf16 %v4448_v4, %v4444_v51  ;;  %v18310_v10 = vpack.c.bf16 %v4450_v49, %v4446_v63  ;;  %v4217_v41 = vld [vmem:[%s21023_s9] sm:$0xf] }
0x105c   :  { %15339 = vtanh.f32 %v4150_v23  ;;  %v4429_v23 = vld [vmem:[%s21022_s8 + $0x148] sm:$0xff]  ;;  %v4222_v24 = vrot.slane %v4217_v41, %v16373_v31 }
0x105d   :  { %v18224_v35 = vpack.c.bf16 %v4433_v26, %v4429_v23  ;;  %v4230_v23 = vrot.slane %v4217_v41, %v16388_v37  ;;  %v4226_v26 = vrot.slane %v4217_v41, %v16379_v34 }
0x1066   :  { %v15340_v2 = vpop.eup %15339 }
0x1067   :  { %v4152_v27 = vmul.f32 %v15340_v2, %v15338_v59  ;;  %v18226_v59 = vpack.c.bf16 %v4435_v22, %v4431_v38  ;;  %v4430_v2 = vld [vmem:[%s21022_s8 + $0x150] sm:$0xff]  ;;  %v4234_v38 = vrot.slane %v4217_v41, %v16396_v55 }
0x1068   :  { %v18250_v1 = vpack.c.bf16 %v4434_v9, %v4430_v2 }
0x1069   :  { %4304 = vmatmul.mubr.f32.vlgmr.msra.gmra.mrb[32].mxu0 %v4152_v27  ;;  %4375 = vmatmul.mubr.f32.vlgmr.msra.gmra.mrb[32].mxu1 %v4152_v27  ;;  %v4441_v27 = vld [vmem:[%s21022_s8 + $0x1a8] sm:$0xff] }
0x106a   :  { %12796 = vmatpush1.bf16.msra.mxu0 %v18068_v8  ;;  %12828 = vmatpush1.bf16.msra.mxu1 %v18070_v62  ;;  %v18260_v14 = vpack.c.bf16 %v4441_v27, %v4437_v43 }
0x106b   :  { %12798 = vmatprep.subr.bf16.mxu0 %v18078_v53  ;;  %12830 = vmatprep.subr.bf16.mxu1 %v18080_v56 }
0x106c   :  { %4516 = vmatprep.mubr.f32.mxu0 %v21030_v3  ;;  %4587 = vmatprep.mubr.f32.mxu1 %v21030_v3 }
0x106e   :  { %12800 = vmatpush1.bf16.msra.mxu0 %v18102_v25  ;;  %12832 = vmatpush1.bf16.msra.mxu1 %v18104_v11 }
0x106f   :  { %12802 = vmatprep.subr.bf16.mxu0 %v18114_v20  ;;  %12834 = vmatprep.subr.bf16.mxu1 %v18116_v58 }
0x1072   :  { %12804 = vmatpush1.bf16.msra.mxu0 %v18140_v54  ;;  %12836 = vmatpush1.bf16.msra.mxu1 %v18142_v5 }
0x1073   :  { %12806 = vmatprep.subr.bf16.mxu0 %v18152_v60  ;;  %12838 = vmatprep.subr.bf16.mxu1 %v18154_v13 }
0x1076   :  { %12808 = vmatpush1.bf16.msra.mxu0 %v18176_v16  ;;  %12840 = vmatpush1.bf16.msra.mxu1 %v18178_v17 }
0x1077   :  { %12810 = vmatprep.subr.bf16.mxu0 %v18188_v33  ;;  %12842 = vmatprep.subr.bf16.mxu1 %v18190_v61 }
0x107a   :  { %12812 = vmatpush1.bf16.msra.mxu0 %v18212_v39  ;;  %12844 = vmatpush1.bf16.msra.mxu1 %v18214_v32 }
0x107b   :  { %12814 = vmatprep.subr.bf16.mxu0 %v18224_v35  ;;  %12846 = vmatprep.subr.bf16.mxu1 %v18226_v59 }
0x107e   :  { %12816 = vmatpush1.bf16.msra.mxu0 %v18248_v46  ;;  %12848 = vmatpush1.bf16.msra.mxu1 %v18250_v1 }
0x107f   :  { %12818 = vmatprep.subr.bf16.mxu0 %v18260_v14  ;;  %12850 = vmatprep.subr.bf16.mxu1 %v18262_v18 }
0x1082   :  { %12820 = vmatpush1.bf16.msra.mxu0 %v18284_v44  ;;  %12852 = vmatpush1.bf16.msra.mxu1 %v18286_v28 }
0x1083   :  { %12822 = vmatprep.subr.bf16.mxu0 %v18293_v0  ;;  %12854 = vmatprep.subr.bf16.mxu1 %v18295_v12 }
0x1086   :  { %12824 = vmatpush1.bf16.msra.mxu0 %v18308_v45  ;;  %12856 = vmatpush1.bf16.msra.mxu1 %v18310_v10 }
0x1087   :  { %12858 = vmatprep.subr.bf16.mxu0 %v18027_v52  ;;  %12890 = vmatprep.subr.bf16.mxu1 %v18035_v57 }
0x1089   :  { %4517 = vmatmul.mubr.f32.vlgmr.msra.gmra.mrb[34].mxu0 %v21030_v3  ;;  %4588 = vmatmul.mubr.f32.vlgmr.msra.gmra.mrb[34].mxu1 %v21030_v3 }
0x108a   :  { %12860 = vmatpush1.bf16.msra.mxu0 %v18068_v8  ;;  %12892 = vmatpush1.bf16.msra.mxu1 %v18070_v62 }
0x108b   :  { %12862 = vmatprep.subr.bf16.mxu0 %v18078_v53  ;;  %12894 = vmatprep.subr.bf16.mxu1 %v18080_v56 }
0x108c   :  { %4718 = vmatprep.mubr.f32.mxu0 %v21030_v3  ;;  %4789 = vmatprep.mubr.f32.mxu1 %v21030_v3 }
0x108e   :  { %12864 = vmatpush1.bf16.msra.mxu0 %v18102_v25  ;;  %12896 = vmatpush1.bf16.msra.mxu1 %v18104_v11 }
0x108f   :  { %12866 = vmatprep.subr.bf16.mxu0 %v18114_v20  ;;  %12898 = vmatprep.subr.bf16.mxu1 %v18116_v58 }
0x1092   :  { %12868 = vmatpush1.bf16.msra.mxu0 %v18140_v54  ;;  %12900 = vmatpush1.bf16.msra.mxu1 %v18142_v5 }
0x1093   :  { %12870 = vmatprep.subr.bf16.mxu0 %v18152_v60  ;;  %12902 = vmatprep.subr.bf16.mxu1 %v18154_v13 }
0x1096   :  { %12872 = vmatpush1.bf16.msra.mxu0 %v18176_v16  ;;  %12904 = vmatpush1.bf16.msra.mxu1 %v18178_v17 }
0x1097   :  { %12874 = vmatprep.subr.bf16.mxu0 %v18188_v33  ;;  %12906 = vmatprep.subr.bf16.mxu1 %v18190_v61 }
0x109a   :  { %12876 = vmatpush1.bf16.msra.mxu0 %v18212_v39  ;;  %12908 = vmatpush1.bf16.msra.mxu1 %v18214_v32 }
0x109b   :  { %12878 = vmatprep.subr.bf16.mxu0 %v18224_v35  ;;  %12910 = vmatprep.subr.bf16.mxu1 %v18226_v59 }
0x109e   :  { %12880 = vmatpush1.bf16.msra.mxu0 %v18248_v46  ;;  %12912 = vmatpush1.bf16.msra.mxu1 %v18250_v1 }
0x109f   :  { %12882 = vmatprep.subr.bf16.mxu0 %v18260_v14  ;;  %12914 = vmatprep.subr.bf16.mxu1 %v18262_v18 }
0x10a2   :  { %12884 = vmatpush1.bf16.msra.mxu0 %v18284_v44  ;;  %12916 = vmatpush1.bf16.msra.mxu1 %v18286_v28 }
0x10a3   :  { %12886 = vmatprep.subr.bf16.mxu0 %v18293_v0  ;;  %12918 = vmatprep.subr.bf16.mxu1 %v18295_v12 }
0x10a6   :  { %12888 = vmatpush1.bf16.msra.mxu0 %v18308_v45  ;;  %12920 = vmatpush1.bf16.msra.mxu1 %v18310_v10 }
0x10a7   :  { %12922 = vmatprep.subr.bf16.mxu0 %v18027_v52  ;;  %12954 = vmatprep.subr.bf16.mxu1 %v18035_v57 }
0x113c   :  { %v4305_v22 = vpop.f32.mrb[32].mxu0  ;;  %v4376_v15 = vpop.f32.mrb[32].mxu1 }
0x113d   :  { %v4306_v47 = vadd.f32 %v4305_v22, %v4222_v24  ;;  %v4377_v2 = vadd.f32 %v4376_v15, %v4230_v23  ;;  %v4307_v9 = vpop.f32.mrb[33].mxu0  ;;  %v4378_v43 = vpop.f32.mrb[33].mxu1 }
0x113e   :  { %v4308_v27 = vadd.f32 %v4307_v9, %v4226_v26  ;;  %v4379_v29 = vadd.f32 %v4378_v43, %v4234_v38 }
0x113f   :  { %4381 = vst [vmem:[#allocation4] sm:$0xff] %v4306_v47  ;;  %4383 = vst [vmem:[#allocation4 + $0x10] sm:$0xff] %v4377_v2 }
0x1140   :  { %4382 = vst [vmem:[#allocation4 + $0x8] sm:$0xff] %v4308_v27  ;;  %4384 = vst [vmem:[#allocation4 + $0x18] sm:$0xff] %v4379_v29 }
0x1147   :  { %v18367_v24 = vld [vmem:[#allocation4] ss:$8 sm:$0xf] }
0x115c   :  { %v4518_v40 = vpop.f32.mrb[34].mxu0  ;;  %v4589_v21 = vpop.f32.mrb[34].mxu1 }
0x115d   :  { %v4520_v7 = vpop.f32.mrb[35].mxu0  ;;  %v4591_v19 = vpop.f32.mrb[35].mxu1 }
0x115e   :  { %v4598_v42 = vcombine.low %v4518_v40, %v4520_v7  ;;  %v4599_v51 = vcombine.low %v4589_v21, %v4591_v19 }
0x1160   :  { %v4606_v4 = vrot.slane %v4598_v42, %v18362_v6  ;;  %v4613_v63 = vrot.slane %v4599_v51, %v18362_v6 }
0x1162   :  { %v4614_v49 = vcombine.low %v4606_v4, %v4613_v63 }
0x1164   :  { %v4621_v41 = vrot.slane %v4614_v49, %v18362_v6 }
0x1166   :  { %v4623_v23 = vadd.f32 %v4621_v41, %v18367_v24 }
0x1168   :  { %v11406_v26 = vmul.f32 -1.442695, %v4623_v23  ;;  %v4631_v15 = vrot.slane %v4623_v23, 3  ;;  %v18414_v23 = vld [vmem:[#allocation4 + $0x1] ss:$8 sm:$0xf] }
0x116a   :  { %15341 = vpow2.f32 %v11406_v26 }
0x1174   :  { %v15342_v38 = vpop.eup %15341 }
0x1175   :  { %v4627_v22 = vadd.f32 1.0, %v15342_v38 }
0x1177   :  { %15343 = vrcp.f32 %v4627_v22 }
0x1178   :  { %15345 = vtanh.f32 %v4631_v15 }
0x1181   :  { %v15344_v47 = vpop.eup %15343 }
0x1182   :  { %v4635_v2 = vrot.slane %v15344_v47, 1  ;;  %v15346_v9 = vpop.eup %15345  ;;  %v4641_v50 = vrot.slane %v15344_v47, 2 }
0x1183   :  { %v4638_v43 = vmul.f32 %v15346_v9, %v15344_v47 }
0x1184   :  { %v4637_v27 = vmul.f32 0.0, %v4635_v2 }
0x1186   :  { %v18370_v29 = vadd.f32 %v4638_v43, %v4637_v27 }
0x1188   :  { %15347 = vtanh.f32 %v18370_v29 }
0x1192   :  { %v15348_v36 = vpop.eup %15347 }
0x1193   :  { %v18373_v48 = vmul.f32 %v15348_v36, %v4641_v50 }
0x1195   :  { %4719 = vmatmul.mubr.f32.vlgmr.msra.gmra.mrb[36].mxu0 %v18373_v48  ;;  %4790 = vmatmul.mubr.f32.vlgmr.msra.gmra.mrb[36].mxu1 %v18373_v48 }
0x1196   :  { %12924 = vmatpush1.bf16.msra.mxu0 %v18068_v8  ;;  %12956 = vmatpush1.bf16.msra.mxu1 %v18070_v62 }
0x1197   :  { %12926 = vmatprep.subr.bf16.mxu0 %v18078_v53  ;;  %12958 = vmatprep.subr.bf16.mxu1 %v18080_v56 }
0x1198   :  { %4918 = vmatprep.mubr.f32.mxu0 %v21030_v3  ;;  %4989 = vmatprep.mubr.f32.mxu1 %v21030_v3 }
0x119a   :  { %12928 = vmatpush1.bf16.msra.mxu0 %v18102_v25  ;;  %12960 = vmatpush1.bf16.msra.mxu1 %v18104_v11 }
0x119b   :  { %12930 = vmatprep.subr.bf16.mxu0 %v18114_v20  ;;  %12962 = vmatprep.subr.bf16.mxu1 %v18116_v58 }
0x119e   :  { %12932 = vmatpush1.bf16.msra.mxu0 %v18140_v54  ;;  %12964 = vmatpush1.bf16.msra.mxu1 %v18142_v5 }
0x119f   :  { %12934 = vmatprep.subr.bf16.mxu0 %v18152_v60  ;;  %12966 = vmatprep.subr.bf16.mxu1 %v18154_v13 }
0x11a2   :  { %12936 = vmatpush1.bf16.msra.mxu0 %v18176_v16  ;;  %12968 = vmatpush1.bf16.msra.mxu1 %v18178_v17 }
0x11a3   :  { %12938 = vmatprep.subr.bf16.mxu0 %v18188_v33  ;;  %12970 = vmatprep.subr.bf16.mxu1 %v18190_v61 }
0x11a6   :  { %12940 = vmatpush1.bf16.msra.mxu0 %v18212_v39  ;;  %12972 = vmatpush1.bf16.msra.mxu1 %v18214_v32 }
0x11a7   :  { %12942 = vmatprep.subr.bf16.mxu0 %v18224_v35  ;;  %12974 = vmatprep.subr.bf16.mxu1 %v18226_v59 }
0x11aa   :  { %12944 = vmatpush1.bf16.msra.mxu0 %v18248_v46  ;;  %12976 = vmatpush1.bf16.msra.mxu1 %v18250_v1 }
0x11ab   :  { %12946 = vmatprep.subr.bf16.mxu0 %v18260_v14  ;;  %12978 = vmatprep.subr.bf16.mxu1 %v18262_v18 }
0x11ae   :  { %12948 = vmatpush1.bf16.msra.mxu0 %v18284_v44  ;;  %12980 = vmatpush1.bf16.msra.mxu1 %v18286_v28 }
0x11af   :  { %12950 = vmatprep.subr.bf16.mxu0 %v18293_v0  ;;  %12982 = vmatprep.subr.bf16.mxu1 %v18295_v12 }
0x11b2   :  { %12952 = vmatpush1.bf16.msra.mxu0 %v18308_v45  ;;  %12984 = vmatpush1.bf16.msra.mxu1 %v18310_v10 }
0x11b3   :  { %12986 = vmatprep.subr.bf16.mxu0 %v18027_v52  ;;  %13018 = vmatprep.subr.bf16.mxu1 %v18035_v57 }
0x1268   :  { %v4720_v40 = vpop.f32.mrb[36].mxu0  ;;  %v4791_v21 = vpop.f32.mrb[36].mxu1 }
0x1269   :  { %v4722_v7 = vpop.f32.mrb[37].mxu0  ;;  %v4793_v19 = vpop.f32.mrb[37].mxu1 }
0x126a   :  { %v4800_v42 = vcombine.low %v4720_v40, %v4722_v7  ;;  %v4801_v51 = vcombine.low %v4791_v21, %v4793_v19  ;;  %v4649_v7 = vrot.slane %v18373_v48, %v16373_v31 }
0x126c   :  { %v4808_v4 = vrot.slane %v4800_v42, %v18362_v6  ;;  %v4815_v63 = vrot.slane %v4801_v51, %v18362_v6 }
0x126e   :  { %v4816_v49 = vcombine.low %v4808_v4, %v4815_v63 }
0x1270   :  { %v4823_v41 = vrot.slane %v4816_v49, %v18362_v6 }
0x1272   :  { %v4825_v26 = vadd.f32 %v4823_v41, %v18414_v23 }
0x1274   :  { %v11407_v38 = vmul.f32 -1.442695, %v4825_v26  ;;  %v4833_v47 = vrot.slane %v4825_v26, 3 }
0x1276   :  { %15349 = vpow2.f32 %v11407_v38 }
0x1280   :  { %v15350_v22 = vpop.eup %15349 }
0x1281   :  { %v4829_v15 = vadd.f32 1.0, %v15350_v22 }
0x1283   :  { %15351 = vrcp.f32 %v4829_v15 }
0x1284   :  { %15353 = vtanh.f32 %v4833_v47 }
0x128d   :  { %v15352_v2 = vpop.eup %15351 }
0x128e   :  { %v4837_v9 = vrot.slane %v15352_v2, 1  ;;  %v15354_v43 = vpop.eup %15353  ;;  %v4843_v40 = vrot.slane %v15352_v2, 2 }
0x128f   :  { %v4840_v27 = vmul.f32 %v15354_v43, %v15352_v2 }
0x1290   :  { %v4839_v50 = vmul.f32 %v4837_v9, %v18370_v29  ;;  %v4651_v29 = vsel %vm4644_vm0, %v4649_v7, 0.0 }
0x1292   :  { %v18418_v36 = vadd.f32 %v4840_v27, %v4839_v50 }
0x1294   :  { %15355 = vtanh.f32 %v18418_v36 }
0x129e   :  { %v15356_v21 = vpop.eup %15355 }
0x129f   :  { %v4845_v19 = vmul.f32 %v15356_v21, %v4843_v40 }
0x12a1   :  { %v4851_v42 = vrot.slane %v4845_v19, %v16373_v31  ;;  %4919 = vmatmul.mubr.f32.vlgmr.msra.gmra.mrb[38].mxu0 %v4845_v19  ;;  %4990 = vmatmul.mubr.f32.vlgmr.msra.gmra.mrb[38].mxu1 %v4845_v19 }
0x12a2   :  { %12988 = vmatpush1.bf16.msra.mxu0 %v18068_v8  ;;  %13020 = vmatpush1.bf16.msra.mxu1 %v18070_v62 }
0x12a3   :  { %v18432_v51 = vsel %vm4846_vm1, %v4851_v42, %v4651_v29  ;;  %12990 = vmatprep.subr.bf16.mxu0 %v18078_v53  ;;  %13022 = vmatprep.subr.bf16.mxu1 %v18080_v56 }
0x12a4   :  { %5118 = vmatprep.mubr.f32.mxu0 %v21030_v3  ;;  %5189 = vmatprep.mubr.f32.mxu1 %v21030_v3 }
0x12a6   :  { %12992 = vmatpush1.bf16.msra.mxu0 %v18102_v25  ;;  %13024 = vmatpush1.bf16.msra.mxu1 %v18104_v11 }
0x12a7   :  { %12994 = vmatprep.subr.bf16.mxu0 %v18114_v20  ;;  %13026 = vmatprep.subr.bf16.mxu1 %v18116_v58 }
0x12aa   :  { %12996 = vmatpush1.bf16.msra.mxu0 %v18140_v54  ;;  %13028 = vmatpush1.bf16.msra.mxu1 %v18142_v5 }
0x12ab   :  { %12998 = vmatprep.subr.bf16.mxu0 %v18152_v60  ;;  %13030 = vmatprep.subr.bf16.mxu1 %v18154_v13 }
0x12ae   :  { %13000 = vmatpush1.bf16.msra.mxu0 %v18176_v16  ;;  %13032 = vmatpush1.bf16.msra.mxu1 %v18178_v17 }
0x12af   :  { %13002 = vmatprep.subr.bf16.mxu0 %v18188_v33  ;;  %13034 = vmatprep.subr.bf16.mxu1 %v18190_v61 }
0x12b2   :  { %13004 = vmatpush1.bf16.msra.mxu0 %v18212_v39  ;;  %13036 = vmatpush1.bf16.msra.mxu1 %v18214_v32 }
0x12b3   :  { %13006 = vmatprep.subr.bf16.mxu0 %v18224_v35  ;;  %13038 = vmatprep.subr.bf16.mxu1 %v18226_v59 }
0x12b6   :  { %13008 = vmatpush1.bf16.msra.mxu0 %v18248_v46  ;;  %13040 = vmatpush1.bf16.msra.mxu1 %v18250_v1 }
0x12b7   :  { %13010 = vmatprep.subr.bf16.mxu0 %v18260_v14  ;;  %13042 = vmatprep.subr.bf16.mxu1 %v18262_v18 }
0x12ba   :  { %13012 = vmatpush1.bf16.msra.mxu0 %v18284_v44  ;;  %13044 = vmatpush1.bf16.msra.mxu1 %v18286_v28 }
0x12bb   :  { %13014 = vmatprep.subr.bf16.mxu0 %v18293_v0  ;;  %13046 = vmatprep.subr.bf16.mxu1 %v18295_v12 }
0x12be   :  { %13016 = vmatpush1.bf16.msra.mxu0 %v18308_v45  ;;  %13048 = vmatpush1.bf16.msra.mxu1 %v18310_v10 }
0x12bf   :  { %13050 = vmatprep.subr.bf16.mxu0 %v18027_v52  ;;  %13082 = vmatprep.subr.bf16.mxu1 %v18035_v57 }
0x1374   :  { %v4920_v48 = vpop.f32.mrb[38].mxu0  ;;  %v4991_v4 = vpop.f32.mrb[38].mxu1 }
0x1375   :  { %v4922_v63 = vpop.f32.mrb[39].mxu0  ;;  %v4993_v49 = vpop.f32.mrb[39].mxu1 }
0x1376   :  { %v5000_v41 = vcombine.low %v4920_v48, %v4922_v63  ;;  %v5001_v26 = vcombine.low %v4991_v4, %v4993_v49 }
0x1378   :  { %v5008_v38 = vrot.slane %v5000_v41, %v18362_v6  ;;  %v5015_v22 = vrot.slane %v5001_v26, %v18362_v6 }
0x137a   :  { %v5016_v15 = vcombine.low %v5008_v38, %v5015_v22 }
0x137c   :  { %v5023_v47 = vrot.slane %v5016_v15, %v18362_v6 }
0x137e   :  { %v5025_v2 = vadd.f32 %v5023_v47, %v18367_v24 }
0x1380   :  { %v11408_v9 = vmul.f32 -1.442695, %v5025_v2  ;;  %v5033_v50 = vrot.slane %v5025_v2, 3 }
0x1382   :  { %15357 = vpow2.f32 %v11408_v9 }
0x138c   :  { %v15358_v43 = vpop.eup %15357 }
0x138d   :  { %v5029_v27 = vadd.f32 1.0, %v15358_v43 }
0x138f   :  { %15359 = vrcp.f32 %v5029_v27 }
0x1390   :  { %15361 = vtanh.f32 %v5033_v50 }
0x1399   :  { %v15360_v40 = vpop.eup %15359 }
0x139a   :  { %v5037_v21 = vrot.slane %v15360_v40, 1  ;;  %v15362_v7 = vpop.eup %15361  ;;  %v5043_v48 = vrot.slane %v15360_v40, 2 }
0x139b   :  { %v5040_v19 = vmul.f32 %v15362_v7, %v15360_v40 }
0x139c   :  { %v5039_v42 = vmul.f32 %v5037_v21, %v18418_v36 }
0x139e   :  { %v18471_v29 = vadd.f32 %v5040_v19, %v5039_v42 }
0x13a0   :  { %15363 = vtanh.f32 %v18471_v29 }
0x13aa   :  { %v15364_v4 = vpop.eup %15363 }
0x13ab   :  { %v5045_v63 = vmul.f32 %v15364_v4, %v5043_v48 }
0x13ad   :  { %v5051_v49 = vrot.slane %v5045_v63, %v16373_v31  ;;  %5119 = vmatmul.mubr.f32.vlgmr.msra.gmra.mrb[40].mxu0 %v5045_v63  ;;  %5190 = vmatmul.mubr.f32.vlgmr.msra.gmra.mrb[40].mxu1 %v5045_v63 }
0x13ae   :  { %13052 = vmatpush1.bf16.msra.mxu0 %v18068_v8  ;;  %13084 = vmatpush1.bf16.msra.mxu1 %v18070_v62 }
0x13af   :  { %13054 = vmatprep.subr.bf16.mxu0 %v18078_v53  ;;  %13086 = vmatprep.subr.bf16.mxu1 %v18080_v56  ;;  %v18483_v36 = vsel %vm5046_vm2, %v5051_v49, %v18432_v51 }
0x13b0   :  { %5318 = vmatprep.mubr.f32.mxu0 %v21030_v3  ;;  %5389 = vmatprep.mubr.f32.mxu1 %v21030_v3 }
0x13b2   :  { %13056 = vmatpush1.bf16.msra.mxu0 %v18102_v25  ;;  %13088 = vmatpush1.bf16.msra.mxu1 %v18104_v11 }
0x13b3   :  { %13058 = vmatprep.subr.bf16.mxu0 %v18114_v20  ;;  %13090 = vmatprep.subr.bf16.mxu1 %v18116_v58 }
0x13b6   :  { %13060 = vmatpush1.bf16.msra.mxu0 %v18140_v54  ;;  %13092 = vmatpush1.bf16.msra.mxu1 %v18142_v5 }
0x13b7   :  { %13062 = vmatprep.subr.bf16.mxu0 %v18152_v60  ;;  %13094 = vmatprep.subr.bf16.mxu1 %v18154_v13 }
0x13ba   :  { %13064 = vmatpush1.bf16.msra.mxu0 %v18176_v16  ;;  %13096 = vmatpush1.bf16.msra.mxu1 %v18178_v17 }
0x13bb   :  { %13066 = vmatprep.subr.bf16.mxu0 %v18188_v33  ;;  %13098 = vmatprep.subr.bf16.mxu1 %v18190_v61 }
0x13be   :  { %13068 = vmatpush1.bf16.msra.mxu0 %v18212_v39  ;;  %13100 = vmatpush1.bf16.msra.mxu1 %v18214_v32 }
0x13bf   :  { %13070 = vmatprep.subr.bf16.mxu0 %v18224_v35  ;;  %13102 = vmatprep.subr.bf16.mxu1 %v18226_v59 }
0x13c2   :  { %13072 = vmatpush1.bf16.msra.mxu0 %v18248_v46  ;;  %13104 = vmatpush1.bf16.msra.mxu1 %v18250_v1 }
0x13c3   :  { %13074 = vmatprep.subr.bf16.mxu0 %v18260_v14  ;;  %13106 = vmatprep.subr.bf16.mxu1 %v18262_v18 }
0x13c6   :  { %13076 = vmatpush1.bf16.msra.mxu0 %v18284_v44  ;;  %13108 = vmatpush1.bf16.msra.mxu1 %v18286_v28 }
0x13c7   :  { %13078 = vmatprep.subr.bf16.mxu0 %v18293_v0  ;;  %13110 = vmatprep.subr.bf16.mxu1 %v18295_v12 }
0x13ca   :  { %13080 = vmatpush1.bf16.msra.mxu0 %v18308_v45  ;;  %13112 = vmatpush1.bf16.msra.mxu1 %v18310_v10 }
0x13cb   :  { %13114 = vmatprep.subr.bf16.mxu0 %v18027_v52  ;;  %13146 = vmatprep.subr.bf16.mxu1 %v18035_v57 }
0x1480   :  { %v5120_v51 = vpop.f32.mrb[40].mxu0  ;;  %v5191_v41 = vpop.f32.mrb[40].mxu1 }
0x1481   :  { %v5122_v26 = vpop.f32.mrb[41].mxu0  ;;  %v5193_v38 = vpop.f32.mrb[41].mxu1 }
0x1482   :  { %v5200_v22 = vcombine.low %v5120_v51, %v5122_v26  ;;  %v5201_v15 = vcombine.low %v5191_v41, %v5193_v38 }
0x1484   :  { %v5208_v47 = vrot.slane %v5200_v22, %v18362_v6  ;;  %v5215_v2 = vrot.slane %v5201_v15, %v18362_v6 }
0x1486   :  { %v5216_v9 = vcombine.low %v5208_v47, %v5215_v2 }
0x1488   :  { %v5223_v43 = vrot.slane %v5216_v9, %v18362_v6 }
0x148a   :  { %v5225_v27 = vadd.f32 %v5223_v43, %v18414_v23 }
0x148c   :  { %v11409_v50 = vmul.f32 -1.442695, %v5225_v27  ;;  %v5233_v7 = vrot.slane %v5225_v27, 3 }
0x148e   :  { %15365 = vpow2.f32 %v11409_v50 }
0x1498   :  { %v15366_v40 = vpop.eup %15365 }
0x1499   :  { %v5229_v21 = vadd.f32 1.0, %v15366_v40 }
0x149b   :  { %15367 = vrcp.f32 %v5229_v21 }
0x149c   :  { %15369 = vtanh.f32 %v5233_v7 }
0x14a5   :  { %v15368_v19 = vpop.eup %15367 }
0x14a6   :  { %v5237_v42 = vrot.slane %v15368_v19, 1  ;;  %v15370_v48 = vpop.eup %15369  ;;  %v5243_v51 = vrot.slane %v15368_v19, 2 }
0x14a7   :  { %v5240_v4 = vmul.f32 %v15370_v48, %v15368_v19 }
0x14a8   :  { %v5239_v63 = vmul.f32 %v5237_v42, %v18471_v29 }
0x14aa   :  { %v18520_v49 = vadd.f32 %v5240_v4, %v5239_v63 }
0x14ac   :  { %15371 = vtanh.f32 %v18520_v49 }
0x14b6   :  { %v15372_v41 = vpop.eup %15371 }
0x14b7   :  { %v5245_v26 = vmul.f32 %v15372_v41, %v5243_v51 }
0x14b9   :  { %v5251_v38 = vrot.slane %v5245_v26, %v16373_v31  ;;  %5319 = vmatmul.mubr.f32.vlgmr.msra.gmra.mrb[42].mxu0 %v5245_v26  ;;  %5390 = vmatmul.mubr.f32.vlgmr.msra.gmra.mrb[42].mxu1 %v5245_v26 }
0x14ba   :  { %13116 = vmatpush1.bf16.msra.mxu0 %v18068_v8  ;;  %13148 = vmatpush1.bf16.msra.mxu1 %v18070_v62 }
0x14bb   :  { %13118 = vmatprep.subr.bf16.mxu0 %v18078_v53  ;;  %13150 = vmatprep.subr.bf16.mxu1 %v18080_v56  ;;  %v18532_v29 = vsel %vm5246_vm3, %v5251_v38, %v18483_v36 }
0x14bc   :  { %5518 = vmatprep.mubr.f32.mxu0 %v21030_v3  ;;  %5589 = vmatprep.mubr.f32.mxu1 %v21030_v3 }
0x14be   :  { %13120 = vmatpush1.bf16.msra.mxu0 %v18102_v25  ;;  %13152 = vmatpush1.bf16.msra.mxu1 %v18104_v11 }
0x14bf   :  { %13122 = vmatprep.subr.bf16.mxu0 %v18114_v20  ;;  %13154 = vmatprep.subr.bf16.mxu1 %v18116_v58 }
0x14c2   :  { %13124 = vmatpush1.bf16.msra.mxu0 %v18140_v54  ;;  %13156 = vmatpush1.bf16.msra.mxu1 %v18142_v5 }
0x14c3   :  { %13126 = vmatprep.subr.bf16.mxu0 %v18152_v60  ;;  %13158 = vmatprep.subr.bf16.mxu1 %v18154_v13 }
0x14c6   :  { %13128 = vmatpush1.bf16.msra.mxu0 %v18176_v16  ;;  %13160 = vmatpush1.bf16.msra.mxu1 %v18178_v17 }
0x14c7   :  { %13130 = vmatprep.subr.bf16.mxu0 %v18188_v33  ;;  %13162 = vmatprep.subr.bf16.mxu1 %v18190_v61 }
0x14ca   :  { %13132 = vmatpush1.bf16.msra.mxu0 %v18212_v39  ;;  %13164 = vmatpush1.bf16.msra.mxu1 %v18214_v32 }
0x14cb   :  { %13134 = vmatprep.subr.bf16.mxu0 %v18224_v35  ;;  %13166 = vmatprep.subr.bf16.mxu1 %v18226_v59 }
0x14ce   :  { %13136 = vmatpush1.bf16.msra.mxu0 %v18248_v46  ;;  %13168 = vmatpush1.bf16.msra.mxu1 %v18250_v1 }
0x14cf   :  { %13138 = vmatprep.subr.bf16.mxu0 %v18260_v14  ;;  %13170 = vmatprep.subr.bf16.mxu1 %v18262_v18 }
0x14d2   :  { %13140 = vmatpush1.bf16.msra.mxu0 %v18284_v44  ;;  %13172 = vmatpush1.bf16.msra.mxu1 %v18286_v28 }
0x14d3   :  { %13142 = vmatprep.subr.bf16.mxu0 %v18293_v0  ;;  %13174 = vmatprep.subr.bf16.mxu1 %v18295_v12 }
0x14d6   :  { %13144 = vmatpush1.bf16.msra.mxu0 %v18308_v45  ;;  %13176 = vmatpush1.bf16.msra.mxu1 %v18310_v10 }
0x14d7   :  { %13178 = vmatprep.subr.bf16.mxu0 %v18027_v52  ;;  %13210 = vmatprep.subr.bf16.mxu1 %v18035_v57 }
0x158c   :  { %v5320_v36 = vpop.f32.mrb[42].mxu0  ;;  %v5391_v22 = vpop.f32.mrb[42].mxu1 }
0x158d   :  { %v5322_v15 = vpop.f32.mrb[43].mxu0  ;;  %v5393_v47 = vpop.f32.mrb[43].mxu1 }
0x158e   :  { %v5400_v2 = vcombine.low %v5320_v36, %v5322_v15  ;;  %v5401_v9 = vcombine.low %v5391_v22, %v5393_v47 }
0x1590   :  { %v5408_v43 = vrot.slane %v5400_v2, %v18362_v6  ;;  %v5415_v27 = vrot.slane %v5401_v9, %v18362_v6 }
0x1592   :  { %v5416_v50 = vcombine.low %v5408_v43, %v5415_v27 }
0x1594   :  { %v5423_v40 = vrot.slane %v5416_v50, %v18362_v6 }
0x1596   :  { %v5425_v21 = vadd.f32 %v5423_v40, %v18367_v24 }
0x1598   :  { %v11410_v7 = vmul.f32 -1.442695, %v5425_v21  ;;  %v5433_v48 = vrot.slane %v5425_v21, 3 }
0x159a   :  { %15373 = vpow2.f32 %v11410_v7 }
0x15a4   :  { %v15374_v19 = vpop.eup %15373 }
0x15a5   :  { %v5429_v42 = vadd.f32 1.0, %v15374_v19 }
0x15a7   :  { %15375 = vrcp.f32 %v5429_v42 }
0x15a8   :  { %15377 = vtanh.f32 %v5433_v48 }
0x15b1   :  { %v15376_v4 = vpop.eup %15375 }
0x15b2   :  { %v5437_v63 = vrot.slane %v15376_v4, 1  ;;  %v15378_v51 = vpop.eup %15377  ;;  %v5443_v36 = vrot.slane %v15376_v4, 2 }
0x15b3   :  { %v5440_v41 = vmul.f32 %v15378_v51, %v15376_v4 }
0x15b4   :  { %v5439_v26 = vmul.f32 %v5437_v63, %v18520_v49 }
0x15b6   :  { %v18569_v38 = vadd.f32 %v5440_v41, %v5439_v26 }
0x15b8   :  { %15379 = vtanh.f32 %v18569_v38 }
0x15c2   :  { %v15380_v22 = vpop.eup %15379 }
0x15c3   :  { %v5445_v15 = vmul.f32 %v15380_v22, %v5443_v36 }
0x15c5   :  { %v5451_v47 = vrot.slane %v5445_v15, %v16373_v31  ;;  %5519 = vmatmul.mubr.f32.vlgmr.msra.gmra.mrb[44].mxu0 %v5445_v15  ;;  %5590 = vmatmul.mubr.f32.vlgmr.msra.gmra.mrb[44].mxu1 %v5445_v15 }
0x15c6   :  { %13180 = vmatpush1.bf16.msra.mxu0 %v18068_v8  ;;  %13212 = vmatpush1.bf16.msra.mxu1 %v18070_v62 }
0x15c7   :  { %13182 = vmatprep.subr.bf16.mxu0 %v18078_v53  ;;  %13214 = vmatprep.subr.bf16.mxu1 %v18080_v56  ;;  %v18581_v49 = vsel %vm5446_vm4, %v5451_v47, %v18532_v29 }
0x15c8   :  { %5718 = vmatprep.mubr.f32.mxu0 %v21030_v3  ;;  %5789 = vmatprep.mubr.f32.mxu1 %v21030_v3 }
0x15ca   :  { %13184 = vmatpush1.bf16.msra.mxu0 %v18102_v25  ;;  %13216 = vmatpush1.bf16.msra.mxu1 %v18104_v11 }
0x15cb   :  { %13186 = vmatprep.subr.bf16.mxu0 %v18114_v20  ;;  %13218 = vmatprep.subr.bf16.mxu1 %v18116_v58 }
0x15ce   :  { %13188 = vmatpush1.bf16.msra.mxu0 %v18140_v54  ;;  %13220 = vmatpush1.bf16.msra.mxu1 %v18142_v5 }
0x15cf   :  { %13190 = vmatprep.subr.bf16.mxu0 %v18152_v60  ;;  %13222 = vmatprep.subr.bf16.mxu1 %v18154_v13 }
0x15d2   :  { %13192 = vmatpush1.bf16.msra.mxu0 %v18176_v16  ;;  %13224 = vmatpush1.bf16.msra.mxu1 %v18178_v17 }
0x15d3   :  { %13194 = vmatprep.subr.bf16.mxu0 %v18188_v33  ;;  %13226 = vmatprep.subr.bf16.mxu1 %v18190_v61 }
0x15d6   :  { %13196 = vmatpush1.bf16.msra.mxu0 %v18212_v39  ;;  %13228 = vmatpush1.bf16.msra.mxu1 %v18214_v32 }
0x15d7   :  { %13198 = vmatprep.subr.bf16.mxu0 %v18224_v35  ;;  %13230 = vmatprep.subr.bf16.mxu1 %v18226_v59 }
0x15da   :  { %13200 = vmatpush1.bf16.msra.mxu0 %v18248_v46  ;;  %13232 = vmatpush1.bf16.msra.mxu1 %v18250_v1 }
0x15db   :  { %13202 = vmatprep.subr.bf16.mxu0 %v18260_v14  ;;  %13234 = vmatprep.subr.bf16.mxu1 %v18262_v18 }
0x15de   :  { %13204 = vmatpush1.bf16.msra.mxu0 %v18284_v44  ;;  %13236 = vmatpush1.bf16.msra.mxu1 %v18286_v28 }
0x15df   :  { %13206 = vmatprep.subr.bf16.mxu0 %v18293_v0  ;;  %13238 = vmatprep.subr.bf16.mxu1 %v18295_v12 }
0x15e2   :  { %13208 = vmatpush1.bf16.msra.mxu0 %v18308_v45  ;;  %13240 = vmatpush1.bf16.msra.mxu1 %v18310_v10 }
0x15e3   :  { %13242 = vmatprep.subr.bf16.mxu0 %v18027_v52  ;;  %13274 = vmatprep.subr.bf16.mxu1 %v18035_v57 }
0x1698   :  { %v5520_v29 = vpop.f32.mrb[44].mxu0  ;;  %v5591_v2 = vpop.f32.mrb[44].mxu1 }
0x1699   :  { %v5522_v9 = vpop.f32.mrb[45].mxu0  ;;  %v5593_v43 = vpop.f32.mrb[45].mxu1 }
0x169a   :  { %v5600_v27 = vcombine.low %v5520_v29, %v5522_v9  ;;  %v5601_v50 = vcombine.low %v5591_v2, %v5593_v43  ;;  %v6060_v9 = vld [vmem:[%s21022_s8 + $0x20] sm:$0xff] }
0x169c   :  { %v5608_v40 = vrot.slane %v5600_v27, %v18362_v6  ;;  %v5615_v21 = vrot.slane %v5601_v50, %v18362_v6  ;;  %v6058_v50 = vld [vmem:[%s21022_s8 + $0x10] sm:$0xff] }
0x169e   :  { %v5616_v7 = vcombine.low %v5608_v40, %v5615_v21  ;;  %v6062_v40 = vld [vmem:[%s21022_s8 + $0x30] sm:$0xff] }
0x169f   :  { %v18708_v21 = vpack.c.bf16 %v6062_v40, %v6058_v50  ;;  %v6101_v40 = vld [vmem:[%s21022_s8 + $0x168] sm:$0xff] }
0x16a0   :  { %v5623_v19 = vrot.slane %v5616_v7, %v18362_v6  ;;  %v6065_v7 = vld [vmem:[%s21022_s8 + $0x48] sm:$0xff] }
0x16a2   :  { %v5625_v42 = vadd.f32 %v5623_v19, %v18414_v23  ;;  %v6069_v19 = vld [vmem:[%s21022_s8 + $0x68] sm:$0xff] }
0x16a4   :  { %v11411_v48 = vmul.f32 -1.442695, %v5625_v42  ;;  %v5633_v57 = vrot.slane %v5625_v42, 3  ;;  %v6067_v42 = vld [vmem:[%s21022_s8 + $0x58] sm:$0xff] }
0x16a6   :  { %15381 = vpow2.f32 %v11411_v48  ;;  %v18722_v48 = vpack.c.bf16 %v6069_v19, %v6065_v7  ;;  %v6099_v7 = vld [vmem:[%s21022_s8 + $0x158] sm:$0xff] }
0x16a7   :  { %v6103_v19 = vld [vmem:[%s21022_s8 + $0x178] sm:$0xff] }
0x16b0   :  { %v15382_v52 = vpop.eup %15381 }
0x16b1   :  { %v5629_v4 = vadd.f32 1.0, %v15382_v52  ;;  %v6071_v52 = vld [vmem:[%s21022_s8 + $0x78] sm:$0xff] }
0x16b3   :  { %15383 = vrcp.f32 %v5629_v4  ;;  %v6064_v4 = vld [vmem:[%s21022_s8 + $0x40] sm:$0xff] }
0x16b4   :  { %15385 = vtanh.f32 %v5633_v57  ;;  %v6068_v57 = vld [vmem:[%s21022_s8 + $0x60] sm:$0xff] }
0x16bd   :  { %v15384_v63 = vpop.eup %15383 }
0x16be   :  { %v5637_v51 = vrot.slane %v15384_v63, 1  ;;  %v15386_v41 = vpop.eup %15385  ;;  %v5643_v15 = vrot.slane %v15384_v63, 2 }
0x16bf   :  { %v5640_v26 = vmul.f32 %v15386_v41, %v15384_v63  ;;  %v18733_v63 = vpack.c.bf16 %v6071_v52, %v6067_v42  ;;  %v6066_v41 = vld [vmem:[%s21022_s8 + $0x50] sm:$0xff]  ;;  %v18869_v52 = vpack.c.bf16 %v6103_v19, %v6099_v7 }
0x16c0   :  { %v5639_v36 = vmul.f32 %v5637_v51, %v18569_v38  ;;  %v18735_v51 = vpack.c.bf16 %v6068_v57, %v6064_v4  ;;  %v6096_v4 = vld [vmem:[%s21022_s8 + $0x140] sm:$0xff] }
0x16c1   :  { %v6100_v57 = vld [vmem:[%s21022_s8 + $0x160] sm:$0xff] }
0x16c2   :  { %v18618_v22 = vadd.f32 %v5640_v26, %v5639_v36  ;;  %v6070_v26 = vld [vmem:[%s21022_s8 + $0x70] sm:$0xff] }
0x16c3   :  { %v18744_v36 = vpack.c.bf16 %v6070_v26, %v6066_v41  ;;  %v6098_v41 = vld [vmem:[%s21022_s8 + $0x150] sm:$0xff]  ;;  %v18881_v26 = vpack.c.bf16 %v6100_v57, %v6096_v4 }
0x16c4   :  { %15387 = vtanh.f32 %v18618_v22 }
0x16ce   :  { %v15388_v47 = vpop.eup %15387 }
0x16cf   :  { %v5645_v29 = vmul.f32 %v15388_v47, %v5643_v15  ;;  %v6077_v15 = vld [vmem:[%s21022_s8 + $0xa8] sm:$0xff]  ;;  %v6075_v47 = vld [vmem:[%s21022_s8 + $0x98] sm:$0xff] }
0x16d1   :  { %v5651_v2 = vrot.slane %v5645_v29, %v16373_v31  ;;  %5719 = vmatmul.mubr.f32.vlgmr.msra.gmra.mrb[46].mxu0 %v5645_v29  ;;  %5790 = vmatmul.mubr.f32.vlgmr.msra.gmra.mrb[46].mxu1 %v5645_v29 }
0x16d2   :  { %13244 = vmatpush1.bf16.msra.mxu0 %v18068_v8  ;;  %13276 = vmatpush1.bf16.msra.mxu1 %v18070_v62 }
0x16d3   :  { %13246 = vmatprep.subr.bf16.mxu0 %v18078_v53  ;;  %13278 = vmatprep.subr.bf16.mxu1 %v18080_v56  ;;  %v18630_v38 = vsel %vm5646_vm5, %v5651_v2, %v18581_v49  ;;  %v6056_v49 = vld [vmem:[%s21022_s8] sm:$0xff]  ;;  %v6079_v2 = vld [vmem:[%s21022_s8 + $0xb8] sm:$0xff] }
0x16d4   :  { %5918 = vmatprep.mubr.f32.mxu0 %v21030_v3  ;;  %5989 = vmatprep.mubr.f32.mxu1 %v21030_v3  ;;  %v18699_v27 = vpack.c.bf16 %v6060_v9, %v6056_v49  ;;  %v6094_v49 = vld [vmem:[%s21022_s8 + $0x130] sm:$0xff]  ;;  %v6097_v9 = vld [vmem:[%s21022_s8 + $0x148] sm:$0xff] }
0x16d5   :  { %v18867_v42 = vpack.c.bf16 %v6101_v40, %v6097_v9 }
0x16d6   :  { %13248 = vmatpush1.bf16.msra.mxu0 %v18102_v25  ;;  %13280 = vmatpush1.bf16.msra.mxu1 %v18104_v11 }
0x16d7   :  { %13250 = vmatprep.subr.bf16.mxu0 %v18114_v20  ;;  %13282 = vmatprep.subr.bf16.mxu1 %v18116_v58 }
0x16da   :  { %13252 = vmatpush1.bf16.msra.mxu0 %v18140_v54  ;;  %13284 = vmatpush1.bf16.msra.mxu1 %v18142_v5 }
0x16db   :  { %13254 = vmatprep.subr.bf16.mxu0 %v18152_v60  ;;  %13286 = vmatprep.subr.bf16.mxu1 %v18154_v13 }
0x16de   :  { %13256 = vmatpush1.bf16.msra.mxu0 %v18176_v16  ;;  %13288 = vmatpush1.bf16.msra.mxu1 %v18178_v17 }
0x16df   :  { %13258 = vmatprep.subr.bf16.mxu0 %v18188_v33  ;;  %13290 = vmatprep.subr.bf16.mxu1 %v18190_v61 }
0x16e2   :  { %13260 = vmatpush1.bf16.msra.mxu0 %v18212_v39  ;;  %13292 = vmatpush1.bf16.msra.mxu1 %v18214_v32 }
0x16e3   :  { %13262 = vmatprep.subr.bf16.mxu0 %v18224_v35  ;;  %13294 = vmatprep.subr.bf16.mxu1 %v18226_v59 }
0x16e6   :  { %13264 = vmatpush1.bf16.msra.mxu0 %v18248_v46  ;;  %13296 = vmatpush1.bf16.msra.mxu1 %v18250_v1 }
0x16e7   :  { %13266 = vmatprep.subr.bf16.mxu0 %v18260_v14  ;;  %13298 = vmatprep.subr.bf16.mxu1 %v18262_v18 }
0x16ea   :  { %13268 = vmatpush1.bf16.msra.mxu0 %v18284_v44  ;;  %13300 = vmatpush1.bf16.msra.mxu1 %v18286_v28 }
0x16eb   :  { %13270 = vmatprep.subr.bf16.mxu0 %v18293_v0  ;;  %13302 = vmatprep.subr.bf16.mxu1 %v18295_v12  ;;  %v6057_v0 = vld [vmem:[%s21022_s8 + $0x8] sm:$0xff] }
0x16ec   :  { %v6061_v12 = vld [vmem:[%s21022_s8 + $0x28] sm:$0xff] }
0x16ee   :  { %13272 = vmatpush1.bf16.msra.mxu0 %v18308_v45  ;;  %13304 = vmatpush1.bf16.msra.mxu1 %v18310_v10  ;;  %v6059_v45 = vld [vmem:[%s21022_s8 + $0x18] sm:$0xff]  ;;  %v18686_v10 = vpack.c.bf16 %v6061_v12, %v6057_v0  ;;  %v6092_v0 = vld [vmem:[%s21022_s8 + $0x120] sm:$0xff] }
0x16f0   :  { %13306 = vmatprep.subr.bf16.mxu0 %v18686_v10 }
0x17a4   :  { %v5720_v8 = vpop.f32.mrb[46].mxu0  ;;  %v5791_v62 = vpop.f32.mrb[46].mxu1 }
0x17a5   :  { %v5722_v53 = vpop.f32.mrb[47].mxu0  ;;  %v5793_v56 = vpop.f32.mrb[47].mxu1 }
0x17a6   :  { %v5800_v25 = vcombine.low %v5720_v8, %v5722_v53  ;;  %v5801_v11 = vcombine.low %v5791_v62, %v5793_v56  ;;  %v6076_v8 = vld [vmem:[%s21022_s8 + $0xa0] sm:$0xff]  ;;  %v18769_v62 = vpack.c.bf16 %v6079_v2, %v6075_v47  ;;  %v6074_v56 = vld [vmem:[%s21022_s8 + $0x90] sm:$0xff]  ;;  %v6109_v47 = vld [vmem:[%s21022_s8 + $0x1a8] sm:$0xff] }
0x17a8   :  { %v5808_v20 = vrot.slane %v5800_v25, %v18362_v6  ;;  %v5815_v58 = vrot.slane %v5801_v11, %v18362_v6  ;;  %v6078_v25 = vld [vmem:[%s21022_s8 + $0xb0] sm:$0xff] }
0x17a9   :  { %v18780_v11 = vpack.c.bf16 %v6078_v25, %v6074_v56  ;;  %v6111_v56 = vld [vmem:[%s21022_s8 + $0x1b8] sm:$0xff]  ;;  %v6104_v25 = vld [vmem:[%s21022_s8 + $0x180] sm:$0xff] }
0x17aa   :  { %v5816_v54 = vcombine.low %v5808_v20, %v5815_v58  ;;  %v6081_v20 = vld [vmem:[%s21022_s8 + $0xc8] sm:$0xff] }
0x17ab   :  { %v6085_v58 = vld [vmem:[%s21022_s8 + $0xe8] sm:$0xff] }
0x17ac   :  { %v5823_v5 = vrot.slane %v5816_v54, %v18362_v6  ;;  %v6083_v54 = vld [vmem:[%s21022_s8 + $0xd8] sm:$0xff] }
0x17ae   :  { %v5825_v60 = vadd.f32 %v5823_v5, %v18367_v24  ;;  %v6063_v24 = vld [vmem:[%s21022_s8 + $0x38] sm:$0xff]  ;;  %v18794_v5 = vpack.c.bf16 %v6085_v58, %v6081_v20  ;;  %v6108_v58 = vld [vmem:[%s21022_s8 + $0x1a0] sm:$0xff] }
0x17af   :  { %v18697_v43 = vpack.c.bf16 %v6063_v24, %v6059_v45  ;;  %v6090_v24 = vld [vmem:[%s21022_s8 + $0x110] sm:$0xff] }
0x17b0   :  { %v11412_v13 = vmul.f32 -1.442695, %v5825_v60  ;;  %v5833_v33 = vrot.slane %v5825_v60, 3  ;;  %v6087_v60 = vld [vmem:[%s21022_s8 + $0xf8] sm:$0xff]  ;;  %v18855_v50 = vpack.c.bf16 %v6094_v49, %v6090_v24  ;;  %v6114_v24 = vld [vmem:[%s21022_s8 + $0x1d0] sm:$0xff] }
0x17b1   :  { %13338 = vmatprep.subr.bf16.mxu1 %v18697_v43  ;;  %v6118_v49 = vld [vmem:[%s21022_s8 + $0x1f0] sm:$0xff] }
0x17b2   :  { %15389 = vpow2.f32 %v11412_v13  ;;  %v6080_v13 = vld [vmem:[%s21022_s8 + $0xc0] sm:$0xff]  ;;  %v18960_v40 = vpack.c.bf16 %v6118_v49, %v6114_v24 }
0x17bc   :  { %v15390_v16 = vpop.eup %15389 }
0x17bd   :  { %v5829_v17 = vadd.f32 1.0, %v15390_v16  ;;  %v6084_v16 = vld [vmem:[%s21022_s8 + $0xe0] sm:$0xff] }
0x17bf   :  { %15391 = vrcp.f32 %v5829_v17  ;;  %v18805_v17 = vpack.c.bf16 %v6087_v60, %v6083_v54  ;;  %v6106_v54 = vld [vmem:[%s21022_s8 + $0x190] sm:$0xff] }
0x17c0   :  { %15393 = vtanh.f32 %v5833_v33  ;;  %v18807_v33 = vpack.c.bf16 %v6084_v16, %v6080_v13  ;;  %v6110_v60 = vld [vmem:[%s21022_s8 + $0x1b0] sm:$0xff]  ;;  %v6113_v13 = vld [vmem:[%s21022_s8 + $0x1c8] sm:$0xff] }
0x17c1   :  { %v6117_v16 = vld [vmem:[%s21022_s8 + $0x1e8] sm:$0xff] }
0x17c9   :  { %v15392_v61 = vpop.eup %15391 }
0x17ca   :  { %v5837_v39 = vrot.slane %v15392_v61, 1  ;;  %v15394_v32 = vpop.eup %15393  ;;  %v5843_v1 = vrot.slane %v15392_v61, 2 }
0x17cb   :  { %v5840_v35 = vmul.f32 %v15394_v32, %v15392_v61  ;;  %v6082_v61 = vld [vmem:[%s21022_s8 + $0xd0] sm:$0xff] }
0x17cc   :  { %v5839_v59 = vmul.f32 %v5837_v39, %v18618_v22  ;;  %v6073_v22 = vld [vmem:[%s21022_s8 + $0x88] sm:$0xff]  ;;  %v6086_v39 = vld [vmem:[%s21022_s8 + $0xf0] sm:$0xff] }
0x17cd   :  { %v18758_v29 = vpack.c.bf16 %v6077_v15, %v6073_v22  ;;  %v18816_v32 = vpack.c.bf16 %v6086_v39, %v6082_v61  ;;  %v6102_v22 = vld [vmem:[%s21022_s8 + $0x170] sm:$0xff]  ;;  %v6105_v15 = vld [vmem:[%s21022_s8 + $0x188] sm:$0xff]  ;;  %v6115_v61 = vld [vmem:[%s21022_s8 + $0x1d8] sm:$0xff]  ;;  %v18929_v39 = vpack.c.bf16 %v6108_v58, %v6104_v25 }
0x17ce   :  { %v18665_v46 = vadd.f32 %v5840_v35, %v5839_v59  ;;  %v6089_v35 = vld [vmem:[%s21022_s8 + $0x108] sm:$0xff]  ;;  %v18894_v2 = vpack.c.bf16 %v6102_v22, %v6098_v41 }
0x17cf   :  { %v6093_v59 = vld [vmem:[%s21022_s8 + $0x128] sm:$0xff] }
0x17d0   :  { %15395 = vtanh.f32 %v18665_v46 }
0x17da   :  { %v15396_v14 = vpop.eup %15395 }
0x17db   :  { %v5845_v18 = vmul.f32 %v15396_v14, %v5843_v1  ;;  %v6091_v1 = vld [vmem:[%s21022_s8 + $0x118] sm:$0xff]  ;;  %v18829_v14 = vpack.c.bf16 %v6093_v59, %v6089_v35  ;;  %v18936_v59 = vpack.c.bf16 %v6110_v60, %v6106_v54 }
0x17dc   :  { %v6119_v35 = vld [vmem:[%s21022_s8 + $0x1f8] sm:$0xff] }
0x17dd   :  { %5919 = vmatmul.mubr.f32.vlgmr.msra.gmra.mrb[48].mxu0 %v5845_v18  ;;  %5990 = vmatmul.mubr.f32.vlgmr.msra.gmra.mrb[48].mxu1 %v5845_v18  ;;  %v5851_v44 = vrot.slane %v5845_v18, %v16373_v31  ;;  %v6095_v18 = vld [vmem:[%s21022_s8 + $0x138] sm:$0xff] }
0x17de   :  { %6184 = vmatprep.mubr.f32.mxu0 %v21030_v3  ;;  %6255 = vmatprep.mubr.f32.mxu1 %v21030_v3  ;;  %v18841_v12 = vpack.c.bf16 %v6095_v18, %v6091_v1  ;;  %v18938_v1 = vpack.c.bf16 %v6117_v16, %v6113_v13  ;;  %v6112_v18 = vld [vmem:[%s21022_s8 + $0x1c0] sm:$0xff] }
0x17df   :  { %v18675_v28 = vsel %vm5846_vm6, %v5851_v44, %v18630_v38  ;;  %13308 = vmatpush1.bf16.msra.mxu0 %v18699_v27  ;;  %13340 = vmatpush1.bf16.msra.mxu1 %v18708_v21  ;;  %v6072_v38 = vld [vmem:[%s21022_s8 + $0x80] sm:$0xff] }
0x17e0   :  { %13310 = vmatprep.subr.bf16.mxu0 %v18722_v48  ;;  %13342 = vmatprep.subr.bf16.mxu1 %v18733_v63  ;;  %v18771_v53 = vpack.c.bf16 %v6076_v8, %v6072_v38  ;;  %v6088_v44 = vld [vmem:[%s21022_s8 + $0x100] sm:$0xff]  ;;  %v18896_v38 = vpack.c.bf16 %v6109_v47, %v6105_v15  ;;  %v6107_v8 = vld [vmem:[%s21022_s8 + $0x198] sm:$0xff] }
0x17e1   :  { %v18843_v45 = vpack.c.bf16 %v6092_v0, %v6088_v44  ;;  %v18908_v20 = vpack.c.bf16 %v6111_v56, %v6107_v8  ;;  %v6116_v44 = vld [vmem:[%s21022_s8 + $0x1e0] sm:$0xff]  ;;  %v18947_v0 = vpack.c.bf16 %v6119_v35, %v6115_v61 }
0x17e2   :  { %v18956_v9 = vpack.c.bf16 %v6116_v44, %v6112_v18 }
0x17e3   :  { %13312 = vmatpush1.bf16.msra.mxu0 %v18735_v51  ;;  %13344 = vmatpush1.bf16.msra.mxu1 %v18744_v36 }
0x17e4   :  { %13314 = vmatprep.subr.bf16.mxu0 %v18758_v29  ;;  %13346 = vmatprep.subr.bf16.mxu1 %v18769_v62 }
0x17e7   :  { %13316 = vmatpush1.bf16.msra.mxu0 %v18771_v53  ;;  %13348 = vmatpush1.bf16.msra.mxu1 %v18780_v11 }
0x17e8   :  { %13318 = vmatprep.subr.bf16.mxu0 %v18794_v5  ;;  %13350 = vmatprep.subr.bf16.mxu1 %v18805_v17 }
0x17eb   :  { %13320 = vmatpush1.bf16.msra.mxu0 %v18807_v33  ;;  %13352 = vmatpush1.bf16.msra.mxu1 %v18816_v32 }
0x17ec   :  { %13322 = vmatprep.subr.bf16.mxu0 %v18829_v14  ;;  %13354 = vmatprep.subr.bf16.mxu1 %v18841_v12 }
0x17ef   :  { %13324 = vmatpush1.bf16.msra.mxu0 %v18843_v45  ;;  %13356 = vmatpush1.bf16.msra.mxu1 %v18855_v50 }
0x17f0   :  { %13326 = vmatprep.subr.bf16.mxu0 %v18867_v42  ;;  %13358 = vmatprep.subr.bf16.mxu1 %v18869_v52 }
0x17f3   :  { %13328 = vmatpush1.bf16.msra.mxu0 %v18881_v26  ;;  %13360 = vmatpush1.bf16.msra.mxu1 %v18894_v2 }
0x17f4   :  { %13330 = vmatprep.subr.bf16.mxu0 %v18896_v38  ;;  %13362 = vmatprep.subr.bf16.mxu1 %v18908_v20 }
0x17f7   :  { %13332 = vmatpush1.bf16.msra.mxu0 %v18929_v39  ;;  %13364 = vmatpush1.bf16.msra.mxu1 %v18936_v59 }
0x17f8   :  { %13334 = vmatprep.subr.bf16.mxu0 %v18938_v1  ;;  %13366 = vmatprep.subr.bf16.mxu1 %v18947_v0 }
0x17fb   :  { %13336 = vmatpush1.bf16.msra.mxu0 %v18956_v9  ;;  %13368 = vmatpush1.bf16.msra.mxu1 %v18960_v40 }
0x17fc   :  { %13370 = vmatprep.subr.bf16.mxu0 %v18686_v10  ;;  %13402 = vmatprep.subr.bf16.mxu1 %v18697_v43 }
0x18b0   :  { %v5920_v7 = vpop.f32.mrb[48].mxu0  ;;  %v5991_v19 = vpop.f32.mrb[48].mxu1 }
0x18b1   :  { %v5922_v4 = vpop.f32.mrb[49].mxu0  ;;  %v5993_v57 = vpop.f32.mrb[49].mxu1 }
0x18b2   :  { %v6000_v41 = vcombine.low %v5920_v7, %v5922_v4  ;;  %v6001_v22 = vcombine.low %v5991_v19, %v5993_v57 }
0x18b4   :  { %v6008_v15 = vrot.slane %v6000_v41, %v18362_v6  ;;  %v6015_v47 = vrot.slane %v6001_v22, %v18362_v6 }
0x18b6   :  { %v6016_v8 = vcombine.low %v6008_v15, %v6015_v47 }
0x18b8   :  { %v6023_v56 = vrot.slane %v6016_v8, %v18362_v6 }
0x18ba   :  { %v6025_v25 = vadd.f32 %v6023_v56, %v18414_v23 }
0x18bc   :  { %v11413_v58 = vmul.f32 -1.442695, %v6025_v25  ;;  %v6033_v13 = vrot.slane %v6025_v25, 3 }
0x18be   :  { %15397 = vpow2.f32 %v11413_v58  ;;  %v19019_v58 = vld [vmem:[#allocation4] ss:$8 sm:$0xf] }
0x18c8   :  { %v15398_v54 = vpop.eup %15397 }
0x18c9   :  { %v6029_v60 = vadd.f32 1.0, %v15398_v54 }
0x18cb   :  { %15399 = vrcp.f32 %v6029_v60 }
0x18cc   :  { %15401 = vtanh.f32 %v6033_v13 }
0x18d5   :  { %v15400_v16 = vpop.eup %15399 }
0x18d6   :  { %v6037_v61 = vrot.slane %v15400_v16, 1  ;;  %v15402_v35 = vpop.eup %15401  ;;  %v6043_v49 = vrot.slane %v15400_v16, 2 }
0x18d7   :  { %v6040_v18 = vmul.f32 %v15402_v35, %v15400_v16 }
0x18d8   :  { %v6039_v44 = vmul.f32 %v6037_v61, %v18665_v46 }
0x18da   :  { %v18972_v24 = vadd.f32 %v6040_v18, %v6039_v44 }
0x18dc   :  { %15403 = vtanh.f32 %v18972_v24 }
0x18e6   :  { %v15404_v7 = vpop.eup %15403 }
0x18e7   :  { %v6045_v23 = vmul.f32 %v15404_v7, %v6043_v49 }
0x18e9   :  { %6185 = vmatmul.mubr.f32.vlgmr.msra.gmra.mrb[50].mxu0 %v6045_v23  ;;  %6256 = vmatmul.mubr.f32.vlgmr.msra.gmra.mrb[50].mxu1 %v6045_v23  ;;  %v6051_v19 = vrot.slane %v6045_v23, %v16373_v31 }
0x18ea   :  { %13372 = vmatpush1.bf16.msra.mxu0 %v18699_v27  ;;  %13404 = vmatpush1.bf16.msra.mxu1 %v18708_v21 }
0x18eb   :  { %13374 = vmatprep.subr.bf16.mxu0 %v18722_v48  ;;  %13406 = vmatprep.subr.bf16.mxu1 %v18733_v63  ;;  %v18984_v46 = vsel %vm6046_vm7, %v6051_v19, %v18675_v28 }
0x18ec   :  { %6384 = vmatprep.mubr.f32.mxu0 %v21030_v3  ;;  %6455 = vmatprep.mubr.f32.mxu1 %v21030_v3 }
0x18ee   :  { %13376 = vmatpush1.bf16.msra.mxu0 %v18735_v51  ;;  %13408 = vmatpush1.bf16.msra.mxu1 %v18744_v36 }
0x18ef   :  { %13378 = vmatprep.subr.bf16.mxu0 %v18758_v29  ;;  %13410 = vmatprep.subr.bf16.mxu1 %v18769_v62 }
0x18f2   :  { %13380 = vmatpush1.bf16.msra.mxu0 %v18771_v53  ;;  %13412 = vmatpush1.bf16.msra.mxu1 %v18780_v11 }
0x18f3   :  { %13382 = vmatprep.subr.bf16.mxu0 %v18794_v5  ;;  %13414 = vmatprep.subr.bf16.mxu1 %v18805_v17 }
0x18f6   :  { %13384 = vmatpush1.bf16.msra.mxu0 %v18807_v33  ;;  %13416 = vmatpush1.bf16.msra.mxu1 %v18816_v32 }
0x18f7   :  { %13386 = vmatprep.subr.bf16.mxu0 %v18829_v14  ;;  %13418 = vmatprep.subr.bf16.mxu1 %v18841_v12 }
0x18fa   :  { %13388 = vmatpush1.bf16.msra.mxu0 %v18843_v45  ;;  %13420 = vmatpush1.bf16.msra.mxu1 %v18855_v50 }
0x18fb   :  { %13390 = vmatprep.subr.bf16.mxu0 %v18867_v42  ;;  %13422 = vmatprep.subr.bf16.mxu1 %v18869_v52 }
0x18fe   :  { %13392 = vmatpush1.bf16.msra.mxu0 %v18881_v26  ;;  %13424 = vmatpush1.bf16.msra.mxu1 %v18894_v2 }
0x18ff   :  { %13394 = vmatprep.subr.bf16.mxu0 %v18896_v38  ;;  %13426 = vmatprep.subr.bf16.mxu1 %v18908_v20 }
0x1902   :  { %13396 = vmatpush1.bf16.msra.mxu0 %v18929_v39  ;;  %13428 = vmatpush1.bf16.msra.mxu1 %v18936_v59 }
0x1903   :  { %13398 = vmatprep.subr.bf16.mxu0 %v18938_v1  ;;  %13430 = vmatprep.subr.bf16.mxu1 %v18947_v0 }
0x1906   :  { %13400 = vmatpush1.bf16.msra.mxu0 %v18956_v9  ;;  %13432 = vmatpush1.bf16.msra.mxu1 %v18960_v40 }
0x1907   :  { %13434 = vmatprep.subr.bf16.mxu0 %v18686_v10  ;;  %13466 = vmatprep.subr.bf16.mxu1 %v18697_v43 }
0x19bc   :  { %v6186_v28 = vpop.f32.mrb[50].mxu0  ;;  %v6257_v4 = vpop.f32.mrb[50].mxu1 }
0x19bd   :  { %v6188_v57 = vpop.f32.mrb[51].mxu0  ;;  %v6259_v41 = vpop.f32.mrb[51].mxu1 }
0x19be   :  { %v6266_v22 = vcombine.low %v6186_v28, %v6188_v57  ;;  %v6267_v15 = vcombine.low %v6257_v4, %v6259_v41 }
0x19c0   :  { %v6274_v47 = vrot.slane %v6266_v22, %v18362_v6  ;;  %v6281_v8 = vrot.slane %v6267_v15, %v18362_v6 }
0x19c2   :  { %v6282_v56 = vcombine.low %v6274_v47, %v6281_v8 }
0x19c4   :  { %v6289_v25 = vrot.slane %v6282_v56, %v18362_v6 }
0x19c6   :  { %v6291_v54 = vadd.f32 %v6289_v25, %v19019_v58 }
0x19c8   :  { %v11414_v60 = vmul.f32 -1.442695, %v6291_v54  ;;  %v6299_v61 = vrot.slane %v6291_v54, 3 }
0x19ca   :  { %15405 = vpow2.f32 %v11414_v60  ;;  %v19067_v60 = vld [vmem:[#allocation4 + $0x1] ss:$8 sm:$0xf] }
0x19d4   :  { %v15406_v13 = vpop.eup %15405 }
0x19d5   :  { %v6295_v16 = vadd.f32 1.0, %v15406_v13 }
0x19d7   :  { %15407 = vrcp.f32 %v6295_v16 }
0x19d8   :  { %15409 = vtanh.f32 %v6299_v61 }
0x19e1   :  { %v15408_v35 = vpop.eup %15407 }
0x19e2   :  { %v6303_v18 = vrot.slane %v15408_v35, 1  ;;  %v15410_v44 = vpop.eup %15409  ;;  %v6309_v19 = vrot.slane %v15408_v35, 2 }
0x19e3   :  { %v6306_v49 = vmul.f32 %v15410_v44, %v15408_v35 }
0x19e4   :  { %v6305_v7 = vmul.f32 %v6303_v18, %v18972_v24 }
0x19e6   :  { %v19023_v23 = vadd.f32 %v6306_v49, %v6305_v7 }
0x19e8   :  { %15411 = vtanh.f32 %v19023_v23 }
0x19f2   :  { %v15412_v28 = vpop.eup %15411 }
0x19f3   :  { %v19026_v4 = vmul.f32 %v15412_v28, %v6309_v19 }
0x19f5   :  { %6385 = vmatmul.mubr.f32.vlgmr.msra.gmra.mrb[52].mxu0 %v19026_v4  ;;  %6456 = vmatmul.mubr.f32.vlgmr.msra.gmra.mrb[52].mxu1 %v19026_v4 }
0x19f6   :  { %13436 = vmatpush1.bf16.msra.mxu0 %v18699_v27  ;;  %13468 = vmatpush1.bf16.msra.mxu1 %v18708_v21 }
0x19f7   :  { %13438 = vmatprep.subr.bf16.mxu0 %v18722_v48  ;;  %13470 = vmatprep.subr.bf16.mxu1 %v18733_v63 }
0x19f8   :  { %6583 = vmatprep.mubr.f32.mxu0 %v21030_v3  ;;  %6654 = vmatprep.mubr.f32.mxu1 %v21030_v3 }
0x19fa   :  { %13440 = vmatpush1.bf16.msra.mxu0 %v18735_v51  ;;  %13472 = vmatpush1.bf16.msra.mxu1 %v18744_v36 }
0x19fb   :  { %13442 = vmatprep.subr.bf16.mxu0 %v18758_v29  ;;  %13474 = vmatprep.subr.bf16.mxu1 %v18769_v62 }
0x19fe   :  { %13444 = vmatpush1.bf16.msra.mxu0 %v18771_v53  ;;  %13476 = vmatpush1.bf16.msra.mxu1 %v18780_v11 }
0x19ff   :  { %13446 = vmatprep.subr.bf16.mxu0 %v18794_v5  ;;  %13478 = vmatprep.subr.bf16.mxu1 %v18805_v17 }
0x1a02   :  { %13448 = vmatpush1.bf16.msra.mxu0 %v18807_v33  ;;  %13480 = vmatpush1.bf16.msra.mxu1 %v18816_v32 }
0x1a03   :  { %13450 = vmatprep.subr.bf16.mxu0 %v18829_v14  ;;  %13482 = vmatprep.subr.bf16.mxu1 %v18841_v12 }
0x1a06   :  { %13452 = vmatpush1.bf16.msra.mxu0 %v18843_v45  ;;  %13484 = vmatpush1.bf16.msra.mxu1 %v18855_v50 }
0x1a07   :  { %13454 = vmatprep.subr.bf16.mxu0 %v18867_v42  ;;  %13486 = vmatprep.subr.bf16.mxu1 %v18869_v52 }
0x1a0a   :  { %13456 = vmatpush1.bf16.msra.mxu0 %v18881_v26  ;;  %13488 = vmatpush1.bf16.msra.mxu1 %v18894_v2 }
0x1a0b   :  { %13458 = vmatprep.subr.bf16.mxu0 %v18896_v38  ;;  %13490 = vmatprep.subr.bf16.mxu1 %v18908_v20 }
0x1a0e   :  { %13460 = vmatpush1.bf16.msra.mxu0 %v18929_v39  ;;  %13492 = vmatpush1.bf16.msra.mxu1 %v18936_v59 }
0x1a0f   :  { %13462 = vmatprep.subr.bf16.mxu0 %v18938_v1  ;;  %13494 = vmatprep.subr.bf16.mxu1 %v18947_v0 }
0x1a12   :  { %13464 = vmatpush1.bf16.msra.mxu0 %v18956_v9  ;;  %13496 = vmatpush1.bf16.msra.mxu1 %v18960_v40 }
0x1a13   :  { %13498 = vmatprep.subr.bf16.mxu0 %v18686_v10  ;;  %13530 = vmatprep.subr.bf16.mxu1 %v18697_v43 }
0x1ac8   :  { %v6386_v24 = vpop.f32.mrb[52].mxu0  ;;  %v6457_v57 = vpop.f32.mrb[52].mxu1 }
0x1ac9   :  { %v6388_v41 = vpop.f32.mrb[53].mxu0  ;;  %v6459_v22 = vpop.f32.mrb[53].mxu1 }
0x1aca   :  { %v6466_v15 = vcombine.low %v6386_v24, %v6388_v41  ;;  %v6467_v47 = vcombine.low %v6457_v57, %v6459_v22  ;;  %v6316_v22 = vrot.slane %v19026_v4, %v16373_v31 }
0x1acc   :  { %v6474_v8 = vrot.slane %v6466_v15, %v18362_v6  ;;  %v6481_v56 = vrot.slane %v6467_v47, %v18362_v6 }
0x1ace   :  { %v6482_v25 = vcombine.low %v6474_v8, %v6481_v56  ;;  %v6318_v8 = vsel %vm4644_vm0, %v6316_v22, 0.0 }
0x1ad0   :  { %v6489_v54 = vrot.slane %v6482_v25, %v18362_v6 }
0x1ad2   :  { %v6491_v13 = vadd.f32 %v6489_v54, %v19067_v60 }
0x1ad4   :  { %v11415_v16 = vmul.f32 -1.442695, %v6491_v13  ;;  %v6499_v18 = vrot.slane %v6491_v13, 3 }
0x1ad6   :  { %15413 = vpow2.f32 %v11415_v16 }
0x1ae0   :  { %v15414_v61 = vpop.eup %15413 }
0x1ae1   :  { %v6495_v35 = vadd.f32 1.0, %v15414_v61 }
0x1ae3   :  { %15415 = vrcp.f32 %v6495_v35 }
0x1ae4   :  { %15417 = vtanh.f32 %v6499_v18 }
0x1aed   :  { %v15416_v44 = vpop.eup %15415 }
0x1aee   :  { %v6503_v49 = vrot.slane %v15416_v44, 1  ;;  %v15418_v7 = vpop.eup %15417  ;;  %v6509_v57 = vrot.slane %v15416_v44, 2 }
0x1aef   :  { %v6506_v19 = vmul.f32 %v15418_v7, %v15416_v44 }
0x1af0   :  { %v6505_v28 = vmul.f32 %v6503_v49, %v19023_v23 }
0x1af2   :  { %v19071_v24 = vadd.f32 %v6506_v19, %v6505_v28 }
0x1af4   :  { %15419 = vtanh.f32 %v19071_v24 }
0x1afe   :  { %v15420_v41 = vpop.eup %15419 }
0x1aff   :  { %v6511_v15 = vmul.f32 %v15420_v41, %v6509_v57 }
0x1b01   :  { %v6516_v47 = vrot.slane %v6511_v15, %v16373_v31  ;;  %6584 = vmatmul.mubr.f32.vlgmr.msra.gmra.mrb[54].mxu0 %v6511_v15  ;;  %6655 = vmatmul.mubr.f32.vlgmr.msra.gmra.mrb[54].mxu1 %v6511_v15 }
0x1b02   :  { %13500 = vmatpush1.bf16.msra.mxu0 %v18699_v27  ;;  %13532 = vmatpush1.bf16.msra.mxu1 %v18708_v21 }
0x1b03   :  { %13502 = vmatprep.subr.bf16.mxu0 %v18722_v48  ;;  %13534 = vmatprep.subr.bf16.mxu1 %v18733_v63  ;;  %v19085_v23 = vsel %vm4846_vm1, %v6516_v47, %v6318_v8 }
0x1b04   :  { %6782 = vmatprep.mubr.f32.mxu0 %v21030_v3  ;;  %6853 = vmatprep.mubr.f32.mxu1 %v21030_v3 }
0x1b06   :  { %13504 = vmatpush1.bf16.msra.mxu0 %v18735_v51  ;;  %13536 = vmatpush1.bf16.msra.mxu1 %v18744_v36 }
0x1b07   :  { %13506 = vmatprep.subr.bf16.mxu0 %v18758_v29  ;;  %13538 = vmatprep.subr.bf16.mxu1 %v18769_v62 }
0x1b0a   :  { %13508 = vmatpush1.bf16.msra.mxu0 %v18771_v53  ;;  %13540 = vmatpush1.bf16.msra.mxu1 %v18780_v11 }
0x1b0b   :  { %13510 = vmatprep.subr.bf16.mxu0 %v18794_v5  ;;  %13542 = vmatprep.subr.bf16.mxu1 %v18805_v17 }
0x1b0e   :  { %13512 = vmatpush1.bf16.msra.mxu0 %v18807_v33  ;;  %13544 = vmatpush1.bf16.msra.mxu1 %v18816_v32 }
0x1b0f   :  { %13514 = vmatprep.subr.bf16.mxu0 %v18829_v14  ;;  %13546 = vmatprep.subr.bf16.mxu1 %v18841_v12 }
0x1b12   :  { %13516 = vmatpush1.bf16.msra.mxu0 %v18843_v45  ;;  %13548 = vmatpush1.bf16.msra.mxu1 %v18855_v50 }
0x1b13   :  { %13518 = vmatprep.subr.bf16.mxu0 %v18867_v42  ;;  %13550 = vmatprep.subr.bf16.mxu1 %v18869_v52 }
0x1b16   :  { %13520 = vmatpush1.bf16.msra.mxu0 %v18881_v26  ;;  %13552 = vmatpush1.bf16.msra.mxu1 %v18894_v2 }
0x1b17   :  { %13522 = vmatprep.subr.bf16.mxu0 %v18896_v38  ;;  %13554 = vmatprep.subr.bf16.mxu1 %v18908_v20 }
0x1b1a   :  { %13524 = vmatpush1.bf16.msra.mxu0 %v18929_v39  ;;  %13556 = vmatpush1.bf16.msra.mxu1 %v18936_v59 }
0x1b1b   :  { %13526 = vmatprep.subr.bf16.mxu0 %v18938_v1  ;;  %13558 = vmatprep.subr.bf16.mxu1 %v18947_v0 }
0x1b1e   :  { %13528 = vmatpush1.bf16.msra.mxu0 %v18956_v9  ;;  %13560 = vmatpush1.bf16.msra.mxu1 %v18960_v40 }
0x1b1f   :  { %13562 = vmatprep.subr.bf16.mxu0 %v18686_v10  ;;  %13594 = vmatprep.subr.bf16.mxu1 %v18697_v43 }
0x1bd4   :  { %v6585_v4 = vpop.f32.mrb[54].mxu0  ;;  %v6656_v56 = vpop.f32.mrb[54].mxu1 }
0x1bd5   :  { %v6587_v25 = vpop.f32.mrb[55].mxu0  ;;  %v6658_v54 = vpop.f32.mrb[55].mxu1 }
0x1bd6   :  { %v6665_v13 = vcombine.low %v6585_v4, %v6587_v25  ;;  %v6666_v16 = vcombine.low %v6656_v56, %v6658_v54 }
0x1bd8   :  { %v6673_v61 = vrot.slane %v6665_v13, %v18362_v6  ;;  %v6680_v35 = vrot.slane %v6666_v16, %v18362_v6 }
0x1bda   :  { %v6681_v18 = vcombine.low %v6673_v61, %v6680_v35 }
0x1bdc   :  { %v6688_v44 = vrot.slane %v6681_v18, %v18362_v6 }
0x1bde   :  { %v6690_v49 = vadd.f32 %v6688_v44, %v19019_v58 }
0x1be0   :  { %v11416_v7 = vmul.f32 -1.442695, %v6690_v49  ;;  %v6698_v57 = vrot.slane %v6690_v49, 3 }
0x1be2   :  { %15421 = vpow2.f32 %v11416_v7 }
0x1bec   :  { %v15422_v19 = vpop.eup %15421 }
0x1bed   :  { %v6694_v28 = vadd.f32 1.0, %v15422_v19 }
0x1bef   :  { %15423 = vrcp.f32 %v6694_v28 }
0x1bf0   :  { %15425 = vtanh.f32 %v6698_v57 }
0x1bf9   :  { %v15424_v41 = vpop.eup %15423 }
0x1bfa   :  { %v6702_v22 = vrot.slane %v15424_v41, 1  ;;  %v15426_v15 = vpop.eup %15425  ;;  %v6708_v56 = vrot.slane %v15424_v41, 2 }
0x1bfb   :  { %v6705_v47 = vmul.f32 %v15426_v15, %v15424_v41 }
0x1bfc   :  { %v6704_v8 = vmul.f32 %v6702_v22, %v19071_v24 }
0x1bfe   :  { %v19122_v4 = vadd.f32 %v6705_v47, %v6704_v8 }
0x1c00   :  { %15427 = vtanh.f32 %v19122_v4 }
0x1c0a   :  { %v15428_v25 = vpop.eup %15427 }
0x1c0b   :  { %v6710_v54 = vmul.f32 %v15428_v25, %v6708_v56 }
0x1c0d   :  { %v6715_v13 = vrot.slane %v6710_v54, %v16373_v31  ;;  %6783 = vmatmul.mubr.f32.vlgmr.msra.gmra.mrb[56].mxu0 %v6710_v54  ;;  %6854 = vmatmul.mubr.f32.vlgmr.msra.gmra.mrb[56].mxu1 %v6710_v54 }
0x1c0e   :  { %13564 = vmatpush1.bf16.msra.mxu0 %v18699_v27  ;;  %13596 = vmatpush1.bf16.msra.mxu1 %v18708_v21 }
0x1c0f   :  { %13566 = vmatprep.subr.bf16.mxu0 %v18722_v48  ;;  %13598 = vmatprep.subr.bf16.mxu1 %v18733_v63  ;;  %v19133_v24 = vsel %vm5046_vm2, %v6715_v13, %v19085_v23 }
0x1c10   :  { %6981 = vmatprep.mubr.f32.mxu0 %v21030_v3  ;;  %7052 = vmatprep.mubr.f32.mxu1 %v21030_v3 }
0x1c12   :  { %13568 = vmatpush1.bf16.msra.mxu0 %v18735_v51  ;;  %13600 = vmatpush1.bf16.msra.mxu1 %v18744_v36 }
0x1c13   :  { %13570 = vmatprep.subr.bf16.mxu0 %v18758_v29  ;;  %13602 = vmatprep.subr.bf16.mxu1 %v18769_v62 }
0x1c16   :  { %13572 = vmatpush1.bf16.msra.mxu0 %v18771_v53  ;;  %13604 = vmatpush1.bf16.msra.mxu1 %v18780_v11 }
0x1c17   :  { %13574 = vmatprep.subr.bf16.mxu0 %v18794_v5  ;;  %13606 = vmatprep.subr.bf16.mxu1 %v18805_v17 }
0x1c1a   :  { %13576 = vmatpush1.bf16.msra.mxu0 %v18807_v33  ;;  %13608 = vmatpush1.bf16.msra.mxu1 %v18816_v32 }
0x1c1b   :  { %13578 = vmatprep.subr.bf16.mxu0 %v18829_v14  ;;  %13610 = vmatprep.subr.bf16.mxu1 %v18841_v12 }
0x1c1e   :  { %13580 = vmatpush1.bf16.msra.mxu0 %v18843_v45  ;;  %13612 = vmatpush1.bf16.msra.mxu1 %v18855_v50 }
0x1c1f   :  { %13582 = vmatprep.subr.bf16.mxu0 %v18867_v42  ;;  %13614 = vmatprep.subr.bf16.mxu1 %v18869_v52 }
0x1c22   :  { %13584 = vmatpush1.bf16.msra.mxu0 %v18881_v26  ;;  %13616 = vmatpush1.bf16.msra.mxu1 %v18894_v2 }
0x1c23   :  { %13586 = vmatprep.subr.bf16.mxu0 %v18896_v38  ;;  %13618 = vmatprep.subr.bf16.mxu1 %v18908_v20 }
0x1c26   :  { %13588 = vmatpush1.bf16.msra.mxu0 %v18929_v39  ;;  %13620 = vmatpush1.bf16.msra.mxu1 %v18936_v59 }
0x1c27   :  { %13590 = vmatprep.subr.bf16.mxu0 %v18938_v1  ;;  %13622 = vmatprep.subr.bf16.mxu1 %v18947_v0 }
0x1c2a   :  { %13592 = vmatpush1.bf16.msra.mxu0 %v18956_v9  ;;  %13624 = vmatpush1.bf16.msra.mxu1 %v18960_v40 }
0x1c2b   :  { %13626 = vmatprep.subr.bf16.mxu0 %v18686_v10  ;;  %13658 = vmatprep.subr.bf16.mxu1 %v18697_v43 }
0x1ce0   :  { %v6784_v23 = vpop.f32.mrb[56].mxu0  ;;  %v6855_v16 = vpop.f32.mrb[56].mxu1 }
0x1ce1   :  { %v6786_v61 = vpop.f32.mrb[57].mxu0  ;;  %v6857_v35 = vpop.f32.mrb[57].mxu1 }
0x1ce2   :  { %v6864_v18 = vcombine.low %v6784_v23, %v6786_v61  ;;  %v6865_v44 = vcombine.low %v6855_v16, %v6857_v35 }
0x1ce4   :  { %v6872_v49 = vrot.slane %v6864_v18, %v18362_v6  ;;  %v6879_v7 = vrot.slane %v6865_v44, %v18362_v6 }
0x1ce6   :  { %v6880_v19 = vcombine.low %v6872_v49, %v6879_v7 }
0x1ce8   :  { %v6887_v28 = vrot.slane %v6880_v19, %v18362_v6 }
0x1cea   :  { %v6889_v57 = vadd.f32 %v6887_v28, %v19067_v60 }
0x1cec   :  { %v11417_v41 = vmul.f32 -1.442695, %v6889_v57  ;;  %v6897_v47 = vrot.slane %v6889_v57, 3 }
0x1cee   :  { %15429 = vpow2.f32 %v11417_v41 }
0x1cf8   :  { %v15430_v22 = vpop.eup %15429 }
0x1cf9   :  { %v6893_v15 = vadd.f32 1.0, %v15430_v22 }
0x1cfb   :  { %15431 = vrcp.f32 %v6893_v15 }
0x1cfc   :  { %15433 = vtanh.f32 %v6897_v47 }
0x1d05   :  { %v15432_v8 = vpop.eup %15431 }
0x1d06   :  { %v6901_v56 = vrot.slane %v15432_v8, 1  ;;  %v15434_v25 = vpop.eup %15433  ;;  %v6907_v16 = vrot.slane %v15432_v8, 2 }
0x1d07   :  { %v6904_v54 = vmul.f32 %v15434_v25, %v15432_v8 }
0x1d08   :  { %v6903_v13 = vmul.f32 %v6901_v56, %v19122_v4 }
0x1d0a   :  { %v19170_v23 = vadd.f32 %v6904_v54, %v6903_v13 }
0x1d0c   :  { %15435 = vtanh.f32 %v19170_v23 }
0x1d16   :  { %v15436_v61 = vpop.eup %15435 }
0x1d17   :  { %v6909_v35 = vmul.f32 %v15436_v61, %v6907_v16 }
0x1d19   :  { %v6914_v18 = vrot.slane %v6909_v35, %v16373_v31  ;;  %6982 = vmatmul.mubr.f32.vlgmr.msra.gmra.mrb[58].mxu0 %v6909_v35  ;;  %7053 = vmatmul.mubr.f32.vlgmr.msra.gmra.mrb[58].mxu1 %v6909_v35 }
0x1d1a   :  { %13628 = vmatpush1.bf16.msra.mxu0 %v18699_v27  ;;  %13660 = vmatpush1.bf16.msra.mxu1 %v18708_v21 }
0x1d1b   :  { %13630 = vmatprep.subr.bf16.mxu0 %v18722_v48  ;;  %13662 = vmatprep.subr.bf16.mxu1 %v18733_v63  ;;  %v19181_v4 = vsel %vm5246_vm3, %v6914_v18, %v19133_v24 }
0x1d1c   :  { %7180 = vmatprep.mubr.f32.mxu0 %v21030_v3  ;;  %7251 = vmatprep.mubr.f32.mxu1 %v21030_v3 }
0x1d1e   :  { %13632 = vmatpush1.bf16.msra.mxu0 %v18735_v51  ;;  %13664 = vmatpush1.bf16.msra.mxu1 %v18744_v36 }
0x1d1f   :  { %13634 = vmatprep.subr.bf16.mxu0 %v18758_v29  ;;  %13666 = vmatprep.subr.bf16.mxu1 %v18769_v62 }
0x1d22   :  { %13636 = vmatpush1.bf16.msra.mxu0 %v18771_v53  ;;  %13668 = vmatpush1.bf16.msra.mxu1 %v18780_v11 }
0x1d23   :  { %13638 = vmatprep.subr.bf16.mxu0 %v18794_v5  ;;  %13670 = vmatprep.subr.bf16.mxu1 %v18805_v17 }
0x1d26   :  { %13640 = vmatpush1.bf16.msra.mxu0 %v18807_v33  ;;  %13672 = vmatpush1.bf16.msra.mxu1 %v18816_v32 }
0x1d27   :  { %13642 = vmatprep.subr.bf16.mxu0 %v18829_v14  ;;  %13674 = vmatprep.subr.bf16.mxu1 %v18841_v12 }
0x1d2a   :  { %13644 = vmatpush1.bf16.msra.mxu0 %v18843_v45  ;;  %13676 = vmatpush1.bf16.msra.mxu1 %v18855_v50 }
0x1d2b   :  { %13646 = vmatprep.subr.bf16.mxu0 %v18867_v42  ;;  %13678 = vmatprep.subr.bf16.mxu1 %v18869_v52 }
0x1d2e   :  { %13648 = vmatpush1.bf16.msra.mxu0 %v18881_v26  ;;  %13680 = vmatpush1.bf16.msra.mxu1 %v18894_v2 }
0x1d2f   :  { %13650 = vmatprep.subr.bf16.mxu0 %v18896_v38  ;;  %13682 = vmatprep.subr.bf16.mxu1 %v18908_v20 }
0x1d32   :  { %13652 = vmatpush1.bf16.msra.mxu0 %v18929_v39  ;;  %13684 = vmatpush1.bf16.msra.mxu1 %v18936_v59 }
0x1d33   :  { %13654 = vmatprep.subr.bf16.mxu0 %v18938_v1  ;;  %13686 = vmatprep.subr.bf16.mxu1 %v18947_v0 }
0x1d36   :  { %13656 = vmatpush1.bf16.msra.mxu0 %v18956_v9  ;;  %13688 = vmatpush1.bf16.msra.mxu1 %v18960_v40 }
0x1d37   :  { %13690 = vmatprep.subr.bf16.mxu0 %v18686_v10  ;;  %13722 = vmatprep.subr.bf16.mxu1 %v18697_v43 }
0x1dec   :  { %v6983_v24 = vpop.f32.mrb[58].mxu0  ;;  %v7054_v44 = vpop.f32.mrb[58].mxu1 }
0x1ded   :  { %v6985_v49 = vpop.f32.mrb[59].mxu0  ;;  %v7056_v7 = vpop.f32.mrb[59].mxu1 }
0x1dee   :  { %v7063_v19 = vcombine.low %v6983_v24, %v6985_v49  ;;  %v7064_v28 = vcombine.low %v7054_v44, %v7056_v7 }
0x1df0   :  { %v7071_v57 = vrot.slane %v7063_v19, %v18362_v6  ;;  %v7078_v41 = vrot.slane %v7064_v28, %v18362_v6 }
0x1df2   :  { %v7079_v22 = vcombine.low %v7071_v57, %v7078_v41 }
0x1df4   :  { %v7086_v15 = vrot.slane %v7079_v22, %v18362_v6 }
0x1df6   :  { %v7088_v47 = vadd.f32 %v7086_v15, %v19019_v58 }
0x1df8   :  { %v11418_v8 = vmul.f32 -1.442695, %v7088_v47  ;;  %v7096_v54 = vrot.slane %v7088_v47, 3 }
0x1dfa   :  { %15437 = vpow2.f32 %v11418_v8 }
0x1e04   :  { %v15438_v56 = vpop.eup %15437 }
0x1e05   :  { %v7092_v25 = vadd.f32 1.0, %v15438_v56 }
0x1e07   :  { %15439 = vrcp.f32 %v7092_v25 }
0x1e08   :  { %15441 = vtanh.f32 %v7096_v54 }
0x1e11   :  { %v15440_v13 = vpop.eup %15439 }
0x1e12   :  { %v7100_v16 = vrot.slane %v15440_v13, 1  ;;  %v15442_v61 = vpop.eup %15441  ;;  %v7106_v44 = vrot.slane %v15440_v13, 2 }
0x1e13   :  { %v7103_v35 = vmul.f32 %v15442_v61, %v15440_v13 }
0x1e14   :  { %v7102_v18 = vmul.f32 %v7100_v16, %v19170_v23 }
0x1e16   :  { %v19218_v24 = vadd.f32 %v7103_v35, %v7102_v18 }
0x1e18   :  { %15443 = vtanh.f32 %v19218_v24 }
0x1e22   :  { %v15444_v49 = vpop.eup %15443 }
0x1e23   :  { %v7108_v7 = vmul.f32 %v15444_v49, %v7106_v44 }
0x1e25   :  { %v7113_v19 = vrot.slane %v7108_v7, %v16373_v31  ;;  %7181 = vmatmul.mubr.f32.vlgmr.msra.gmra.mrb[60].mxu0 %v7108_v7  ;;  %7252 = vmatmul.mubr.f32.vlgmr.msra.gmra.mrb[60].mxu1 %v7108_v7 }
0x1e26   :  { %13692 = vmatpush1.bf16.msra.mxu0 %v18699_v27  ;;  %13724 = vmatpush1.bf16.msra.mxu1 %v18708_v21 }
0x1e27   :  { %13694 = vmatprep.subr.bf16.mxu0 %v18722_v48  ;;  %13726 = vmatprep.subr.bf16.mxu1 %v18733_v63  ;;  %v19229_v23 = vsel %vm5446_vm4, %v7113_v19, %v19181_v4 }
0x1e28   :  { %7379 = vmatprep.mubr.f32.mxu0 %v21030_v3  ;;  %7450 = vmatprep.mubr.f32.mxu1 %v21030_v3 }
0x1e2a   :  { %13696 = vmatpush1.bf16.msra.mxu0 %v18735_v51  ;;  %13728 = vmatpush1.bf16.msra.mxu1 %v18744_v36 }
0x1e2b   :  { %13698 = vmatprep.subr.bf16.mxu0 %v18758_v29  ;;  %13730 = vmatprep.subr.bf16.mxu1 %v18769_v62 }
0x1e2e   :  { %13700 = vmatpush1.bf16.msra.mxu0 %v18771_v53  ;;  %13732 = vmatpush1.bf16.msra.mxu1 %v18780_v11 }
0x1e2f   :  { %13702 = vmatprep.subr.bf16.mxu0 %v18794_v5  ;;  %13734 = vmatprep.subr.bf16.mxu1 %v18805_v17 }
0x1e32   :  { %13704 = vmatpush1.bf16.msra.mxu0 %v18807_v33  ;;  %13736 = vmatpush1.bf16.msra.mxu1 %v18816_v32 }
0x1e33   :  { %13706 = vmatprep.subr.bf16.mxu0 %v18829_v14  ;;  %13738 = vmatprep.subr.bf16.mxu1 %v18841_v12 }
0x1e36   :  { %13708 = vmatpush1.bf16.msra.mxu0 %v18843_v45  ;;  %13740 = vmatpush1.bf16.msra.mxu1 %v18855_v50 }
0x1e37   :  { %13710 = vmatprep.subr.bf16.mxu0 %v18867_v42  ;;  %13742 = vmatprep.subr.bf16.mxu1 %v18869_v52 }
0x1e3a   :  { %13712 = vmatpush1.bf16.msra.mxu0 %v18881_v26  ;;  %13744 = vmatpush1.bf16.msra.mxu1 %v18894_v2 }
0x1e3b   :  { %13714 = vmatprep.subr.bf16.mxu0 %v18896_v38  ;;  %13746 = vmatprep.subr.bf16.mxu1 %v18908_v20 }
0x1e3e   :  { %13716 = vmatpush1.bf16.msra.mxu0 %v18929_v39  ;;  %13748 = vmatpush1.bf16.msra.mxu1 %v18936_v59 }
0x1e3f   :  { %13718 = vmatprep.subr.bf16.mxu0 %v18938_v1  ;;  %13750 = vmatprep.subr.bf16.mxu1 %v18947_v0 }
0x1e42   :  { %13720 = vmatpush1.bf16.msra.mxu0 %v18956_v9  ;;  %13752 = vmatpush1.bf16.msra.mxu1 %v18960_v40 }
0x1e43   :  { %13754 = vmatprep.subr.bf16.mxu0 %v18686_v10  ;;  %13786 = vmatprep.subr.bf16.mxu1 %v18697_v43 }
0x1ef8   :  { %v7182_v4 = vpop.f32.mrb[60].mxu0  ;;  %v7253_v28 = vpop.f32.mrb[60].mxu1 }
0x1ef9   :  { %v7184_v57 = vpop.f32.mrb[61].mxu0  ;;  %v7255_v41 = vpop.f32.mrb[61].mxu1 }
0x1efa   :  { %v7262_v22 = vcombine.low %v7182_v4, %v7184_v57  ;;  %v7263_v15 = vcombine.low %v7253_v28, %v7255_v41  ;;  %v7730_v57 = vld [vmem:[%s21024_s10 + $0x68] sm:$0xff]  ;;  %v7728_v41 = vld [vmem:[%s21024_s10 + $0x58] sm:$0xff] }
0x1efc   :  { %v7270_v47 = vrot.slane %v7262_v22, %v18362_v6  ;;  %v7277_v8 = vrot.slane %v7263_v15, %v18362_v6  ;;  %v7732_v22 = vld [vmem:[%s21024_s10 + $0x78] sm:$0xff] }
0x1efe   :  { %v7278_v56 = vcombine.low %v7270_v47, %v7277_v8 }
0x1f00   :  { %v7285_v25 = vrot.slane %v7278_v56, %v18362_v6 }
0x1f02   :  { %v7287_v54 = vadd.f32 %v7285_v25, %v19067_v60  ;;  %v7725_v25 = vld [vmem:[%s21024_s10 + $0x40] sm:$0xff] }
0x1f04   :  { %v11419_v13 = vmul.f32 -1.442695, %v7287_v54  ;;  %v7295_v43 = vrot.slane %v7287_v54, 3  ;;  %v7729_v54 = vld [vmem:[%s21024_s10 + $0x60] sm:$0xff] }
0x1f06   :  { %15445 = vpow2.f32 %v11419_v13 }
0x1f10   :  { %v15446_v10 = vpop.eup %15445 }
0x1f11   :  { %v7291_v16 = vadd.f32 1.0, %v15446_v10 }
0x1f13   :  { %15447 = vrcp.f32 %v7291_v16  ;;  %v13853_v16 = vpack.c.bf16 %v7732_v22, %v7728_v41 }
0x1f14   :  { %15449 = vtanh.f32 %v7295_v43  ;;  %v7727_v43 = vld [vmem:[%s21024_s10 + $0x50] sm:$0xff] }
0x1f1d   :  { %v15448_v61 = vpop.eup %15447 }
0x1f1e   :  { %v7299_v35 = vrot.slane %v15448_v61, 1  ;;  %v15450_v18 = vpop.eup %15449  ;;  %v7305_v19 = vrot.slane %v15448_v61, 2 }
0x1f1f   :  { %v7302_v44 = vmul.f32 %v15450_v18, %v15448_v61  ;;  %v7731_v61 = vld [vmem:[%s21024_s10 + $0x70] sm:$0xff]  ;;  %v7738_v18 = vld [vmem:[%s21024_s10 + $0xa8] sm:$0xff] }
0x1f20   :  { %v7301_v49 = vmul.f32 %v7299_v35, %v19218_v24  ;;  %v7734_v35 = vld [vmem:[%s21024_s10 + $0x88] sm:$0xff] }
0x1f22   :  { %v19266_v7 = vadd.f32 %v7302_v44, %v7301_v49  ;;  %v7736_v44 = vld [vmem:[%s21024_s10 + $0x98] sm:$0xff] }
0x1f23   :  { %v7740_v49 = vld [vmem:[%s21024_s10 + $0xb8] sm:$0xff] }
0x1f24   :  { %15451 = vtanh.f32 %v19266_v7 }
0x1f2e   :  { %v15452_v4 = vpop.eup %15451 }
0x1f2f   :  { %v7307_v60 = vmul.f32 %v15452_v4, %v7305_v19  ;;  %v13823_v19 = vpack.c.bf16 %v7729_v54, %v7725_v25  ;;  %v13855_v4 = vpack.c.bf16 %v7731_v61, %v7727_v43  ;;  %v7759_v25 = vld [vmem:[%s21024_s10 + $0x150] sm:$0xff]  ;;  %v7772_v43 = vld [vmem:[%s21024_s10 + $0x1b8] sm:$0xff] }
0x1f30   :  { %v7763_v54 = vld [vmem:[%s21024_s10 + $0x170] sm:$0xff] }
0x1f31   :  { %7380 = vmatmul.mubr.f32.vlgmr.msra.gmra.mrb[62].mxu0 %v7307_v60  ;;  %7451 = vmatmul.mubr.f32.vlgmr.msra.gmra.mrb[62].mxu1 %v7307_v60  ;;  %v7312_v28 = vrot.slane %v7307_v60, %v16373_v31  ;;  %v7733_v60 = vld [vmem:[%s21024_s10 + $0x80] sm:$0xff] }
0x1f32   :  { %13756 = vmatpush1.bf16.msra.mxu0 %v18699_v27  ;;  %13788 = vmatpush1.bf16.msra.mxu1 %v18708_v21  ;;  %v7718_v27 = vld [vmem:[%s21024_s10 + $0x8] sm:$0xff] }
0x1f33   :  { %13758 = vmatprep.subr.bf16.mxu0 %v18722_v48  ;;  %13790 = vmatprep.subr.bf16.mxu1 %v18733_v63  ;;  %v19277_v24 = vsel %vm5646_vm5, %v7312_v28, %v19229_v23  ;;  %v7722_v21 = vld [vmem:[%s21024_s10 + $0x28] sm:$0xff]  ;;  %v7720_v48 = vld [vmem:[%s21024_s10 + $0x18] sm:$0xff]  ;;  %v7737_v28 = vld [vmem:[%s21024_s10 + $0xa0] sm:$0xff] }
0x1f34   :  { %7578 = vmatprep.mubr.f32.mxu0 %v21030_v3  ;;  %7649 = vmatprep.mubr.f32.mxu1 %v21030_v3  ;;  %v13817_v63 = vpack.c.bf16 %v7722_v21, %v7718_v27  ;;  %v7726_v23 = vld [vmem:[%s21024_s10 + $0x48] sm:$0xff]  ;;  %v13825_v27 = vpack.c.bf16 %v7738_v18, %v7734_v35  ;;  %v13857_v21 = vpack.c.bf16 %v7740_v49, %v7736_v44  ;;  %v7765_v18 = vld [vmem:[%s21024_s10 + $0x180] sm:$0xff] }
0x1f35   :  { %v13821_v10 = vpack.c.bf16 %v7730_v57, %v7726_v23  ;;  %v7760_v23 = vld [vmem:[%s21024_s10 + $0x158] sm:$0xff]  ;;  %v13871_v35 = vpack.c.bf16 %v7763_v54, %v7759_v25  ;;  %v7769_v44 = vld [vmem:[%s21024_s10 + $0x1a0] sm:$0xff] }
0x1f36   :  { %13760 = vmatpush1.bf16.msra.mxu0 %v18735_v51  ;;  %13792 = vmatpush1.bf16.msra.mxu1 %v18744_v36  ;;  %v7724_v51 = vld [vmem:[%s21024_s10 + $0x38] sm:$0xff] }
0x1f37   :  { %13762 = vmatprep.subr.bf16.mxu0 %v18758_v29  ;;  %13794 = vmatprep.subr.bf16.mxu1 %v18769_v62  ;;  %v13849_v36 = vpack.c.bf16 %v7724_v51, %v7720_v48  ;;  %v7735_v48 = vld [vmem:[%s21024_s10 + $0x90] sm:$0xff]  ;;  %v7742_v51 = vld [vmem:[%s21024_s10 + $0xc8] sm:$0xff]  ;;  %v7764_v57 = vld [vmem:[%s21024_s10 + $0x178] sm:$0xff] }
0x1f38   :  { %v7994_v25 = vld [vmem:[%s21025_s11 + $0xb8] sm:$0xff] }
0x1f3a   :  { %13764 = vmatpush1.bf16.msra.mxu0 %v18771_v53  ;;  %13796 = vmatpush1.bf16.msra.mxu1 %v18780_v11 }
0x1f3b   :  { %13766 = vmatprep.subr.bf16.mxu0 %v18794_v5  ;;  %13798 = vmatprep.subr.bf16.mxu1 %v18805_v17 }
0x1f3e   :  { %13768 = vmatpush1.bf16.msra.mxu0 %v18807_v33  ;;  %13800 = vmatpush1.bf16.msra.mxu1 %v18816_v32 }
0x1f3f   :  { %13770 = vmatprep.subr.bf16.mxu0 %v18829_v14  ;;  %13802 = vmatprep.subr.bf16.mxu1 %v18841_v12 }
0x1f42   :  { %13772 = vmatpush1.bf16.msra.mxu0 %v18843_v45  ;;  %13804 = vmatpush1.bf16.msra.mxu1 %v18855_v50 }
0x1f43   :  { %13774 = vmatprep.subr.bf16.mxu0 %v18867_v42  ;;  %13806 = vmatprep.subr.bf16.mxu1 %v18869_v52 }
0x1f46   :  { %13776 = vmatpush1.bf16.msra.mxu0 %v18881_v26  ;;  %13808 = vmatpush1.bf16.msra.mxu1 %v18894_v2 }
0x1f47   :  { %13778 = vmatprep.subr.bf16.mxu0 %v18896_v38  ;;  %13810 = vmatprep.subr.bf16.mxu1 %v18908_v20 }
0x1f4a   :  { %13780 = vmatpush1.bf16.msra.mxu0 %v18929_v39  ;;  %13812 = vmatpush1.bf16.msra.mxu1 %v18936_v59 }
0x1f4b   :  { %13782 = vmatprep.subr.bf16.mxu0 %v18938_v1  ;;  %13814 = vmatprep.subr.bf16.mxu1 %v18947_v0  ;;  %v7717_v0 = vld [vmem:[%s21024_s10] sm:$0xff] }
0x1f4e   :  { %13784 = vmatpush1.bf16.msra.mxu0 %v18956_v9  ;;  %13816 = vmatpush1.bf16.msra.mxu1 %v18960_v40  ;;  %v7721_v9 = vld [vmem:[%s21024_s10 + $0x20] sm:$0xff]  ;;  %v7719_v40 = vld [vmem:[%s21024_s10 + $0x10] sm:$0xff] }
0x1f4f   :  { %13818 = vmatprep.subr.bf16.mxu0 %v13817_v63  ;;  %13850 = vmatprep.subr.bf16.mxu1 %v13849_v36  ;;  %v13819_v8 = vpack.c.bf16 %v7721_v9, %v7717_v0  ;;  %v7739_v63 = vld [vmem:[%s21024_s10 + $0xb0] sm:$0xff] }
0x1f50   :  { %v7751_v0 = vld [vmem:[%s21024_s10 + $0x110] sm:$0xff] }
0x1f51   :  { %v7755_v9 = vld [vmem:[%s21024_s10 + $0x130] sm:$0xff] }
0x1f52   :  { %v13867_v22 = vpack.c.bf16 %v7755_v9, %v7751_v0  ;;  %v7986_v9 = vld [vmem:[%s21025_s11 + $0x78] sm:$0xff] }
0x2004   :  { %v7381_v29 = vpop.f32.mrb[62].mxu0  ;;  %v7452_v62 = vpop.f32.mrb[62].mxu1 }
0x2005   :  { %v7383_v53 = vpop.f32.mrb[63].mxu0  ;;  %v7454_v11 = vpop.f32.mrb[63].mxu1 }
0x2006   :  { %v7461_v5 = vcombine.low %v7381_v29, %v7383_v53  ;;  %v7462_v17 = vcombine.low %v7452_v62, %v7454_v11  ;;  %v7746_v29 = vld [vmem:[%s21024_s10 + $0xe8] sm:$0xff]  ;;  %v7744_v62 = vld [vmem:[%s21024_s10 + $0xd8] sm:$0xff]  ;;  %v13859_v11 = vpack.c.bf16 %v7739_v63, %v7735_v48  ;;  %v13843_v48 = vpack.c.bf16 %v7769_v44, %v7765_v18 }
0x2007   :  { %v7748_v53 = vld [vmem:[%s21024_s10 + $0xf8] sm:$0xff]  ;;  %v7996_v18 = vld [vmem:[%s21025_s11 + $0xc8] sm:$0xff] }
0x2008   :  { %v7469_v33 = vrot.slane %v7461_v5, %v18362_v6  ;;  %v7476_v32 = vrot.slane %v7462_v17, %v18362_v6  ;;  %v7741_v5 = vld [vmem:[%s21024_s10 + $0xc0] sm:$0xff]  ;;  %v8000_v44 = vld [vmem:[%s21025_s11 + $0xe8] sm:$0xff] }
0x2009   :  { %v7745_v17 = vld [vmem:[%s21024_s10 + $0xe0] sm:$0xff] }
0x200a   :  { %v7477_v14 = vcombine.low %v7469_v33, %v7476_v32  ;;  %v13829_v33 = vpack.c.bf16 %v7746_v29, %v7742_v51  ;;  %v13861_v32 = vpack.c.bf16 %v7748_v53, %v7744_v62  ;;  %v7773_v51 = vld [vmem:[%s21024_s10 + $0x1c0] sm:$0xff] }
0x200b   :  { %v7777_v53 = vld [vmem:[%s21024_s10 + $0x1e0] sm:$0xff] }
0x200c   :  { %v7484_v12 = vrot.slane %v7477_v14, %v18362_v6  ;;  %v7743_v14 = vld [vmem:[%s21024_s10 + $0xd0] sm:$0xff] }
0x200e   :  { %v7486_v45 = vadd.f32 %v7484_v12, %v19019_v58  ;;  %v7723_v58 = vld [vmem:[%s21024_s10 + $0x30] sm:$0xff] }
0x200f   :  { %v13851_v56 = vpack.c.bf16 %v7723_v58, %v7719_v40  ;;  %v7747_v12 = vld [vmem:[%s21024_s10 + $0xf0] sm:$0xff]  ;;  %v7758_v40 = vld [vmem:[%s21024_s10 + $0x148] sm:$0xff] }
0x2010   :  { %v11420_v50 = vmul.f32 -1.442695, %v7486_v45  ;;  %v7494_v26 = vrot.slane %v7486_v45, 3  ;;  %v7750_v45 = vld [vmem:[%s21024_s10 + $0x108] sm:$0xff] }
0x2011   :  { %v7762_v58 = vld [vmem:[%s21024_s10 + $0x168] sm:$0xff] }
0x2012   :  { %15453 = vpow2.f32 %v11420_v50  ;;  %v7754_v50 = vld [vmem:[%s21024_s10 + $0x128] sm:$0xff] }
0x201c   :  { %v15454_v42 = vpop.eup %15453 }
0x201d   :  { %v7490_v52 = vadd.f32 1.0, %v15454_v42  ;;  %v7752_v42 = vld [vmem:[%s21024_s10 + $0x118] sm:$0xff] }
0x201f   :  { %15455 = vrcp.f32 %v7490_v52  ;;  %v7756_v52 = vld [vmem:[%s21024_s10 + $0x138] sm:$0xff] }
0x2020   :  { %15457 = vtanh.f32 %v7494_v26  ;;  %v13831_v26 = vpack.c.bf16 %v7745_v17, %v7741_v5  ;;  %v13847_v5 = vpack.c.bf16 %v7777_v53, %v7773_v51  ;;  %v8004_v51 = vld [vmem:[%s21025_s11 + $0x108] sm:$0xff] }
0x2029   :  { %v15456_v2 = vpop.eup %15455 }
0x202a   :  { %v7498_v38 = vrot.slane %v15456_v2, 1  ;;  %v15458_v20 = vpop.eup %15457  ;;  %v7504_v15 = vrot.slane %v15456_v2, 2 }
0x202b   :  { %v7501_v39 = vmul.f32 %v15458_v20, %v15456_v2  ;;  %v13863_v2 = vpack.c.bf16 %v7747_v12, %v7743_v14  ;;  %v7753_v20 = vld [vmem:[%s21024_s10 + $0x120] sm:$0xff]  ;;  %v7974_v14 = vld [vmem:[%s21025_s11 + $0x18] sm:$0xff] }
0x202c   :  { %v7500_v59 = vmul.f32 %v7498_v38, %v19266_v7  ;;  %v7749_v38 = vld [vmem:[%s21024_s10 + $0x100] sm:$0xff] }
0x202d   :  { %v13835_v41 = vpack.c.bf16 %v7753_v20, %v7749_v38  ;;  %v7980_v20 = vld [vmem:[%s21025_s11 + $0x48] sm:$0xff] }
0x202e   :  { %v19324_v1 = vadd.f32 %v7501_v39, %v7500_v59  ;;  %v13833_v39 = vpack.c.bf16 %v7754_v50, %v7750_v45  ;;  %v13865_v59 = vpack.c.bf16 %v7756_v52, %v7752_v42  ;;  %v7971_v45 = vld [vmem:[%s21025_s11] sm:$0xff] }
0x202f   :  { %v7975_v50 = vld [vmem:[%s21025_s11 + $0x20] sm:$0xff] }
0x2030   :  { %15459 = vtanh.f32 %v19324_v1  ;;  %v19541_v52 = vpack.c.bf16 %v7975_v50, %v7971_v45  ;;  %v8016_v45 = vld [vmem:[%s21025_s11 + $0x168] sm:$0xff]  ;;  %v8014_v50 = vld [vmem:[%s21025_s11 + $0x158] sm:$0xff] }
0x203a   :  { %v15460_v47 = vpop.eup %15459 }
0x203b   :  { %v7506_v13 = vmul.f32 %v15460_v47, %v7504_v15  ;;  %v7757_v15 = vld [vmem:[%s21024_s10 + $0x140] sm:$0xff] }
0x203c   :  { %v7761_v47 = vld [vmem:[%s21024_s10 + $0x160] sm:$0xff] }
0x203d   :  { %7579 = vmatmul.mubr.f32.vlgmr.msra.gmra.mrb[64].mxu0 %v7506_v13  ;;  %7650 = vmatmul.mubr.f32.vlgmr.msra.gmra.mrb[64].mxu1 %v7506_v13  ;;  %v7511_v7 = vrot.slane %v7506_v13, %v16373_v31  ;;  %v7766_v13 = vld [vmem:[%s21024_s10 + $0x188] sm:$0xff]  ;;  %v13839_v61 = vpack.c.bf16 %v7761_v47, %v7757_v15 }
0x203e   :  { %13820 = vmatpush1.bf16.msra.mxu0 %v13819_v8  ;;  %13852 = vmatpush1.bf16.msra.mxu1 %v13851_v56  ;;  %v13837_v8 = vpack.c.bf16 %v7762_v58, %v7758_v40  ;;  %v13869_v56 = vpack.c.bf16 %v7764_v57, %v7760_v23  ;;  %v7979_v40 = vld [vmem:[%s21025_s11 + $0x40] sm:$0xff]  ;;  %v7988_v15 = vld [vmem:[%s21025_s11 + $0x88] sm:$0xff] }
0x203f   :  { %13822 = vmatprep.subr.bf16.mxu0 %v13821_v10  ;;  %13854 = vmatprep.subr.bf16.mxu1 %v13853_v16  ;;  %v19394_v36 = vsel %vm5846_vm6, %v7511_v7, %v19277_v24  ;;  %v13827_v24 = vpack.c.bf16 %v7737_v28, %v7733_v60  ;;  %v7770_v10 = vld [vmem:[%s21024_s10 + $0x1a8] sm:$0xff]  ;;  %v7768_v16 = vld [vmem:[%s21024_s10 + $0x198] sm:$0xff]  ;;  %v7983_v58 = vld [vmem:[%s21025_s11 + $0x60] sm:$0xff] }
0x2040   :  { %7867 = vmatprep.mubr.f32.mxu0 %v21030_v3  ;;  %7944 = vmatprep.mubr.f32.mxu1 %v21030_v3  ;;  %v13841_v49 = vpack.c.bf16 %v7770_v10, %v7766_v13  ;;  %v13873_v7 = vpack.c.bf16 %v7772_v43, %v7768_v16  ;;  %v7774_v60 = vld [vmem:[%s21024_s10 + $0x1c8] sm:$0xff]  ;;  %v19577_v57 = vpack.c.bf16 %v7983_v58, %v7979_v40  ;;  %v7987_v10 = vld [vmem:[%s21025_s11 + $0x80] sm:$0xff]  ;;  %v7989_v43 = vld [vmem:[%s21025_s11 + $0x90] sm:$0xff] }
0x2041   :  { %v7778_v28 = vld [vmem:[%s21024_s10 + $0x1e8] sm:$0xff]  ;;  %v7991_v16 = vld [vmem:[%s21025_s11 + $0xa0] sm:$0xff]  ;;  %v8013_v40 = vld [vmem:[%s21025_s11 + $0x150] sm:$0xff] }
0x2042   :  { %13824 = vmatpush1.bf16.msra.mxu0 %v13823_v19  ;;  %13856 = vmatpush1.bf16.msra.mxu1 %v13855_v4  ;;  %v7767_v19 = vld [vmem:[%s21024_s10 + $0x190] sm:$0xff]  ;;  %v13845_v29 = vpack.c.bf16 %v7778_v28, %v7774_v60  ;;  %v7995_v60 = vld [vmem:[%s21025_s11 + $0xc0] sm:$0xff] }
0x2043   :  { %13826 = vmatprep.subr.bf16.mxu0 %v13825_v27  ;;  %13858 = vmatprep.subr.bf16.mxu1 %v13857_v21  ;;  %v7771_v4 = vld [vmem:[%s21024_s10 + $0x1b0] sm:$0xff]  ;;  %v7776_v27 = vld [vmem:[%s21024_s10 + $0x1d8] sm:$0xff] }
0x2044   :  { %v7780_v21 = vld [vmem:[%s21024_s10 + $0x1f8] sm:$0xff]  ;;  %v13875_v63 = vpack.c.bf16 %v7771_v4, %v7767_v19 }
0x2045   :  { %v13877_v62 = vpack.c.bf16 %v7780_v21, %v7776_v27  ;;  %v7998_v19 = vld [vmem:[%s21025_s11 + $0xd8] sm:$0xff]  ;;  %v7999_v27 = vld [vmem:[%s21025_s11 + $0xe0] sm:$0xff]  ;;  %v7997_v21 = vld [vmem:[%s21025_s11 + $0xd0] sm:$0xff] }
0x2046   :  { %13828 = vmatpush1.bf16.msra.mxu0 %v13827_v24  ;;  %13860 = vmatpush1.bf16.msra.mxu1 %v13859_v11  ;;  %v7775_v24 = vld [vmem:[%s21024_s10 + $0x1d0] sm:$0xff]  ;;  %v8002_v4 = vld [vmem:[%s21025_s11 + $0xf8] sm:$0xff] }
0x2047   :  { %13830 = vmatprep.subr.bf16.mxu0 %v13829_v33  ;;  %13862 = vmatprep.subr.bf16.mxu1 %v13861_v32  ;;  %v7779_v11 = vld [vmem:[%s21024_s10 + $0x1f0] sm:$0xff]  ;;  %v7972_v33 = vld [vmem:[%s21025_s11 + $0x8] sm:$0xff]  ;;  %v19642_v28 = vpack.c.bf16 %v8002_v4, %v7998_v19 }
0x2048   :  { %v13879_v17 = vpack.c.bf16 %v7779_v11, %v7775_v24  ;;  %v7976_v32 = vld [vmem:[%s21025_s11 + $0x28] sm:$0xff]  ;;  %v8010_v11 = vld [vmem:[%s21025_s11 + $0x138] sm:$0xff]  ;;  %v8025_v19 = vld [vmem:[%s21025_s11 + $0x1b0] sm:$0xff] }
0x2049   :  { %v19528_v12 = vpack.c.bf16 %v7976_v32, %v7972_v33  ;;  %v8005_v32 = vld [vmem:[%s21025_s11 + $0x110] sm:$0xff] }
0x204a   :  { %13832 = vmatpush1.bf16.msra.mxu0 %v13831_v26  ;;  %13864 = vmatpush1.bf16.msra.mxu1 %v13863_v2  ;;  %v7973_v26 = vld [vmem:[%s21025_s11 + $0x10] sm:$0xff] }
0x204b   :  { %13834 = vmatprep.subr.bf16.mxu0 %v13833_v39  ;;  %13866 = vmatprep.subr.bf16.mxu1 %v13865_v59  ;;  %v7977_v2 = vld [vmem:[%s21025_s11 + $0x30] sm:$0xff]  ;;  %v7984_v39 = vld [vmem:[%s21025_s11 + $0x68] sm:$0xff]  ;;  %v7982_v59 = vld [vmem:[%s21025_s11 + $0x58] sm:$0xff] }
0x204c   :  { %v19550_v38 = vpack.c.bf16 %v7977_v2, %v7973_v26  ;;  %v19564_v0 = vpack.c.bf16 %v7984_v39, %v7980_v20  ;;  %v19575_v23 = vpack.c.bf16 %v7986_v9, %v7982_v59  ;;  %v8018_v26 = vld [vmem:[%s21025_s11 + $0x178] sm:$0xff]  ;;  %v8011_v59 = vld [vmem:[%s21025_s11 + $0x140] sm:$0xff] }
0x204d   :  { %v8015_v9 = vld [vmem:[%s21025_s11 + $0x160] sm:$0xff]  ;;  %v19720_v58 = vpack.c.bf16 %v8018_v26, %v8014_v50 }
0x204e   :  { %13836 = vmatpush1.bf16.msra.mxu0 %v13835_v41  ;;  %13868 = vmatpush1.bf16.msra.mxu1 %v13867_v22  ;;  %v7981_v41 = vld [vmem:[%s21025_s11 + $0x50] sm:$0xff] }
0x204f   :  { %13838 = vmatprep.subr.bf16.mxu0 %v13837_v8  ;;  %13870 = vmatprep.subr.bf16.mxu1 %v13869_v56  ;;  %v7985_v22 = vld [vmem:[%s21025_s11 + $0x70] sm:$0xff]  ;;  %v7992_v8 = vld [vmem:[%s21025_s11 + $0xa8] sm:$0xff]  ;;  %v7990_v56 = vld [vmem:[%s21025_s11 + $0x98] sm:$0xff] }
0x2050   :  { %v19589_v47 = vpack.c.bf16 %v7985_v22, %v7981_v41  ;;  %v19602_v54 = vpack.c.bf16 %v7992_v8, %v7988_v15  ;;  %v19604_v13 = vpack.c.bf16 %v7994_v25, %v7990_v56  ;;  %v8017_v41 = vld [vmem:[%s21025_s11 + $0x170] sm:$0xff]  ;;  %v8020_v22 = vld [vmem:[%s21025_s11 + $0x188] sm:$0xff]  ;;  %v8022_v8 = vld [vmem:[%s21025_s11 + $0x198] sm:$0xff]  ;;  %v19738_v25 = vpack.c.bf16 %v8015_v9, %v8011_v59 }
0x2051   :  { %v8024_v15 = vld [vmem:[%s21025_s11 + $0x1a8] sm:$0xff]  ;;  %v8026_v56 = vld [vmem:[%s21025_s11 + $0x1b8] sm:$0xff] }
0x2052   :  { %13840 = vmatpush1.bf16.msra.mxu0 %v13839_v61  ;;  %13872 = vmatpush1.bf16.msra.mxu1 %v13871_v35  ;;  %v19616_v61 = vpack.c.bf16 %v7991_v16, %v7987_v10  ;;  %v7993_v35 = vld [vmem:[%s21025_s11 + $0xb0] sm:$0xff]  ;;  %v19742_v10 = vpack.c.bf16 %v8017_v41, %v8013_v40  ;;  %v19744_v16 = vpack.c.bf16 %v8024_v15, %v8020_v22 }
0x2053   :  { %13842 = vmatprep.subr.bf16.mxu0 %v13841_v49  ;;  %13874 = vmatprep.subr.bf16.mxu1 %v13873_v7  ;;  %v19629_v49 = vpack.c.bf16 %v7993_v35, %v7989_v43  ;;  %v19631_v7 = vpack.c.bf16 %v8000_v44, %v7996_v18  ;;  %v8019_v43 = vld [vmem:[%s21025_s11 + $0x180] sm:$0xff]  ;;  %v19753_v18 = vpack.c.bf16 %v8026_v56, %v8022_v8  ;;  %v8021_v44 = vld [vmem:[%s21025_s11 + $0x190] sm:$0xff] }
0x2054   :  { %v8023_v35 = vld [vmem:[%s21025_s11 + $0x1a0] sm:$0xff] }
0x2055   :  { %v19762_v4 = vpack.c.bf16 %v8023_v35, %v8019_v43  ;;  %v15725_v56 = vld [vmem:[#allocation4 + $0x1] ss:$8 sm:$0xf] }
0x2056   :  { %13844 = vmatpush1.bf16.msra.mxu0 %v13843_v48  ;;  %13876 = vmatpush1.bf16.msra.mxu1 %v13875_v63  ;;  %v8001_v48 = vld [vmem:[%s21025_s11 + $0xf0] sm:$0xff]  ;;  %v19654_v63 = vpack.c.bf16 %v7999_v27, %v7995_v60  ;;  %v19766_v60 = vpack.c.bf16 %v8025_v19, %v8021_v44  ;;  %v8028_v27 = vld [vmem:[%s21025_s11 + $0x1c8] sm:$0xff] }
0x2057   :  { %13846 = vmatprep.subr.bf16.mxu0 %v13845_v29  ;;  %13878 = vmatprep.subr.bf16.mxu1 %v13877_v62  ;;  %v8008_v29 = vld [vmem:[%s21025_s11 + $0x128] sm:$0xff]  ;;  %v8006_v62 = vld [vmem:[%s21025_s11 + $0x118] sm:$0xff]  ;;  %v19667_v53 = vpack.c.bf16 %v8001_v48, %v7997_v21 }
0x2058   :  { %v19669_v24 = vpack.c.bf16 %v8008_v29, %v8004_v51  ;;  %v19681_v33 = vpack.c.bf16 %v8010_v11, %v8006_v62  ;;  %v8032_v21 = vld [vmem:[%s21025_s11 + $0x1e8] sm:$0xff]  ;;  %v8030_v48 = vld [vmem:[%s21025_s11 + $0x1d8] sm:$0xff]  ;;  %v8027_v62 = vld [vmem:[%s21025_s11 + $0x1c0] sm:$0xff] }
0x2059   :  { %v19780_v51 = vpack.c.bf16 %v8032_v21, %v8028_v27  ;;  %v8034_v29 = vld [vmem:[%s21025_s11 + $0x1f8] sm:$0xff]  ;;  %v8031_v11 = vld [vmem:[%s21025_s11 + $0x1e0] sm:$0xff] }
0x205a   :  { %13848 = vmatpush1.bf16.msra.mxu0 %v13847_v5  ;;  %13880 = vmatpush1.bf16.msra.mxu1 %v13879_v17  ;;  %v8003_v5 = vld [vmem:[%s21025_s11 + $0x100] sm:$0xff] }
0x205b   :  { %13882 = vmatprep.subr.bf16.mxu0 %v19528_v12  ;;  %v8007_v17 = vld [vmem:[%s21025_s11 + $0x120] sm:$0xff] }
0x205c   :  { %v19702_v2 = vpack.c.bf16 %v8007_v17, %v8003_v5  ;;  %v19791_v5 = vpack.c.bf16 %v8034_v29, %v8030_v48  ;;  %v19793_v17 = vpack.c.bf16 %v8031_v11, %v8027_v62 }
0x205d   :  { %7868 = vmatmul.mubr.f32.vlgmr.msra.gmra.mrb[66].mxu0 %v18984_v46  ;;  %7945 = vmatmul.mubr.f32.vlgmr.msra.gmra.mrb[66].mxu1 %v18984_v46  ;;  %v7978_v46 = vld [vmem:[%s21025_s11 + $0x38] sm:$0xff] }
0x205e   :  { %7873 = vmatprep.mubr.f32.mxu0 %v21030_v3  ;;  %7950 = vmatprep.mubr.f32.mxu1 %v21030_v3  ;;  %v19539_v42 = vpack.c.bf16 %v7978_v46, %v7974_v14  ;;  %v8009_v14 = vld [vmem:[%s21025_s11 + $0x130] sm:$0xff]  ;;  %v8012_v46 = vld [vmem:[%s21025_s11 + $0x148] sm:$0xff] }
0x205f   :  { %13884 = vmatpush1.bf16.msra.mxu0 %v19541_v52  ;;  %v19706_v20 = vpack.c.bf16 %v8009_v14, %v8005_v32  ;;  %v19708_v39 = vpack.c.bf16 %v8016_v45, %v8012_v46  ;;  %v8029_v32 = vld [vmem:[%s21025_s11 + $0x1d0] sm:$0xff] }
0x2060   :  { %13914 = vmatprep.subr.bf16.mxu1 %v19539_v42  ;;  %13886 = vmatprep.subr.bf16.mxu0 %v19564_v0  ;;  %v8033_v14 = vld [vmem:[%s21025_s11 + $0x1f0] sm:$0xff] }
0x2061   :  { %13916 = vmatpush1.bf16.msra.mxu1 %v19550_v38  ;;  %v19802_v46 = vpack.c.bf16 %v8033_v14, %v8029_v32 }
0x2062   :  { %13918 = vmatprep.subr.bf16.mxu1 %v19575_v23 }
0x2063   :  { %13888 = vmatpush1.bf16.msra.mxu0 %v19577_v57 }
0x2064   :  { %13890 = vmatprep.subr.bf16.mxu0 %v19602_v54 }
0x2065   :  { %13920 = vmatpush1.bf16.msra.mxu1 %v19589_v47 }
0x2066   :  { %13922 = vmatprep.subr.bf16.mxu1 %v19604_v13 }
0x2067   :  { %13892 = vmatpush1.bf16.msra.mxu0 %v19616_v61 }
0x2068   :  { %13894 = vmatprep.subr.bf16.mxu0 %v19631_v7 }
0x2069   :  { %13924 = vmatpush1.bf16.msra.mxu1 %v19629_v49 }
0x206a   :  { %13926 = vmatprep.subr.bf16.mxu1 %v19642_v28 }
0x206b   :  { %13896 = vmatpush1.bf16.msra.mxu0 %v19654_v63 }
0x206c   :  { %13898 = vmatprep.subr.bf16.mxu0 %v19669_v24 }
0x206d   :  { %13928 = vmatpush1.bf16.msra.mxu1 %v19667_v53 }
0x206e   :  { %13930 = vmatprep.subr.bf16.mxu1 %v19681_v33 }
0x206f   :  { %13900 = vmatpush1.bf16.msra.mxu0 %v19702_v2 }
0x2070   :  { %13902 = vmatprep.subr.bf16.mxu0 %v19708_v39 }
0x2071   :  { %13932 = vmatpush1.bf16.msra.mxu1 %v19706_v20 }
0x2072   :  { %13934 = vmatprep.subr.bf16.mxu1 %v19720_v58 }
0x2073   :  { %13904 = vmatpush1.bf16.msra.mxu0 %v19738_v25 }
0x2074   :  { %13906 = vmatprep.subr.bf16.mxu0 %v19744_v16 }
0x2075   :  { %13936 = vmatpush1.bf16.msra.mxu1 %v19742_v10 }
0x2076   :  { %13938 = vmatprep.subr.bf16.mxu1 %v19753_v18 }
0x2077   :  { %13908 = vmatpush1.bf16.msra.mxu0 %v19762_v4 }
0x2078   :  { %13910 = vmatprep.subr.bf16.mxu0 %v19780_v51 }
0x2079   :  { %13940 = vmatpush1.bf16.msra.mxu1 %v19766_v60 }
0x207a   :  { %13942 = vmatprep.subr.bf16.mxu1 %v19791_v5 }
0x207b   :  { %13912 = vmatpush1.bf16.msra.mxu0 %v19793_v17 }
0x207c   :  { %13946 = vmatprep.subr.bf16.mxu0 %v19528_v12 }
0x207d   :  { %13944 = vmatpush1.bf16.msra.mxu1 %v19802_v46 }
0x207e   :  { %13978 = vmatprep.subr.bf16.mxu1 %v19539_v42 }
0x2110   :  { %v7580_v45 = vpop.f32.mrb[64].mxu0  ;;  %v7651_v50 = vpop.f32.mrb[64].mxu1 }
0x2111   :  { %v7582_v26 = vpop.f32.mrb[65].mxu0  ;;  %v7653_v59 = vpop.f32.mrb[65].mxu1 }
0x2112   :  { %v7660_v9 = vcombine.low %v7580_v45, %v7582_v26  ;;  %v7661_v40 = vcombine.low %v7651_v50, %v7653_v59 }
0x2114   :  { %v7668_v41 = vrot.slane %v7660_v9, %v18362_v6  ;;  %v7675_v22 = vrot.slane %v7661_v40, %v18362_v6 }
0x2116   :  { %v7676_v15 = vcombine.low %v7668_v41, %v7675_v22 }
0x2118   :  { %v7683_v8 = vrot.slane %v7676_v15, %v18362_v6 }
0x211a   :  { %v7685_v43 = vadd.f32 %v15725_v56, %v7683_v8 }
0x211c   :  { %v11421_v35 = vmul.f32 -1.442695, %v7685_v43  ;;  %v7693_v27 = vrot.slane %v7685_v43, 3 }
0x211e   :  { %15461 = vpow2.f32 %v11421_v35 }
0x2128   :  { %v15462_v44 = vpop.eup %15461 }
0x2129   :  { %v7689_v19 = vadd.f32 1.0, %v15462_v44 }
0x212b   :  { %15463 = vrcp.f32 %v7689_v19 }
0x212c   :  { %15465 = vtanh.f32 %v7693_v27 }
0x2130   :  { %v19812_v21 = vpop.f32.mrb[66].mxu0  ;;  %v19814_v48 = vpop.f32.mrb[66].mxu1 }
0x2131   :  { %v19816_v29 = vpop.f32.mrb[67].mxu0  ;;  %v19818_v62 = vpop.f32.mrb[67].mxu1 }
0x2135   :  { %v15464_v11 = vpop.eup %15463 }
0x2136   :  { %v7697_v32 = vrot.slane %v15464_v11, 1  ;;  %v15466_v6 = vpop.eup %15465  ;;  %v7703_v26 = vrot.slane %v15464_v11, 2 }
0x2137   :  { %v7700_v45 = vmul.f32 %v15466_v6, %v15464_v11 }
0x2138   :  { %v7699_v14 = vmul.f32 %v7697_v32, %v19324_v1  ;;  %v7781_v1 = vld [vmem:[%s21026_s12] sm:$0xf] }
0x2139   :  { %v19870_v22 = vrot.slane %v7781_v1, %v16379_v34 }
0x213a   :  { %v7701_v50 = vadd.f32 %v7700_v45, %v7699_v14  ;;  %v19891_v45 = vrot.slane %v7781_v1, %v16388_v37 }
0x213b   :  { %v19886_v44 = vadd.f32 %v19816_v29, %v19870_v22 }
0x213c   :  { %15467 = vtanh.f32 %v7701_v50  ;;  %21039 = vst [vmem:[#allocation10_spill] sm:$0xff] %v19891_v45  ;;  %v19898_v29 = vadd.f32 %v19814_v48, %v19891_v45 }
0x2146   :  { %v15468_v59 = vpop.eup %15467 }
0x2147   :  { %v7705_v9 = vmul.f32 %v15468_v59, %v7703_v26 }
0x2149   :  { %v7710_v40 = vrot.slane %v7705_v9, %v16373_v31 }
0x214b   :  { %v7712_v41 = vsel %vm6046_vm7, %v7710_v40, %v19394_v36  ;;  %v19867_v36 = vrot.slane %v7781_v1, %v16373_v31 }
0x214c   :  { %7874 = vmatmul.mubr.f32.gmra.mrb[68].mxu0 %v7712_v41  ;;  %7951 = vmatmul.mubr.f32.gmra.mrb[68].mxu1 %v7712_v41 }
0x214d   :  { %8099 = vmatprep.mubr.f32.mxu0 %v21030_v3  ;;  %8170 = vmatprep.mubr.f32.mxu1 %v21030_v3  ;;  %v19882_v35 = vadd.f32 %v19812_v21, %v19867_v36  ;;  %v19894_v21 = vrot.slane %v7781_v1, %v16396_v55 }
0x214f   :  { %21040 = vst [vmem:[#allocation11_spill] sm:$0xff] %v19894_v21  ;;  %v19903_v9 = vadd.f32 %v19818_v62, %v19894_v21 }
0x2150   :  { %8100 = vmatmul.mubr.f32.vlgmr.msra.gmra.mrb[70].mxu0 %v21030_v3  ;;  %8171 = vmatmul.mubr.f32.vlgmr.msra.gmra.mrb[70].mxu1 %v21030_v3 }
0x2151   :  { %13948 = vmatpush1.bf16.msra.mxu0 %v19541_v52  ;;  %13980 = vmatpush1.bf16.msra.mxu1 %v19550_v38 }
0x2152   :  { %13950 = vmatprep.subr.bf16.mxu0 %v19564_v0  ;;  %13982 = vmatprep.subr.bf16.mxu1 %v19575_v23 }
0x2153   :  { %8274 = vmatprep.mubr.f32.mxu0 %v21030_v3  ;;  %8345 = vmatprep.mubr.f32.mxu1 %v21030_v3 }
0x2155   :  { %13952 = vmatpush1.bf16.msra.mxu0 %v19577_v57  ;;  %13984 = vmatpush1.bf16.msra.mxu1 %v19589_v47 }
0x2156   :  { %13954 = vmatprep.subr.bf16.mxu0 %v19602_v54  ;;  %13986 = vmatprep.subr.bf16.mxu1 %v19604_v13 }
0x2159   :  { %13956 = vmatpush1.bf16.msra.mxu0 %v19616_v61  ;;  %13988 = vmatpush1.bf16.msra.mxu1 %v19629_v49 }
0x215a   :  { %13958 = vmatprep.subr.bf16.mxu0 %v19631_v7  ;;  %13990 = vmatprep.subr.bf16.mxu1 %v19642_v28 }
0x215d   :  { %13960 = vmatpush1.bf16.msra.mxu0 %v19654_v63  ;;  %13992 = vmatpush1.bf16.msra.mxu1 %v19667_v53 }
0x215e   :  { %13962 = vmatprep.subr.bf16.mxu0 %v19669_v24  ;;  %13994 = vmatprep.subr.bf16.mxu1 %v19681_v33 }
0x2161   :  { %13964 = vmatpush1.bf16.msra.mxu0 %v19702_v2  ;;  %13996 = vmatpush1.bf16.msra.mxu1 %v19706_v20 }
0x2162   :  { %13966 = vmatprep.subr.bf16.mxu0 %v19708_v39  ;;  %13998 = vmatprep.subr.bf16.mxu1 %v19720_v58 }
0x2165   :  { %13968 = vmatpush1.bf16.msra.mxu0 %v19738_v25  ;;  %14000 = vmatpush1.bf16.msra.mxu1 %v19742_v10 }
0x2166   :  { %13970 = vmatprep.subr.bf16.mxu0 %v19744_v16  ;;  %14002 = vmatprep.subr.bf16.mxu1 %v19753_v18 }
0x2169   :  { %13972 = vmatpush1.bf16.msra.mxu0 %v19762_v4  ;;  %14004 = vmatpush1.bf16.msra.mxu1 %v19766_v60 }
0x216a   :  { %13974 = vmatprep.subr.bf16.mxu0 %v19780_v51  ;;  %14006 = vmatprep.subr.bf16.mxu1 %v19791_v5 }
0x216d   :  { %13976 = vmatpush1.bf16.msra.mxu0 %v19793_v17  ;;  %14008 = vmatpush1.bf16.msra.mxu1 %v19802_v46 }
0x216e   :  { %14010 = vmatprep.subr.bf16.mxu0 %v19528_v12  ;;  %14042 = vmatprep.subr.bf16.mxu1 %v19539_v42 }
0x221f   :  { %v19872_v15 = vpop.f32.mrb[68].mxu0  ;;  %v19874_v8 = vpop.f32.mrb[68].mxu1 }
0x2220   :  { %21036 = vst [vmem:[#allocation7_spill] sm:$0xff] %v19872_v15  ;;  %21037 = vst [vmem:[#allocation8_spill] sm:$0xff] %v19874_v8  ;;  %v19876_v56 = vpop.f32.mrb[69].mxu0  ;;  %v19878_v43 = vpop.f32.mrb[69].mxu1 }
0x2221   :  { %21038 = vst [vmem:[#allocation9_spill] sm:$0xff] %v19878_v43 }
0x2223   :  { %v8101_v19 = vpop.f32.mrb[70].mxu0  ;;  %v8172_v27 = vpop.f32.mrb[70].mxu1 }
0x2224   :  { %v8177_v11 = vadd.f32 %v8101_v19, %v19882_v35  ;;  %v8103_v32 = vpop.f32.mrb[71].mxu0  ;;  %v8174_v6 = vpop.f32.mrb[71].mxu1  ;;  %v8179_v59 = vadd.f32 %v8172_v27, %v19898_v29 }
0x2225   :  { %v8178_v14 = vadd.f32 %v8103_v32, %v19886_v44  ;;  %v8180_v40 = vadd.f32 %v8174_v6, %v19903_v9 }
0x2226   :  { %v11422_v50 = vmul.f32 -1.442695, %v8177_v11  ;;  %v11424_v41 = vmul.f32 -1.442695, %v8179_v59 }
0x2227   :  { %v11423_v26 = vmul.f32 -1.442695, %v8178_v14 }
0x2228   :  { %15469 = vpow2.f32 %v11422_v50 }
0x2229   :  { %15471 = vpow2.f32 %v11423_v26 }
0x222a   :  { %15473 = vtanh.f32 %v8180_v40 }
0x222b   :  { %15475 = vpow2.f32 %v11424_v41 }
0x2232   :  { %v15470_v19 = vpop.eup %15469 }
0x2233   :  { %v8190_v11 = vadd.f32 1.0, %v15470_v19  ;;  %v15472_v32 = vpop.eup %15471 }
0x2234   :  { %v8191_v1 = vadd.f32 1.0, %v15472_v32  ;;  %v15474_v48 = vpop.eup %15473 }
0x2235   :  { %15477 = vrcp.f32 %v8190_v11  ;;  %v15476_v14 = vpop.eup %15475 }
0x2236   :  { %15479 = vrcp.f32 %v8191_v1  ;;  %v8192_v3 = vadd.f32 1.0, %v15476_v14 }
0x2238   :  { %15481 = vrcp.f32 %v8192_v3 }
0x223f   :  { %v15478_v50 = vpop.eup %15477 }
0x2240   :  { %v8201_v26 = vmul.f32 %v15478_v50, %v15474_v48  ;;  %v15480_v27 = vpop.eup %15479 }
0x2241   :  { %v8200_v43 = vmul.f32 0.0, %v15480_v27 }
0x2242   :  { %v15482_v6 = vpop.eup %15481 }
0x2243   :  { %v19906_v62 = vadd.f32 %v8201_v26, %v8200_v43  ;;  %v21041_v43 = vmov 0.0  }
0x2245   :  { %15483 = vtanh.f32 %v19906_v62 }
0x224f   :  { %v15484_v59 = vpop.eup %15483 }
0x2250   :  { %v19909_v40 = vmul.f32 %v15484_v59, %v15482_v6 }
0x2252   :  { %8275 = vmatmul.mubr.f32.vlgmr.msra.gmra.mrb[72].mxu0 %v19909_v40  ;;  %8346 = vmatmul.mubr.f32.vlgmr.msra.gmra.mrb[72].mxu1 %v19909_v40 }
0x2253   :  { %14012 = vmatpush1.bf16.msra.mxu0 %v19541_v52  ;;  %14044 = vmatpush1.bf16.msra.mxu1 %v19550_v38 }
0x2254   :  { %14014 = vmatprep.subr.bf16.mxu0 %v19564_v0  ;;  %14046 = vmatprep.subr.bf16.mxu1 %v19575_v23 }
0x2255   :  { %8467 = vmatprep.mubr.f32.mxu0 %v21041_v43  ;;  %8538 = vmatprep.mubr.f32.mxu1 %v21041_v43 }
0x2257   :  { %14016 = vmatpush1.bf16.msra.mxu0 %v19577_v57  ;;  %14048 = vmatpush1.bf16.msra.mxu1 %v19589_v47 }
0x2258   :  { %14018 = vmatprep.subr.bf16.mxu0 %v19602_v54  ;;  %14050 = vmatprep.subr.bf16.mxu1 %v19604_v13 }
0x225b   :  { %14020 = vmatpush1.bf16.msra.mxu0 %v19616_v61  ;;  %14052 = vmatpush1.bf16.msra.mxu1 %v19629_v49 }
0x225c   :  { %14022 = vmatprep.subr.bf16.mxu0 %v19631_v7  ;;  %14054 = vmatprep.subr.bf16.mxu1 %v19642_v28 }
0x225f   :  { %14024 = vmatpush1.bf16.msra.mxu0 %v19654_v63  ;;  %14056 = vmatpush1.bf16.msra.mxu1 %v19667_v53 }
0x2260   :  { %14026 = vmatprep.subr.bf16.mxu0 %v19669_v24  ;;  %14058 = vmatprep.subr.bf16.mxu1 %v19681_v33 }
0x2263   :  { %14028 = vmatpush1.bf16.msra.mxu0 %v19702_v2  ;;  %14060 = vmatpush1.bf16.msra.mxu1 %v19706_v20 }
0x2264   :  { %14030 = vmatprep.subr.bf16.mxu0 %v19708_v39  ;;  %14062 = vmatprep.subr.bf16.mxu1 %v19720_v58 }
0x2267   :  { %14032 = vmatpush1.bf16.msra.mxu0 %v19738_v25  ;;  %14064 = vmatpush1.bf16.msra.mxu1 %v19742_v10 }
0x2268   :  { %14034 = vmatprep.subr.bf16.mxu0 %v19744_v16  ;;  %14066 = vmatprep.subr.bf16.mxu1 %v19753_v18 }
0x226b   :  { %14036 = vmatpush1.bf16.msra.mxu0 %v19762_v4  ;;  %14068 = vmatpush1.bf16.msra.mxu1 %v19766_v60 }
0x226c   :  { %14038 = vmatprep.subr.bf16.mxu0 %v19780_v51  ;;  %14070 = vmatprep.subr.bf16.mxu1 %v19791_v5 }
0x226f   :  { %14040 = vmatpush1.bf16.msra.mxu0 %v19793_v17  ;;  %14072 = vmatpush1.bf16.msra.mxu1 %v19802_v46 }
0x2270   :  { %14074 = vmatprep.subr.bf16.mxu0 %v19528_v12  ;;  %14106 = vmatprep.subr.bf16.mxu1 %v19539_v42 }
0x2325   :  { %v8276_v3 = vpop.f32.mrb[72].mxu0  ;;  %v8347_v41 = vpop.f32.mrb[72].mxu1 }
0x2326   :  { %v8356_v19 = vrot.slane %v8276_v3, 7  ;;  %v8278_v11 = vpop.f32.mrb[73].mxu0  ;;  %v8349_v32 = vpop.f32.mrb[73].mxu1  ;;  %v8358_v27 = vrot.slane %v8347_v41, 7  ;;  %v8388_v41 = vrot.slane %v19906_v62, 7 }
0x2327   :  { %v8357_v1 = vrot.slane %v8278_v11, 7  ;;  %v8359_v6 = vrot.slane %v8349_v32, 7 }
0x2328   :  { %v8364_v48 = vadd.f32 %v8356_v19, %v19882_v35  ;;  %v8366_v59 = vadd.f32 %v8358_v27, %v19898_v29 }
0x2329   :  { %v8365_v14 = vadd.f32 %v8357_v1, %v19886_v44  ;;  %v8367_v21 = vadd.f32 %v8359_v6, %v19903_v9 }
0x232a   :  { %v11425_v50 = vmul.f32 -1.442695, %v8364_v48  ;;  %v11427_v8 = vmul.f32 -1.442695, %v8366_v59 }
0x232b   :  { %v11426_v26 = vmul.f32 -1.442695, %v8365_v14 }
0x232c   :  { %15485 = vpow2.f32 %v11425_v50 }
0x232d   :  { %15487 = vpow2.f32 %v11426_v26 }
0x232e   :  { %15489 = vtanh.f32 %v8367_v21 }
0x232f   :  { %15491 = vpow2.f32 %v11427_v8 }
0x2336   :  { %v15486_v45 = vpop.eup %15485 }
0x2337   :  { %v8377_v3 = vadd.f32 1.0, %v15486_v45  ;;  %v15488_v15 = vpop.eup %15487 }
0x2338   :  { %v8378_v19 = vadd.f32 1.0, %v15488_v15  ;;  %v15490_v11 = vpop.eup %15489  ;;  %v8208_v15 = vrot.slane %v19909_v40, %v16373_v31 }
0x2339   :  { %15493 = vrcp.f32 %v8377_v3  ;;  %v15492_v1 = vpop.eup %15491 }
0x233a   :  { %15495 = vrcp.f32 %v8378_v19  ;;  %v8379_v50 = vadd.f32 1.0, %v15492_v1  ;;  %v8209_v62 = vsel %vm4644_vm0, %v8208_v15, 0.0 }
0x233c   :  { %15497 = vrcp.f32 %v8379_v50 }
0x2343   :  { %v15494_v48 = vpop.eup %15493 }
0x2344   :  { %v8391_v14 = vmul.f32 %v15494_v48, %v15490_v11  ;;  %v15496_v32 = vpop.eup %15495 }
0x2345   :  { %v8390_v26 = vmul.f32 %v15496_v32, %v8388_v41 }
0x2346   :  { %v15498_v45 = vpop.eup %15497 }
0x2347   :  { %v19952_v27 = vadd.f32 %v8391_v14, %v8390_v26 }
0x2349   :  { %15499 = vtanh.f32 %v19952_v27 }
0x2353   :  { %v15500_v21 = vpop.eup %15499 }
0x2354   :  { %v8394_v8 = vmul.f32 %v15500_v21, %v15498_v45 }
0x2356   :  { %v8398_v6 = vrot.slane %v8394_v8, %v16379_v34  ;;  %v8401_v59 = vrot.slane %v8394_v8, 1 }
0x2358   :  { %v19962_v3 = vsel %vm4846_vm1, %v8398_v6, %v8209_v62  ;;  %8468 = vmatmul.mubr.f32.vlgmr.msra.gmra.mrb[74].mxu0 %v8401_v59  ;;  %8539 = vmatmul.mubr.f32.vlgmr.msra.gmra.mrb[74].mxu1 %v8401_v59 }
0x2359   :  { %14076 = vmatpush1.bf16.msra.mxu0 %v19541_v52  ;;  %14108 = vmatpush1.bf16.msra.mxu1 %v19550_v38 }
0x235a   :  { %14078 = vmatprep.subr.bf16.mxu0 %v19564_v0  ;;  %14110 = vmatprep.subr.bf16.mxu1 %v19575_v23 }
0x235b   :  { %8660 = vmatprep.mubr.f32.mxu0 %v21041_v43  ;;  %8731 = vmatprep.mubr.f32.mxu1 %v21041_v43 }
0x235d   :  { %14080 = vmatpush1.bf16.msra.mxu0 %v19577_v57  ;;  %14112 = vmatpush1.bf16.msra.mxu1 %v19589_v47 }
0x235e   :  { %14082 = vmatprep.subr.bf16.mxu0 %v19602_v54  ;;  %14114 = vmatprep.subr.bf16.mxu1 %v19604_v13 }
0x2361   :  { %14084 = vmatpush1.bf16.msra.mxu0 %v19616_v61  ;;  %14116 = vmatpush1.bf16.msra.mxu1 %v19629_v49 }
0x2362   :  { %14086 = vmatprep.subr.bf16.mxu0 %v19631_v7  ;;  %14118 = vmatprep.subr.bf16.mxu1 %v19642_v28 }
0x2365   :  { %14088 = vmatpush1.bf16.msra.mxu0 %v19654_v63  ;;  %14120 = vmatpush1.bf16.msra.mxu1 %v19667_v53 }
0x2366   :  { %14090 = vmatprep.subr.bf16.mxu0 %v19669_v24  ;;  %14122 = vmatprep.subr.bf16.mxu1 %v19681_v33 }
0x2369   :  { %14092 = vmatpush1.bf16.msra.mxu0 %v19702_v2  ;;  %14124 = vmatpush1.bf16.msra.mxu1 %v19706_v20 }
0x236a   :  { %14094 = vmatprep.subr.bf16.mxu0 %v19708_v39  ;;  %14126 = vmatprep.subr.bf16.mxu1 %v19720_v58 }
0x236d   :  { %14096 = vmatpush1.bf16.msra.mxu0 %v19738_v25  ;;  %14128 = vmatpush1.bf16.msra.mxu1 %v19742_v10 }
0x236e   :  { %14098 = vmatprep.subr.bf16.mxu0 %v19744_v16  ;;  %14130 = vmatprep.subr.bf16.mxu1 %v19753_v18 }
0x2371   :  { %14100 = vmatpush1.bf16.msra.mxu0 %v19762_v4  ;;  %14132 = vmatpush1.bf16.msra.mxu1 %v19766_v60 }
0x2372   :  { %14102 = vmatprep.subr.bf16.mxu0 %v19780_v51  ;;  %14134 = vmatprep.subr.bf16.mxu1 %v19791_v5 }
0x2375   :  { %14104 = vmatpush1.bf16.msra.mxu0 %v19793_v17  ;;  %14136 = vmatpush1.bf16.msra.mxu1 %v19802_v46 }
0x2376   :  { %14138 = vmatprep.subr.bf16.mxu0 %v19528_v12  ;;  %14170 = vmatprep.subr.bf16.mxu1 %v19539_v42 }
0x242b   :  { %v8469_v40 = vpop.f32.mrb[74].mxu0  ;;  %v8540_v19 = vpop.f32.mrb[74].mxu1 }
0x242c   :  { %v8549_v11 = vrot.slane %v8469_v40, 6  ;;  %v8471_v1 = vpop.f32.mrb[75].mxu0  ;;  %v8542_v48 = vpop.f32.mrb[75].mxu1  ;;  %v8551_v45 = vrot.slane %v8540_v19, 6  ;;  %v8581_v19 = vrot.slane %v19952_v27, 7 }
0x242d   :  { %v8550_v41 = vrot.slane %v8471_v1, 6  ;;  %v8552_v21 = vrot.slane %v8542_v48, 6 }
0x242e   :  { %v8557_v14 = vadd.f32 %v8549_v11, %v19882_v35  ;;  %v8559_v15 = vadd.f32 %v8551_v45, %v19898_v29 }
0x242f   :  { %v8558_v32 = vadd.f32 %v8550_v41, %v19886_v44  ;;  %v8560_v8 = vadd.f32 %v8552_v21, %v19903_v9 }
0x2430   :  { %v11428_v50 = vmul.f32 -1.442695, %v8557_v14  ;;  %v11430_v6 = vmul.f32 -1.442695, %v8559_v15 }
0x2431   :  { %v11429_v26 = vmul.f32 -1.442695, %v8558_v32 }
0x2432   :  { %15501 = vpow2.f32 %v11428_v50 }
0x2433   :  { %15503 = vpow2.f32 %v11429_v26 }
0x2434   :  { %15505 = vtanh.f32 %v8560_v8 }
0x2435   :  { %15507 = vpow2.f32 %v11430_v6 }
0x243c   :  { %v15502_v59 = vpop.eup %15501 }
0x243d   :  { %v8570_v62 = vadd.f32 1.0, %v15502_v59  ;;  %v15504_v40 = vpop.eup %15503 }
0x243e   :  { %v8571_v11 = vadd.f32 1.0, %v15504_v40  ;;  %v15506_v1 = vpop.eup %15505 }
0x243f   :  { %15509 = vrcp.f32 %v8570_v62  ;;  %v15508_v41 = vpop.eup %15507 }
0x2440   :  { %15511 = vrcp.f32 %v8571_v11  ;;  %v8572_v50 = vadd.f32 1.0, %v15508_v41 }
0x2442   :  { %15513 = vrcp.f32 %v8572_v50 }
0x2449   :  { %v15510_v14 = vpop.eup %15509 }
0x244a   :  { %v8584_v32 = vmul.f32 %v15510_v14, %v15506_v1  ;;  %v15512_v48 = vpop.eup %15511 }
0x244b   :  { %v8583_v26 = vmul.f32 %v15512_v48, %v8581_v19 }
0x244c   :  { %v15514_v21 = vpop.eup %15513 }
0x244d   :  { %v20003_v45 = vadd.f32 %v8584_v32, %v8583_v26 }
0x244f   :  { %15515 = vtanh.f32 %v20003_v45 }
0x2459   :  { %v15516_v15 = vpop.eup %15515 }
0x245a   :  { %v8587_v8 = vmul.f32 %v15516_v15, %v15514_v21 }
0x245c   :  { %v8591_v6 = vrot.slane %v8587_v8, %v16388_v37  ;;  %v8594_v59 = vrot.slane %v8587_v8, 2 }
0x245e   :  { %8661 = vmatmul.mubr.f32.vlgmr.msra.gmra.mrb[76].mxu0 %v8594_v59  ;;  %8732 = vmatmul.mubr.f32.vlgmr.msra.gmra.mrb[76].mxu1 %v8594_v59  ;;  %v20010_v27 = vsel %vm5046_vm2, %v8591_v6, %v19962_v3 }
0x245f   :  { %14140 = vmatpush1.bf16.msra.mxu0 %v19541_v52  ;;  %14172 = vmatpush1.bf16.msra.mxu1 %v19550_v38 }
0x2460   :  { %14142 = vmatprep.subr.bf16.mxu0 %v19564_v0  ;;  %14174 = vmatprep.subr.bf16.mxu1 %v19575_v23 }
0x2461   :  { %8853 = vmatprep.mubr.f32.mxu0 %v21041_v43  ;;  %8924 = vmatprep.mubr.f32.mxu1 %v21041_v43 }
0x2463   :  { %14144 = vmatpush1.bf16.msra.mxu0 %v19577_v57  ;;  %14176 = vmatpush1.bf16.msra.mxu1 %v19589_v47 }
0x2464   :  { %14146 = vmatprep.subr.bf16.mxu0 %v19602_v54  ;;  %14178 = vmatprep.subr.bf16.mxu1 %v19604_v13 }
0x2467   :  { %14148 = vmatpush1.bf16.msra.mxu0 %v19616_v61  ;;  %14180 = vmatpush1.bf16.msra.mxu1 %v19629_v49 }
0x2468   :  { %14150 = vmatprep.subr.bf16.mxu0 %v19631_v7  ;;  %14182 = vmatprep.subr.bf16.mxu1 %v19642_v28 }
0x246b   :  { %14152 = vmatpush1.bf16.msra.mxu0 %v19654_v63  ;;  %14184 = vmatpush1.bf16.msra.mxu1 %v19667_v53 }
0x246c   :  { %14154 = vmatprep.subr.bf16.mxu0 %v19669_v24  ;;  %14186 = vmatprep.subr.bf16.mxu1 %v19681_v33 }
0x246f   :  { %14156 = vmatpush1.bf16.msra.mxu0 %v19702_v2  ;;  %14188 = vmatpush1.bf16.msra.mxu1 %v19706_v20 }
0x2470   :  { %14158 = vmatprep.subr.bf16.mxu0 %v19708_v39  ;;  %14190 = vmatprep.subr.bf16.mxu1 %v19720_v58 }
0x2473   :  { %14160 = vmatpush1.bf16.msra.mxu0 %v19738_v25  ;;  %14192 = vmatpush1.bf16.msra.mxu1 %v19742_v10 }
0x2474   :  { %14162 = vmatprep.subr.bf16.mxu0 %v19744_v16  ;;  %14194 = vmatprep.subr.bf16.mxu1 %v19753_v18 }
0x2477   :  { %14164 = vmatpush1.bf16.msra.mxu0 %v19762_v4  ;;  %14196 = vmatpush1.bf16.msra.mxu1 %v19766_v60 }
0x2478   :  { %14166 = vmatprep.subr.bf16.mxu0 %v19780_v51  ;;  %14198 = vmatprep.subr.bf16.mxu1 %v19791_v5 }
0x247b   :  { %14168 = vmatpush1.bf16.msra.mxu0 %v19793_v17  ;;  %14200 = vmatpush1.bf16.msra.mxu1 %v19802_v46 }
0x247c   :  { %14202 = vmatprep.subr.bf16.mxu0 %v19528_v12  ;;  %14234 = vmatprep.subr.bf16.mxu1 %v19539_v42 }
0x2531   :  { %v8662_v3 = vpop.f32.mrb[76].mxu0  ;;  %v8733_v62 = vpop.f32.mrb[76].mxu1 }
0x2532   :  { %v8742_v40 = vrot.slane %v8662_v3, 5  ;;  %v8664_v11 = vpop.f32.mrb[77].mxu0  ;;  %v8735_v1 = vpop.f32.mrb[77].mxu1  ;;  %v8744_v50 = vrot.slane %v8733_v62, 5  ;;  %v8774_v62 = vrot.slane %v20003_v45, 7 }
0x2533   :  { %v8743_v41 = vrot.slane %v8664_v11, 5  ;;  %v8745_v26 = vrot.slane %v8735_v1, 5 }
0x2534   :  { %v8750_v14 = vadd.f32 %v8742_v40, %v19882_v35  ;;  %v8752_v21 = vadd.f32 %v8744_v50, %v19898_v29 }
0x2535   :  { %v8751_v19 = vadd.f32 %v8743_v41, %v19886_v44  ;;  %v8753_v15 = vadd.f32 %v8745_v26, %v19903_v9 }
0x2536   :  { %v11431_v32 = vmul.f32 -1.442695, %v8750_v14  ;;  %v11433_v8 = vmul.f32 -1.442695, %v8752_v21 }
0x2537   :  { %v11432_v48 = vmul.f32 -1.442695, %v8751_v19 }
0x2538   :  { %15517 = vpow2.f32 %v11431_v32 }
0x2539   :  { %15519 = vpow2.f32 %v11432_v48 }
0x253a   :  { %15521 = vtanh.f32 %v8753_v15 }
0x253b   :  { %15523 = vpow2.f32 %v11433_v8 }
0x2542   :  { %v15518_v6 = vpop.eup %15517 }
0x2543   :  { %v8763_v59 = vadd.f32 1.0, %v15518_v6  ;;  %v15520_v3 = vpop.eup %15519 }
0x2544   :  { %v8764_v40 = vadd.f32 1.0, %v15520_v3  ;;  %v15522_v11 = vpop.eup %15521 }
0x2545   :  { %15525 = vrcp.f32 %v8763_v59  ;;  %v15524_v41 = vpop.eup %15523 }
0x2546   :  { %15527 = vrcp.f32 %v8764_v40  ;;  %v8765_v32 = vadd.f32 1.0, %v15524_v41 }
0x2548   :  { %15529 = vrcp.f32 %v8765_v32 }
0x254f   :  { %v15526_v14 = vpop.eup %15525 }
0x2550   :  { %v8777_v19 = vmul.f32 %v15526_v14, %v15522_v11  ;;  %v15528_v1 = vpop.eup %15527 }
0x2551   :  { %v8776_v48 = vmul.f32 %v15528_v1, %v8774_v62 }
0x2552   :  { %v15530_v26 = vpop.eup %15529 }
0x2553   :  { %v20051_v50 = vadd.f32 %v8777_v19, %v8776_v48 }
0x2555   :  { %15531 = vtanh.f32 %v20051_v50 }
0x255f   :  { %v15532_v21 = vpop.eup %15531 }
0x2560   :  { %v8780_v15 = vmul.f32 %v15532_v21, %v15530_v26 }
0x2562   :  { %v8784_v8 = vrot.slane %v8780_v15, %v16396_v55  ;;  %v8787_v6 = vrot.slane %v8780_v15, 3 }
0x2564   :  { %8854 = vmatmul.mubr.f32.vlgmr.msra.gmra.mrb[78].mxu0 %v8787_v6  ;;  %8925 = vmatmul.mubr.f32.vlgmr.msra.gmra.mrb[78].mxu1 %v8787_v6  ;;  %v20058_v45 = vsel %vm5246_vm3, %v8784_v8, %v20010_v27 }
0x2565   :  { %14204 = vmatpush1.bf16.msra.mxu0 %v19541_v52  ;;  %14236 = vmatpush1.bf16.msra.mxu1 %v19550_v38 }
0x2566   :  { %14206 = vmatprep.subr.bf16.mxu0 %v19564_v0  ;;  %14238 = vmatprep.subr.bf16.mxu1 %v19575_v23 }
0x2567   :  { %9046 = vmatprep.mubr.f32.mxu0 %v21041_v43  ;;  %9117 = vmatprep.mubr.f32.mxu1 %v21041_v43 }
0x2569   :  { %14208 = vmatpush1.bf16.msra.mxu0 %v19577_v57  ;;  %14240 = vmatpush1.bf16.msra.mxu1 %v19589_v47 }
0x256a   :  { %14210 = vmatprep.subr.bf16.mxu0 %v19602_v54  ;;  %14242 = vmatprep.subr.bf16.mxu1 %v19604_v13 }
0x256d   :  { %14212 = vmatpush1.bf16.msra.mxu0 %v19616_v61  ;;  %14244 = vmatpush1.bf16.msra.mxu1 %v19629_v49 }
0x256e   :  { %14214 = vmatprep.subr.bf16.mxu0 %v19631_v7  ;;  %14246 = vmatprep.subr.bf16.mxu1 %v19642_v28 }
0x2571   :  { %14216 = vmatpush1.bf16.msra.mxu0 %v19654_v63  ;;  %14248 = vmatpush1.bf16.msra.mxu1 %v19667_v53 }
0x2572   :  { %14218 = vmatprep.subr.bf16.mxu0 %v19669_v24  ;;  %14250 = vmatprep.subr.bf16.mxu1 %v19681_v33 }
0x2575   :  { %14220 = vmatpush1.bf16.msra.mxu0 %v19702_v2  ;;  %14252 = vmatpush1.bf16.msra.mxu1 %v19706_v20 }
0x2576   :  { %14222 = vmatprep.subr.bf16.mxu0 %v19708_v39  ;;  %14254 = vmatprep.subr.bf16.mxu1 %v19720_v58 }
0x2579   :  { %14224 = vmatpush1.bf16.msra.mxu0 %v19738_v25  ;;  %14256 = vmatpush1.bf16.msra.mxu1 %v19742_v10 }
0x257a   :  { %14226 = vmatprep.subr.bf16.mxu0 %v19744_v16  ;;  %14258 = vmatprep.subr.bf16.mxu1 %v19753_v18 }
0x257d   :  { %14228 = vmatpush1.bf16.msra.mxu0 %v19762_v4  ;;  %14260 = vmatpush1.bf16.msra.mxu1 %v19766_v60 }
0x257e   :  { %14230 = vmatprep.subr.bf16.mxu0 %v19780_v51  ;;  %14262 = vmatprep.subr.bf16.mxu1 %v19791_v5 }
0x2581   :  { %14232 = vmatpush1.bf16.msra.mxu0 %v19793_v17  ;;  %14264 = vmatpush1.bf16.msra.mxu1 %v19802_v46 }
0x2582   :  { %14266 = vmatprep.subr.bf16.mxu0 %v19528_v12  ;;  %14298 = vmatprep.subr.bf16.mxu1 %v19539_v42 }
0x2637   :  { %v8855_v27 = vpop.f32.mrb[78].mxu0  ;;  %v8926_v59 = vpop.f32.mrb[78].mxu1 }
0x2638   :  { %v8935_v3 = vrot.slane %v8855_v27, 4  ;;  %v8857_v40 = vpop.f32.mrb[79].mxu0  ;;  %v8928_v11 = vpop.f32.mrb[79].mxu1  ;;  %v8937_v32 = vrot.slane %v8926_v59, 4  ;;  %v8967_v59 = vrot.slane %v20051_v50, 7 }
0x2639   :  { %v8936_v41 = vrot.slane %v8857_v40, 4  ;;  %v8938_v48 = vrot.slane %v8928_v11, 4 }
0x263a   :  { %v8943_v14 = vadd.f32 %v8935_v3, %v19882_v35  ;;  %v8945_v26 = vadd.f32 %v8937_v32, %v19898_v29 }
0x263b   :  { %v8944_v62 = vadd.f32 %v8936_v41, %v19886_v44  ;;  %v8946_v21 = vadd.f32 %v8938_v48, %v19903_v9 }
0x263c   :  { %v11434_v19 = vmul.f32 -1.442695, %v8943_v14  ;;  %v11436_v15 = vmul.f32 -1.442695, %v8945_v26  ;;  %v8976_v26 = vsub.s32 4, %v16370_v30 }
0x263d   :  { %v11435_v1 = vmul.f32 -1.442695, %v8944_v62 }
0x263e   :  { %15533 = vpow2.f32 %v11434_v19 }
0x263f   :  { %15535 = vpow2.f32 %v11435_v1 }
0x2640   :  { %15537 = vtanh.f32 %v8946_v21 }
0x2641   :  { %15539 = vpow2.f32 %v11436_v15 }
0x2648   :  { %v15534_v8 = vpop.eup %15533 }
0x2649   :  { %v8956_v6 = vadd.f32 1.0, %v15534_v8  ;;  %v15536_v27 = vpop.eup %15535 }
0x264a   :  { %v8957_v3 = vadd.f32 1.0, %v15536_v27  ;;  %v15538_v40 = vpop.eup %15537 }
0x264b   :  { %15541 = vrcp.f32 %v8956_v6  ;;  %v15540_v41 = vpop.eup %15539 }
0x264c   :  { %15543 = vrcp.f32 %v8957_v3  ;;  %v8958_v19 = vadd.f32 1.0, %v15540_v41 }
0x264e   :  { %15545 = vrcp.f32 %v8958_v19 }
0x2655   :  { %v15542_v14 = vpop.eup %15541 }
0x2656   :  { %v8970_v62 = vmul.f32 %v15542_v14, %v15538_v40  ;;  %v15544_v11 = vpop.eup %15543 }
0x2657   :  { %v8969_v1 = vmul.f32 %v15544_v11, %v8967_v59 }
0x2658   :  { %v15546_v48 = vpop.eup %15545 }
0x2659   :  { %v20099_v32 = vadd.f32 %v8970_v62, %v8969_v1 }
0x265b   :  { %15547 = vtanh.f32 %v20099_v32 }
0x2665   :  { %v15548_v21 = vpop.eup %15547 }
0x2666   :  { %v8973_v15 = vmul.f32 %v15548_v21, %v15546_v48 }
0x2668   :  { %v8977_v8 = vrot.slane %v8973_v15, %v8976_v26  ;;  %v8980_v6 = vrot.slane %v8973_v15, 4 }
0x266a   :  { %9047 = vmatmul.mubr.f32.vlgmr.msra.gmra.mrb[80].mxu0 %v8980_v6  ;;  %9118 = vmatmul.mubr.f32.vlgmr.msra.gmra.mrb[80].mxu1 %v8980_v6  ;;  %v20108_v50 = vsel %vm5446_vm4, %v8977_v8, %v20058_v45 }
0x266b   :  { %14268 = vmatpush1.bf16.msra.mxu0 %v19541_v52  ;;  %14300 = vmatpush1.bf16.msra.mxu1 %v19550_v38 }
0x266c   :  { %14270 = vmatprep.subr.bf16.mxu0 %v19564_v0  ;;  %14302 = vmatprep.subr.bf16.mxu1 %v19575_v23 }
0x266d   :  { %9239 = vmatprep.mubr.f32.mxu0 %v21041_v43  ;;  %9310 = vmatprep.mubr.f32.mxu1 %v21041_v43 }
0x266f   :  { %14272 = vmatpush1.bf16.msra.mxu0 %v19577_v57  ;;  %14304 = vmatpush1.bf16.msra.mxu1 %v19589_v47 }
0x2670   :  { %14274 = vmatprep.subr.bf16.mxu0 %v19602_v54  ;;  %14306 = vmatprep.subr.bf16.mxu1 %v19604_v13 }
0x2673   :  { %14276 = vmatpush1.bf16.msra.mxu0 %v19616_v61  ;;  %14308 = vmatpush1.bf16.msra.mxu1 %v19629_v49 }
0x2674   :  { %14278 = vmatprep.subr.bf16.mxu0 %v19631_v7  ;;  %14310 = vmatprep.subr.bf16.mxu1 %v19642_v28 }
0x2677   :  { %14280 = vmatpush1.bf16.msra.mxu0 %v19654_v63  ;;  %14312 = vmatpush1.bf16.msra.mxu1 %v19667_v53 }
0x2678   :  { %14282 = vmatprep.subr.bf16.mxu0 %v19669_v24  ;;  %14314 = vmatprep.subr.bf16.mxu1 %v19681_v33 }
0x267b   :  { %14284 = vmatpush1.bf16.msra.mxu0 %v19702_v2  ;;  %14316 = vmatpush1.bf16.msra.mxu1 %v19706_v20 }
0x267c   :  { %14286 = vmatprep.subr.bf16.mxu0 %v19708_v39  ;;  %14318 = vmatprep.subr.bf16.mxu1 %v19720_v58 }
0x267f   :  { %14288 = vmatpush1.bf16.msra.mxu0 %v19738_v25  ;;  %14320 = vmatpush1.bf16.msra.mxu1 %v19742_v10 }
0x2680   :  { %14290 = vmatprep.subr.bf16.mxu0 %v19744_v16  ;;  %14322 = vmatprep.subr.bf16.mxu1 %v19753_v18 }
0x2683   :  { %14292 = vmatpush1.bf16.msra.mxu0 %v19762_v4  ;;  %14324 = vmatpush1.bf16.msra.mxu1 %v19766_v60 }
0x2684   :  { %14294 = vmatprep.subr.bf16.mxu0 %v19780_v51  ;;  %14326 = vmatprep.subr.bf16.mxu1 %v19791_v5 }
0x2687   :  { %14296 = vmatpush1.bf16.msra.mxu0 %v19793_v17  ;;  %14328 = vmatpush1.bf16.msra.mxu1 %v19802_v46 }
0x2688   :  { %14330 = vmatprep.subr.bf16.mxu0 %v19528_v12  ;;  %14362 = vmatprep.subr.bf16.mxu1 %v19539_v42 }
0x273d   :  { %v9048_v45 = vpop.f32.mrb[80].mxu0  ;;  %v9119_v27 = vpop.f32.mrb[80].mxu1 }
0x273e   :  { %v9128_v3 = vrot.slane %v9048_v45, 3  ;;  %v9050_v40 = vpop.f32.mrb[81].mxu0  ;;  %v9121_v41 = vpop.f32.mrb[81].mxu1  ;;  %v9130_v1 = vrot.slane %v9119_v27, 3  ;;  %v9160_v27 = vrot.slane %v20099_v32, 7 }
0x273f   :  { %v9129_v14 = vrot.slane %v9050_v40, 3  ;;  %v9131_v48 = vrot.slane %v9121_v41, 3 }
0x2740   :  { %v9136_v59 = vadd.f32 %v9128_v3, %v19882_v35  ;;  %v9138_v12 = vadd.f32 %v9130_v1, %v19898_v29 }
0x2741   :  { %v9137_v62 = vadd.f32 %v9129_v14, %v19886_v44  ;;  %v9139_v42 = vadd.f32 %v9131_v48, %v19903_v9  ;;  %v9169_v48 = vsub.s32 5, %v16370_v30 }
0x2742   :  { %v11437_v11 = vmul.f32 -1.442695, %v9136_v59  ;;  %v11439_v21 = vmul.f32 -1.442695, %v9138_v12 }
0x2743   :  { %v11438_v19 = vmul.f32 -1.442695, %v9137_v62 }
0x2744   :  { %15549 = vpow2.f32 %v11437_v11 }
0x2745   :  { %15551 = vpow2.f32 %v11438_v19 }
0x2746   :  { %15553 = vtanh.f32 %v9139_v42 }
0x2747   :  { %15555 = vpow2.f32 %v11439_v21 }
0x274e   :  { %v15550_v15 = vpop.eup %15549 }
0x274f   :  { %v9149_v8 = vadd.f32 1.0, %v15550_v15  ;;  %v15552_v6 = vpop.eup %15551 }
0x2750   :  { %v9150_v45 = vadd.f32 1.0, %v15552_v6  ;;  %v15554_v3 = vpop.eup %15553 }
0x2751   :  { %15557 = vrcp.f32 %v9149_v8  ;;  %v15556_v40 = vpop.eup %15555 }
0x2752   :  { %15559 = vrcp.f32 %v9150_v45  ;;  %v9151_v62 = vadd.f32 1.0, %v15556_v40  ;;  %v9659_v40 = vld [vmem:[%s21025_s11 + $0x8] sm:$0xff] }
0x2754   :  { %15561 = vrcp.f32 %v9151_v62  ;;  %v9658_v62 = vld [vmem:[%s21025_s11] sm:$0xff] }
0x275b   :  { %v15558_v14 = vpop.eup %15557 }
0x275c   :  { %v9163_v59 = vmul.f32 %v15558_v14, %v15554_v3  ;;  %v15560_v41 = vpop.eup %15559  ;;  %v9663_v14 = vld [vmem:[%s21025_s11 + $0x28] sm:$0xff] }
0x275d   :  { %v9162_v11 = vmul.f32 %v15560_v41, %v9160_v27  ;;  %v20215_v27 = vpack.c.bf16 %v9663_v14, %v9659_v40  ;;  %v9559_v41 = vld [vmem:[%s21027_s13 + $0x8] sm:$0xff] }
0x275e   :  { %v15562_v1 = vpop.eup %15561  ;;  %v9699_v40 = vld [vmem:[%s21025_s11 + $0x148] sm:$0xff] }
0x275f   :  { %v20149_v19 = vadd.f32 %v9163_v59, %v9162_v11  ;;  %v9558_v59 = vld [vmem:[%s21027_s13] sm:$0xff]  ;;  %v9703_v14 = vld [vmem:[%s21025_s11 + $0x168] sm:$0xff] }
0x2760   :  { %v14394_v11 = vpack.c.bf16 %v9559_v41, %v9558_v59  ;;  %v9568_v59 = vld [vmem:[%s21027_s13 + $0x50] sm:$0xff]  ;;  %v20344_v41 = vpack.c.bf16 %v9703_v14, %v9699_v40 }
0x2761   :  { %15563 = vtanh.f32 %v20149_v19 }
0x276b   :  { %v15564_v12 = vpop.eup %15563 }
0x276c   :  { %v9166_v42 = vmul.f32 %v15564_v12, %v15562_v1  ;;  %v15728_v1 = vmov 0.0|0.0  }
0x276e   :  { %v9170_v21 = vrot.slane %v9166_v42, %v9169_v48  ;;  %v9173_v15 = vrot.slane %v9166_v42, 5  ;;  %v9667_v42 = vld [vmem:[%s21025_s11 + $0x48] sm:$0xff] }
0x2770   :  { %9240 = vmatmul.mubr.f32.vlgmr.msra.gmra.mrb[82].mxu0 %v9173_v15  ;;  %9311 = vmatmul.mubr.f32.vlgmr.msra.gmra.mrb[82].mxu1 %v9173_v15  ;;  %v20158_v32 = vsel %vm5646_vm5, %v9170_v21, %v20108_v50  ;;  %v9671_v21 = vld [vmem:[%s21025_s11 + $0x68] sm:$0xff] }
0x2771   :  { %14332 = vmatpush1.bf16.msra.mxu0 %v19541_v52  ;;  %14364 = vmatpush1.bf16.msra.mxu1 %v19550_v38  ;;  %v20241_v15 = vpack.c.bf16 %v9671_v21, %v9667_v42 }
0x2772   :  { %14334 = vmatprep.subr.bf16.mxu0 %v19564_v0  ;;  %14366 = vmatprep.subr.bf16.mxu1 %v19575_v23 }
0x2773   :  { %9432 = vmatprep.mubr.f32.mxu0 %v21041_v43  ;;  %9503 = vmatprep.mubr.f32.mxu1 %v21041_v43 }
0x2775   :  { %14336 = vmatpush1.bf16.msra.mxu0 %v19577_v57  ;;  %14368 = vmatpush1.bf16.msra.mxu1 %v19589_v47 }
0x2776   :  { %14338 = vmatprep.subr.bf16.mxu0 %v19602_v54  ;;  %14370 = vmatprep.subr.bf16.mxu1 %v19604_v13 }
0x2779   :  { %14340 = vmatpush1.bf16.msra.mxu0 %v19616_v61  ;;  %14372 = vmatpush1.bf16.msra.mxu1 %v19629_v49 }
0x277a   :  { %14342 = vmatprep.subr.bf16.mxu0 %v19631_v7  ;;  %14374 = vmatprep.subr.bf16.mxu1 %v19642_v28 }
0x277d   :  { %14344 = vmatpush1.bf16.msra.mxu0 %v19654_v63  ;;  %14376 = vmatpush1.bf16.msra.mxu1 %v19667_v53 }
0x277e   :  { %14346 = vmatprep.subr.bf16.mxu0 %v19669_v24  ;;  %14378 = vmatprep.subr.bf16.mxu1 %v19681_v33 }
0x2781   :  { %14348 = vmatpush1.bf16.msra.mxu0 %v19702_v2  ;;  %14380 = vmatpush1.bf16.msra.mxu1 %v19706_v20 }
0x2782   :  { %14350 = vmatprep.subr.bf16.mxu0 %v19708_v39  ;;  %14382 = vmatprep.subr.bf16.mxu1 %v19720_v58 }
0x2785   :  { %14352 = vmatpush1.bf16.msra.mxu0 %v19738_v25  ;;  %14384 = vmatpush1.bf16.msra.mxu1 %v19742_v10 }
0x2786   :  { %14354 = vmatprep.subr.bf16.mxu0 %v19744_v16  ;;  %14386 = vmatprep.subr.bf16.mxu1 %v19753_v18  ;;  %v9353_v16 = vrot.slane %v20149_v19, 7  ;;  %v9662_v19 = vld [vmem:[%s21025_s11 + $0x20] sm:$0xff] }
0x2787   :  { %v20231_v12 = vpack.c.bf16 %v9662_v19, %v9658_v62  ;;  %v9569_v62 = vld [vmem:[%s21027_s13 + $0x58] sm:$0xff]  ;;  %v9702_v19 = vld [vmem:[%s21025_s11 + $0x160] sm:$0xff] }
0x2788   :  { %v14409_v42 = vpack.c.bf16 %v9569_v62, %v9568_v59 }
0x2789   :  { %14356 = vmatpush1.bf16.msra.mxu0 %v19762_v4  ;;  %14388 = vmatpush1.bf16.msra.mxu1 %v19766_v60 }
0x278a   :  { %14358 = vmatprep.subr.bf16.mxu0 %v19780_v51  ;;  %14390 = vmatprep.subr.bf16.mxu1 %v19791_v5 }
0x278d   :  { %14360 = vmatpush1.bf16.msra.mxu0 %v19793_v17  ;;  %14392 = vmatpush1.bf16.msra.mxu1 %v19802_v46  ;;  %v21035_v46 = vsub.s32 6, %v16370_v30 }
0x278e   :  { %14393 = vmatprep.subr.bf16.mxu0 %v15728_v1  ;;  %14418 = vmatprep.subr.bf16.mxu1 %v20215_v27 }
0x2843   :  { %v9241_v52 = vpop.f32.mrb[82].mxu0  ;;  %v9312_v38 = vpop.f32.mrb[82].mxu1 }
0x2844   :  { %v9321_v0 = vrot.slane %v9241_v52, 2  ;;  %v9243_v23 = vpop.f32.mrb[83].mxu0  ;;  %v9314_v57 = vpop.f32.mrb[83].mxu1  ;;  %v9323_v7 = vrot.slane %v9312_v38, 2  ;;  %v9561_v52 = vld [vmem:[%s21027_s13 + $0x18] sm:$0xff]  ;;  %v9666_v38 = vld [vmem:[%s21025_s11 + $0x40] sm:$0xff] }
0x2845   :  { %v9322_v47 = vrot.slane %v9243_v23, 2  ;;  %v9324_v28 = vrot.slane %v9314_v57, 2  ;;  %v9670_v23 = vld [vmem:[%s21025_s11 + $0x60] sm:$0xff] }
0x2846   :  { %v9329_v54 = vadd.f32 %v9321_v0, %v19882_v35  ;;  %v9331_v63 = vadd.f32 %v9323_v7, %v19898_v29  ;;  %v20256_v57 = vpack.c.bf16 %v9670_v23, %v9666_v38  ;;  %v9674_v7 = vld [vmem:[%s21025_s11 + $0x80] sm:$0xff]  ;;  %v9571_v23 = vld [vmem:[%s21027_s13 + $0x68] sm:$0xff] }
0x2847   :  { %v9330_v13 = vadd.f32 %v9322_v47, %v19886_v44  ;;  %v9332_v53 = vadd.f32 %v9324_v28, %v19903_v9  ;;  %v9675_v47 = vld [vmem:[%s21025_s11 + $0x88] sm:$0xff]  ;;  %v9570_v38 = vld [vmem:[%s21027_s13 + $0x60] sm:$0xff] }
0x2848   :  { %v11440_v61 = vmul.f32 -1.442695, %v9329_v54  ;;  %v11442_v24 = vmul.f32 -1.442695, %v9331_v63  ;;  %v9679_v54 = vld [vmem:[%s21025_s11 + $0xa8] sm:$0xff]  ;;  %v9678_v63 = vld [vmem:[%s21025_s11 + $0xa0] sm:$0xff] }
0x2849   :  { %v11441_v49 = vmul.f32 -1.442695, %v9330_v13  ;;  %v20266_v13 = vpack.c.bf16 %v9679_v54, %v9675_v47  ;;  %v9706_v47 = vld [vmem:[%s21025_s11 + $0x180] sm:$0xff] }
0x284a   :  { %15565 = vpow2.f32 %v11440_v61  ;;  %v9562_v61 = vld [vmem:[%s21027_s13 + $0x20] sm:$0xff] }
0x284b   :  { %15567 = vpow2.f32 %v11441_v49  ;;  %v9563_v49 = vld [vmem:[%s21027_s13 + $0x28] sm:$0xff]  ;;  %v9710_v54 = vld [vmem:[%s21025_s11 + $0x1a0] sm:$0xff] }
0x284c   :  { %15569 = vtanh.f32 %v9332_v53  ;;  %v14400_v28 = vpack.c.bf16 %v9563_v49, %v9562_v61  ;;  %v20281_v53 = vpack.c.bf16 %v9678_v63, %v9674_v7  ;;  %v14412_v61 = vpack.c.bf16 %v9571_v23, %v9570_v38  ;;  %v9715_v49 = vld [vmem:[%s21025_s11 + $0x1c8] sm:$0xff]  ;;  %v9572_v63 = vld [vmem:[%s21027_s13 + $0x70] sm:$0xff] }
0x284d   :  { %15571 = vpow2.f32 %v11442_v24  ;;  %v9683_v24 = vld [vmem:[%s21025_s11 + $0xc8] sm:$0xff] }
0x284e   :  { %v9719_v7 = vld [vmem:[%s21025_s11 + $0x1e8] sm:$0xff] }
0x2854   :  { %v15566_v33 = vpop.eup %15565 }
0x2855   :  { %v9342_v2 = vadd.f32 1.0, %v15566_v33  ;;  %v15568_v20 = vpop.eup %15567  ;;  %v9687_v33 = vld [vmem:[%s21025_s11 + $0xe8] sm:$0xff] }
0x2856   :  { %v9343_v39 = vadd.f32 1.0, %v15568_v20  ;;  %v15570_v58 = vpop.eup %15569  ;;  %v9564_v20 = vld [vmem:[%s21027_s13 + $0x30] sm:$0xff] }
0x2857   :  { %15573 = vrcp.f32 %v9342_v2  ;;  %v15572_v25 = vpop.eup %15571  ;;  %v20291_v2 = vpack.c.bf16 %v9687_v33, %v9683_v24  ;;  %v9573_v24 = vld [vmem:[%s21027_s13 + $0x78] sm:$0xff]  ;;  %v20397_v33 = vpack.c.bf16 %v9719_v7, %v9715_v49 }
0x2858   :  { %15575 = vrcp.f32 %v9343_v39  ;;  %v9344_v60 = vadd.f32 1.0, %v15572_v25  ;;  %v9565_v39 = vld [vmem:[%s21027_s13 + $0x38] sm:$0xff] }
0x2859   :  { %v14403_v25 = vpack.c.bf16 %v9565_v39, %v9564_v20  ;;  %v9714_v20 = vld [vmem:[%s21025_s11 + $0x1c0] sm:$0xff] }
0x285a   :  { %15577 = vrcp.f32 %v9344_v60  ;;  %v9718_v39 = vld [vmem:[%s21025_s11 + $0x1e0] sm:$0xff] }
0x2861   :  { %v15574_v10 = vpop.eup %15573 }
0x2862   :  { %v9356_v18 = vmul.f32 %v15574_v10, %v15570_v58  ;;  %v15576_v4 = vpop.eup %15575  ;;  %v9682_v58 = vld [vmem:[%s21025_s11 + $0xc0] sm:$0xff] }
0x2863   :  { %v9355_v51 = vmul.f32 %v15576_v4, %v9353_v16  ;;  %v9686_v10 = vld [vmem:[%s21025_s11 + $0xe0] sm:$0xff]  ;;  %v9695_v4 = vld [vmem:[%s21025_s11 + $0x128] sm:$0xff] }
0x2864   :  { %v15578_v17 = vpop.eup %15577  ;;  %v20306_v16 = vpack.c.bf16 %v9686_v10, %v9682_v58  ;;  %v14415_v58 = vpack.c.bf16 %v9573_v24, %v9572_v63  ;;  %v9661_v10 = vld [vmem:[%s21025_s11 + $0x18] sm:$0xff] }
0x2865   :  { %v20197_v5 = vadd.f32 %v9356_v18, %v9355_v51  ;;  %v9691_v18 = vld [vmem:[%s21025_s11 + $0x108] sm:$0xff]  ;;  %v9566_v51 = vld [vmem:[%s21027_s13 + $0x40] sm:$0xff] }
0x2866   :  { %v20316_v60 = vpack.c.bf16 %v9695_v4, %v9691_v18  ;;  %v9665_v18 = vld [vmem:[%s21025_s11 + $0x38] sm:$0xff] }
0x2867   :  { %15579 = vtanh.f32 %v20197_v5  ;;  %v20417_v4 = vpack.c.bf16 %v9665_v18, %v9661_v10  ;;  %v9546_v7 = vrot.slane %v20197_v5, 7  ;;  %v9660_v18 = vld [vmem:[%s21025_s11 + $0x10] sm:$0xff] }
0x2868   :  { %v9664_v5 = vld [vmem:[%s21025_s11 + $0x30] sm:$0xff] }
0x2871   :  { %v15580_v50 = vpop.eup %15579 }
0x2872   :  { %v9359_v8 = vmul.f32 %v15580_v50, %v15578_v17  ;;  %v9567_v17 = vld [vmem:[%s21027_s13 + $0x48] sm:$0xff]  ;;  %v9690_v50 = vld [vmem:[%s21025_s11 + $0x100] sm:$0xff] }
0x2874   :  { %v9366_v6 = vrot.slane %v9359_v8, 6  ;;  %v9363_v45 = vrot.slane %v9359_v8, %v21035_v46  ;;  %v14406_v8 = vpack.c.bf16 %v9567_v17, %v9566_v51 }
0x2876   :  { %9433 = vmatmul.mubr.f32.vlgmr.msra.gmra.mrb[84].mxu0 %v9366_v6  ;;  %9504 = vmatmul.mubr.f32.vlgmr.msra.gmra.mrb[84].mxu1 %v9366_v6  ;;  %v20206_v3 = vsel %vm5846_vm6, %v9363_v45, %v20158_v32  ;;  %v9560_v32 = vld [vmem:[%s21027_s13 + $0x10] sm:$0xff]  ;;  %v9694_v6 = vld [vmem:[%s21025_s11 + $0x120] sm:$0xff] }
0x2877   :  { %9789 = vmatprep.mubr.f32.mxu1 %v21041_v43  ;;  %14395 = vmatpush3.bf16.msra.mxu0 %v14394_v11  ;;  %v14397_v0 = vpack.c.bf16 %v9561_v52, %v9560_v32  ;;  %v20331_v45 = vpack.c.bf16 %v9694_v6, %v9690_v50  ;;  %v9698_v11 = vld [vmem:[%s21025_s11 + $0x140] sm:$0xff]  ;;  %v9707_v32 = vld [vmem:[%s21025_s11 + $0x188] sm:$0xff] }
0x2878   :  { %14420 = vmatpush1.bf16.msra.mxu1 %v20231_v12  ;;  %14396 = vmatprep.subr.bf16.mxu0 %v15728_v1  ;;  %v20355_v21 = vpack.c.bf16 %v9702_v19, %v9698_v11  ;;  %v9711_v52 = vld [vmem:[%s21025_s11 + $0x1a8] sm:$0xff] }
0x2879   :  { %14422 = vmatprep.subr.bf16.mxu1 %v20241_v15  ;;  %11539 = vmatprep.mubr.msk.f32.mxu0 %vm15729_vm8, %v21041_v43 }
0x287b   :  { %14398 = vmatpush3.bf16.msra.mxu0 %v14397_v0  ;;  %v20369_v0 = vpack.c.bf16 %v9711_v52, %v9707_v32 }
0x287c   :  { %14424 = vmatpush1.bf16.msra.mxu1 %v20256_v57  ;;  %14399 = vmatprep.subr.bf16.mxu0 %v15728_v1 }
0x287d   :  { %14426 = vmatprep.subr.bf16.mxu1 %v20266_v13 }
0x287f   :  { %14401 = vmatpush3.bf16.msra.mxu0 %v14400_v28  ;;  %v20388_v28 = vpack.c.bf16 %v9710_v54, %v9706_v47 }
0x2880   :  { %14428 = vmatpush1.bf16.msra.mxu1 %v20281_v53  ;;  %14402 = vmatprep.subr.bf16.mxu0 %v15728_v1 }
0x2881   :  { %14430 = vmatprep.subr.bf16.mxu1 %v20291_v2 }
0x2883   :  { %14404 = vmatpush3.bf16.msra.mxu0 %v14403_v25  ;;  %v20407_v25 = vpack.c.bf16 %v9718_v39, %v9714_v20 }
0x2884   :  { %14432 = vmatpush1.bf16.msra.mxu1 %v20306_v16  ;;  %14405 = vmatprep.subr.bf16.mxu0 %v15728_v1 }
0x2885   :  { %14434 = vmatprep.subr.bf16.mxu1 %v20316_v60 }
0x2887   :  { %14407 = vmatpush3.bf16.msra.mxu0 %v14406_v8 }
0x2888   :  { %14436 = vmatpush1.bf16.msra.mxu1 %v20331_v45  ;;  %14408 = vmatprep.subr.bf16.mxu0 %v15728_v1 }
0x2889   :  { %14438 = vmatprep.subr.bf16.mxu1 %v20344_v41 }
0x288b   :  { %14410 = vmatpush3.bf16.msra.mxu0 %v14409_v42 }
0x288c   :  { %14440 = vmatpush1.bf16.msra.mxu1 %v20355_v21  ;;  %14411 = vmatprep.subr.bf16.mxu0 %v15728_v1 }
0x288d   :  { %14442 = vmatprep.subr.bf16.mxu1 %v20369_v0 }
0x288f   :  { %14413 = vmatpush3.bf16.msra.mxu0 %v14412_v61 }
0x2890   :  { %14444 = vmatpush1.bf16.msra.mxu1 %v20388_v28  ;;  %14414 = vmatprep.subr.bf16.mxu0 %v15728_v1 }
0x2891   :  { %14446 = vmatprep.subr.bf16.mxu1 %v20397_v33 }
0x2893   :  { %14416 = vmatpush3.bf16.msra.mxu0 %v14415_v58  ;;  %v21034_v58 = vsub.s32 7, %v16370_v30 }
0x2894   :  { %14448 = vmatpush1.bf16.msra.mxu1 %v20407_v25  ;;  %14450 = vmatprep.subr.bf16.mxu0 %v20417_v4 }
0x2895   :  { %14482 = vmatprep.subr.bf16.mxu1 %v20215_v27 }
0x2949   :  { %v9434_v51 = vpop.f32.mrb[84].mxu0  ;;  %v9505_v17 = vpop.f32.mrb[84].mxu1 }
0x294a   :  { %v9514_v50 = vrot.slane %v9434_v51, 1  ;;  %v9436_v8 = vpop.f32.mrb[85].mxu0  ;;  %v9507_v6 = vpop.f32.mrb[85].mxu1  ;;  %v9516_v19 = vrot.slane %v9505_v17, 1  ;;  %v9669_v17 = vld [vmem:[%s21025_s11 + $0x58] sm:$0xff] }
0x294b   :  { %v9515_v40 = vrot.slane %v9436_v8, 1  ;;  %v9517_v42 = vrot.slane %v9507_v6, 1 }
0x294c   :  { %v9522_v14 = vadd.f32 %v9514_v50, %v19882_v35  ;;  %v9524_v32 = vadd.f32 %v9516_v19, %v19898_v29  ;;  %v9673_v50 = vld [vmem:[%s21025_s11 + $0x78] sm:$0xff] }
0x294d   :  { %v9523_v59 = vadd.f32 %v9515_v40, %v19886_v44  ;;  %v9525_v52 = vadd.f32 %v9517_v42, %v19903_v9  ;;  %v20448_v40 = vpack.c.bf16 %v9664_v5, %v9660_v18  ;;  %v9677_v19 = vld [vmem:[%s21025_s11 + $0x98] sm:$0xff] }
0x294e   :  { %v11443_v62 = vmul.f32 -1.442695, %v9522_v14  ;;  %v11445_v38 = vmul.f32 -1.442695, %v9524_v32  ;;  %v20450_v14 = vpack.c.bf16 %v9673_v50, %v9669_v17  ;;  %v9681_v42 = vld [vmem:[%s21025_s11 + $0xb8] sm:$0xff]  ;;  %v9700_v17 = vld [vmem:[%s21025_s11 + $0x150] sm:$0xff] }
0x294f   :  { %v11444_v11 = vmul.f32 -1.442695, %v9523_v59  ;;  %v9668_v59 = vld [vmem:[%s21025_s11 + $0x50] sm:$0xff] }
0x2950   :  { %15581 = vpow2.f32 %v11443_v62  ;;  %v9672_v62 = vld [vmem:[%s21025_s11 + $0x70] sm:$0xff] }
0x2951   :  { %15583 = vpow2.f32 %v11444_v11  ;;  %v20471_v32 = vpack.c.bf16 %v9672_v62, %v9668_v59  ;;  %v9704_v50 = vld [vmem:[%s21025_s11 + $0x170] sm:$0xff]  ;;  %v9713_v59 = vld [vmem:[%s21025_s11 + $0x1b8] sm:$0xff] }
0x2952   :  { %15585 = vtanh.f32 %v9525_v52  ;;  %v9676_v52 = vld [vmem:[%s21025_s11 + $0x90] sm:$0xff]  ;;  %v20553_v62 = vpack.c.bf16 %v9704_v50, %v9700_v17 }
0x2953   :  { %15587 = vpow2.f32 %v11445_v38  ;;  %v9680_v38 = vld [vmem:[%s21025_s11 + $0xb0] sm:$0xff] }
0x295a   :  { %v15582_v23 = vpop.eup %15581 }
0x295b   :  { %v9535_v47 = vadd.f32 1.0, %v15582_v23  ;;  %v15584_v54 = vpop.eup %15583  ;;  %v9685_v23 = vld [vmem:[%s21025_s11 + $0xd8] sm:$0xff] }
0x295c   :  { %v9536_v35 = vadd.f32 1.0, %v15584_v54  ;;  %v15586_v44 = vpop.eup %15585  ;;  %v20493_v54 = vpack.c.bf16 %v9680_v38, %v9676_v52  ;;  %v9717_v52 = vld [vmem:[%s21025_s11 + $0x1d8] sm:$0xff] }
0x295d   :  { %15589 = vrcp.f32 %v9535_v47  ;;  %v15588_v61 = vpop.eup %15587  ;;  %v9689_v47 = vld [vmem:[%s21025_s11 + $0xf8] sm:$0xff] }
0x295e   :  { %15591 = vrcp.f32 %v9536_v35  ;;  %v9537_v20 = vadd.f32 1.0, %v15588_v61  ;;  %v20497_v35 = vpack.c.bf16 %v9689_v47, %v9685_v23  ;;  %v9688_v61 = vld [vmem:[%s21025_s11 + $0xf0] sm:$0xff]  ;;  %v9721_v38 = vld [vmem:[%s21025_s11 + $0x1f8] sm:$0xff] }
0x295f   :  { %v20577_v47 = vpack.c.bf16 %v9721_v38, %v9717_v52 }
0x2960   :  { %15593 = vrcp.f32 %v9537_v20  ;;  %v9692_v20 = vld [vmem:[%s21025_s11 + $0x110] sm:$0xff] }
0x2967   :  { %v15590_v49 = vpop.eup %15589 }
0x2968   :  { %v9549_v63 = vmul.f32 %v15590_v49, %v15586_v44  ;;  %v15592_v24 = vpop.eup %15591  ;;  %v9684_v44 = vld [vmem:[%s21025_s11 + $0xd0] sm:$0xff]  ;;  %v9693_v49 = vld [vmem:[%s21025_s11 + $0x118] sm:$0xff] }
0x2969   :  { %v9548_v29 = vmul.f32 %v15592_v24, %v9546_v7  ;;  %v9697_v7 = vld [vmem:[%s21025_s11 + $0x138] sm:$0xff] }
0x296a   :  { %v15594_v9 = vpop.eup %15593  ;;  %v20517_v24 = vpack.c.bf16 %v9697_v7, %v9693_v49 }
0x296b   :  { %v20426_v39 = vadd.f32 %v9549_v63, %v9548_v29  ;;  %v20513_v63 = vpack.c.bf16 %v9688_v61, %v9684_v44  ;;  %v9696_v29 = vld [vmem:[%s21025_s11 + $0x130] sm:$0xff] }
0x296c   :  { %v20533_v18 = vpack.c.bf16 %v9696_v29, %v9692_v20  ;;  %v9716_v44 = vld [vmem:[%s21025_s11 + $0x1d0] sm:$0xff] }
0x296d   :  { %15595 = vtanh.f32 %v20426_v39  ;;  %v9720_v61 = vld [vmem:[%s21025_s11 + $0x1f0] sm:$0xff]  ;;  %v9891_v38 = vrot.slane %v20426_v39, 7 }
0x296e   :  { %v20587_v49 = vpack.c.bf16 %v9720_v61, %v9716_v44 }
0x2977   :  { %v15596_v10 = vpop.eup %15595 }
0x2978   :  { %v20436_v51 = vmul.f32 %v15596_v10, %v15594_v9  ;;  %v9701_v9 = vld [vmem:[%s21025_s11 + $0x158] sm:$0xff] }
0x2979   :  { %v9705_v10 = vld [vmem:[%s21025_s11 + $0x178] sm:$0xff] }
0x297a   :  { %v9723_v8 = vrot.slane %v20436_v51, 7  ;;  %v9556_v6 = vrot.slane %v20436_v51, %v21034_v58  ;;  %v20537_v5 = vpack.c.bf16 %v9705_v10, %v9701_v9  ;;  %v11446_v51 = vld [vmem:[%s21028_s14] ss:$0 sm:$0xff] }
0x297c   :  { %9790 = vmatmul.mubr.f32.vlgmr.msra.gmra.mrb[86].mxu1 %v9723_v8  ;;  %v9557_v11 = vsel %vm6046_vm7, %v9556_v6, %v20206_v3  ;;  %v20475_v3 = vpack.c.bf16 %v9681_v42, %v9677_v19  ;;  %v9709_v6 = vld [vmem:[%s21025_s11 + $0x198] sm:$0xff]  ;;  %v9708_v19 = vld [vmem:[%s21025_s11 + $0x190] sm:$0xff] }
0x297d   :  { %11540 = vmatmul.mubr.f32.vlgmr.msra.gmra.mrb[86].mxu0 %v9557_v11  ;;  %14484 = vmatpush1.bf16.msra.mxu1 %v20231_v12  ;;  %v20557_v11 = vpack.c.bf16 %v9713_v59, %v9709_v6  ;;  %v9712_v42 = vld [vmem:[%s21025_s11 + $0x1b0] sm:$0xff]  ;;  %v21042_v6 = vld [vmem:[#allocation7_spill] sm:$0xff] }
0x297e   :  { %14452 = vmatpush1.bf16.msra.mxu0 %v20448_v40  ;;  %9860 = vmatprep.mubr.f32.mxu0 %v21041_v43  ;;  %v20573_v23 = vpack.c.bf16 %v9712_v42, %v9708_v19  ;;  %v20627_v59 = vadd.f32 %v21042_v6, %v19867_v36  ;;  %v21046_v36 = vld [vmem:[#allocation9_spill] sm:$0xff] }
0x297f   :  { %14454 = vmatprep.subr.bf16.mxu0 %v20450_v14  ;;  %14486 = vmatprep.subr.bf16.mxu1 %v20241_v15 }
0x2980   :  { %9967 = vmatprep.mubr.f32.mxu1 %v21041_v43 }
0x2981   :  { %14488 = vmatpush1.bf16.msra.mxu1 %v20256_v57 }
0x2982   :  { %14456 = vmatpush1.bf16.msra.mxu0 %v20471_v32  ;;  %14490 = vmatprep.subr.bf16.mxu1 %v20266_v13 }
0x2983   :  { %14458 = vmatprep.subr.bf16.mxu0 %v20475_v3 }
0x2985   :  { %14492 = vmatpush1.bf16.msra.mxu1 %v20281_v53 }
0x2986   :  { %14460 = vmatpush1.bf16.msra.mxu0 %v20493_v54  ;;  %14494 = vmatprep.subr.bf16.mxu1 %v20291_v2 }
0x2987   :  { %14462 = vmatprep.subr.bf16.mxu0 %v20497_v35 }
0x2989   :  { %14496 = vmatpush1.bf16.msra.mxu1 %v20306_v16 }
0x298a   :  { %14464 = vmatpush1.bf16.msra.mxu0 %v20513_v63  ;;  %14498 = vmatprep.subr.bf16.mxu1 %v20316_v60 }
0x298b   :  { %14466 = vmatprep.subr.bf16.mxu0 %v20517_v24 }
0x298d   :  { %14500 = vmatpush1.bf16.msra.mxu1 %v20331_v45 }
0x298e   :  { %14468 = vmatpush1.bf16.msra.mxu0 %v20533_v18  ;;  %14502 = vmatprep.subr.bf16.mxu1 %v20344_v41 }
0x298f   :  { %14470 = vmatprep.subr.bf16.mxu0 %v20537_v5 }
0x2991   :  { %14504 = vmatpush1.bf16.msra.mxu1 %v20355_v21 }
0x2992   :  { %14472 = vmatpush1.bf16.msra.mxu0 %v20553_v62  ;;  %14506 = vmatprep.subr.bf16.mxu1 %v20369_v0 }
0x2993   :  { %14474 = vmatprep.subr.bf16.mxu0 %v20557_v11 }
0x2995   :  { %14508 = vmatpush1.bf16.msra.mxu1 %v20388_v28 }
0x2996   :  { %14476 = vmatpush1.bf16.msra.mxu0 %v20573_v23  ;;  %14510 = vmatprep.subr.bf16.mxu1 %v20397_v33 }
0x2997   :  { %14478 = vmatprep.subr.bf16.mxu0 %v20577_v47 }
0x2999   :  { %14512 = vmatpush1.bf16.msra.mxu1 %v20407_v25 }
0x299a   :  { %14480 = vmatpush1.bf16.msra.mxu0 %v20587_v49  ;;  %14546 = vmatprep.subr.bf16.mxu1 %v20215_v27 }
0x299b   :  { %14514 = vmatprep.subr.bf16.mxu0 %v20417_v4 }
0x299d   :  { %9861 = vmatmul.mubr.f32.vlgmr.msra.gmra.mrb[88].mxu0 %v9723_v8  ;;  %v20619_v8 = vadd.f32 %v19876_v56, %v19870_v22 }
0x299e   :  { %14516 = vmatpush1.bf16.msra.mxu0 %v20448_v40  ;;  %10038 = vmatprep.mubr.f32.mxu0 %v21041_v43 }
0x299f   :  { %14518 = vmatprep.subr.bf16.mxu0 %v20450_v14 }
0x29a2   :  { %14520 = vmatpush1.bf16.msra.mxu0 %v20471_v32 }
0x29a3   :  { %14522 = vmatprep.subr.bf16.mxu0 %v20475_v3 }
0x29a6   :  { %14524 = vmatpush1.bf16.msra.mxu0 %v20493_v54 }
0x29a7   :  { %14526 = vmatprep.subr.bf16.mxu0 %v20497_v35 }
0x29aa   :  { %14528 = vmatpush1.bf16.msra.mxu0 %v20513_v63 }
0x29ab   :  { %14530 = vmatprep.subr.bf16.mxu0 %v20517_v24 }
0x29ae   :  { %14532 = vmatpush1.bf16.msra.mxu0 %v20533_v18 }
0x29af   :  { %14534 = vmatprep.subr.bf16.mxu0 %v20537_v5 }
0x29b2   :  { %14536 = vmatpush1.bf16.msra.mxu0 %v20553_v62 }
0x29b3   :  { %14538 = vmatprep.subr.bf16.mxu0 %v20557_v11 }
0x29b6   :  { %14540 = vmatpush1.bf16.msra.mxu0 %v20573_v23 }
0x29b7   :  { %14542 = vmatprep.subr.bf16.mxu0 %v20577_v47 }
0x29ba   :  { %14544 = vmatpush1.bf16.msra.mxu0 %v20587_v49 }
0x29bb   :  { %14578 = vmatprep.subr.bf16.mxu0 %v20417_v4 }
0x2a4f   :  { %v9791_v7 = vpop.f32.mrb[86].mxu1 }
0x2a50   :  { %v9647_v20 = vpop.f32.mrb[86].mxu0  ;;  %v9793_v29 = vpop.f32.mrb[87].mxu1  ;;  %v9867_v22 = vadd.f32 %v9791_v7, %v20627_v59 }
0x2a51   :  { %v9648_v9 = vadd.f32 %v11446_v51, %v9647_v20  ;;  %v9868_v10 = vadd.f32 %v9793_v29, %v20619_v8  ;;  %v11541_v17 = vpop.f32.mrb[87].mxu0  ;;  %v21043_v51 = vld [vmem:[#allocation10_spill] sm:$0xff]  ;;  %v21044_v20 = vld [vmem:[#allocation8_spill] sm:$0xff] }
0x2a52   :  { %v11447_v56 = vmul.f32 -1.442695, %v9867_v22  ;;  %v20633_v29 = vadd.f32 %v21044_v20, %v21043_v51 }
0x2a53   :  { %9651 = vst [vmem:[%s21029_s15] sm:$0xff] %v9648_v9  ;;  %v11448_v50 = vmul.f32 -1.442695, %v9868_v10  ;;  %v21045_v10 = vld [vmem:[#allocation11_spill] sm:$0xff] }
0x2a54   :  { %v20637_v17 = vadd.f32 %v21046_v36, %v21045_v10 }
0x2a55   :  { %15597 = vpow2.f32 %v11448_v50 }
0x2a56   :  { %15599 = vpow2.f32 %v11447_v56 }
0x2a5f   :  { %v15598_v19 = vpop.eup %15597 }
0x2a60   :  { %v9881_v42 = vadd.f32 1.0, %v15598_v19  ;;  %v15600_v52 = vpop.eup %15599 }
0x2a61   :  { %v9880_v9 = vadd.f32 1.0, %v15600_v52 }
0x2a62   :  { %15601 = vrcp.f32 %v9881_v42 }
0x2a63   :  { %15603 = vrcp.f32 %v9880_v9 }
0x2a6c   :  { %v15602_v44 = vpop.eup %15601 }
0x2a6d   :  { %v9893_v61 = vmul.f32 %v15602_v44, %v9891_v38  ;;  %v15604_v39 = vpop.eup %15603 }
0x2a70   :  { %v9862_v7 = vpop.f32.mrb[88].mxu0 }
0x2a71   :  { %v9869_v50 = vadd.f32 %v9862_v7, %v20633_v29  ;;  %v9864_v6 = vpop.f32.mrb[89].mxu0 }
0x2a72   :  { %v9870_v22 = vadd.f32 %v9864_v6, %v20637_v17 }
0x2a73   :  { %v11449_v56 = vmul.f32 -1.442695, %v9869_v50 }
0x2a74   :  { %15605 = vtanh.f32 %v9870_v22 }
0x2a75   :  { %15607 = vpow2.f32 %v11449_v56 }
0x2a7e   :  { %v15606_v19 = vpop.eup %15605 }
0x2a7f   :  { %v15608_v42 = vpop.eup %15607  ;;  %v9894_v38 = vmul.f32 %v15606_v19, %v15604_v39 }
0x2a80   :  { %v9882_v44 = vadd.f32 1.0, %v15608_v42 }
0x2a81   :  { %v20641_v52 = vadd.f32 %v9894_v38, %v9893_v61 }
0x2a82   :  { %15609 = vrcp.f32 %v9882_v44 }
0x2a83   :  { %15611 = vtanh.f32 %v20641_v52 }
0x2a8c   :  { %v15610_v51 = vpop.eup %15609 }
0x2a8d   :  { %v15612_v20 = vpop.eup %15611 }
0x2a8e   :  { %v20644_v10 = vmul.f32 %v15612_v20, %v15610_v51 }
0x2a90   :  { %9968 = vmatmul.mubr.f32.vlgmr.msra.gmra.mrb[88].mxu1 %v20644_v10  ;;  %10039 = vmatmul.mubr.f32.vlgmr.msra.gmra.mrb[90].mxu0 %v20644_v10 }
0x2a91   :  { %14548 = vmatpush1.bf16.msra.mxu1 %v20231_v12  ;;  %14580 = vmatpush1.bf16.msra.mxu0 %v20448_v40 }
0x2a92   :  { %14550 = vmatprep.subr.bf16.mxu1 %v20241_v15  ;;  %14582 = vmatprep.subr.bf16.mxu0 %v20450_v14 }
0x2a93   :  { %10160 = vmatprep.mubr.f32.mxu1 %v21041_v43  ;;  %10231 = vmatprep.mubr.f32.mxu0 %v21041_v43 }
0x2a95   :  { %14552 = vmatpush1.bf16.msra.mxu1 %v20256_v57  ;;  %14584 = vmatpush1.bf16.msra.mxu0 %v20471_v32 }
0x2a96   :  { %14554 = vmatprep.subr.bf16.mxu1 %v20266_v13  ;;  %14586 = vmatprep.subr.bf16.mxu0 %v20475_v3 }
0x2a99   :  { %14556 = vmatpush1.bf16.msra.mxu1 %v20281_v53  ;;  %14588 = vmatpush1.bf16.msra.mxu0 %v20493_v54 }
0x2a9a   :  { %14558 = vmatprep.subr.bf16.mxu1 %v20291_v2  ;;  %14590 = vmatprep.subr.bf16.mxu0 %v20497_v35 }
0x2a9d   :  { %14560 = vmatpush1.bf16.msra.mxu1 %v20306_v16  ;;  %14592 = vmatpush1.bf16.msra.mxu0 %v20513_v63 }
0x2a9e   :  { %14562 = vmatprep.subr.bf16.mxu1 %v20316_v60  ;;  %14594 = vmatprep.subr.bf16.mxu0 %v20517_v24 }
0x2aa1   :  { %14564 = vmatpush1.bf16.msra.mxu1 %v20331_v45  ;;  %14596 = vmatpush1.bf16.msra.mxu0 %v20533_v18 }
0x2aa2   :  { %14566 = vmatprep.subr.bf16.mxu1 %v20344_v41  ;;  %14598 = vmatprep.subr.bf16.mxu0 %v20537_v5 }
0x2aa5   :  { %14568 = vmatpush1.bf16.msra.mxu1 %v20355_v21  ;;  %14600 = vmatpush1.bf16.msra.mxu0 %v20553_v62 }
0x2aa6   :  { %14570 = vmatprep.subr.bf16.mxu1 %v20369_v0  ;;  %14602 = vmatprep.subr.bf16.mxu0 %v20557_v11 }
0x2aa9   :  { %14572 = vmatpush1.bf16.msra.mxu1 %v20388_v28  ;;  %14604 = vmatpush1.bf16.msra.mxu0 %v20573_v23 }
0x2aaa   :  { %14574 = vmatprep.subr.bf16.mxu1 %v20397_v33  ;;  %14606 = vmatprep.subr.bf16.mxu0 %v20577_v47 }
0x2aad   :  { %14576 = vmatpush1.bf16.msra.mxu1 %v20407_v25  ;;  %14608 = vmatpush1.bf16.msra.mxu0 %v20587_v49 }
0x2aae   :  { %14610 = vmatprep.subr.bf16.mxu1 %v20215_v27  ;;  %14642 = vmatprep.subr.bf16.mxu0 %v20417_v4 }
0x2b63   :  { %v9969_v61 = vpop.f32.mrb[88].mxu1  ;;  %v10040_v9 = vpop.f32.mrb[90].mxu0 }
0x2b64   :  { %v10049_v36 = vrot.slane %v9969_v61, 7  ;;  %v9971_v7 = vpop.f32.mrb[89].mxu1  ;;  %v10042_v50 = vpop.f32.mrb[91].mxu0  ;;  %v10051_v42 = vrot.slane %v10040_v9, 7  ;;  %v10081_v9 = vrot.slane %v20641_v52, 7 }
0x2b65   :  { %v10050_v6 = vrot.slane %v9971_v7, 7  ;;  %v10052_v38 = vrot.slane %v10042_v50, 7 }
0x2b66   :  { %v10057_v22 = vadd.f32 %v10049_v36, %v20627_v59  ;;  %v10059_v44 = vadd.f32 %v10051_v42, %v20633_v29 }
0x2b67   :  { %v10058_v56 = vadd.f32 %v10050_v6, %v20619_v8  ;;  %v10060_v51 = vadd.f32 %v10052_v38, %v20637_v17 }
0x2b68   :  { %v11450_v39 = vmul.f32 -1.442695, %v10057_v22  ;;  %v11452_v20 = vmul.f32 -1.442695, %v10059_v44 }
0x2b69   :  { %v11451_v19 = vmul.f32 -1.442695, %v10058_v56 }
0x2b6a   :  { %15613 = vpow2.f32 %v11450_v39 }
0x2b6b   :  { %15615 = vpow2.f32 %v11451_v19 }
0x2b6c   :  { %15617 = vtanh.f32 %v10060_v51 }
0x2b6d   :  { %15619 = vpow2.f32 %v11452_v20 }
0x2b74   :  { %v15614_v58 = vpop.eup %15613 }
0x2b75   :  { %v10070_v61 = vadd.f32 1.0, %v15614_v58  ;;  %v15616_v46 = vpop.eup %15615 }
0x2b76   :  { %v10071_v36 = vadd.f32 1.0, %v15616_v46  ;;  %v15618_v7 = vpop.eup %15617  ;;  %v9901_v46 = vrot.slane %v20644_v10, %v16373_v31 }
0x2b77   :  { %15621 = vrcp.f32 %v10070_v61  ;;  %v15620_v6 = vpop.eup %15619 }
0x2b78   :  { %15623 = vrcp.f32 %v10071_v36  ;;  %v10072_v39 = vadd.f32 1.0, %v15620_v6  ;;  %v9902_v52 = vsel %vm4644_vm0, %v9901_v46, 0.0 }
0x2b7a   :  { %15625 = vrcp.f32 %v10072_v39 }
0x2b81   :  { %v15622_v22 = vpop.eup %15621 }
0x2b82   :  { %v10084_v56 = vmul.f32 %v15622_v22, %v15618_v7  ;;  %v15624_v50 = vpop.eup %15623 }
0x2b83   :  { %v10083_v19 = vmul.f32 %v15624_v50, %v10081_v9 }
0x2b84   :  { %v15626_v58 = vpop.eup %15625 }
0x2b85   :  { %v20687_v42 = vadd.f32 %v10084_v56, %v10083_v19 }
0x2b87   :  { %15627 = vtanh.f32 %v20687_v42 }
0x2b91   :  { %v15628_v38 = vpop.eup %15627 }
0x2b92   :  { %v10087_v44 = vmul.f32 %v15628_v38, %v15626_v58 }
0x2b94   :  { %v10091_v51 = vrot.slane %v10087_v44, %v16379_v34  ;;  %v10094_v20 = vrot.slane %v10087_v44, 1 }
0x2b96   :  { %v20697_v61 = vsel %vm4846_vm1, %v10091_v51, %v9902_v52  ;;  %10161 = vmatmul.mubr.f32.vlgmr.msra.gmra.mrb[90].mxu1 %v10094_v20  ;;  %10232 = vmatmul.mubr.f32.vlgmr.msra.gmra.mrb[92].mxu0 %v10094_v20 }
0x2b97   :  { %14612 = vmatpush1.bf16.msra.mxu1 %v20231_v12  ;;  %14644 = vmatpush1.bf16.msra.mxu0 %v20448_v40 }
0x2b98   :  { %14614 = vmatprep.subr.bf16.mxu1 %v20241_v15  ;;  %14646 = vmatprep.subr.bf16.mxu0 %v20450_v14 }
0x2b99   :  { %10353 = vmatprep.mubr.f32.mxu1 %v21041_v43  ;;  %10424 = vmatprep.mubr.f32.mxu0 %v21041_v43 }
0x2b9b   :  { %14616 = vmatpush1.bf16.msra.mxu1 %v20256_v57  ;;  %14648 = vmatpush1.bf16.msra.mxu0 %v20471_v32 }
0x2b9c   :  { %14618 = vmatprep.subr.bf16.mxu1 %v20266_v13  ;;  %14650 = vmatprep.subr.bf16.mxu0 %v20475_v3 }
0x2b9f   :  { %14620 = vmatpush1.bf16.msra.mxu1 %v20281_v53  ;;  %14652 = vmatpush1.bf16.msra.mxu0 %v20493_v54 }
0x2ba0   :  { %14622 = vmatprep.subr.bf16.mxu1 %v20291_v2  ;;  %14654 = vmatprep.subr.bf16.mxu0 %v20497_v35 }
0x2ba3   :  { %14624 = vmatpush1.bf16.msra.mxu1 %v20306_v16  ;;  %14656 = vmatpush1.bf16.msra.mxu0 %v20513_v63 }
0x2ba4   :  { %14626 = vmatprep.subr.bf16.mxu1 %v20316_v60  ;;  %14658 = vmatprep.subr.bf16.mxu0 %v20517_v24 }
0x2ba7   :  { %14628 = vmatpush1.bf16.msra.mxu1 %v20331_v45  ;;  %14660 = vmatpush1.bf16.msra.mxu0 %v20533_v18 }
0x2ba8   :  { %14630 = vmatprep.subr.bf16.mxu1 %v20344_v41  ;;  %14662 = vmatprep.subr.bf16.mxu0 %v20537_v5 }
0x2bab   :  { %14632 = vmatpush1.bf16.msra.mxu1 %v20355_v21  ;;  %14664 = vmatpush1.bf16.msra.mxu0 %v20553_v62 }
0x2bac   :  { %14634 = vmatprep.subr.bf16.mxu1 %v20369_v0  ;;  %14666 = vmatprep.subr.bf16.mxu0 %v20557_v11 }
0x2baf   :  { %14636 = vmatpush1.bf16.msra.mxu1 %v20388_v28  ;;  %14668 = vmatpush1.bf16.msra.mxu0 %v20573_v23 }
0x2bb0   :  { %14638 = vmatprep.subr.bf16.mxu1 %v20397_v33  ;;  %14670 = vmatprep.subr.bf16.mxu0 %v20577_v47 }
0x2bb3   :  { %14640 = vmatpush1.bf16.msra.mxu1 %v20407_v25  ;;  %14672 = vmatpush1.bf16.msra.mxu0 %v20587_v49 }
0x2bb4   :  { %14674 = vmatprep.subr.bf16.mxu1 %v20215_v27  ;;  %14706 = vmatprep.subr.bf16.mxu0 %v20417_v4 }
0x2c69   :  { %v10162_v31 = vpop.f32.mrb[90].mxu1  ;;  %v10233_v34 = vpop.f32.mrb[92].mxu0 }
0x2c6a   :  { %v10242_v10 = vrot.slane %v10162_v31, 6  ;;  %v10164_v36 = vpop.f32.mrb[91].mxu1  ;;  %v10235_v7 = vpop.f32.mrb[93].mxu0  ;;  %v10244_v39 = vrot.slane %v10233_v34, 6  ;;  %v10274_v34 = vrot.slane %v20687_v42, 7 }
0x2c6b   :  { %v10243_v6 = vrot.slane %v10164_v36, 6  ;;  %v10245_v19 = vrot.slane %v10235_v7, 6 }
0x2c6c   :  { %v10250_v22 = vadd.f32 %v10242_v10, %v20627_v59  ;;  %v10252_v58 = vadd.f32 %v10244_v39, %v20633_v29 }
0x2c6d   :  { %v10251_v9 = vadd.f32 %v10243_v6, %v20619_v8  ;;  %v10253_v38 = vadd.f32 %v10245_v19, %v20637_v17 }
0x2c6e   :  { %v11453_v56 = vmul.f32 -1.442695, %v10250_v22  ;;  %v11455_v46 = vmul.f32 -1.442695, %v10252_v58 }
0x2c6f   :  { %v11454_v50 = vmul.f32 -1.442695, %v10251_v9 }
0x2c70   :  { %15629 = vpow2.f32 %v11453_v56 }
0x2c71   :  { %15631 = vpow2.f32 %v11454_v50 }
0x2c72   :  { %15633 = vtanh.f32 %v10253_v38 }
0x2c73   :  { %15635 = vpow2.f32 %v11455_v46 }
0x2c7a   :  { %v15630_v44 = vpop.eup %15629 }
0x2c7b   :  { %v10263_v51 = vadd.f32 1.0, %v15630_v44  ;;  %v15632_v20 = vpop.eup %15631 }
0x2c7c   :  { %v10264_v52 = vadd.f32 1.0, %v15632_v20  ;;  %v15634_v31 = vpop.eup %15633 }
0x2c7d   :  { %15637 = vrcp.f32 %v10263_v51  ;;  %v15636_v10 = vpop.eup %15635 }
0x2c7e   :  { %15639 = vrcp.f32 %v10264_v52  ;;  %v10265_v22 = vadd.f32 1.0, %v15636_v10 }
0x2c80   :  { %15641 = vrcp.f32 %v10265_v22 }
0x2c87   :  { %v15638_v36 = vpop.eup %15637 }
0x2c88   :  { %v10277_v6 = vmul.f32 %v15638_v36, %v15634_v31  ;;  %v15640_v7 = vpop.eup %15639 }
0x2c89   :  { %v10276_v9 = vmul.f32 %v15640_v7, %v10274_v34 }
0x2c8a   :  { %v15642_v50 = vpop.eup %15641 }
0x2c8b   :  { %v20738_v56 = vadd.f32 %v10277_v6, %v10276_v9 }
0x2c8d   :  { %15643 = vtanh.f32 %v20738_v56 }
0x2c97   :  { %v15644_v39 = vpop.eup %15643 }
0x2c98   :  { %v10280_v19 = vmul.f32 %v15644_v39, %v15642_v50 }
0x2c9a   :  { %v10284_v58 = vrot.slane %v10280_v19, %v16388_v37  ;;  %v10287_v38 = vrot.slane %v10280_v19, 2 }
0x2c9c   :  { %10354 = vmatmul.mubr.f32.vlgmr.msra.gmra.mrb[92].mxu1 %v10287_v38  ;;  %10425 = vmatmul.mubr.f32.vlgmr.msra.gmra.mrb[94].mxu0 %v10287_v38  ;;  %v20745_v42 = vsel %vm5046_vm2, %v10284_v58, %v20697_v61 }
0x2c9d   :  { %14676 = vmatpush1.bf16.msra.mxu1 %v20231_v12  ;;  %14708 = vmatpush1.bf16.msra.mxu0 %v20448_v40 }
0x2c9e   :  { %14678 = vmatprep.subr.bf16.mxu1 %v20241_v15  ;;  %14710 = vmatprep.subr.bf16.mxu0 %v20450_v14 }
0x2c9f   :  { %10546 = vmatprep.mubr.f32.mxu1 %v21041_v43  ;;  %10617 = vmatprep.mubr.f32.mxu0 %v21041_v43 }
0x2ca1   :  { %14680 = vmatpush1.bf16.msra.mxu1 %v20256_v57  ;;  %14712 = vmatpush1.bf16.msra.mxu0 %v20471_v32 }
0x2ca2   :  { %14682 = vmatprep.subr.bf16.mxu1 %v20266_v13  ;;  %14714 = vmatprep.subr.bf16.mxu0 %v20475_v3 }
0x2ca5   :  { %14684 = vmatpush1.bf16.msra.mxu1 %v20281_v53  ;;  %14716 = vmatpush1.bf16.msra.mxu0 %v20493_v54 }
0x2ca6   :  { %14686 = vmatprep.subr.bf16.mxu1 %v20291_v2  ;;  %14718 = vmatprep.subr.bf16.mxu0 %v20497_v35 }
0x2ca9   :  { %14688 = vmatpush1.bf16.msra.mxu1 %v20306_v16  ;;  %14720 = vmatpush1.bf16.msra.mxu0 %v20513_v63 }
0x2caa   :  { %14690 = vmatprep.subr.bf16.mxu1 %v20316_v60  ;;  %14722 = vmatprep.subr.bf16.mxu0 %v20517_v24 }
0x2cad   :  { %14692 = vmatpush1.bf16.msra.mxu1 %v20331_v45  ;;  %14724 = vmatpush1.bf16.msra.mxu0 %v20533_v18 }
0x2cae   :  { %14694 = vmatprep.subr.bf16.mxu1 %v20344_v41  ;;  %14726 = vmatprep.subr.bf16.mxu0 %v20537_v5 }
0x2cb1   :  { %14696 = vmatpush1.bf16.msra.mxu1 %v20355_v21  ;;  %14728 = vmatpush1.bf16.msra.mxu0 %v20553_v62 }
0x2cb2   :  { %14698 = vmatprep.subr.bf16.mxu1 %v20369_v0  ;;  %14730 = vmatprep.subr.bf16.mxu0 %v20557_v11 }
0x2cb5   :  { %14700 = vmatpush1.bf16.msra.mxu1 %v20388_v28  ;;  %14732 = vmatpush1.bf16.msra.mxu0 %v20573_v23 }
0x2cb6   :  { %14702 = vmatprep.subr.bf16.mxu1 %v20397_v33  ;;  %14734 = vmatprep.subr.bf16.mxu0 %v20577_v47 }
0x2cb9   :  { %14704 = vmatpush1.bf16.msra.mxu1 %v20407_v25  ;;  %14736 = vmatpush1.bf16.msra.mxu0 %v20587_v49 }
0x2cba   :  { %14738 = vmatprep.subr.bf16.mxu1 %v20215_v27  ;;  %14770 = vmatprep.subr.bf16.mxu0 %v20417_v4 }
0x2d6f   :  { %v10355_v37 = vpop.f32.mrb[92].mxu1  ;;  %v10426_v61 = vpop.f32.mrb[94].mxu0 }
0x2d70   :  { %v10435_v46 = vrot.slane %v10355_v37, 5  ;;  %v10357_v44 = vpop.f32.mrb[93].mxu1  ;;  %v10428_v51 = vpop.f32.mrb[95].mxu0  ;;  %v10437_v34 = vrot.slane %v10426_v61, 5  ;;  %v10467_v61 = vrot.slane %v20738_v56, 7 }
0x2d71   :  { %v10436_v20 = vrot.slane %v10357_v44, 5  ;;  %v10438_v6 = vrot.slane %v10428_v51, 5 }
0x2d72   :  { %v10443_v52 = vadd.f32 %v10435_v46, %v20627_v59  ;;  %v10445_v7 = vadd.f32 %v10437_v34, %v20633_v29 }
0x2d73   :  { %v10444_v31 = vadd.f32 %v10436_v20, %v20619_v8  ;;  %v10446_v22 = vadd.f32 %v10438_v6, %v20637_v17 }
0x2d74   :  { %v11456_v10 = vmul.f32 -1.442695, %v10443_v52  ;;  %v11458_v9 = vmul.f32 -1.442695, %v10445_v7 }
0x2d75   :  { %v11457_v36 = vmul.f32 -1.442695, %v10444_v31 }
0x2d76   :  { %15645 = vpow2.f32 %v11456_v10 }
0x2d77   :  { %15647 = vpow2.f32 %v11457_v36 }
0x2d78   :  { %15649 = vtanh.f32 %v10446_v22 }
0x2d79   :  { %15651 = vpow2.f32 %v11458_v9 }
0x2d80   :  { %v15646_v50 = vpop.eup %15645 }
0x2d81   :  { %v10456_v39 = vadd.f32 1.0, %v15646_v50  ;;  %v15648_v19 = vpop.eup %15647 }
0x2d82   :  { %v10457_v58 = vadd.f32 1.0, %v15648_v19  ;;  %v15650_v38 = vpop.eup %15649 }
0x2d83   :  { %15653 = vrcp.f32 %v10456_v39  ;;  %v15652_v37 = vpop.eup %15651 }
0x2d84   :  { %15655 = vrcp.f32 %v10457_v58  ;;  %v10458_v20 = vadd.f32 1.0, %v15652_v37 }
0x2d86   :  { %15657 = vrcp.f32 %v10458_v20 }
0x2d8d   :  { %v15654_v46 = vpop.eup %15653 }
0x2d8e   :  { %v10470_v44 = vmul.f32 %v15654_v46, %v15650_v38  ;;  %v15656_v51 = vpop.eup %15655 }
0x2d8f   :  { %v10469_v52 = vmul.f32 %v15656_v51, %v10467_v61 }
0x2d90   :  { %v15658_v10 = vpop.eup %15657 }
0x2d91   :  { %v20786_v31 = vadd.f32 %v10470_v44, %v10469_v52 }
0x2d93   :  { %15659 = vtanh.f32 %v20786_v31 }
0x2d9d   :  { %v15660_v36 = vpop.eup %15659 }
0x2d9e   :  { %v10473_v34 = vmul.f32 %v15660_v36, %v15658_v10 }
0x2da0   :  { %v10477_v6 = vrot.slane %v10473_v34, %v16396_v55  ;;  %v10480_v7 = vrot.slane %v10473_v34, 3 }
0x2da2   :  { %10547 = vmatmul.mubr.f32.vlgmr.msra.gmra.mrb[94].mxu1 %v10480_v7  ;;  %10618 = vmatmul.mubr.f32.vlgmr.msra.gmra.mrb[96].mxu0 %v10480_v7  ;;  %v20793_v56 = vsel %vm5246_vm3, %v10477_v6, %v20745_v42 }
0x2da3   :  { %14740 = vmatpush1.bf16.msra.mxu1 %v20231_v12  ;;  %14772 = vmatpush1.bf16.msra.mxu0 %v20448_v40 }
0x2da4   :  { %14742 = vmatprep.subr.bf16.mxu1 %v20241_v15  ;;  %14774 = vmatprep.subr.bf16.mxu0 %v20450_v14 }
0x2da5   :  { %10739 = vmatprep.mubr.f32.mxu1 %v21041_v43  ;;  %10810 = vmatprep.mubr.f32.mxu0 %v21041_v43 }
0x2da7   :  { %14744 = vmatpush1.bf16.msra.mxu1 %v20256_v57  ;;  %14776 = vmatpush1.bf16.msra.mxu0 %v20471_v32 }
0x2da8   :  { %14746 = vmatprep.subr.bf16.mxu1 %v20266_v13  ;;  %14778 = vmatprep.subr.bf16.mxu0 %v20475_v3 }
0x2dab   :  { %14748 = vmatpush1.bf16.msra.mxu1 %v20281_v53  ;;  %14780 = vmatpush1.bf16.msra.mxu0 %v20493_v54 }
0x2dac   :  { %14750 = vmatprep.subr.bf16.mxu1 %v20291_v2  ;;  %14782 = vmatprep.subr.bf16.mxu0 %v20497_v35 }
0x2daf   :  { %14752 = vmatpush1.bf16.msra.mxu1 %v20306_v16  ;;  %14784 = vmatpush1.bf16.msra.mxu0 %v20513_v63 }
0x2db0   :  { %14754 = vmatprep.subr.bf16.mxu1 %v20316_v60  ;;  %14786 = vmatprep.subr.bf16.mxu0 %v20517_v24 }
0x2db3   :  { %14756 = vmatpush1.bf16.msra.mxu1 %v20331_v45  ;;  %14788 = vmatpush1.bf16.msra.mxu0 %v20533_v18 }
0x2db4   :  { %14758 = vmatprep.subr.bf16.mxu1 %v20344_v41  ;;  %14790 = vmatprep.subr.bf16.mxu0 %v20537_v5 }
0x2db7   :  { %14760 = vmatpush1.bf16.msra.mxu1 %v20355_v21  ;;  %14792 = vmatpush1.bf16.msra.mxu0 %v20553_v62 }
0x2db8   :  { %14762 = vmatprep.subr.bf16.mxu1 %v20369_v0  ;;  %14794 = vmatprep.subr.bf16.mxu0 %v20557_v11 }
0x2dbb   :  { %14764 = vmatpush1.bf16.msra.mxu1 %v20388_v28  ;;  %14796 = vmatpush1.bf16.msra.mxu0 %v20573_v23 }
0x2dbc   :  { %14766 = vmatprep.subr.bf16.mxu1 %v20397_v33  ;;  %14798 = vmatprep.subr.bf16.mxu0 %v20577_v47 }
0x2dbf   :  { %14768 = vmatpush1.bf16.msra.mxu1 %v20407_v25  ;;  %14800 = vmatpush1.bf16.msra.mxu0 %v20587_v49 }
0x2dc0   :  { %14802 = vmatprep.subr.bf16.mxu1 %v20215_v27  ;;  %14834 = vmatprep.subr.bf16.mxu0 %v20417_v4 }
0x2e75   :  { %v10548_v55 = vpop.f32.mrb[94].mxu1  ;;  %v10619_v42 = vpop.f32.mrb[96].mxu0 }
0x2e76   :  { %v10628_v22 = vrot.slane %v10548_v55, 4  ;;  %v10550_v9 = vpop.f32.mrb[95].mxu1  ;;  %v10621_v50 = vpop.f32.mrb[97].mxu0  ;;  %v10630_v46 = vrot.slane %v10619_v42, 4  ;;  %v10660_v42 = vrot.slane %v20786_v31, 7 }
0x2e77   :  { %v10629_v39 = vrot.slane %v10550_v9, 4  ;;  %v10631_v61 = vrot.slane %v10621_v50, 4 }
0x2e78   :  { %v10636_v19 = vadd.f32 %v10628_v22, %v20627_v59  ;;  %v10638_v44 = vadd.f32 %v10630_v46, %v20633_v29 }
0x2e79   :  { %v10637_v58 = vadd.f32 %v10629_v39, %v20619_v8  ;;  %v10639_v51 = vadd.f32 %v10631_v61, %v20637_v17 }
0x2e7a   :  { %v11459_v38 = vmul.f32 -1.442695, %v10636_v19  ;;  %v11461_v20 = vmul.f32 -1.442695, %v10638_v44 }
0x2e7b   :  { %v11460_v37 = vmul.f32 -1.442695, %v10637_v58 }
0x2e7c   :  { %15661 = vpow2.f32 %v11459_v38 }
0x2e7d   :  { %15663 = vpow2.f32 %v11460_v37 }
0x2e7e   :  { %15665 = vtanh.f32 %v10639_v51 }
0x2e7f   :  { %15667 = vpow2.f32 %v11461_v20 }
0x2e86   :  { %v15662_v52 = vpop.eup %15661 }
0x2e87   :  { %v10649_v10 = vadd.f32 1.0, %v15662_v52  ;;  %v15664_v36 = vpop.eup %15663 }
0x2e88   :  { %v10650_v34 = vadd.f32 1.0, %v15664_v36  ;;  %v15666_v6 = vpop.eup %15665 }
0x2e89   :  { %15669 = vrcp.f32 %v10649_v10  ;;  %v15668_v7 = vpop.eup %15667 }
0x2e8a   :  { %15671 = vrcp.f32 %v10650_v34  ;;  %v10651_v50 = vadd.f32 1.0, %v15668_v7 }
0x2e8c   :  { %15673 = vrcp.f32 %v10651_v50 }
0x2e93   :  { %v15670_v55 = vpop.eup %15669 }
0x2e94   :  { %v10663_v22 = vmul.f32 %v15670_v55, %v15666_v6  ;;  %v15672_v9 = vpop.eup %15671 }
0x2e95   :  { %v10662_v39 = vmul.f32 %v15672_v9, %v10660_v42 }
0x2e96   :  { %v15674_v58 = vpop.eup %15673 }
0x2e97   :  { %v20834_v19 = vadd.f32 %v10663_v22, %v10662_v39 }
0x2e99   :  { %15675 = vtanh.f32 %v20834_v19 }
0x2ea3   :  { %v15676_v38 = vpop.eup %15675 }
0x2ea4   :  { %v10666_v37 = vmul.f32 %v15676_v38, %v15674_v58 }
0x2ea6   :  { %v10670_v46 = vrot.slane %v10666_v37, %v8976_v26  ;;  %v10673_v61 = vrot.slane %v10666_v37, 4 }
0x2ea8   :  { %10740 = vmatmul.mubr.f32.vlgmr.msra.gmra.mrb[96].mxu1 %v10673_v61  ;;  %10811 = vmatmul.mubr.f32.vlgmr.msra.gmra.mrb[98].mxu0 %v10673_v61  ;;  %v20842_v31 = vsel %vm5446_vm4, %v10670_v46, %v20793_v56  ;;  %v10853_v46 = vrot.slane %v20834_v19, 7 }
0x2ea9   :  { %14804 = vmatpush1.bf16.msra.mxu1 %v20231_v12  ;;  %14836 = vmatpush1.bf16.msra.mxu0 %v20448_v40 }
0x2eaa   :  { %14806 = vmatprep.subr.bf16.mxu1 %v20241_v15  ;;  %14838 = vmatprep.subr.bf16.mxu0 %v20450_v14 }
0x2eab   :  { %10932 = vmatprep.mubr.f32.mxu1 %v21041_v43  ;;  %11003 = vmatprep.mubr.f32.mxu0 %v21041_v43 }
0x2ead   :  { %14808 = vmatpush1.bf16.msra.mxu1 %v20256_v57  ;;  %14840 = vmatpush1.bf16.msra.mxu0 %v20471_v32 }
0x2eae   :  { %14810 = vmatprep.subr.bf16.mxu1 %v20266_v13  ;;  %14842 = vmatprep.subr.bf16.mxu0 %v20475_v3 }
0x2eb1   :  { %14812 = vmatpush1.bf16.msra.mxu1 %v20281_v53  ;;  %14844 = vmatpush1.bf16.msra.mxu0 %v20493_v54 }
0x2eb2   :  { %14814 = vmatprep.subr.bf16.mxu1 %v20291_v2  ;;  %14846 = vmatprep.subr.bf16.mxu0 %v20497_v35 }
0x2eb5   :  { %14816 = vmatpush1.bf16.msra.mxu1 %v20306_v16  ;;  %14848 = vmatpush1.bf16.msra.mxu0 %v20513_v63 }
0x2eb6   :  { %14818 = vmatprep.subr.bf16.mxu1 %v20316_v60  ;;  %14850 = vmatprep.subr.bf16.mxu0 %v20517_v24 }
0x2eb9   :  { %14820 = vmatpush1.bf16.msra.mxu1 %v20331_v45  ;;  %14852 = vmatpush1.bf16.msra.mxu0 %v20533_v18 }
0x2eba   :  { %14822 = vmatprep.subr.bf16.mxu1 %v20344_v41  ;;  %14854 = vmatprep.subr.bf16.mxu0 %v20537_v5 }
0x2ebd   :  { %14824 = vmatpush1.bf16.msra.mxu1 %v20355_v21  ;;  %14856 = vmatpush1.bf16.msra.mxu0 %v20553_v62 }
0x2ebe   :  { %14826 = vmatprep.subr.bf16.mxu1 %v20369_v0  ;;  %14858 = vmatprep.subr.bf16.mxu0 %v20557_v11 }
0x2ec1   :  { %14828 = vmatpush1.bf16.msra.mxu1 %v20388_v28  ;;  %14860 = vmatpush1.bf16.msra.mxu0 %v20573_v23 }
0x2ec2   :  { %14830 = vmatprep.subr.bf16.mxu1 %v20397_v33  ;;  %14862 = vmatprep.subr.bf16.mxu0 %v20577_v47 }
0x2ec5   :  { %14832 = vmatpush1.bf16.msra.mxu1 %v20407_v25  ;;  %14864 = vmatpush1.bf16.msra.mxu0 %v20587_v49 }
0x2ec6   :  { %14866 = vmatprep.subr.bf16.mxu1 %v20215_v27  ;;  %14898 = vmatprep.subr.bf16.mxu0 %v20417_v4 }
0x2f7b   :  { %v10741_v26 = vpop.f32.mrb[96].mxu1  ;;  %v10812_v56 = vpop.f32.mrb[98].mxu0 }
0x2f7c   :  { %v10821_v44 = vrot.slane %v10741_v26, 3  ;;  %v10743_v51 = vpop.f32.mrb[97].mxu1  ;;  %v10814_v20 = vpop.f32.mrb[99].mxu0  ;;  %v10823_v7 = vrot.slane %v10812_v56, 3 }
0x2f7d   :  { %v10822_v52 = vrot.slane %v10743_v51, 3  ;;  %v10824_v55 = vrot.slane %v10814_v20, 3 }
0x2f7e   :  { %v10829_v10 = vadd.f32 %v10821_v44, %v20627_v59  ;;  %v10831_v27 = vadd.f32 %v10823_v7, %v20633_v29 }
0x2f7f   :  { %v10830_v36 = vadd.f32 %v10822_v52, %v20619_v8  ;;  %v10832_v4 = vadd.f32 %v10824_v55, %v20637_v17 }
0x2f80   :  { %v11462_v34 = vmul.f32 -1.442695, %v10829_v10  ;;  %v11464_v42 = vmul.f32 -1.442695, %v10831_v27  ;;  %v11251_v27 = vld [vmem:[%s21027_s13] sm:$0xff] }
0x2f81   :  { %v11463_v6 = vmul.f32 -1.442695, %v10830_v36 }
0x2f82   :  { %15677 = vpow2.f32 %v11462_v34 }
0x2f83   :  { %15679 = vpow2.f32 %v11463_v6  ;;  %v21047_v6 = vsub.s32 6, %v16370_v30 }
0x2f84   :  { %15681 = vtanh.f32 %v10832_v4  ;;  %v11252_v4 = vld [vmem:[%s21027_s13 + $0x8] sm:$0xff] }
0x2f85   :  { %15683 = vpow2.f32 %v11464_v42  ;;  %v14930_v42 = vpack.c.bf16 %v11252_v4, %v11251_v27 }
0x2f8c   :  { %v15678_v22 = vpop.eup %15677 }
0x2f8d   :  { %v10842_v9 = vadd.f32 1.0, %v15678_v22  ;;  %v15680_v50 = vpop.eup %15679  ;;  %v11253_v22 = vld [vmem:[%s21027_s13 + $0x10] sm:$0xff] }
0x2f8e   :  { %v10843_v39 = vadd.f32 1.0, %v15680_v50  ;;  %v15682_v58 = vpop.eup %15681  ;;  %v11255_v50 = vld [vmem:[%s21027_s13 + $0x20] sm:$0xff] }
0x2f8f   :  { %15685 = vrcp.f32 %v10842_v9  ;;  %v15684_v38 = vpop.eup %15683 }
0x2f90   :  { %15687 = vrcp.f32 %v10843_v39  ;;  %v10844_v56 = vadd.f32 1.0, %v15684_v38  ;;  %v11256_v39 = vld [vmem:[%s21027_s13 + $0x28] sm:$0xff]  ;;  %v11257_v38 = vld [vmem:[%s21027_s13 + $0x30] sm:$0xff] }
0x2f92   :  { %15689 = vrcp.f32 %v10844_v56 }
0x2f99   :  { %v15686_v37 = vpop.eup %15685 }
0x2f9a   :  { %v10856_v61 = vmul.f32 %v15686_v37, %v15682_v58  ;;  %v15688_v26 = vpop.eup %15687  ;;  %v14936_v58 = vpack.c.bf16 %v11256_v39, %v11255_v50  ;;  %v11258_v37 = vld [vmem:[%s21027_s13 + $0x38] sm:$0xff] }
0x2f9b   :  { %v10855_v44 = vmul.f32 %v15688_v26, %v10853_v46  ;;  %v14939_v46 = vpack.c.bf16 %v11258_v37, %v11257_v38  ;;  %v11260_v26 = vld [vmem:[%s21027_s13 + $0x48] sm:$0xff] }
0x2f9c   :  { %v15690_v20 = vpop.eup %15689 }
0x2f9d   :  { %v20883_v51 = vadd.f32 %v10856_v61, %v10855_v44  ;;  %v11259_v61 = vld [vmem:[%s21027_s13 + $0x40] sm:$0xff]  ;;  %v11261_v44 = vld [vmem:[%s21027_s13 + $0x50] sm:$0xff] }
0x2f9e   :  { %v14942_v56 = vpack.c.bf16 %v11260_v26, %v11259_v61 }
0x2f9f   :  { %15691 = vtanh.f32 %v20883_v51 }
0x2fa9   :  { %v15692_v52 = vpop.eup %15691 }
0x2faa   :  { %v10859_v10 = vmul.f32 %v15692_v52, %v15690_v20  ;;  %v11263_v52 = vld [vmem:[%s21027_s13 + $0x60] sm:$0xff] }
0x2fac   :  { %v10863_v36 = vrot.slane %v10859_v10, %v9169_v48  ;;  %v10866_v34 = vrot.slane %v10859_v10, 5  ;;  %v11264_v10 = vld [vmem:[%s21027_s13 + $0x68] sm:$0xff] }
0x2fae   :  { %10933 = vmatmul.mubr.f32.vlgmr.msra.gmra.mrb[98].mxu1 %v10866_v34  ;;  %11004 = vmatmul.mubr.f32.vlgmr.msra.gmra.mrb[100].mxu0 %v10866_v34  ;;  %v20891_v19 = vsel %vm5646_vm5, %v10863_v36, %v20842_v31  ;;  %v14948_v36 = vpack.c.bf16 %v11264_v10, %v11263_v52  ;;  %v11265_v34 = vld [vmem:[%s21027_s13 + $0x70] sm:$0xff] }
0x2faf   :  { %14868 = vmatpush1.bf16.msra.mxu1 %v20231_v12  ;;  %14900 = vmatpush1.bf16.msra.mxu0 %v20448_v40 }
0x2fb0   :  { %14870 = vmatprep.subr.bf16.mxu1 %v20241_v15  ;;  %14902 = vmatprep.subr.bf16.mxu0 %v20450_v14 }
0x2fb1   :  { %11125 = vmatprep.mubr.f32.mxu1 %v21041_v43  ;;  %11196 = vmatprep.mubr.f32.mxu0 %v21041_v43 }
0x2fb3   :  { %14872 = vmatpush1.bf16.msra.mxu1 %v20256_v57  ;;  %14904 = vmatpush1.bf16.msra.mxu0 %v20471_v32 }
0x2fb4   :  { %14874 = vmatprep.subr.bf16.mxu1 %v20266_v13  ;;  %14906 = vmatprep.subr.bf16.mxu0 %v20475_v3 }
0x2fb7   :  { %14876 = vmatpush1.bf16.msra.mxu1 %v20281_v53  ;;  %14908 = vmatpush1.bf16.msra.mxu0 %v20493_v54 }
0x2fb8   :  { %14878 = vmatprep.subr.bf16.mxu1 %v20291_v2  ;;  %14910 = vmatprep.subr.bf16.mxu0 %v20497_v35 }
0x2fbb   :  { %14880 = vmatpush1.bf16.msra.mxu1 %v20306_v16  ;;  %14912 = vmatpush1.bf16.msra.mxu0 %v20513_v63  ;;  %v11046_v63 = vrot.slane %v20883_v51, 7  ;;  %v11262_v51 = vld [vmem:[%s21027_s13 + $0x58] sm:$0xff] }
0x2fbc   :  { %14882 = vmatprep.subr.bf16.mxu1 %v20316_v60  ;;  %14914 = vmatprep.subr.bf16.mxu0 %v20517_v24  ;;  %v14945_v20 = vpack.c.bf16 %v11262_v51, %v11261_v44 }
0x2fbf   :  { %14884 = vmatpush1.bf16.msra.mxu1 %v20331_v45  ;;  %14916 = vmatpush1.bf16.msra.mxu0 %v20533_v18 }
0x2fc0   :  { %14886 = vmatprep.subr.bf16.mxu1 %v20344_v41  ;;  %14918 = vmatprep.subr.bf16.mxu0 %v20537_v5 }
0x2fc3   :  { %14888 = vmatpush1.bf16.msra.mxu1 %v20355_v21  ;;  %14920 = vmatpush1.bf16.msra.mxu0 %v20553_v62 }
0x2fc4   :  { %14890 = vmatprep.subr.bf16.mxu1 %v20369_v0  ;;  %14922 = vmatprep.subr.bf16.mxu0 %v20557_v11 }
0x2fc7   :  { %14892 = vmatpush1.bf16.msra.mxu1 %v20388_v28  ;;  %14924 = vmatpush1.bf16.msra.mxu0 %v20573_v23 }
0x2fc8   :  { %14894 = vmatprep.subr.bf16.mxu1 %v20397_v33  ;;  %14926 = vmatprep.subr.bf16.mxu0 %v20577_v47 }
0x2fcb   :  { %14896 = vmatpush1.bf16.msra.mxu1 %v20407_v25  ;;  %14928 = vmatpush1.bf16.msra.mxu0 %v20587_v49 }
0x2fcc   :  { %14929 = vmatprep.subr.bf16.mxu1 %v15728_v1 }
0x3081   :  { %v10934_v48 = vpop.f32.mrb[98].mxu1  ;;  %v11005_v12 = vpop.f32.mrb[100].mxu0 }
0x3082   :  { %v11014_v15 = vrot.slane %v10934_v48, 2  ;;  %v10936_v57 = vpop.f32.mrb[99].mxu1  ;;  %v11007_v13 = vpop.f32.mrb[101].mxu0  ;;  %v11016_v41 = vrot.slane %v11005_v12, 2 }
0x3083   :  { %v11015_v53 = vrot.slane %v10936_v57, 2  ;;  %v11017_v21 = vrot.slane %v11007_v13, 2 }
0x3084   :  { %v11022_v2 = vadd.f32 %v11014_v15, %v20627_v59  ;;  %v11024_v0 = vadd.f32 %v11016_v41, %v20633_v29 }
0x3085   :  { %v11023_v16 = vadd.f32 %v11015_v53, %v20619_v8  ;;  %v11025_v28 = vadd.f32 %v11017_v21, %v20637_v17 }
0x3086   :  { %v11465_v60 = vmul.f32 -1.442695, %v11022_v2  ;;  %v11467_v33 = vmul.f32 -1.442695, %v11024_v0 }
0x3087   :  { %v11466_v45 = vmul.f32 -1.442695, %v11023_v16 }
0x3088   :  { %15693 = vpow2.f32 %v11465_v60 }
0x3089   :  { %15695 = vpow2.f32 %v11466_v45 }
0x308a   :  { %15697 = vtanh.f32 %v11025_v28 }
0x308b   :  { %15699 = vpow2.f32 %v11467_v33 }
0x3092   :  { %v15694_v25 = vpop.eup %15693 }
0x3093   :  { %v11035_v40 = vadd.f32 1.0, %v15694_v25  ;;  %v15696_v14 = vpop.eup %15695 }
0x3094   :  { %v11036_v32 = vadd.f32 1.0, %v15696_v14  ;;  %v15698_v3 = vpop.eup %15697 }
0x3095   :  { %15701 = vrcp.f32 %v11035_v40  ;;  %v15700_v54 = vpop.eup %15699 }
0x3096   :  { %15703 = vrcp.f32 %v11036_v32  ;;  %v11037_v5 = vadd.f32 1.0, %v15700_v54 }
0x3098   :  { %15705 = vrcp.f32 %v11037_v5 }
0x309f   :  { %v15702_v35 = vpop.eup %15701 }
0x30a0   :  { %v11049_v24 = vmul.f32 %v15702_v35, %v15698_v3  ;;  %v15704_v18 = vpop.eup %15703 }
0x30a1   :  { %v11048_v62 = vmul.f32 %v15704_v18, %v11046_v63 }
0x30a2   :  { %v15706_v23 = vpop.eup %15705 }
0x30a3   :  { %v20931_v11 = vadd.f32 %v11049_v24, %v11048_v62 }
0x30a5   :  { %15707 = vtanh.f32 %v20931_v11  ;;  %v11239_v54 = vrot.slane %v20931_v11, 7  ;;  %v11471_v11 = vld [vmem:[%s21028_s14] ss:$0 sm:$0xff] }
0x30af   :  { %v15708_v47 = vpop.eup %15707 }
0x30b0   :  { %v11052_v49 = vmul.f32 %v15708_v47, %v15706_v23  ;;  %v21048_v23 = vsub.s32 7, %v16370_v30 }
0x30b2   :  { %v11059_v31 = vrot.slane %v11052_v49, 6  ;;  %v11056_v7 = vrot.slane %v11052_v49, %v21047_v6 }
0x30b4   :  { %11126 = vmatmul.mubr.f32.vlgmr.msra.gmra.mrb[100].mxu1 %v11059_v31  ;;  %11197 = vmatmul.mubr.f32.vlgmr.msra.gmra.mrb[102].mxu0 %v11059_v31  ;;  %v20939_v55 = vsel %vm5846_vm6, %v11056_v7, %v20891_v19  ;;  %v11266_v19 = vld [vmem:[%s21027_s13 + $0x78] sm:$0xff] }
0x30b5   :  { %11574 = vmatprep.mubr.msk.f32.mxu1 %vm15729_vm8, %v21041_v43  ;;  %14931 = vmatpush3.bf16.msra.mxu1 %v14930_v42  ;;  %v11254_v43 = vld [vmem:[%s21027_s13 + $0x18] sm:$0xff]  ;;  %v14951_v48 = vpack.c.bf16 %v11266_v19, %v11265_v34 }
0x30b6   :  { %14932 = vmatprep.subr.bf16.mxu1 %v15728_v1  ;;  %v14933_v9 = vpack.c.bf16 %v11254_v43, %v11253_v22 }
0x30b9   :  { %14934 = vmatpush3.bf16.msra.mxu1 %v14933_v9 }
0x30ba   :  { %14935 = vmatprep.subr.bf16.mxu1 %v15728_v1 }
0x30bd   :  { %14937 = vmatpush3.bf16.msra.mxu1 %v14936_v58 }
0x30be   :  { %14938 = vmatprep.subr.bf16.mxu1 %v15728_v1 }
0x30c1   :  { %14940 = vmatpush3.bf16.msra.mxu1 %v14939_v46 }
0x30c2   :  { %14941 = vmatprep.subr.bf16.mxu1 %v15728_v1 }
0x30c5   :  { %14943 = vmatpush3.bf16.msra.mxu1 %v14942_v56 }
0x30c6   :  { %14944 = vmatprep.subr.bf16.mxu1 %v15728_v1 }
0x30c9   :  { %14946 = vmatpush3.bf16.msra.mxu1 %v14945_v20 }
0x30ca   :  { %14947 = vmatprep.subr.bf16.mxu1 %v15728_v1 }
0x30cd   :  { %14949 = vmatpush3.bf16.msra.mxu1 %v14948_v36 }
0x30ce   :  { %14950 = vmatprep.subr.bf16.mxu1 %v15728_v1 }
0x30d1   :  { %14952 = vmatpush3.bf16.msra.mxu1 %v14951_v48 }
0x3187   :  { %v11127_v12 = vpop.f32.mrb[100].mxu1  ;;  %v11198_v15 = vpop.f32.mrb[102].mxu0 }
0x3188   :  { %v11207_v57 = vrot.slane %v11127_v12, 1  ;;  %v11129_v13 = vpop.f32.mrb[101].mxu1  ;;  %v11200_v53 = vpop.f32.mrb[103].mxu0  ;;  %v11209_v21 = vrot.slane %v11198_v15, 1 }
0x3189   :  { %v11208_v2 = vrot.slane %v11129_v13, 1  ;;  %v11210_v0 = vrot.slane %v11200_v53, 1 }
0x318a   :  { %v11215_v16 = vadd.f32 %v11207_v57, %v20627_v59  ;;  %v11217_v28 = vadd.f32 %v11209_v21, %v20633_v29 }
0x318b   :  { %v11216_v60 = vadd.f32 %v11208_v2, %v20619_v8  ;;  %v11218_v1 = vadd.f32 %v11210_v0, %v20637_v17 }
0x318c   :  { %v11468_v45 = vmul.f32 -1.442695, %v11215_v16  ;;  %v11470_v33 = vmul.f32 -1.442695, %v11217_v28 }
0x318d   :  { %v11469_v41 = vmul.f32 -1.442695, %v11216_v60 }
0x318e   :  { %15709 = vpow2.f32 %v11468_v45 }
0x318f   :  { %15711 = vpow2.f32 %v11469_v41 }
0x3190   :  { %15713 = vtanh.f32 %v11218_v1 }
0x3191   :  { %15715 = vpow2.f32 %v11470_v33 }
0x3198   :  { %v15710_v25 = vpop.eup %15709 }
0x3199   :  { %v11228_v40 = vadd.f32 1.0, %v15710_v25  ;;  %v15712_v14 = vpop.eup %15711 }
0x319a   :  { %v11229_v59 = vadd.f32 1.0, %v15712_v14  ;;  %v15714_v8 = vpop.eup %15713 }
0x319b   :  { %15717 = vrcp.f32 %v11228_v40  ;;  %v15716_v32 = vpop.eup %15715 }
0x319c   :  { %15719 = vrcp.f32 %v11229_v59  ;;  %v11230_v24 = vadd.f32 1.0, %v15716_v32 }
0x319e   :  { %15721 = vrcp.f32 %v11230_v24 }
0x31a5   :  { %v15718_v3 = vpop.eup %15717 }
0x31a6   :  { %v11242_v35 = vmul.f32 %v15718_v3, %v15714_v8  ;;  %v15720_v63 = vpop.eup %15719 }
0x31a7   :  { %v11241_v29 = vmul.f32 %v15720_v63, %v11239_v54 }
0x31a8   :  { %v15722_v17 = vpop.eup %15721 }
0x31a9   :  { %v11243_v18 = vadd.f32 %v11242_v35, %v11241_v29 }
0x31ab   :  { %15723 = vtanh.f32 %v11243_v18 }
0x31b5   :  { %v15724_v5 = vpop.eup %15723 }
0x31b6   :  { %v11245_v62 = vmul.f32 %v15724_v5, %v15722_v17 }
0x31b8   :  { %v11249_v47 = vrot.slane %v11245_v62, %v21048_v23 }
0x31ba   :  { %v11250_v49 = vsel %vm6046_vm7, %v11249_v47, %v20939_v55 }
0x31bb   :  { %11575 = vmatmul.mubr.f32.vlgmr.msra.gmra.mrb[102].mxu1 %v11250_v49 }
0x328e   :  { %v11340_v31 = vpop.f32.mrb[102].mxu1 }
0x328f   :  { %v11341_v6 = vadd.f32 %v11471_v11, %v11340_v31  ;;  %v11576_v7 = vpop.f32.mrb[103].mxu1 }
0x3291   :  { %11472 = vst [vmem:[%s21029_s15 + $0x8] sm:$0xff] %v11341_v6 }

</bundles_post_ra>
